<compile_context>
chip_gen: v5e
topology: v5e:2x2
jax: 0.10.0
libtpu: 0.0.40
codegen_flags: <defaults>
</compile_context>

<pallas_src>
import functools

import jax
import jax.numpy as jnp
from jax.experimental import pallas as pl
from jax.experimental.pallas import tpu as pltpu


_TILE_BUDGET_BYTES = 8 * 1024 * 1024    # per feature tile (x2 when double-buffered)
_VMEM_LIMIT_BYTES = 48 * 1024 * 1024    # > v5e/v6e scoped defaults, < v7x 64 MiB phys


def _weighted_basis_sum(feat_ref, w_ref):
    """acc[n, c] = sum_b feat[n, b, c] * w[0, b, c], accumulated in f32.

    Unrolled over the small static basis axis so the reduction stays in the
    VPU (VALU slots) and only one (TILE_N, C) f32 slab is ever live.
    """
    nbases = feat_ref.shape[1]
    acc = feat_ref[:, 0, :].astype(jnp.float32) * w_ref[0, 0, :]
    for b in range(1, nbases):
        acc = acc + feat_ref[:, b, :].astype(jnp.float32) * w_ref[0, b, :]
    return acc


def _fu_kernel_none(feat_ref, w_ref, out_ref):
    # feat_ref: (TILE_N, B, C) native dtype   w_ref: (1, B, C) f32
    out_ref[...] = _weighted_basis_sum(feat_ref, w_ref).astype(out_ref.dtype)


def _fu_kernel_layer(feat_ref, w_ref, gb_ref, out_ref, *, eps):
    # fused: weighted basis sum -> layernorm over C (one-pass stats) -> affine -> relu
    s = _weighted_basis_sum(feat_ref, w_ref)                    # (TILE_N, C) f32
    mean = jnp.mean(s, axis=-1, keepdims=True)
    mean_sq = jnp.mean(s * s, axis=-1, keepdims=True)
    var = mean_sq - mean * mean                                  # biased, like nn.LayerNorm
    y = (s - mean) * jax.lax.rsqrt(var + eps) * gb_ref[0, :] + gb_ref[1, :]
    out_ref[...] = jnp.maximum(y, 0.0).astype(out_ref.dtype)


def _pick_tile_n(n, nbases, ncombines, dtype_bytes):
    """Row-tile size: VMEM-budgeted, multiple of 8, >= 2 grid steps when possible."""
    if n <= 8:
        return n                                   # full-extent tiny block is allowed
    row_bytes = max(1, nbases * ncombines * dtype_bytes)
    budget_rows = max(8, _TILE_BUDGET_BYTES // row_bytes)
    tile = min(budget_rows, 2048)
    # cap at ceil(N/2) (rounded up to a sublane multiple) so the grid has >= 2
    # steps and v7x megacore can shard row tiles across both TensorCores.
    half = -(-n // 2)
    half = -(-half // 8) * 8
    tile = min(tile, half)
    return max(8, (tile // 8) * 8)


def fu_layer(feature, weight, gamma=None, beta=None, *, norm="none", eps=1e-5):
    """feature: (N, nbases, ncombines)  (any float dtype; streamed natively)
       weight:  (1, nbases, ncombines) or (nbases, ncombines)
       gamma/beta: (ncombines,) LayerNorm affine params when norm='layer'
       Returns (N, ncombines) in feature's dtype."""
    n, nbases, ncomb = feature.shape
    w = weight.reshape(1, nbases, ncomb).astype(jnp.float32)

    # TODO(synk): training-mode dropout (prop_dropout > 0) would need
    # pltpu.prng_seed / stateful_bernoulli; inference forward is identity.
    # TODO(synk): if ncombines < 128, pad C to 128 (or fold nodes into the lane
    # axis) at the model level to avoid masked partial stores on the output.

    dtype_bytes = jnp.dtype(feature.dtype).itemsize
    tile_n = _pick_tile_n(n, nbases, ncomb, dtype_bytes)
    grid = (pl.cdiv(n, tile_n),)                    # ragged last block is masked

    feat_spec = pl.BlockSpec((tile_n, nbases, ncomb), lambda i: (i, 0, 0))
    w_spec = pl.BlockSpec((1, nbases, ncomb), lambda i: (0, 0, 0))        # resident
    out_spec = pl.BlockSpec((tile_n, ncomb), lambda i: (i, 0))
    cparams = pltpu.CompilerParams(
        dimension_semantics=("parallel",),
        vmem_limit_bytes=_VMEM_LIMIT_BYTES)
    out_shape = jax.ShapeDtypeStruct((n, ncomb), feature.dtype)

    if norm == "none":
        return pl.pallas_call(
            _fu_kernel_none,
            out_shape=out_shape,
            grid=grid,
            in_specs=[feat_spec, w_spec],
            out_specs=out_spec,
            compiler_params=cparams,
        )(feature, w)

    if norm == "layer":
        gb = jnp.stack([gamma.reshape(ncomb), beta.reshape(ncomb)]).astype(jnp.float32)
        gb_spec = pl.BlockSpec((2, ncomb), lambda i: (0, 0))              # resident
        return pl.pallas_call(
            functools.partial(_fu_kernel_layer, eps=eps),
            out_shape=out_shape,
            grid=grid,
            in_specs=[feat_spec, w_spec, gb_spec],
            out_specs=out_spec,
            compiler_params=cparams,
        )(feature, w, gb)

    # TODO(synk): norm='batch' (BatchNorm1d) needs batch / running statistics;
    # eval-mode batchnorm could be folded into a per-channel affine epilogue.
    raise NotImplementedError("norm='batch' not implemented")


def fu_layer_ref(feature, weight, gamma=None, beta=None, *, norm="none", eps=1e-5):
    """Pure-JAX reference mirroring the PyTorch forward (inference)."""
    _, nbases, ncomb = feature.shape
    f = feature.astype(jnp.float32)
    s = jnp.sum(f * weight.reshape(1, nbases, ncomb).astype(jnp.float32), axis=1)
    if norm == "layer":
        mean = jnp.mean(s, axis=-1, keepdims=True)
        var = jnp.mean((s - mean) ** 2, axis=-1, keepdims=True)
        y = (s - mean) * jax.lax.rsqrt(var + eps) * gamma.reshape(1, -1) \
            + beta.reshape(1, -1)
        return jnp.maximum(y, 0.0)
    return s


if __name__ == "__main__":
    n, nbases, ncombines = 256, 8, 128   # small, lane-dense demo shapes

    key = jax.random.PRNGKey(0)
    k_f, k_w, k_g, k_b = jax.random.split(key, 4)
    feature = jax.random.normal(k_f, (n, nbases, ncombines), jnp.float32)

    # --- norm='none' path (module default).
    weight = jax.random.normal(k_w, (1, nbases, ncombines), jnp.float32)
    out_none = jax.block_until_ready(fu_layer(feature, weight, norm="none"))
    ref_none = fu_layer_ref(feature, weight, norm="none")
    assert out_none.shape == (n, ncombines)
    assert jnp.allclose(out_none, ref_none, atol=1e-4, rtol=1e-4), \
        "norm='none' mismatch vs reference"

    # --- norm='layer' path: fused layernorm + relu epilogue.
    weight_l = 0.01 * jax.random.normal(k_w, (1, nbases, ncombines), jnp.float32)
    gamma = 1.0 + 0.1 * jax.random.normal(k_g, (ncombines,), jnp.float32)
    beta = 0.1 * jax.random.normal(k_b, (ncombines,), jnp.float32)
    out_layer = jax.block_until_ready(
        fu_layer(feature, weight_l, gamma, beta, norm="layer"))
    ref_layer = fu_layer_ref(feature, weight_l, gamma, beta, norm="layer")
    assert out_layer.shape == (n, ncombines)
    assert jnp.allclose(out_layer, ref_layer, atol=1e-4, rtol=1e-4), \
        "norm='layer' mismatch vs reference"

    # --- ragged N (not a multiple of the tile): exercises the cdiv grid +
    #     masked writeback of the last block.
    n_ragged = 200
    feat_r = jax.random.normal(k_f, (n_ragged, nbases, ncombines), jnp.float32)
    out_r = jax.block_until_ready(
        fu_layer(feat_r, weight_l, gamma, beta, norm="layer"))
    ref_r = fu_layer_ref(feat_r, weight_l, gamma, beta, norm="layer")
    assert out_r.shape == (n_ragged, ncombines)
    assert jnp.allclose(out_r, ref_r, atol=1e-4, rtol=1e-4), \
        "ragged-N norm='layer' mismatch vs reference"

    # --- bf16 feature streamed natively (f32 accumulation inside the kernel,
    #     bf16 output store).
    feat_bf16 = feature.astype(jnp.bfloat16)
    out_bf16 = jax.block_until_ready(fu_layer(feat_bf16, weight, norm="none"))
    ref_bf16 = fu_layer_ref(feat_bf16, weight, norm="none")
    assert out_bf16.dtype == jnp.bfloat16
    assert jnp.allclose(out_bf16.astype(jnp.float32), ref_bf16,
                        atol=5e-2, rtol=5e-2), "bf16 norm='none' mismatch vs reference"

    print("KERNEL_OK")
</pallas_src>

<mosaic_0001>
module attributes {stable_mosaic.version = 11 : i64} {
  func.func @_fu_kernel_none(%arg0: i32, %arg1: memref<128x8x128xf32, #tpu.memory_space<vmem>>, %arg2: memref<1x8x128xf32, #tpu.memory_space<vmem>>, %arg3: memref<128x128xf32, #tpu.memory_space<vmem>>) attributes {dimension_semantics = [#tpu.dimension_semantics<parallel>], iteration_bounds = array<i64: 2>, scalar_prefetch = 0 : i64, scratch_operands = 0 : i64, tpu.core_type = #tpu.core_type<tc>, window_params = [{transform_indices = @transform_0, window_bounds = array<i64: 128, 8, 128>}, {pipeline_mode = #tpu.pipeline_mode<synchronous>, transform_indices = @transform_1, window_bounds = array<i64: 1, 8, 128>}, {transform_indices = @transform_2, window_bounds = array<i64: 128, 128>}]} {
    %c0 = arith.constant 0 : index
    %c0_0 = arith.constant 0 : index
    %c0_1 = arith.constant 0 : index
    %0 = vector.load %arg1[%c0, %c0_0, %c0_1] : memref<128x8x128xf32, #tpu.memory_space<vmem>>, vector<128x1x128xf32>
    %1 = vector.shape_cast %0 : vector<128x1x128xf32> to vector<128x128xf32>
    %c0_2 = arith.constant 0 : index
    %c0_3 = arith.constant 0 : index
    %c0_4 = arith.constant 0 : index
    %2 = vector.load %arg2[%c0_2, %c0_3, %c0_4] : memref<1x8x128xf32, #tpu.memory_space<vmem>>, vector<1x1x128xf32>
    %3 = vector.shape_cast %2 : vector<1x1x128xf32> to vector<128xf32>
    %4 = vector.shape_cast %3 : vector<128xf32> to vector<1x128xf32>
    %5 = vector.broadcast %4 : vector<1x128xf32> to vector<128x128xf32>
    %6 = arith.mulf %1, %5 : vector<128x128xf32>
    %c0_5 = arith.constant 0 : index
    %c1 = arith.constant 1 : index
    %c0_6 = arith.constant 0 : index
    %7 = vector.load %arg1[%c0_5, %c1, %c0_6] : memref<128x8x128xf32, #tpu.memory_space<vmem>>, vector<128x1x128xf32>
    %8 = vector.shape_cast %7 : vector<128x1x128xf32> to vector<128x128xf32>
    %c0_7 = arith.constant 0 : index
    %c1_8 = arith.constant 1 : index
    %c0_9 = arith.constant 0 : index
    %9 = vector.load %arg2[%c0_7, %c1_8, %c0_9] : memref<1x8x128xf32, #tpu.memory_space<vmem>>, vector<1x1x128xf32>
    %10 = vector.shape_cast %9 : vector<1x1x128xf32> to vector<128xf32>
    %11 = vector.shape_cast %10 : vector<128xf32> to vector<1x128xf32>
    %12 = vector.broadcast %11 : vector<1x128xf32> to vector<128x128xf32>
    %13 = arith.mulf %8, %12 : vector<128x128xf32>
    %14 = arith.addf %6, %13 : vector<128x128xf32>
    %c0_10 = arith.constant 0 : index
    %c2 = arith.constant 2 : index
    %c0_11 = arith.constant 0 : index
    %15 = vector.load %arg1[%c0_10, %c2, %c0_11] : memref<128x8x128xf32, #tpu.memory_space<vmem>>, vector<128x1x128xf32>
    %16 = vector.shape_cast %15 : vector<128x1x128xf32> to vector<128x128xf32>
    %c0_12 = arith.constant 0 : index
    %c2_13 = arith.constant 2 : index
    %c0_14 = arith.constant 0 : index
    %17 = vector.load %arg2[%c0_12, %c2_13, %c0_14] : memref<1x8x128xf32, #tpu.memory_space<vmem>>, vector<1x1x128xf32>
    %18 = vector.shape_cast %17 : vector<1x1x128xf32> to vector<128xf32>
    %19 = vector.shape_cast %18 : vector<128xf32> to vector<1x128xf32>
    %20 = vector.broadcast %19 : vector<1x128xf32> to vector<128x128xf32>
    %21 = arith.mulf %16, %20 : vector<128x128xf32>
    %22 = arith.addf %14, %21 : vector<128x128xf32>
    %c0_15 = arith.constant 0 : index
    %c3 = arith.constant 3 : index
    %c0_16 = arith.constant 0 : index
    %23 = vector.load %arg1[%c0_15, %c3, %c0_16] : memref<128x8x128xf32, #tpu.memory_space<vmem>>, vector<128x1x128xf32>
    %24 = vector.shape_cast %23 : vector<128x1x128xf32> to vector<128x128xf32>
    %c0_17 = arith.constant 0 : index
    %c3_18 = arith.constant 3 : index
    %c0_19 = arith.constant 0 : index
    %25 = vector.load %arg2[%c0_17, %c3_18, %c0_19] : memref<1x8x128xf32, #tpu.memory_space<vmem>>, vector<1x1x128xf32>
    %26 = vector.shape_cast %25 : vector<1x1x128xf32> to vector<128xf32>
    %27 = vector.shape_cast %26 : vector<128xf32> to vector<1x128xf32>
    %28 = vector.broadcast %27 : vector<1x128xf32> to vector<128x128xf32>
    %29 = arith.mulf %24, %28 : vector<128x128xf32>
    %30 = arith.addf %22, %29 : vector<128x128xf32>
    %c0_20 = arith.constant 0 : index
    %c4 = arith.constant 4 : index
    %c0_21 = arith.constant 0 : index
    %31 = vector.load %arg1[%c0_20, %c4, %c0_21] : memref<128x8x128xf32, #tpu.memory_space<vmem>>, vector<128x1x128xf32>
    %32 = vector.shape_cast %31 : vector<128x1x128xf32> to vector<128x128xf32>
    %c0_22 = arith.constant 0 : index
    %c4_23 = arith.constant 4 : index
    %c0_24 = arith.constant 0 : index
    %33 = vector.load %arg2[%c0_22, %c4_23, %c0_24] : memref<1x8x128xf32, #tpu.memory_space<vmem>>, vector<1x1x128xf32>
    %34 = vector.shape_cast %33 : vector<1x1x128xf32> to vector<128xf32>
    %35 = vector.shape_cast %34 : vector<128xf32> to vector<1x128xf32>
    %36 = vector.broadcast %35 : vector<1x128xf32> to vector<128x128xf32>
    %37 = arith.mulf %32, %36 : vector<128x128xf32>
    %38 = arith.addf %30, %37 : vector<128x128xf32>
    %c0_25 = arith.constant 0 : index
    %c5 = arith.constant 5 : index
    %c0_26 = arith.constant 0 : index
    %39 = vector.load %arg1[%c0_25, %c5, %c0_26] : memref<128x8x128xf32, #tpu.memory_space<vmem>>, vector<128x1x128xf32>
    %40 = vector.shape_cast %39 : vector<128x1x128xf32> to vector<128x128xf32>
    %c0_27 = arith.constant 0 : index
    %c5_28 = arith.constant 5 : index
    %c0_29 = arith.constant 0 : index
    %41 = vector.load %arg2[%c0_27, %c5_28, %c0_29] : memref<1x8x128xf32, #tpu.memory_space<vmem>>, vector<1x1x128xf32>
    %42 = vector.shape_cast %41 : vector<1x1x128xf32> to vector<128xf32>
    %43 = vector.shape_cast %42 : vector<128xf32> to vector<1x128xf32>
    %44 = vector.broadcast %43 : vector<1x128xf32> to vector<128x128xf32>
    %45 = arith.mulf %40, %44 : vector<128x128xf32>
    %46 = arith.addf %38, %45 : vector<128x128xf32>
    %c0_30 = arith.constant 0 : index
    %c6 = arith.constant 6 : index
    %c0_31 = arith.constant 0 : index
    %47 = vector.load %arg1[%c0_30, %c6, %c0_31] : memref<128x8x128xf32, #tpu.memory_space<vmem>>, vector<128x1x128xf32>
    %48 = vector.shape_cast %47 : vector<128x1x128xf32> to vector<128x128xf32>
    %c0_32 = arith.constant 0 : index
    %c6_33 = arith.constant 6 : index
    %c0_34 = arith.constant 0 : index
    %49 = vector.load %arg2[%c0_32, %c6_33, %c0_34] : memref<1x8x128xf32, #tpu.memory_space<vmem>>, vector<1x1x128xf32>
    %50 = vector.shape_cast %49 : vector<1x1x128xf32> to vector<128xf32>
    %51 = vector.shape_cast %50 : vector<128xf32> to vector<1x128xf32>
    %52 = vector.broadcast %51 : vector<1x128xf32> to vector<128x128xf32>
    %53 = arith.mulf %48, %52 : vector<128x128xf32>
    %54 = arith.addf %46, %53 : vector<128x128xf32>
    %c0_35 = arith.constant 0 : index
    %c7 = arith.constant 7 : index
    %c0_36 = arith.constant 0 : index
    %55 = vector.load %arg1[%c0_35, %c7, %c0_36] : memref<128x8x128xf32, #tpu.memory_space<vmem>>, vector<128x1x128xf32>
    %56 = vector.shape_cast %55 : vector<128x1x128xf32> to vector<128x128xf32>
    %c0_37 = arith.constant 0 : index
    %c7_38 = arith.constant 7 : index
    %c0_39 = arith.constant 0 : index
    %57 = vector.load %arg2[%c0_37, %c7_38, %c0_39] : memref<1x8x128xf32, #tpu.memory_space<vmem>>, vector<1x1x128xf32>
    %58 = vector.shape_cast %57 : vector<1x1x128xf32> to vector<128xf32>
    %59 = vector.shape_cast %58 : vector<128xf32> to vector<1x128xf32>
    %60 = vector.broadcast %59 : vector<1x128xf32> to vector<128x128xf32>
    %61 = arith.mulf %56, %60 : vector<128x128xf32>
    %62 = arith.addf %54, %61 : vector<128x128xf32>
    %c0_40 = arith.constant 0 : index
    %c0_41 = arith.constant 0 : index
    %63 = vector.load %arg3[%c0_40, %c0_41] : memref<128x128xf32, #tpu.memory_space<vmem>>, vector<128x128xf32>
    tpu.vector_store %arg3[%c0_40, %c0_41], %62 {strides = array<i32>} : memref<128x128xf32, #tpu.memory_space<vmem>>, vector<128x128xf32>,
    return
  }
  func.func @transform_0(%arg0: i32) -> (i32, i32, i32) {
    %c0_i32 = arith.constant 0 : i32
    %c0_i32_0 = arith.constant 0 : i32
    %c0_i32_1 = arith.constant 0 : i32
    return %arg0, %c0_i32, %c0_i32_0 : i32, i32, i32
  }
  func.func @transform_1(%arg0: i32) -> (i32, i32, i32) {
    %c0_i32 = arith.constant 0 : i32
    %c0_i32_0 = arith.constant 0 : i32
    %c0_i32_1 = arith.constant 0 : i32
    %c0_i32_2 = arith.constant 0 : i32
    return %c0_i32, %c0_i32_0, %c0_i32_1 : i32, i32, i32
  }
  func.func @transform_2(%arg0: i32) -> (i32, i32) {
    %c0_i32 = arith.constant 0 : i32
    %c0_i32_0 = arith.constant 0 : i32
    return %arg0, %c0_i32 : i32, i32
  }
}

</mosaic_0001>

<bundles_post_ra>
// kernel: tpu_custom_call.1
= control target key start
LH: loop header
LB: loop body
LE: loop exit
PB: predicated region body
PF: predicated region fallthrough
CT: control target
= control target key end

     0   :  { %7 = vsyncpa [#allocation3], 0  ;;  %s11970_s0 = inlined_call_operand.hbm [shape: f32[256,8,128], index: 0, kind: input, shape index: {}]   ;;  %s11971_s1 = inlined_call_operand.hbm [shape: f32[1,8,128], index: 1, kind: input, shape index: {}]   ;;  %s11972_s2 = inlined_call_operand.hbm [shape: f32[256,128], index: 2, kind: output, shape index: {}]  }
   0x1   :  { %9 = vsyncpa [#allocation3 + $0x1], 0 }
   0x2   :  { %10 = vsyncpa [#allocation6], 0 }
   0x3   :  { %11 = vsyncpa [#allocation4], 0 }
   0x4   :  { %13 = vsyncpa [#allocation4 + $0x1], 0  ;;  %s3870_s9 = smov 0   ;;  %s3872_s10 = smov 0  }
   0x5   :  { %s3874_s11 = smov 0   ;;  %s3876_s12 = smov 0  }
   0x6 LB: > { %s3891_s13 = sadd.s32 4294967295, %s3848_s12   ;;  %s3631_s14 = sadd.s32 4294967294, %s3848_s12   ;;  %s3848_s12 = sphi %s3876_s12, %s14933_s12   ;;  %s3844_s11 = sphi %s3874_s11, %s14932_s11   ;;  %s3840_s10 = sphi %s3872_s10, %s14931_s10   ;;  %s3836_s9 = sphi %s3870_s9, %s14930_s9  }
   0x7   : > { %s3895_s15 = sadd.s32 1, %s3848_s12   ;;  %s26_s16 = sadd.s32 1, %s3844_s11 }
   0x8   : > { %s23_s17 = ssub.s32 %s3848_s12, %s3895_s15  ;;  %p33_p0 = scmp.ne.s32.totalorder %s3844_s11, %s3840_s10 }
   0x9   : > { %p24_p1 = scmp.eq.s32.totalorder %s23_s17, 0  ;;  %p34_p2 = scmp.eq.s32.totalorder %s3848_s12, 0 }
   0xa   : > { %p39_p3 = scmp.ne.s32.totalorder %s3840_s10, %s3836_s9  ;;  %p40_p4 = scmp.eq.s32.totalorder %s3891_s13, 0 }
   0xb   : > { %s3907_s18 = scalar_select %p24_p1, %s3844_s11, %s26_s16  }
   0xc   : > { %p3909_p5 = por %p34_p2, %p33_p0  ;;  %p3915_p6 = por %p40_p4, %p39_p3 }
   0xd   : > { %p84_p7 = scmp.eq.s32.totalorder %s3891_s13, 1  ;;  %p90_p8 = scmp.eq.s32.totalorder %s3631_s14, 1 }
   0xe   : > { %p3632_p9 = scmp.ge.s32.totalorder %s3848_s12, 1  ;;  %p97_p10 = scmp.lt.s32.totalorder %s3848_s12, 3 }
   0xf   : > { %p3922_p11 = por %p84_p7, %p33_p0  ;;  %p3926_p12 = por %p90_p8, %p39_p3 }
  0x10   : > { %p3930_p13 = pnand %p3632_p9, %p97_p10  ;;  %s109_s26 = sshll.u32 %s11971_s1, 4  ;;  %s110_s26 = int_to_ptr.hbm [resolvable:$true] %s109_s26 }
  0x11   : > { %s3850_s27 = smov [#allocation5]   ;;  %p3670_p3 = scmp.lt.s32.totalorder %s3848_s12, 2 }
  0x12   : > { %p3657_p1 = pneg %p3930_p13  ;;  %s111_s28 = sshll.u32 %s3850_s27, 4  ;;  %s112_s28 = int_to_ptr.vmem [resolvable:$true] %s111_s28 }
  0x13   : > { %s122_s29 = sand.u32 1, %s3844_s11   ;;  %p3946_p7 = pnand %p3670_p3, %p3909_p5 }
  0x14   : > { %p3658_p2 = pnand %p3657_p1, %p40_p4  ;;  %s3635_s3 = sshll.u32 %s122_s29, 10 }
  0x15   : > { %s3647_s4 = sshll.u32 %s3848_s12, 10  ;;  %s126_s14 = scalar_lea.vmem [#allocation2], %s3635_s3 }
  0x16   : > { %3660 = dma.hbm_to_vmem [thread:$0]  (!%p3658_p2), %s110_s26, 128, %s112_s28, [#allocation6]  }
  0x17   : > { %s131_s7 = scalar_lea.hbm %s11970_s0, %s3647_s4  ;;  %s134_s16 = sshll.u32 %s126_s14, 4  ;;  %s135_s16 = int_to_ptr.vmem [resolvable:$true] %s134_s16 }
  0x18   : > { %s132_s8 = sshll.u32 %s131_s7, 4  ;;  %s123_s17 = scalar_lea.sflag [#allocation3], %s122_s29  ;;  %s133_s8 = int_to_ptr.hbm [resolvable:$true] %s132_s8 }
  0x19   : > { %s3748_s24 = sshra.s32 %s133_s8, 4  ;;  %p3752_p8 = pneg %p3946_p7  ;;  %s3749_s24 = int_to_ptr.hbm [resolvable:$true] %s3748_s24 }
  0x1a   : > { %s3750_s19 = scalar_lea.hbm %s3749_s24, 1024  ;;  %s3755_s27 = scalar_lea.hbm %s11970_s0, 2048 }
  0x1b   : > { %p3751_p5 = scmp.ne.s32.totalorder %s3749_s24, %s3750_s19  ;;  %p3756_p1 = scmp.lt.s32.totalorder %s3749_s24, %s11970_s0 }
  0x1c   : > { %p3757_p2 = scmp.lt.s32.totalorder %s3755_s27, %s3750_s19 }
  0x1d   : > { %p3753_p9 = pnand %p3752_p8, %p3751_p5 }
  0x1e   : > { %p3758_p3 = por %p3757_p2, %p3756_p1 }
  0x1f   : > { %p3754_p10 = pneg %p3753_p9 }
  0x21   : > { %p3759_p0 = pnand %p3758_p3, %p3754_p10 }
  0x23   : > { %3762 = shalt.err (!%p3759_p0)
}
  0x24   : > { %s3851_s29 = smov 128   ;;  %s3852_s3 = smov 8  }
  0x25   : > { %3664 = dma.hbm_to_vmem [thread:$0]  (!%p3946_p7), %s133_s8, 16384, %s135_s16, %s123_s17, %s3851_s29, %s3851_s29, %s3852_s3  }
  0x26   : > { %146 = sbr.rel (%p3930_p13) target bundleno = 1606 (0x646), region = 28 }
  0x2b   : > { %s3967_s5 = sand.u32 1, %s3840_s10  }
  0x2c   : > { %s3639_s6 = sshll.u32 %s3967_s5, 10  ;;  %s149_s7 = scalar_lea.sflag [#allocation3], %s3967_s5 }
  0x2d   : > { %s3971_s14 = scalar_lea.vmem [#allocation2], %s3639_s6 }
  0x2e   : > { %3823 = dma.done.wait (%p3915_p6), %s149_s7, 16384  }
  0x2f   : > { %3825 = vsyncadd (%p3915_p6), %s149_s7, 4294950912 }
  0x30   : > { %3827 = dma.done.wait (%p40_p4), [#allocation6], 128  }
  0x31   : > { %3829 = vsyncadd (%p40_p4), [#allocation6], 4294967168  ;;  %v181_v0 = vld [vmem:[%s3971_s14] sm:$0x1]  ;;  %v182_v1 = vld [vmem:[%s3971_s14 + $0x8] sm:$0x1] }
  0x32   : > { %v183_v2 = vld [vmem:[%s3971_s14 + $0x10] sm:$0x1]  ;;  %v184_v3 = vld [vmem:[%s3971_s14 + $0x18] sm:$0x1]  ;;  %v185_v4 = vld [vmem:[%s3971_s14 + $0x20] sm:$0x1] }
  0x33   : > { %v186_v5 = vld [vmem:[%s3971_s14 + $0x28] sm:$0x1]  ;;  %v187_v6 = vld [vmem:[%s3971_s14 + $0x30] sm:$0x1]  ;;  %v188_v7 = vld [vmem:[%s3971_s14 + $0x38] sm:$0x1] }
  0x34   : > { %v3989_v8 = vld [vmem:[#allocation5] ss:$0 sm:$0xff]  ;;  %v190_v10 = vld [vmem:[%s3971_s14 + $0x48] sm:$0x1]  ;;  %v191_v11 = vld [vmem:[%s3971_s14 + $0x50] sm:$0x1] }
  0x35   : > { %v189_v9 = vld [vmem:[%s3971_s14 + $0x40] sm:$0x1]  ;;  %v192_v12 = vld [vmem:[%s3971_s14 + $0x58] sm:$0x1]  ;;  %v194_v14 = vld [vmem:[%s3971_s14 + $0x68] sm:$0x1]  ;;  %v4008_v25 = vmul.f32 %v3989_v8, %v181_v0  ;;  %v4011_v26 = vmul.f32 %v3989_v8, %v182_v1  ;;  %v4014_v27 = vmul.f32 %v3989_v8, %v183_v2  ;;  %v4017_v28 = vmul.f32 %v3989_v8, %v184_v3 }
  0x36   : > { %v193_v13 = vld [vmem:[%s3971_s14 + $0x60] sm:$0x1]  ;;  %v195_v15 = vld [vmem:[%s3971_s14 + $0x70] sm:$0x1]  ;;  %v196_v16 = vld [vmem:[%s3971_s14 + $0x78] sm:$0x1]  ;;  %v4024_v33 = vmul.f32 %v3989_v8, %v185_v4  ;;  %v4027_v34 = vmul.f32 %v3989_v8, %v186_v5  ;;  %v4030_v35 = vmul.f32 %v3989_v8, %v187_v6  ;;  %v4033_v36 = vmul.f32 %v3989_v8, %v188_v7 }
  0x37   : > { %v197_v17 = vld [vmem:[%s3971_s14 + $0x80] sm:$0x1]  ;;  %v198_v18 = vld [vmem:[%s3971_s14 + $0x88] sm:$0x1]  ;;  %v199_v19 = vld [vmem:[%s3971_s14 + $0x90] sm:$0x1]  ;;  %v4040_v41 = vmul.f32 %v3989_v8, %v189_v9  ;;  %v4043_v42 = vmul.f32 %v3989_v8, %v190_v10  ;;  %v4046_v43 = vmul.f32 %v3989_v8, %v191_v11  ;;  %v4049_v44 = vmul.f32 %v3989_v8, %v192_v12 }
  0x38   : > { %v200_v20 = vld [vmem:[%s3971_s14 + $0x98] sm:$0x1]  ;;  %v201_v21 = vld [vmem:[%s3971_s14 + $0xa0] sm:$0x1]  ;;  %v202_v22 = vld [vmem:[%s3971_s14 + $0xa8] sm:$0x1]  ;;  %v4056_v49 = vmul.f32 %v3989_v8, %v193_v13  ;;  %v4059_v50 = vmul.f32 %v3989_v8, %v194_v14  ;;  %v4062_v51 = vmul.f32 %v3989_v8, %v195_v15  ;;  %v4065_v52 = vmul.f32 %v3989_v8, %v196_v16 }
  0x39   : > { %v203_v23 = vld [vmem:[%s3971_s14 + $0xb0] sm:$0x1]  ;;  %v204_v24 = vld [vmem:[%s3971_s14 + $0xb8] sm:$0x1]  ;;  %v205_v29 = vld [vmem:[%s3971_s14 + $0xc0] sm:$0x1]  ;;  %v4072_v57 = vmul.f32 %v3989_v8, %v197_v17  ;;  %v4075_v58 = vmul.f32 %v3989_v8, %v198_v18  ;;  %v4078_v59 = vmul.f32 %v3989_v8, %v199_v19  ;;  %v4081_v60 = vmul.f32 %v3989_v8, %v200_v20 }
  0x3a   : > { %v206_v30 = vld [vmem:[%s3971_s14 + $0xc8] sm:$0x1]  ;;  %v207_v31 = vld [vmem:[%s3971_s14 + $0xd0] sm:$0x1]  ;;  %v208_v32 = vld [vmem:[%s3971_s14 + $0xd8] sm:$0x1]  ;;  %v4088_v1 = vmul.f32 %v3989_v8, %v201_v21  ;;  %v4091_v2 = vmul.f32 %v3989_v8, %v202_v22  ;;  %v4094_v3 = vmul.f32 %v3989_v8, %v203_v23  ;;  %v4097_v4 = vmul.f32 %v3989_v8, %v204_v24 }
  0x3b   : > { %v209_v37 = vld [vmem:[%s3971_s14 + $0xe0] sm:$0x1]  ;;  %v210_v38 = vld [vmem:[%s3971_s14 + $0xe8] sm:$0x1]  ;;  %v211_v39 = vld [vmem:[%s3971_s14 + $0xf0] sm:$0x1]  ;;  %v4104_v10 = vmul.f32 %v3989_v8, %v205_v29  ;;  %v4107_v11 = vmul.f32 %v3989_v8, %v206_v30  ;;  %v4110_v12 = vmul.f32 %v3989_v8, %v207_v31  ;;  %v4113_v13 = vmul.f32 %v3989_v8, %v208_v32 }
  0x3c   : > { %v212_v40 = vld [vmem:[%s3971_s14 + $0xf8] sm:$0x1]  ;;  %v213_v45 = vld [vmem:[%s3971_s14 + $0x100] sm:$0x1]  ;;  %v214_v46 = vld [vmem:[%s3971_s14 + $0x108] sm:$0x1]  ;;  %v4120_v18 = vmul.f32 %v3989_v8, %v209_v37  ;;  %v4123_v19 = vmul.f32 %v3989_v8, %v210_v38  ;;  %v4126_v20 = vmul.f32 %v3989_v8, %v211_v39 }
  0x3d   : > { %v215_v47 = vld [vmem:[%s3971_s14 + $0x110] sm:$0x1]  ;;  %v216_v48 = vld [vmem:[%s3971_s14 + $0x118] sm:$0x1]  ;;  %11979 = vst [vmem:[#allocation11_spill] sm:$0xff] %v4065_v52  ;;  %v4129_v21 = vmul.f32 %v3989_v8, %v212_v40  ;;  %v4136_v30 = vmul.f32 %v3989_v8, %v213_v45  ;;  %v4139_v31 = vmul.f32 %v3989_v8, %v214_v46  ;;  %vm3270_vm0 = vcmask 1041409  }
  0x3e   : > { %v217_v53 = vld [vmem:[%s3971_s14 + $0x120] sm:$0x1]  ;;  %v218_v54 = vld [vmem:[%s3971_s14 + $0x128] sm:$0x1]  ;;  %v219_v55 = vld [vmem:[%s3971_s14 + $0x130] sm:$0x1]  ;;  %v4142_v32 = vmul.f32 %v3989_v8, %v215_v47  ;;  %v4145_v37 = vmul.f32 %v3989_v8, %v216_v48 }
  0x3f   : > { %v220_v56 = vld [vmem:[%s3971_s14 + $0x138] sm:$0x1]  ;;  %11980 = vst [vmem:[#allocation12_spill] sm:$0xff] %v4072_v57  ;;  %v221_v61 = vld [vmem:[%s3971_s14 + $0x140] sm:$0x1]  ;;  %v4152_v45 = vmul.f32 %v3989_v8, %v217_v53  ;;  %v4155_v46 = vmul.f32 %v3989_v8, %v218_v54  ;;  %v4158_v47 = vmul.f32 %v3989_v8, %v219_v55  ;;  %vm3273_vm1 = vcmask 1042434  }
  0x40   : > { %11981 = vst [vmem:[#allocation13_spill] sm:$0xff] %v4075_v58  ;;  %v222_v62 = vld [vmem:[%s3971_s14 + $0x148] sm:$0x1]  ;;  %v223_v63 = vld [vmem:[%s3971_s14 + $0x150] sm:$0x1]  ;;  %v4161_v48 = vmul.f32 %v3989_v8, %v220_v56  ;;  %v4168_v53 = vmul.f32 %v3989_v8, %v221_v61  ;;  %vm3276_vm2 = vcmask 1043459  }
  0x41   : > { %11982 = vst [vmem:[#allocation14_spill] sm:$0xff] %v4078_v59  ;;  %v224_v0 = vld [vmem:[%s3971_s14 + $0x158] sm:$0x1]  ;;  %v225_v5 = vld [vmem:[%s3971_s14 + $0x160] sm:$0x1]  ;;  %v4171_v54 = vmul.f32 %v3989_v8, %v222_v62  ;;  %v4174_v55 = vmul.f32 %v3989_v8, %v223_v63  ;;  %vm3279_vm3 = vcmask 1044484  }
  0x42   : > { %11983 = vst [vmem:[#allocation15_spill] sm:$0xff] %v4081_v60  ;;  %v226_v6 = vld [vmem:[%s3971_s14 + $0x168] sm:$0x1]  ;;  %v227_v7 = vld [vmem:[%s3971_s14 + $0x170] sm:$0x1]  ;;  %v4177_v56 = vmul.f32 %v3989_v8, %v224_v0  ;;  %v4184_v61 = vmul.f32 %v3989_v8, %v225_v5  ;;  %vm3282_vm4 = vcmask 1045509  }
  0x43   : > { %11984 = vst [vmem:[#allocation16_spill] sm:$0xff] %v4088_v1  ;;  %v228_v9 = vld [vmem:[%s3971_s14 + $0x178] sm:$0x1]  ;;  %v229_v14 = vld [vmem:[%s3971_s14 + $0x180] sm:$0x1]  ;;  %v4187_v62 = vmul.f32 %v3989_v8, %v226_v6  ;;  %v4190_v63 = vmul.f32 %v3989_v8, %v227_v7  ;;  %s3641_s20 = sshll.u32 %s3967_s5, 7 }
  0x44   : > { %11985 = vst [vmem:[#allocation17_spill] sm:$0xff] %v4091_v2  ;;  %v230_v15 = vld [vmem:[%s3971_s14 + $0x188] sm:$0x1]  ;;  %v231_v16 = vld [vmem:[%s3971_s14 + $0x190] sm:$0x1]  ;;  %v4193_v0 = vmul.f32 %v3989_v8, %v228_v9  ;;  %v4200_v5 = vmul.f32 %v3989_v8, %v229_v14  ;;  %vm3285_vm5 = vcmask 1046534  }
  0x45   : > { %11986 = vst [vmem:[#allocation18_spill] sm:$0xff] %v4094_v3  ;;  %v232_v17 = vld [vmem:[%s3971_s14 + $0x198] sm:$0x1]  ;;  %v233_v22 = vld [vmem:[%s3971_s14 + $0x1a0] sm:$0x1]  ;;  %v4203_v6 = vmul.f32 %v3989_v8, %v230_v15  ;;  %v4206_v7 = vmul.f32 %v3989_v8, %v231_v16  ;;  %vm3288_vm6 = vcmask 1047559  }
  0x46   : > { %11987 = vst [vmem:[#allocation19_spill] sm:$0xff] %v4097_v4  ;;  %v234_v23 = vld [vmem:[%s3971_s14 + $0x1a8] sm:$0x1]  ;;  %v235_v24 = vld [vmem:[%s3971_s14 + $0x1b0] sm:$0x1]  ;;  %v4209_v9 = vmul.f32 %v3989_v8, %v232_v17  ;;  %v4216_v14 = vmul.f32 %v3989_v8, %v233_v22  ;;  %s11714_s23 = scalar_lea.vmem [#allocation7], %s3641_s20 }
  0x47   : > { %11988 = vst [vmem:[#allocation20_spill] sm:$0xff] %v4104_v10  ;;  %v236_v29 = vld [vmem:[%s3971_s14 + $0x1b8] sm:$0x1]  ;;  %v237_v38 = vld [vmem:[%s3971_s14 + $0x1c0] sm:$0x1]  ;;  %v4219_v15 = vmul.f32 %v3989_v8, %v234_v23  ;;  %v4222_v16 = vmul.f32 %v3989_v8, %v235_v24  ;;  %s3648_s30 = sshll.u32 %s3891_s13, 7 }
  0x48   : > { %11989 = vst [vmem:[#allocation21_spill] sm:$0xff] %v4107_v11  ;;  %v238_v39 = vld [vmem:[%s3971_s14 + $0x1c8] sm:$0x1]  ;;  %v239_v40 = vld [vmem:[%s3971_s14 + $0x1d0] sm:$0x1]  ;;  %v4225_v17 = vmul.f32 %v3989_v8, %v236_v29  ;;  %v4232_v22 = vmul.f32 %v3989_v8, %v237_v38  ;;  %s3544_s16 = scalar_lea.hbm %s11972_s2, %s3648_s30  ;;  %s3545_s17 = sshll.u32 %s11714_s23, 4  ;;  %s3546_s17 = int_to_ptr.vmem [resolvable:$true] %s3545_s17 }
  0x49   : > { %11990 = vst [vmem:[#allocation22_spill] sm:$0xff] %v4110_v12  ;;  %v4235_v23 = vmul.f32 %v3989_v8, %v238_v39  ;;  %v4238_v24 = vmul.f32 %v3989_v8, %v239_v40  ;;  %v471_v12 = vld [vmem:[%s3971_s14 + $0x101] sm:$0x1]  ;;  %v472_v11 = vld [vmem:[%s3971_s14 + $0x109] sm:$0x1]  ;;  %s3547_s24 = sshll.u32 %s3544_s16, 4  ;;  %s3548_s24 = int_to_ptr.hbm [resolvable:$true] %s3547_s24 }
  0x4a   : > { %11991 = vst [vmem:[#allocation23_spill] sm:$0xff] %v4113_v13  ;;  %v470_v13 = vld [vmem:[%s3971_s14 + $0xf9] sm:$0x1]  ;;  %v473_v10 = vld [vmem:[%s3971_s14 + $0x111] sm:$0x1]  ;;  %s3533_s19 = scalar_lea.sflag [#allocation4], %s3967_s5 }
  0x4b   : > { %11992 = vst [vmem:[#allocation24_spill] sm:$0xff] %v4120_v18  ;;  %v469_v18 = vld [vmem:[%s3971_s14 + $0xf1] sm:$0x1]  ;;  %v474_v4 = vld [vmem:[%s3971_s14 + $0x119] sm:$0x1]  ;;  %s3792_s25 = sshra.s32 %s3548_s24, 4  ;;  %s3793_s25 = int_to_ptr.hbm [resolvable:$true] %s3792_s25 }
  0x4c   : > { %11993 = vst [vmem:[#allocation25_spill] sm:$0xff] %v4123_v19  ;;  %v468_v19 = vld [vmem:[%s3971_s14 + $0xe9] sm:$0x1]  ;;  %v475_v3 = vld [vmem:[%s3971_s14 + $0x121] sm:$0x1]  ;;  %s3794_s26 = scalar_lea.hbm %s3793_s25, 128  ;;  %p3799_p0 = scmp.lt.s32.totalorder %s3793_s25, %s11972_s2 }
  0x4d   : > { %11994 = vst [vmem:[#allocation26_spill] sm:$0xff] %v4126_v20  ;;  %v476_v2 = vld [vmem:[%s3971_s14 + $0x129] sm:$0x1]  ;;  %v477_v1 = vld [vmem:[%s3971_s14 + $0x131] sm:$0x1]  ;;  %p3795_p4 = scmp.ne.s32.totalorder %s3793_s25, %s3794_s26  ;;  %s3798_s4 = scalar_lea.hbm %s11972_s2, 256 }
  0x4e   : > { %11995 = vst [vmem:[#allocation27_spill] sm:$0xff] %v4129_v21  ;;  %v240_v21 = vld [vmem:[%s3971_s14 + $0x1d8] sm:$0x1]  ;;  %v478_v60 = vld [vmem:[%s3971_s14 + $0x139] sm:$0x1]  ;;  %p3800_p7 = scmp.lt.s32.totalorder %s3798_s4, %s3794_s26 }
  0x4f   : > { %11996 = vst [vmem:[#allocation28_spill] sm:$0xff] %v4136_v30  ;;  %v244_v30 = vld [vmem:[%s3971_s14 + $0x1f8] sm:$0x1]  ;;  %v4241_v29 = vmul.f32 %v3989_v8, %v240_v21  ;;  %v479_v59 = vld [vmem:[%s3971_s14 + $0x141] sm:$0x1]  ;;  %p3796_p6 = pnand %p3795_p4, %p3922_p11 }
  0x50   : > { %11997 = vst [vmem:[#allocation29_spill] sm:$0xff] %v4139_v31  ;;  %v243_v31 = vld [vmem:[%s3971_s14 + $0x1f0] sm:$0x1]  ;;  %v4257_v21 = vmul.f32 %v3989_v8, %v244_v30  ;;  %v480_v58 = vld [vmem:[%s3971_s14 + $0x149] sm:$0x1]  ;;  %p3801_p5 = por %p3800_p7, %p3799_p0 }
  0x51   : > { %11998 = vst [vmem:[#allocation30_spill] sm:$0xff] %v4142_v32  ;;  %v242_v32 = vld [vmem:[%s3971_s14 + $0x1e8] sm:$0x1]  ;;  %v4254_v40 = vmul.f32 %v3989_v8, %v243_v31  ;;  %v481_v57 = vld [vmem:[%s3971_s14 + $0x151] sm:$0x1]  ;;  %p3797_p13 = pneg %p3796_p6 }
  0x52   : > { %11999 = vst [vmem:[#allocation31_spill] sm:$0xff] %v4145_v37  ;;  %v241_v37 = vld [vmem:[%s3971_s14 + $0x1e0] sm:$0x1]  ;;  %v4251_v39 = vmul.f32 %v3989_v8, %v242_v32 }
  0x53   : > { %12000 = vst [vmem:[#allocation32_spill] sm:$0xff] %v4152_v45  ;;  %v248_v45 = vld [vmem:[%s3971_s14 + $0x218] sm:$0x1]  ;;  %v4248_v38 = vmul.f32 %v3989_v8, %v241_v37  ;;  %p3802_p8 = pnand %p3801_p5, %p3797_p13 }
  0x54   : > { %12001 = vst [vmem:[#allocation33_spill] sm:$0xff] %v4155_v46  ;;  %v247_v46 = vld [vmem:[%s3971_s14 + $0x210] sm:$0x1]  ;;  %v4273_v30 = vmul.f32 %v3989_v8, %v248_v45 }
  0x55   : > { %12002 = vst [vmem:[#allocation34_spill] sm:$0xff] %v4158_v47  ;;  %v246_v47 = vld [vmem:[%s3971_s14 + $0x208] sm:$0x1]  ;;  %v4270_v31 = vmul.f32 %v3989_v8, %v247_v46 }
  0x56   : > { %12003 = vst [vmem:[#allocation35_spill] sm:$0xff] %v4161_v48  ;;  %v245_v48 = vld [vmem:[%s3971_s14 + $0x200] sm:$0x1]  ;;  %v4267_v32 = vmul.f32 %v3989_v8, %v246_v47 }
  0x57   : > { %12004 = vst [vmem:[#allocation36_spill] sm:$0xff] %v4168_v53  ;;  %v252_v53 = vld [vmem:[%s3971_s14 + $0x238] sm:$0x1]  ;;  %v4264_v37 = vmul.f32 %v3989_v8, %v245_v48 }
  0x58   : > { %12005 = vst [vmem:[#allocation37_spill] sm:$0xff] %v4171_v54  ;;  %v251_v54 = vld [vmem:[%s3971_s14 + $0x230] sm:$0x1]  ;;  %v4289_v45 = vmul.f32 %v3989_v8, %v252_v53 }
  0x59   : > { %12006 = vst [vmem:[#allocation38_spill] sm:$0xff] %v4174_v55  ;;  %v250_v55 = vld [vmem:[%s3971_s14 + $0x228] sm:$0x1]  ;;  %v4286_v46 = vmul.f32 %v3989_v8, %v251_v54 }
  0x5a   : > { %12007 = vst [vmem:[#allocation39_spill] sm:$0xff] %v4177_v56  ;;  %v249_v56 = vld [vmem:[%s3971_s14 + $0x220] sm:$0x1]  ;;  %v4283_v47 = vmul.f32 %v3989_v8, %v250_v55 }
  0x5b   : > { %12008 = vst [vmem:[#allocation40_spill] sm:$0xff] %v4184_v61  ;;  %v256_v61 = vld [vmem:[%s3971_s14 + $0x258] sm:$0x1]  ;;  %v4280_v48 = vmul.f32 %v3989_v8, %v249_v56 }
  0x5c   : > { %12009 = vst [vmem:[#allocation41_spill] sm:$0xff] %v4187_v62  ;;  %v255_v62 = vld [vmem:[%s3971_s14 + $0x250] sm:$0x1]  ;;  %v4305_v53 = vmul.f32 %v3989_v8, %v256_v61 }
  0x5d   : > { %12010 = vst [vmem:[#allocation42_spill] sm:$0xff] %v4190_v63  ;;  %v254_v63 = vld [vmem:[%s3971_s14 + $0x248] sm:$0x1]  ;;  %v4302_v54 = vmul.f32 %v3989_v8, %v255_v62 }
  0x5e   : > { %12011 = vst [vmem:[#allocation43_spill] sm:$0xff] %v4193_v0  ;;  %v253_v0 = vld [vmem:[%s3971_s14 + $0x240] sm:$0x1]  ;;  %v4299_v55 = vmul.f32 %v3989_v8, %v254_v63 }
  0x5f   : > { %12012 = vst [vmem:[#allocation44_spill] sm:$0xff] %v4200_v5  ;;  %v260_v5 = vld [vmem:[%s3971_s14 + $0x278] sm:$0x1]  ;;  %v4296_v56 = vmul.f32 %v3989_v8, %v253_v0 }
  0x60   : > { %12013 = vst [vmem:[#allocation45_spill] sm:$0xff] %v4203_v6  ;;  %v259_v6 = vld [vmem:[%s3971_s14 + $0x270] sm:$0x1]  ;;  %v4321_v61 = vmul.f32 %v3989_v8, %v260_v5 }
  0x61   : > { %12014 = vst [vmem:[#allocation46_spill] sm:$0xff] %v4206_v7  ;;  %v258_v7 = vld [vmem:[%s3971_s14 + $0x268] sm:$0x1]  ;;  %v4318_v62 = vmul.f32 %v3989_v8, %v259_v6 }
  0x62   : > { %12015 = vst [vmem:[#allocation47_spill] sm:$0xff] %v4209_v9  ;;  %v257_v9 = vld [vmem:[%s3971_s14 + $0x260] sm:$0x1]  ;;  %v4315_v63 = vmul.f32 %v3989_v8, %v258_v7 }
  0x63   : > { %12016 = vst [vmem:[#allocation48_spill] sm:$0xff] %v4216_v14  ;;  %v264_v14 = vld [vmem:[%s3971_s14 + $0x298] sm:$0x1]  ;;  %v4312_v0 = vmul.f32 %v3989_v8, %v257_v9 }
  0x64   : > { %12017 = vst [vmem:[#allocation49_spill] sm:$0xff] %v4219_v15  ;;  %v263_v15 = vld [vmem:[%s3971_s14 + $0x290] sm:$0x1]  ;;  %v4337_v5 = vmul.f32 %v3989_v8, %v264_v14 }
  0x65   : > { %12018 = vst [vmem:[#allocation50_spill] sm:$0xff] %v4222_v16  ;;  %v262_v16 = vld [vmem:[%s3971_s14 + $0x288] sm:$0x1]  ;;  %v4334_v6 = vmul.f32 %v3989_v8, %v263_v15 }
  0x66   : > { %12019 = vst [vmem:[#allocation51_spill] sm:$0xff] %v4225_v17  ;;  %v261_v17 = vld [vmem:[%s3971_s14 + $0x280] sm:$0x1]  ;;  %v4331_v7 = vmul.f32 %v3989_v8, %v262_v16 }
  0x67   : > { %12020 = vst [vmem:[#allocation52_spill] sm:$0xff] %v4232_v22  ;;  %v268_v22 = vld [vmem:[%s3971_s14 + $0x2b8] sm:$0x1]  ;;  %v4328_v9 = vmul.f32 %v3989_v8, %v261_v17 }
  0x68   : > { %12021 = vst [vmem:[#allocation53_spill] sm:$0xff] %v4235_v23  ;;  %v267_v23 = vld [vmem:[%s3971_s14 + $0x2b0] sm:$0x1]  ;;  %v4353_v14 = vmul.f32 %v3989_v8, %v268_v22 }
  0x69   : > { %12022 = vst [vmem:[#allocation54_spill] sm:$0xff] %v4238_v24  ;;  %v266_v24 = vld [vmem:[%s3971_s14 + $0x2a8] sm:$0x1]  ;;  %v4350_v15 = vmul.f32 %v3989_v8, %v267_v23 }
  0x6a   : > { %12023 = vst [vmem:[#allocation55_spill] sm:$0xff] %v4241_v29  ;;  %v265_v29 = vld [vmem:[%s3971_s14 + $0x2a0] sm:$0x1]  ;;  %v4347_v16 = vmul.f32 %v3989_v8, %v266_v24 }
  0x6b   : > { %12024 = vst [vmem:[#allocation56_spill] sm:$0xff] %v4248_v38  ;;  %v272_v38 = vld [vmem:[%s3971_s14 + $0x2d8] sm:$0x1]  ;;  %v4344_v17 = vmul.f32 %v3989_v8, %v265_v29 }
  0x6c   : > { %12025 = vst [vmem:[#allocation57_spill] sm:$0xff] %v4251_v39  ;;  %v271_v39 = vld [vmem:[%s3971_s14 + $0x2d0] sm:$0x1]  ;;  %v4369_v22 = vmul.f32 %v3989_v8, %v272_v38 }
  0x6d   : > { %12026 = vst [vmem:[#allocation58_spill] sm:$0xff] %v4254_v40  ;;  %v270_v40 = vld [vmem:[%s3971_s14 + $0x2c8] sm:$0x1]  ;;  %v4366_v23 = vmul.f32 %v3989_v8, %v271_v39 }
  0x6e   : > { %12027 = vst [vmem:[#allocation59_spill] sm:$0xff] %v4257_v21  ;;  %v269_v21 = vld [vmem:[%s3971_s14 + $0x2c0] sm:$0x1]  ;;  %v4363_v24 = vmul.f32 %v3989_v8, %v270_v40 }
  0x6f   : > { %12028 = vst [vmem:[#allocation60_spill] sm:$0xff] %v4264_v37  ;;  %v276_v37 = vld [vmem:[%s3971_s14 + $0x2f8] sm:$0x1]  ;;  %v4360_v29 = vmul.f32 %v3989_v8, %v269_v21 }
  0x70   : > { %12029 = vst [vmem:[#allocation61_spill] sm:$0xff] %v4267_v32  ;;  %v275_v32 = vld [vmem:[%s3971_s14 + $0x2f0] sm:$0x1]  ;;  %v4385_v38 = vmul.f32 %v3989_v8, %v276_v37 }
  0x71   : > { %12030 = vst [vmem:[#allocation62_spill] sm:$0xff] %v4270_v31  ;;  %v274_v31 = vld [vmem:[%s3971_s14 + $0x2e8] sm:$0x1]  ;;  %v4382_v39 = vmul.f32 %v3989_v8, %v275_v32 }
  0x72   : > { %12031 = vst [vmem:[#allocation63_spill] sm:$0xff] %v4273_v30  ;;  %v273_v30 = vld [vmem:[%s3971_s14 + $0x2e0] sm:$0x1]  ;;  %v4379_v40 = vmul.f32 %v3989_v8, %v274_v31 }
  0x73   : > { %12032 = vst [vmem:[#allocation64_spill] sm:$0xff] %v4280_v48  ;;  %v280_v48 = vld [vmem:[%s3971_s14 + $0x318] sm:$0x1]  ;;  %v4376_v21 = vmul.f32 %v3989_v8, %v273_v30 }
  0x74   : > { %12033 = vst [vmem:[#allocation65_spill] sm:$0xff] %v4283_v47  ;;  %v279_v47 = vld [vmem:[%s3971_s14 + $0x310] sm:$0x1]  ;;  %v4401_v37 = vmul.f32 %v3989_v8, %v280_v48  ;;  %v305_v48 = vld [vmem:[%s3971_s14 + $0x3e0] sm:$0x1] }
  0x75   : > { %12034 = vst [vmem:[#allocation66_spill] sm:$0xff] %v4286_v46  ;;  %v278_v46 = vld [vmem:[%s3971_s14 + $0x308] sm:$0x1]  ;;  %v4398_v32 = vmul.f32 %v3989_v8, %v279_v47 }
  0x76   : > { %12035 = vst [vmem:[#allocation67_spill] sm:$0xff] %v4289_v45  ;;  %v277_v45 = vld [vmem:[%s3971_s14 + $0x300] sm:$0x1]  ;;  %v4395_v31 = vmul.f32 %v3989_v8, %v278_v46 }
  0x77   : > { %12036 = vst [vmem:[#allocation68_spill] sm:$0xff] %v4296_v56  ;;  %v284_v56 = vld [vmem:[%s3971_s14 + $0x338] sm:$0x1]  ;;  %v4392_v30 = vmul.f32 %v3989_v8, %v277_v45 }
  0x78   : > { %12037 = vst [vmem:[#allocation69_spill] sm:$0xff] %v4299_v55  ;;  %v283_v55 = vld [vmem:[%s3971_s14 + $0x330] sm:$0x1]  ;;  %v4417_v47 = vmul.f32 %v3989_v8, %v284_v56 }
  0x79   : > { %12038 = vst [vmem:[#allocation70_spill] sm:$0xff] %v4302_v54  ;;  %v282_v54 = vld [vmem:[%s3971_s14 + $0x328] sm:$0x1]  ;;  %v4414_v46 = vmul.f32 %v3989_v8, %v283_v55 }
  0x7a   : > { %12039 = vst [vmem:[#allocation71_spill] sm:$0xff] %v4305_v53  ;;  %v281_v53 = vld [vmem:[%s3971_s14 + $0x320] sm:$0x1]  ;;  %v4411_v45 = vmul.f32 %v3989_v8, %v282_v54 }
  0x7b   : > { %12040 = vst [vmem:[#allocation72_spill] sm:$0xff] %v4312_v0  ;;  %v288_v0 = vld [vmem:[%s3971_s14 + $0x358] sm:$0x1]  ;;  %v4408_v20 = vmul.f32 %v3989_v8, %v281_v53 }
  0x7c   : > { %12041 = vst [vmem:[#allocation73_spill] sm:$0xff] %v4315_v63  ;;  %v287_v63 = vld [vmem:[%s3971_s14 + $0x350] sm:$0x1]  ;;  %v4433_v56 = vmul.f32 %v3989_v8, %v288_v0  ;;  %v442_v0 = vld [vmem:[%s3971_s14 + $0x19] sm:$0x1] }
  0x7d   : > { %12042 = vst [vmem:[#allocation74_spill] sm:$0xff] %v4318_v62  ;;  %v286_v62 = vld [vmem:[%s3971_s14 + $0x348] sm:$0x1]  ;;  %v4430_v55 = vmul.f32 %v3989_v8, %v287_v63  ;;  %v440_v63 = vld [vmem:[%s3971_s14 + $0x9] sm:$0x1] }
  0x7e   : > { %12043 = vst [vmem:[#allocation75_spill] sm:$0xff] %v4321_v61  ;;  %v285_v61 = vld [vmem:[%s3971_s14 + $0x340] sm:$0x1]  ;;  %v4427_v54 = vmul.f32 %v3989_v8, %v286_v62 }
  0x7f   : > { %12044 = vst [vmem:[#allocation76_spill] sm:$0xff] %v4328_v9  ;;  %v292_v9 = vld [vmem:[%s3971_s14 + $0x378] sm:$0x1]  ;;  %v4424_v53 = vmul.f32 %v3989_v8, %v285_v61 }
  0x80   : > { %12045 = vst [vmem:[#allocation77_spill] sm:$0xff] %v4331_v7  ;;  %v291_v7 = vld [vmem:[%s3971_s14 + $0x370] sm:$0x1]  ;;  %v4445_v62 = vmul.f32 %v3989_v8, %v292_v9 }
  0x81   : > { %12046 = vst [vmem:[#allocation78_spill] sm:$0xff] %v4334_v6  ;;  %v290_v6 = vld [vmem:[%s3971_s14 + $0x368] sm:$0x1]  ;;  %v4442_v61 = vmul.f32 %v3989_v8, %v291_v7 }
  0x82   : > { %12047 = vst [vmem:[#allocation79_spill] sm:$0xff] %v4337_v5  ;;  %v289_v5 = vld [vmem:[%s3971_s14 + $0x360] sm:$0x1] }
  0x83   : > { %12048 = vst [vmem:[#allocation80_spill] sm:$0xff] %v4344_v17  ;;  %v296_v17 = vld [vmem:[%s3971_s14 + $0x398] sm:$0x1] }
  0x84   : > { %12049 = vst [vmem:[#allocation81_spill] sm:$0xff] %v4347_v16  ;;  %v295_v16 = vld [vmem:[%s3971_s14 + $0x390] sm:$0x1]  ;;  %v4461_v9 = vmul.f32 %v3989_v8, %v296_v17 }
  0x85   : > { %12050 = vst [vmem:[#allocation82_spill] sm:$0xff] %v4350_v15  ;;  %v294_v15 = vld [vmem:[%s3971_s14 + $0x388] sm:$0x1]  ;;  %v4458_v7 = vmul.f32 %v3989_v8, %v295_v16 }
  0x86   : > { %12051 = vst [vmem:[#allocation83_spill] sm:$0xff] %v4353_v14  ;;  %v293_v14 = vld [vmem:[%s3971_s14 + $0x380] sm:$0x1] }
  0x87   : > { %12052 = vst [vmem:[#allocation84_spill] sm:$0xff] %v4360_v29  ;;  %v300_v29 = vld [vmem:[%s3971_s14 + $0x3b8] sm:$0x1] }
  0x88   : > { %12053 = vst [vmem:[#allocation85_spill] sm:$0xff] %v4363_v24  ;;  %v299_v24 = vld [vmem:[%s3971_s14 + $0x3b0] sm:$0x1]  ;;  %v4479_v17 = vmul.f32 %v3989_v8, %v300_v29 }
  0x89   : > { %12054 = vst [vmem:[#allocation86_spill] sm:$0xff] %v4366_v23  ;;  %v298_v23 = vld [vmem:[%s3971_s14 + $0x3a8] sm:$0x1]  ;;  %v4476_v16 = vmul.f32 %v3989_v8, %v299_v24 }
  0x8a   : > { %12055 = vst [vmem:[#allocation87_spill] sm:$0xff] %v4369_v22  ;;  %v297_v22 = vld [vmem:[%s3971_s14 + $0x3a0] sm:$0x1] }
  0x8b   : > { %12056 = vst [vmem:[#allocation88_spill] sm:$0xff] %v4376_v21  ;;  %v304_v21 = vld [vmem:[%s3971_s14 + $0x3d8] sm:$0x1] }
  0x8c   : > { %12057 = vst [vmem:[#allocation89_spill] sm:$0xff] %v4379_v40  ;;  %v303_v40 = vld [vmem:[%s3971_s14 + $0x3d0] sm:$0x1]  ;;  %v4495_v29 = vmul.f32 %v3989_v8, %v304_v21 }
  0x8d   : > { %12058 = vst [vmem:[#allocation90_spill] sm:$0xff] %v4382_v39  ;;  %v302_v39 = vld [vmem:[%s3971_s14 + $0x3c8] sm:$0x1]  ;;  %v4492_v24 = vmul.f32 %v3989_v8, %v303_v40 }
  0x8e   : > { %12059 = vst [vmem:[#allocation91_spill] sm:$0xff] %v4385_v38  ;;  %v301_v38 = vld [vmem:[%s3971_s14 + $0x3c0] sm:$0x1] }
  0x8f   : > { %12060 = vst [vmem:[#allocation92_spill] sm:$0xff] %v4392_v30  ;;  %v467_v30 = vld [vmem:[%s3971_s14 + $0xe1] sm:$0x1] }
  0x90   : > { %12061 = vst [vmem:[#allocation93_spill] sm:$0xff] %v4395_v31  ;;  %v308_v31 = vld [vmem:[%s3971_s14 + $0x3f8] sm:$0x1] }
  0x91   : > { %12062 = vst [vmem:[#allocation94_spill] sm:$0xff] %v4398_v32  ;;  %v307_v32 = vld [vmem:[%s3971_s14 + $0x3f0] sm:$0x1]  ;;  %v4511_v21 = vmul.f32 %v3989_v8, %v308_v31 }
  0x92   : > { %12063 = vst [vmem:[#allocation95_spill] sm:$0xff] %v4401_v37  ;;  %v306_v37 = vld [vmem:[%s3971_s14 + $0x3e8] sm:$0x1]  ;;  %v4508_v40 = vmul.f32 %v3989_v8, %v307_v32 }
  0x93   : > { %12064 = vst [vmem:[#allocation96_spill] sm:$0xff] %v4408_v20  ;;  %v466_v20 = vld [vmem:[%s3971_s14 + $0xd9] sm:$0x1] }
  0x94   : > { %12065 = vst [vmem:[#allocation97_spill] sm:$0xff] %v4411_v45  ;;  %v465_v45 = vld [vmem:[%s3971_s14 + $0xd1] sm:$0x1] }
  0x95   : > { %12066 = vst [vmem:[#allocation98_spill] sm:$0xff] %v4414_v46  ;;  %v4439_v46 = vmul.f32 %v3989_v8, %v290_v6  ;;  %v4455_v6 = vmul.f32 %v3989_v8, %v294_v15  ;;  %v4473_v15 = vmul.f32 %v3989_v8, %v298_v23  ;;  %v4489_v23 = vmul.f32 %v3989_v8, %v302_v39 }
  0x96   : > { %12067 = vst [vmem:[#allocation99_spill] sm:$0xff] %v4417_v47  ;;  %v4436_v47 = vmul.f32 %v3989_v8, %v289_v5  ;;  %v443_v5 = vld [vmem:[%s3971_s14 + $0x21] sm:$0x1]  ;;  %v4505_v39 = vmul.f32 %v3989_v8, %v306_v37  ;;  %v462_v37 = vld [vmem:[%s3971_s14 + $0xb9] sm:$0x1] }
  0x97   : > { %12068 = vst [vmem:[#allocation100_spill] sm:$0xff] %v4424_v53  ;;  %v459_v53 = vld [vmem:[%s3971_s14 + $0xa1] sm:$0x1] }
  0x98   : > { %12069 = vst [vmem:[#allocation101_spill] sm:$0xff] %v4427_v54  ;;  %v439_v54 = vld [vmem:[%s3971_s14 + $0x1] sm:$0x1] }
  0x99   : > { %12070 = vst [vmem:[#allocation102_spill] sm:$0xff] %v4430_v55  ;;  %v441_v55 = vld [vmem:[%s3971_s14 + $0x11] sm:$0x1] }
  0x9a   : > { %12071 = vst [vmem:[#allocation103_spill] sm:$0xff] %v4433_v56  ;;  %v4452_v56 = vmul.f32 %v3989_v8, %v293_v14  ;;  %v4470_v14 = vmul.f32 %v3989_v8, %v297_v22  ;;  %v4486_v22 = vmul.f32 %v3989_v8, %v301_v38  ;;  %v4502_v38 = vmul.f32 %v3989_v8, %v305_v48  ;;  %v460_v48 = vld [vmem:[%s3971_s14 + $0xa9] sm:$0x1] }
  0x9b   : > { %12072 = vst [vmem:[#allocation104_spill] sm:$0xff] %v4436_v47  ;;  %v4467_v47 = vld [vmem:[#allocation5 + $0x1] ss:$0 sm:$0xff] }
  0x9c   : > { %12073 = vst [vmem:[#allocation105_spill] sm:$0xff] %v4439_v46  ;;  %v446_v46 = vld [vmem:[%s3971_s14 + $0x39] sm:$0x1]  ;;  %v4522_v32 = vmul.f32 %v4467_v47, %v439_v54  ;;  %v4528_v8 = vmul.f32 %v4467_v47, %v441_v55  ;;  %v4531_v31 = vmul.f32 %v4467_v47, %v442_v0  ;;  %v4538_v54 = vmul.f32 %v4467_v47, %v443_v5 }
  0x9d   : > { %12074 = vst [vmem:[#allocation106_spill] sm:$0xff] %v4442_v61  ;;  %v445_v61 = vld [vmem:[%s3971_s14 + $0x31] sm:$0x1]  ;;  %v4547_v0 = vmul.f32 %v4467_v47, %v446_v46 }
  0x9e   : > { %12075 = vst [vmem:[#allocation107_spill] sm:$0xff] %v4445_v62  ;;  %v444_v62 = vld [vmem:[%s3971_s14 + $0x29] sm:$0x1]  ;;  %v4544_v55 = vmul.f32 %v4467_v47, %v445_v61 }
  0x9f   : > { %12076 = vst [vmem:[#allocation108_spill] sm:$0xff] %v4452_v56  ;;  %v450_v56 = vld [vmem:[%s3971_s14 + $0x59] sm:$0x1] }
  0xa0   : > { %12077 = vst [vmem:[#allocation109_spill] sm:$0xff] %v4455_v6  ;;  %v449_v6 = vld [vmem:[%s3971_s14 + $0x51] sm:$0x1]  ;;  %v4563_v46 = vmul.f32 %v4467_v47, %v450_v56 }
  0xa1   : > { %12078 = vst [vmem:[#allocation110_spill] sm:$0xff] %v4458_v7  ;;  %v448_v7 = vld [vmem:[%s3971_s14 + $0x49] sm:$0x1]  ;;  %v4560_v61 = vmul.f32 %v4467_v47, %v449_v6 }
  0xa2   : > { %12079 = vst [vmem:[#allocation111_spill] sm:$0xff] %v4461_v9  ;;  %v447_v9 = vld [vmem:[%s3971_s14 + $0x41] sm:$0x1] }
  0xa3   : > { %12080 = vst [vmem:[#allocation112_spill] sm:$0xff] %v4470_v14  ;;  %v454_v14 = vld [vmem:[%s3971_s14 + $0x79] sm:$0x1]  ;;  %v4554_v5 = vmul.f32 %v4467_v47, %v447_v9 }
  0xa4   : > { %12081 = vst [vmem:[#allocation113_spill] sm:$0xff] %v4473_v15  ;;  %v453_v15 = vld [vmem:[%s3971_s14 + $0x71] sm:$0x1]  ;;  %v4579_v56 = vmul.f32 %v4467_v47, %v454_v14 }
  0xa5   : > { %12082 = vst [vmem:[#allocation114_spill] sm:$0xff] %v4476_v16  ;;  %v452_v16 = vld [vmem:[%s3971_s14 + $0x69] sm:$0x1]  ;;  %v4576_v6 = vmul.f32 %v4467_v47, %v453_v15 }
  0xa6   : > { %12083 = vst [vmem:[#allocation115_spill] sm:$0xff] %v4479_v17  ;;  %v451_v17 = vld [vmem:[%s3971_s14 + $0x61] sm:$0x1] }
  0xa7   : > { %12084 = vst [vmem:[#allocation116_spill] sm:$0xff] %v4486_v22  ;;  %v458_v22 = vld [vmem:[%s3971_s14 + $0x99] sm:$0x1]  ;;  %v4570_v9 = vmul.f32 %v4467_v47, %v451_v17 }
  0xa8   : > { %12085 = vst [vmem:[#allocation117_spill] sm:$0xff] %v4489_v23  ;;  %v457_v23 = vld [vmem:[%s3971_s14 + $0x91] sm:$0x1]  ;;  %v4595_v14 = vmul.f32 %v4467_v47, %v458_v22  ;;  %v4611_v22 = vmul.f32 %v4467_v47, %v462_v37  ;;  %v4627_v37 = vmul.f32 %v4467_v47, %v466_v20  ;;  %v4643_v20 = vmul.f32 %v4467_v47, %v470_v13 }
  0xa9   : > { %12086 = vst [vmem:[#allocation118_spill] sm:$0xff] %v4492_v24  ;;  %v456_v24 = vld [vmem:[%s3971_s14 + $0x89] sm:$0x1]  ;;  %v4592_v15 = vmul.f32 %v4467_v47, %v457_v23  ;;  %v4659_v13 = vmul.f32 %v4467_v47, %v474_v4  ;;  %v4675_v4 = vmul.f32 %v4467_v47, %v478_v60 }
  0xaa   : > { %12087 = vst [vmem:[#allocation119_spill] sm:$0xff] %v4495_v29  ;;  %v455_v29 = vld [vmem:[%s3971_s14 + $0x81] sm:$0x1] }
  0xab   : > { %12088 = vst [vmem:[#allocation120_spill] sm:$0xff] %v4502_v38  ;;  %v461_v38 = vld [vmem:[%s3971_s14 + $0xb1] sm:$0x1]  ;;  %v4586_v17 = vmul.f32 %v4467_v47, %v455_v29  ;;  %v4602_v29 = vmul.f32 %v4467_v47, %v459_v53 }
  0xac   : > { %12089 = vst [vmem:[#allocation121_spill] sm:$0xff] %v4505_v39  ;;  %v464_v39 = vld [vmem:[%s3971_s14 + $0xc9] sm:$0x1]  ;;  %v4608_v23 = vmul.f32 %v4467_v47, %v461_v38  ;;  %v4624_v38 = vmul.f32 %v4467_v47, %v465_v45  ;;  %v4640_v45 = vmul.f32 %v4467_v47, %v469_v18  ;;  %v4656_v18 = vmul.f32 %v4467_v47, %v473_v10 }
  0xad   : > { %12090 = vst [vmem:[#allocation122_spill] sm:$0xff] %v4508_v40  ;;  %v4525_v40 = vmul.f32 %v4467_v47, %v440_v63  ;;  %v4541_v63 = vmul.f32 %v4467_v47, %v444_v62  ;;  %v4557_v62 = vmul.f32 %v4467_v47, %v448_v7  ;;  %v4573_v7 = vmul.f32 %v4467_v47, %v452_v16 }
  0xae   : > { %12091 = vst [vmem:[#allocation123_spill] sm:$0xff] %v4511_v21  ;;  %v463_v21 = vld [vmem:[%s3971_s14 + $0xc1] sm:$0x1]  ;;  %v4589_v16 = vmul.f32 %v4467_v47, %v456_v24  ;;  %v4605_v24 = vmul.f32 %v4467_v47, %v460_v48  ;;  %v4621_v48 = vmul.f32 %v4467_v47, %v464_v39  ;;  %v4637_v39 = vmul.f32 %v4467_v47, %v468_v19 }
  0xaf   : > { %12092 = vst [vmem:[#allocation124_spill] sm:$0xff] %v4579_v56  ;;  %v482_v56 = vld [vmem:[%s3971_s14 + $0x159] sm:$0x1]  ;;  %v4618_v53 = vmul.f32 %v4467_v47, %v463_v21  ;;  %v4634_v21 = vmul.f32 %v4467_v47, %v467_v30  ;;  %v4650_v30 = vmul.f32 %v4467_v47, %v471_v12  ;;  %v4653_v19 = vmul.f32 %v4467_v47, %v472_v11 }
  0xb0   : > { %12093 = vst [vmem:[#allocation125_spill] sm:$0xff] %v4586_v17  ;;  %v486_v17 = vld [vmem:[%s3971_s14 + $0x179] sm:$0x1]  ;;  %v4666_v12 = vmul.f32 %v4467_v47, %v475_v3  ;;  %v4669_v11 = vmul.f32 %v4467_v47, %v476_v2  ;;  %v4672_v10 = vmul.f32 %v4467_v47, %v477_v1  ;;  %v4682_v3 = vmul.f32 %v4467_v47, %v479_v59 }
  0xb1   : > { %12094 = vst [vmem:[#allocation126_spill] sm:$0xff] %v4589_v16  ;;  %v485_v16 = vld [vmem:[%s3971_s14 + $0x171] sm:$0x1]  ;;  %v4685_v2 = vmul.f32 %v4467_v47, %v480_v58  ;;  %v4688_v1 = vmul.f32 %v4467_v47, %v481_v57  ;;  %v4691_v60 = vmul.f32 %v4467_v47, %v482_v56  ;;  %v4707_v56 = vmul.f32 %v4467_v47, %v486_v17 }
  0xb2   : > { %12095 = vst [vmem:[#allocation127_spill] sm:$0xff] %v4592_v15  ;;  %v484_v15 = vld [vmem:[%s3971_s14 + $0x169] sm:$0x1]  ;;  %v4704_v57 = vmul.f32 %v4467_v47, %v485_v16 }
  0xb3   : > { %12096 = vst [vmem:[#allocation128_spill] sm:$0xff] %v4595_v14  ;;  %v483_v14 = vld [vmem:[%s3971_s14 + $0x161] sm:$0x1]  ;;  %v4701_v58 = vmul.f32 %v4467_v47, %v484_v15 }
  0xb4   : > { %12097 = vst [vmem:[#allocation129_spill] sm:$0xff] %v4602_v29  ;;  %v490_v29 = vld [vmem:[%s3971_s14 + $0x199] sm:$0x1]  ;;  %v4698_v59 = vmul.f32 %v4467_v47, %v483_v14 }
  0xb5   : > { %12098 = vst [vmem:[#allocation130_spill] sm:$0xff] %v4605_v24  ;;  %v489_v24 = vld [vmem:[%s3971_s14 + $0x191] sm:$0x1]  ;;  %v4723_v17 = vmul.f32 %v4467_v47, %v490_v29 }
  0xb6   : > { %12099 = vst [vmem:[#allocation131_spill] sm:$0xff] %v4608_v23  ;;  %v488_v23 = vld [vmem:[%s3971_s14 + $0x189] sm:$0x1]  ;;  %v4720_v16 = vmul.f32 %v4467_v47, %v489_v24 }
  0xb7   : > { %12100 = vst [vmem:[#allocation132_spill] sm:$0xff] %v4611_v22  ;;  %v487_v22 = vld [vmem:[%s3971_s14 + $0x181] sm:$0x1]  ;;  %v4717_v15 = vmul.f32 %v4467_v47, %v488_v23 }
  0xb8   : > { %12101 = vst [vmem:[#allocation133_spill] sm:$0xff] %v4618_v53  ;;  %v494_v53 = vld [vmem:[%s3971_s14 + $0x1b9] sm:$0x1]  ;;  %v4714_v14 = vmul.f32 %v4467_v47, %v487_v22 }
  0xb9   : > { %12102 = vst [vmem:[#allocation134_spill] sm:$0xff] %v4621_v48  ;;  %v493_v48 = vld [vmem:[%s3971_s14 + $0x1b1] sm:$0x1]  ;;  %v4739_v29 = vmul.f32 %v4467_v47, %v494_v53 }
  0xba   : > { %12103 = vst [vmem:[#allocation135_spill] sm:$0xff] %v4624_v38  ;;  %v492_v38 = vld [vmem:[%s3971_s14 + $0x1a9] sm:$0x1]  ;;  %v4736_v24 = vmul.f32 %v4467_v47, %v493_v48 }
  0xbb   : > { %12104 = vst [vmem:[#allocation136_spill] sm:$0xff] %v4627_v37  ;;  %v491_v37 = vld [vmem:[%s3971_s14 + $0x1a1] sm:$0x1]  ;;  %v4733_v23 = vmul.f32 %v4467_v47, %v492_v38 }
  0xbc   : > { %12105 = vst [vmem:[#allocation137_spill] sm:$0xff] %v4634_v21  ;;  %v498_v21 = vld [vmem:[%s3971_s14 + $0x1d9] sm:$0x1]  ;;  %v4730_v22 = vmul.f32 %v4467_v47, %v491_v37 }
  0xbd   : > { %12106 = vst [vmem:[#allocation138_spill] sm:$0xff] %v4637_v39  ;;  %v497_v39 = vld [vmem:[%s3971_s14 + $0x1d1] sm:$0x1]  ;;  %v4755_v53 = vmul.f32 %v4467_v47, %v498_v21 }
  0xbe   : > { %12107 = vst [vmem:[#allocation139_spill] sm:$0xff] %v4640_v45  ;;  %v496_v45 = vld [vmem:[%s3971_s14 + $0x1c9] sm:$0x1]  ;;  %v4752_v48 = vmul.f32 %v4467_v47, %v497_v39 }
  0xbf   : > { %12108 = vst [vmem:[#allocation140_spill] sm:$0xff] %v4643_v20  ;;  %v495_v20 = vld [vmem:[%s3971_s14 + $0x1c1] sm:$0x1]  ;;  %v4749_v38 = vmul.f32 %v4467_v47, %v496_v45 }
  0xc0   : > { %12109 = vst [vmem:[#allocation141_spill] sm:$0xff] %v4650_v30  ;;  %v502_v30 = vld [vmem:[%s3971_s14 + $0x1f9] sm:$0x1]  ;;  %v4746_v37 = vmul.f32 %v4467_v47, %v495_v20 }
  0xc1   : > { %12110 = vst [vmem:[#allocation142_spill] sm:$0xff] %v4653_v19  ;;  %v501_v19 = vld [vmem:[%s3971_s14 + $0x1f1] sm:$0x1]  ;;  %v4771_v21 = vmul.f32 %v4467_v47, %v502_v30 }
  0xc2   : > { %12111 = vst [vmem:[#allocation143_spill] sm:$0xff] %v4656_v18  ;;  %v500_v18 = vld [vmem:[%s3971_s14 + $0x1e9] sm:$0x1]  ;;  %v4768_v39 = vmul.f32 %v4467_v47, %v501_v19 }
  0xc3   : > { %12112 = vst [vmem:[#allocation144_spill] sm:$0xff] %v4659_v13  ;;  %v499_v13 = vld [vmem:[%s3971_s14 + $0x1e1] sm:$0x1]  ;;  %v4765_v45 = vmul.f32 %v4467_v47, %v500_v18 }
  0xc4   : > { %12113 = vst [vmem:[#allocation145_spill] sm:$0xff] %v4666_v12  ;;  %v506_v12 = vld [vmem:[%s3971_s14 + $0x219] sm:$0x1]  ;;  %v4762_v20 = vmul.f32 %v4467_v47, %v499_v13 }
  0xc5   : > { %12114 = vst [vmem:[#allocation146_spill] sm:$0xff] %v4669_v11  ;;  %v505_v11 = vld [vmem:[%s3971_s14 + $0x211] sm:$0x1]  ;;  %v4787_v30 = vmul.f32 %v4467_v47, %v506_v12 }
  0xc6   : > { %12115 = vst [vmem:[#allocation147_spill] sm:$0xff] %v4672_v10  ;;  %v504_v10 = vld [vmem:[%s3971_s14 + $0x209] sm:$0x1]  ;;  %v4784_v19 = vmul.f32 %v4467_v47, %v505_v11 }
  0xc7   : > { %12116 = vst [vmem:[#allocation148_spill] sm:$0xff] %v4675_v4  ;;  %v503_v4 = vld [vmem:[%s3971_s14 + $0x201] sm:$0x1]  ;;  %v4781_v18 = vmul.f32 %v4467_v47, %v504_v10 }
  0xc8   : > { %12117 = vst [vmem:[#allocation149_spill] sm:$0xff] %v4682_v3  ;;  %v510_v3 = vld [vmem:[%s3971_s14 + $0x239] sm:$0x1]  ;;  %v4778_v13 = vmul.f32 %v4467_v47, %v503_v4 }
  0xc9   : > { %12118 = vst [vmem:[#allocation150_spill] sm:$0xff] %v4685_v2  ;;  %v509_v2 = vld [vmem:[%s3971_s14 + $0x231] sm:$0x1]  ;;  %v4803_v12 = vmul.f32 %v4467_v47, %v510_v3 }
  0xca   : > { %12119 = vst [vmem:[#allocation151_spill] sm:$0xff] %v4688_v1  ;;  %v508_v1 = vld [vmem:[%s3971_s14 + $0x229] sm:$0x1]  ;;  %v4800_v11 = vmul.f32 %v4467_v47, %v509_v2 }
  0xcb   : > { %12120 = vst [vmem:[#allocation152_spill] sm:$0xff] %v4691_v60  ;;  %v507_v60 = vld [vmem:[%s3971_s14 + $0x221] sm:$0x1]  ;;  %v4797_v10 = vmul.f32 %v4467_v47, %v508_v1 }
  0xcc   : > { %12121 = vst [vmem:[#allocation153_spill] sm:$0xff] %v4698_v59  ;;  %v514_v59 = vld [vmem:[%s3971_s14 + $0x259] sm:$0x1]  ;;  %v4794_v4 = vmul.f32 %v4467_v47, %v507_v60 }
  0xcd   : > { %12122 = vst [vmem:[#allocation154_spill] sm:$0xff] %v4701_v58  ;;  %v513_v58 = vld [vmem:[%s3971_s14 + $0x251] sm:$0x1]  ;;  %v4819_v3 = vmul.f32 %v4467_v47, %v514_v59  ;;  %v539_v59 = vld [vmem:[%s3971_s14 + $0x321] sm:$0x1] }
  0xce   : > { %12123 = vst [vmem:[#allocation155_spill] sm:$0xff] %v4704_v57  ;;  %v512_v57 = vld [vmem:[%s3971_s14 + $0x249] sm:$0x1]  ;;  %v4816_v2 = vmul.f32 %v4467_v47, %v513_v58 }
  0xcf   : > { %12124 = vst [vmem:[#allocation156_spill] sm:$0xff] %v4707_v56  ;;  %v511_v56 = vld [vmem:[%s3971_s14 + $0x241] sm:$0x1]  ;;  %v4813_v1 = vmul.f32 %v4467_v47, %v512_v57 }
  0xd0   : > { %12125 = vst [vmem:[#allocation157_spill] sm:$0xff] %v4714_v14  ;;  %v518_v14 = vld [vmem:[%s3971_s14 + $0x279] sm:$0x1]  ;;  %v4810_v60 = vmul.f32 %v4467_v47, %v511_v56 }
  0xd1   : > { %12126 = vst [vmem:[#allocation158_spill] sm:$0xff] %v4717_v15  ;;  %v517_v15 = vld [vmem:[%s3971_s14 + $0x271] sm:$0x1]  ;;  %v4835_v58 = vmul.f32 %v4467_v47, %v518_v14 }
  0xd2   : > { %12127 = vst [vmem:[#allocation159_spill] sm:$0xff] %v4720_v16  ;;  %v516_v16 = vld [vmem:[%s3971_s14 + $0x269] sm:$0x1]  ;;  %v4832_v57 = vmul.f32 %v4467_v47, %v517_v15  ;;  %v543_v15 = vld [vmem:[%s3971_s14 + $0x341] sm:$0x1] }
  0xd3   : > { %12128 = vst [vmem:[#allocation160_spill] sm:$0xff] %v4723_v17  ;;  %v515_v17 = vld [vmem:[%s3971_s14 + $0x261] sm:$0x1]  ;;  %v4829_v56 = vmul.f32 %v4467_v47, %v516_v16 }
  0xd4   : > { %12129 = vst [vmem:[#allocation161_spill] sm:$0xff] %v4730_v22  ;;  %v522_v22 = vld [vmem:[%s3971_s14 + $0x299] sm:$0x1]  ;;  %v4826_v52 = vmul.f32 %v4467_v47, %v515_v17 }
  0xd5   : > { %12130 = vst [vmem:[#allocation162_spill] sm:$0xff] %v4733_v23  ;;  %v521_v23 = vld [vmem:[%s3971_s14 + $0x291] sm:$0x1]  ;;  %v4851_v14 = vmul.f32 %v4467_v47, %v522_v22  ;;  %v546_v22 = vld [vmem:[%s3971_s14 + $0x359] sm:$0x1] }
  0xd6   : > { %12131 = vst [vmem:[#allocation163_spill] sm:$0xff] %v4736_v24  ;;  %v520_v24 = vld [vmem:[%s3971_s14 + $0x289] sm:$0x1]  ;;  %v4848_v16 = vmul.f32 %v4467_v47, %v521_v23 }
  0xd7   : > { %12132 = vst [vmem:[#allocation164_spill] sm:$0xff] %v4739_v29  ;;  %v519_v29 = vld [vmem:[%s3971_s14 + $0x281] sm:$0x1]  ;;  %v4845_v17 = vmul.f32 %v4467_v47, %v520_v24 }
  0xd8   : > { %12133 = vst [vmem:[#allocation165_spill] sm:$0xff] %v4746_v37  ;;  %v526_v37 = vld [vmem:[%s3971_s14 + $0x2b9] sm:$0x1] }
  0xd9   : > { %12134 = vst [vmem:[#allocation166_spill] sm:$0xff] %v4749_v38  ;;  %v525_v38 = vld [vmem:[%s3971_s14 + $0x2b1] sm:$0x1]  ;;  %v4866_v23 = vmul.f32 %v4467_v47, %v526_v37 }
  0xda   : > { %12135 = vst [vmem:[#allocation167_spill] sm:$0xff] %v4752_v48  ;;  %v524_v48 = vld [vmem:[%s3971_s14 + $0x2a9] sm:$0x1]  ;;  %v4863_v24 = vmul.f32 %v4467_v47, %v525_v38  ;;  %v549_v37 = vld [vmem:[%s3971_s14 + $0x371] sm:$0x1] }
  0xdb   : > { %12136 = vst [vmem:[#allocation168_spill] sm:$0xff] %v4755_v53  ;;  %v523_v53 = vld [vmem:[%s3971_s14 + $0x2a1] sm:$0x1] }
  0xdc   : > { %12137 = vst [vmem:[#allocation169_spill] sm:$0xff] %v4762_v20  ;;  %v530_v20 = vld [vmem:[%s3971_s14 + $0x2d9] sm:$0x1] }
  0xdd   : > { %12138 = vst [vmem:[#allocation170_spill] sm:$0xff] %v4765_v45  ;;  %v529_v45 = vld [vmem:[%s3971_s14 + $0x2d1] sm:$0x1]  ;;  %v4881_v38 = vmul.f32 %v4467_v47, %v530_v20  ;;  %v552_v20 = vld [vmem:[%s3971_s14 + $0x389] sm:$0x1] }
  0xde   : > { %12139 = vst [vmem:[#allocation171_spill] sm:$0xff] %v4768_v39  ;;  %v528_v39 = vld [vmem:[%s3971_s14 + $0x2c9] sm:$0x1] }
  0xdf   : > { %12140 = vst [vmem:[#allocation172_spill] sm:$0xff] %v4771_v21  ;;  %v527_v21 = vld [vmem:[%s3971_s14 + $0x2c1] sm:$0x1] }
  0xe0   : > { %12141 = vst [vmem:[#allocation173_spill] sm:$0xff] %v4778_v13  ;;  %v534_v13 = vld [vmem:[%s3971_s14 + $0x2f9] sm:$0x1] }
  0xe1   : > { %12142 = vst [vmem:[#allocation174_spill] sm:$0xff] %v4781_v18  ;;  %v533_v18 = vld [vmem:[%s3971_s14 + $0x2f1] sm:$0x1] }
  0xe2   : > { %12143 = vst [vmem:[#allocation175_spill] sm:$0xff] %v4784_v19  ;;  %v532_v19 = vld [vmem:[%s3971_s14 + $0x2e9] sm:$0x1] }
  0xe3   : > { %12144 = vst [vmem:[#allocation176_spill] sm:$0xff] %v4787_v30  ;;  %v531_v30 = vld [vmem:[%s3971_s14 + $0x2e1] sm:$0x1] }
  0xe4   : > { %12145 = vst [vmem:[#allocation177_spill] sm:$0xff] %v4794_v4  ;;  %v538_v4 = vld [vmem:[%s3971_s14 + $0x319] sm:$0x1] }
  0xe5   : > { %12146 = vst [vmem:[#allocation178_spill] sm:$0xff] %v4797_v10  ;;  %v537_v10 = vld [vmem:[%s3971_s14 + $0x311] sm:$0x1] }
  0xe6   : > { %12147 = vst [vmem:[#allocation179_spill] sm:$0xff] %v4800_v11  ;;  %v536_v11 = vld [vmem:[%s3971_s14 + $0x309] sm:$0x1] }
  0xe7   : > { %12148 = vst [vmem:[#allocation180_spill] sm:$0xff] %v4803_v12  ;;  %v535_v12 = vld [vmem:[%s3971_s14 + $0x301] sm:$0x1] }
  0xe8   : > { %12149 = vst [vmem:[#allocation181_spill] sm:$0xff] %v4810_v60  ;;  %v4842_v60 = vmul.f32 %v4467_v47, %v519_v29  ;;  %v4860_v29 = vmul.f32 %v4467_v47, %v524_v48  ;;  %v4878_v48 = vmul.f32 %v4467_v47, %v529_v45  ;;  %v4896_v45 = vmul.f32 %v4467_v47, %v534_v13  ;;  %v555_v13 = vld [vmem:[%s3971_s14 + $0x3a1] sm:$0x1] }
  0xe9   : > { %12150 = vst [vmem:[#allocation182_spill] sm:$0xff] %v4813_v1  ;;  %v542_v1 = vld [vmem:[%s3971_s14 + $0x339] sm:$0x1] }
  0xea   : > { %12151 = vst [vmem:[#allocation183_spill] sm:$0xff] %v4816_v2  ;;  %v541_v2 = vld [vmem:[%s3971_s14 + $0x331] sm:$0x1] }
  0xeb   : > { %12152 = vst [vmem:[#allocation184_spill] sm:$0xff] %v4819_v3  ;;  %v540_v3 = vld [vmem:[%s3971_s14 + $0x329] sm:$0x1] }
  0xec   : > { %12153 = vst [vmem:[#allocation185_spill] sm:$0xff] %v4829_v56  ;;  %v4857_v56 = vmul.f32 %v4467_v47, %v523_v53  ;;  %v4875_v53 = vmul.f32 %v4467_v47, %v528_v39  ;;  %v4893_v39 = vmul.f32 %v4467_v47, %v533_v18  ;;  %v4911_v18 = vmul.f32 %v4467_v47, %v538_v4  ;;  %v558_v4 = vld [vmem:[%s3971_s14 + $0x3b9] sm:$0x1] }
  0xed   : > { %12154 = vst [vmem:[#allocation186_spill] sm:$0xff] %v4832_v57  ;;  %v545_v57 = vld [vmem:[%s3971_s14 + $0x351] sm:$0x1] }
  0xee   : > { %12155 = vst [vmem:[#allocation187_spill] sm:$0xff] %v4835_v58  ;;  %v544_v58 = vld [vmem:[%s3971_s14 + $0x349] sm:$0x1] }
  0xef   : > { %12156 = vst [vmem:[#allocation188_spill] sm:$0xff] %v4845_v17  ;;  %v4872_v17 = vmul.f32 %v4467_v47, %v527_v21  ;;  %v4890_v21 = vmul.f32 %v4467_v47, %v532_v19  ;;  %v4908_v19 = vmul.f32 %v4467_v47, %v537_v10  ;;  %v4926_v10 = vmul.f32 %v4467_v47, %v542_v1  ;;  %v562_v1 = vld [vmem:[%s3971_s14 + $0x3d9] sm:$0x1] }
  0xf0   : > { %12157 = vst [vmem:[#allocation189_spill] sm:$0xff] %v4848_v16  ;;  %v548_v16 = vld [vmem:[%s3971_s14 + $0x369] sm:$0x1] }
  0xf1   : > { %12158 = vst [vmem:[#allocation190_spill] sm:$0xff] %v4851_v14  ;;  %v547_v14 = vld [vmem:[%s3971_s14 + $0x361] sm:$0x1] }
  0xf2   : > { %12159 = vst [vmem:[#allocation191_spill] sm:$0xff] %v4860_v29  ;;  %v4887_v29 = vmul.f32 %v4467_v47, %v531_v30  ;;  %v4905_v30 = vmul.f32 %v4467_v47, %v536_v11  ;;  %v4923_v11 = vmul.f32 %v4467_v47, %v541_v2  ;;  %v4941_v2 = vmul.f32 %v4467_v47, %v546_v22 }
  0xf3   : > { %12160 = vst [vmem:[#allocation192_spill] sm:$0xff] %v4863_v24  ;;  %v551_v24 = vld [vmem:[%s3971_s14 + $0x381] sm:$0x1] }
  0xf4   : > { %12161 = vst [vmem:[#allocation193_spill] sm:$0xff] %v4866_v23  ;;  %v550_v23 = vld [vmem:[%s3971_s14 + $0x379] sm:$0x1]  ;;  %v4962_v22 = vmul.f32 %v4467_v47, %v551_v24  ;;  %v4983_v24 = vmul.f32 %v4467_v47, %v558_v4 }
  0xf5   : > { %12162 = vst [vmem:[#allocation194_spill] sm:$0xff] %v4875_v53  ;;  %v4902_v53 = vmul.f32 %v4467_v47, %v535_v12  ;;  %v4920_v12 = vmul.f32 %v4467_v47, %v540_v3  ;;  %v4938_v3 = vmul.f32 %v4467_v47, %v545_v57  ;;  %v564_v57 = vld [vmem:[%s3971_s14 + $0x3e9] sm:$0x1] }
  0xf6   : > { %12163 = vst [vmem:[#allocation195_spill] sm:$0xff] %v4878_v48  ;;  %v554_v48 = vld [vmem:[%s3971_s14 + $0x399] sm:$0x1] }
  0xf7   : > { %12164 = vst [vmem:[#allocation196_spill] sm:$0xff] %v4881_v38  ;;  %v553_v38 = vld [vmem:[%s3971_s14 + $0x391] sm:$0x1] }
  0xf8   : > { %12165 = vst [vmem:[#allocation197_spill] sm:$0xff] %v4890_v21  ;;  %v4917_v21 = vmul.f32 %v4467_v47, %v539_v59  ;;  %v4935_v59 = vmul.f32 %v4467_v47, %v544_v58  ;;  %v4956_v58 = vmul.f32 %v4467_v47, %v550_v23 }
  0xf9   : > { %12166 = vst [vmem:[#allocation198_spill] sm:$0xff] %v4893_v39  ;;  %v557_v39 = vld [vmem:[%s3971_s14 + $0x3b1] sm:$0x1] }
  0xfa   : > { %12167 = vst [vmem:[#allocation199_spill] sm:$0xff] %v4896_v45  ;;  %v556_v45 = vld [vmem:[%s3971_s14 + $0x3a9] sm:$0x1] }
  0xfb   : > { %12168 = vst [vmem:[#allocation200_spill] sm:$0xff] %v4905_v30  ;;  %v4932_v30 = vmul.f32 %v4467_v47, %v543_v15  ;;  %v4953_v15 = vmul.f32 %v4467_v47, %v549_v37  ;;  %v4974_v37 = vmul.f32 %v4467_v47, %v555_v13  ;;  %v4977_v23 = vmul.f32 %v4467_v47, %v556_v45 }
  0xfc   : > { %12169 = vst [vmem:[#allocation201_spill] sm:$0xff] %v4908_v19  ;;  %v560_v19 = vld [vmem:[%s3971_s14 + $0x3c9] sm:$0x1]  ;;  %v4995_v13 = vmul.f32 %v4467_v47, %v562_v1  ;;  %v5023_v1 = vadd.f32 %v4531_v31, %v4017_v28  ;;  %v5043_v28 = vadd.f32 %v4554_v5, %v4040_v41  ;;  %v5063_v41 = vadd.f32 %v4573_v7, %v4059_v50  ;;  %v12183_v31 = vld [vmem:[#allocation125_spill] sm:$0xff] }
  0xfd   : > { %12170 = vst [vmem:[#allocation202_spill] sm:$0xff] %v4911_v18  ;;  %v559_v18 = vld [vmem:[%s3971_s14 + $0x3c1] sm:$0x1]  ;;  %v12191_v5 = vld [vmem:[#allocation15_spill] sm:$0xff]  ;;  %v12197_v7 = vld [vmem:[#allocation17_spill] sm:$0xff] }
  0xfe   : > { %12171 = vst [vmem:[#allocation203_spill] sm:$0xff] %v4917_v21  ;;  %v4950_v21 = vmul.f32 %v4467_v47, %v548_v16  ;;  %v4971_v16 = vmul.f32 %v4467_v47, %v554_v48 }
  0xff   : > { %12172 = vst [vmem:[#allocation204_spill] sm:$0xff] %v4920_v12  ;;  %v4947_v12 = vmul.f32 %v4467_v47, %v547_v14  ;;  %v4968_v14 = vmul.f32 %v4467_v47, %v553_v38  ;;  %v4989_v38 = vmul.f32 %v4467_v47, %v560_v19  ;;  %v5011_v19 = vadd.f32 %v4522_v32, %v4008_v25  ;;  %v12180_v32 = vld [vmem:[#allocation124_spill] sm:$0xff] }
 0x100   : > { %12173 = vst [vmem:[#allocation205_spill] sm:$0xff] %v4923_v11  ;;  %v561_v11 = vld [vmem:[%s3971_s14 + $0x3d1] sm:$0x1]  ;;  %v5031_v25 = vadd.f32 %v4541_v63, %v4027_v34  ;;  %v5051_v34 = vadd.f32 %v4560_v61, %v4046_v43  ;;  %v12186_v63 = vld [vmem:[#allocation126_spill] sm:$0xff] }
 0x101   : > { %12174 = vst [vmem:[#allocation206_spill] sm:$0xff] %v4926_v10  ;;  %v563_v10 = vld [vmem:[%s3971_s14 + $0x3e1] sm:$0x1]  ;;  %v4992_v48 = vmul.f32 %v4467_v47, %v561_v11  ;;  %v5015_v11 = vadd.f32 %v4525_v40, %v4011_v26  ;;  %v5035_v26 = vadd.f32 %v4544_v55, %v4030_v35  ;;  %v5055_v35 = vadd.f32 %v4563_v46, %v4049_v44  ;;  %v12179_v40 = vld [vmem:[#allocation11_spill] sm:$0xff]  ;;  %v12194_v61 = vld [vmem:[#allocation16_spill] sm:$0xff] }
 0x102   : > { %12175 = vst [vmem:[#allocation207_spill] sm:$0xff] %v4935_v59  ;;  %v566_v59 = vld [vmem:[%s3971_s14 + $0x3f9] sm:$0x1]  ;;  %v4998_v45 = vmul.f32 %v4467_v47, %v563_v10  ;;  %v5019_v10 = vadd.f32 %v4528_v8, %v4014_v27  ;;  %v5039_v27 = vadd.f32 %v4547_v0, %v4033_v36  ;;  %v5059_v36 = vadd.f32 %v4570_v9, %v4056_v49  ;;  %v12182_v8 = vld [vmem:[#allocation12_spill] sm:$0xff]  ;;  %v12188_v55 = vld [vmem:[#allocation14_spill] sm:$0xff] }
 0x103   : > { %12176 = vst [vmem:[#allocation208_spill] sm:$0xff] %v4938_v3  ;;  %v565_v3 = vld [vmem:[%s3971_s14 + $0x3f1] sm:$0x1]  ;;  %v5071_v43 = vadd.f32 %v12180_v32, %v12179_v40  ;;  %v5075_v44 = vadd.f32 %v12183_v31, %v12182_v8  ;;  %v12189_v0 = vld [vmem:[#allocation127_spill] sm:$0xff]  ;;  %v12195_v46 = vld [vmem:[#allocation129_spill] sm:$0xff] }
 0x104   : > { %12177 = vst [vmem:[#allocation209_spill] sm:$0xff] %v4941_v2  ;;  %v4965_v2 = vmul.f32 %v4467_v47, %v552_v20  ;;  %v4986_v20 = vmul.f32 %v4467_v47, %v559_v18  ;;  %v5004_v4 = vmul.f32 %v4467_v47, %v565_v3  ;;  %v5007_v18 = vmul.f32 %v4467_v47, %v566_v59  ;;  %v12200_v3 = vld [vmem:[#allocation18_spill] sm:$0xff]  ;;  %v12203_v32 = vld [vmem:[#allocation19_spill] sm:$0xff]  ;;  %v12204_v8 = vld [vmem:[#allocation132_spill] sm:$0xff] }
 0x105   : > { %12178 = vst [vmem:[#allocation210_spill] sm:$0xff] %v4956_v58  ;;  %v4980_v58 = vmul.f32 %v4467_v47, %v557_v39  ;;  %v5001_v39 = vmul.f32 %v4467_v47, %v564_v57  ;;  %v5027_v47 = vadd.f32 %v4538_v54, %v4024_v33  ;;  %v5047_v33 = vadd.f32 %v4557_v62, %v4043_v42  ;;  %v12185_v54 = vld [vmem:[#allocation13_spill] sm:$0xff]  ;;  %v12192_v62 = vld [vmem:[#allocation128_spill] sm:$0xff]  ;;  %v12201_v57 = vld [vmem:[#allocation131_spill] sm:$0xff] }
 0x106   : > { %v5067_v42 = vadd.f32 %v4576_v6, %v4062_v51  ;;  %12181 = vst [vmem:[#allocation11_spill] sm:$0xff] %v5071_v43  ;;  %v5079_v49 = vadd.f32 %v12186_v63, %v12185_v54  ;;  %v5083_v50 = vadd.f32 %v12189_v0, %v12188_v55  ;;  %v5087_v51 = vadd.f32 %v12192_v62, %v12191_v5  ;;  %v12198_v6 = vld [vmem:[#allocation130_spill] sm:$0xff]  ;;  %v12206_v54 = vld [vmem:[#allocation20_spill] sm:$0xff]  ;;  %v12207_v63 = vld [vmem:[#allocation133_spill] sm:$0xff] }
 0x107   : > { %12184 = vst [vmem:[#allocation124_spill] sm:$0xff] %v5075_v44  ;;  %v5091_v9 = vadd.f32 %v12195_v46, %v12194_v61  ;;  %v5095_v59 = vadd.f32 %v12198_v6, %v12197_v7  ;;  %v5099_v40 = vadd.f32 %v12201_v57, %v12200_v3  ;;  %v5103_v31 = vadd.f32 %v12204_v8, %v12203_v32  ;;  %v12209_v0 = vld [vmem:[#allocation21_spill] sm:$0xff]  ;;  %v12210_v5 = vld [vmem:[#allocation134_spill] sm:$0xff]  ;;  %v12213_v46 = vld [vmem:[#allocation135_spill] sm:$0xff] }
 0x108   : > { %12187 = vst [vmem:[#allocation12_spill] sm:$0xff] %v5079_v49  ;;  %v5107_v55 = vadd.f32 %v12207_v63, %v12206_v54  ;;  %v5111_v62 = vadd.f32 %v12210_v5, %v12209_v0  ;;  %v12212_v61 = vld [vmem:[#allocation22_spill] sm:$0xff]  ;;  %v12215_v6 = vld [vmem:[#allocation23_spill] sm:$0xff]  ;;  %v12218_v57 = vld [vmem:[#allocation24_spill] sm:$0xff] }
 0x109   : > { %12190 = vst [vmem:[#allocation125_spill] sm:$0xff] %v5083_v50  ;;  %v5115_v7 = vadd.f32 %v12213_v46, %v12212_v61  ;;  %v12221_v8 = vld [vmem:[#allocation25_spill] sm:$0xff]  ;;  %v12224_v63 = vld [vmem:[#allocation26_spill] sm:$0xff]  ;;  %v12227_v5 = vld [vmem:[#allocation27_spill] sm:$0xff] }
 0x10a   : > { %12193 = vst [vmem:[#allocation13_spill] sm:$0xff] %v5087_v51  ;;  %v12230_v46 = vld [vmem:[#allocation28_spill] sm:$0xff]  ;;  %v864_v51 = vld [vmem:[%s3971_s14 + $0x13a] sm:$0x1]  ;;  %v865_v50 = vld [vmem:[%s3971_s14 + $0x142] sm:$0x1] }
 0x10b   : > { %12196 = vst [vmem:[#allocation126_spill] sm:$0xff] %v5091_v9  ;;  %v863_v9 = vld [vmem:[%s3971_s14 + $0x132] sm:$0x1]  ;;  %v866_v49 = vld [vmem:[%s3971_s14 + $0x14a] sm:$0x1] }
 0x10c   : > { %12199 = vst [vmem:[#allocation14_spill] sm:$0xff] %v5095_v59  ;;  %v12216_v59 = vld [vmem:[#allocation136_spill] sm:$0xff] }
 0x10d   : > { %12202 = vst [vmem:[#allocation127_spill] sm:$0xff] %v5099_v40  ;;  %v5119_v3 = vadd.f32 %v12216_v59, %v12215_v6  ;;  %v12219_v40 = vld [vmem:[#allocation137_spill] sm:$0xff]  ;;  %v867_v44 = vld [vmem:[%s3971_s14 + $0x152] sm:$0x1] }
 0x10e   : > { %12205 = vst [vmem:[#allocation15_spill] sm:$0xff] %v5103_v31  ;;  %v5123_v32 = vadd.f32 %v12219_v40, %v12218_v57  ;;  %v12222_v31 = vld [vmem:[#allocation138_spill] sm:$0xff]  ;;  %v12233_v6 = vld [vmem:[#allocation29_spill] sm:$0xff] }
 0x10f   : > { %12208 = vst [vmem:[#allocation128_spill] sm:$0xff] %v5107_v55  ;;  %v5127_v54 = vadd.f32 %v12222_v31, %v12221_v8  ;;  %v12225_v55 = vld [vmem:[#allocation139_spill] sm:$0xff]  ;;  %v12236_v57 = vld [vmem:[#allocation30_spill] sm:$0xff] }
 0x110   : > { %12211 = vst [vmem:[#allocation16_spill] sm:$0xff] %v5111_v62  ;;  %v5131_v0 = vadd.f32 %v12225_v55, %v12224_v63  ;;  %v12228_v62 = vld [vmem:[#allocation140_spill] sm:$0xff]  ;;  %v12239_v8 = vld [vmem:[#allocation31_spill] sm:$0xff] }
 0x111   : > { %12214 = vst [vmem:[#allocation129_spill] sm:$0xff] %v5115_v7  ;;  %v5135_v61 = vadd.f32 %v12228_v62, %v12227_v5  ;;  %v12231_v7 = vld [vmem:[#allocation141_spill] sm:$0xff]  ;;  %v12242_v63 = vld [vmem:[#allocation32_spill] sm:$0xff] }
 0x112   : > { %12217 = vst [vmem:[#allocation17_spill] sm:$0xff] %v5119_v3  ;;  %v5139_v59 = vadd.f32 %v12231_v7, %v12230_v46  ;;  %v12234_v3 = vld [vmem:[#allocation142_spill] sm:$0xff]  ;;  %v12245_v5 = vld [vmem:[#allocation33_spill] sm:$0xff] }
 0x113   : > { %12220 = vst [vmem:[#allocation130_spill] sm:$0xff] %v5123_v32  ;;  %v5143_v40 = vadd.f32 %v12234_v3, %v12233_v6  ;;  %v12237_v32 = vld [vmem:[#allocation143_spill] sm:$0xff]  ;;  %v12248_v46 = vld [vmem:[#allocation34_spill] sm:$0xff] }
 0x114   : > { %12223 = vst [vmem:[#allocation18_spill] sm:$0xff] %v5127_v54  ;;  %v5147_v31 = vadd.f32 %v12237_v32, %v12236_v57  ;;  %v12240_v54 = vld [vmem:[#allocation144_spill] sm:$0xff]  ;;  %v12251_v6 = vld [vmem:[#allocation35_spill] sm:$0xff] }
 0x115   : > { %12226 = vst [vmem:[#allocation131_spill] sm:$0xff] %v5131_v0  ;;  %v5151_v55 = vadd.f32 %v12240_v54, %v12239_v8  ;;  %v12243_v0 = vld [vmem:[#allocation145_spill] sm:$0xff]  ;;  %v12254_v57 = vld [vmem:[#allocation36_spill] sm:$0xff] }
 0x116   : > { %12229 = vst [vmem:[#allocation19_spill] sm:$0xff] %v5135_v61  ;;  %v5155_v62 = vadd.f32 %v12243_v0, %v12242_v63  ;;  %v12246_v61 = vld [vmem:[#allocation146_spill] sm:$0xff]  ;;  %v12257_v8 = vld [vmem:[#allocation37_spill] sm:$0xff] }
 0x117   : > { %12232 = vst [vmem:[#allocation132_spill] sm:$0xff] %v5139_v59  ;;  %v5159_v7 = vadd.f32 %v12246_v61, %v12245_v5  ;;  %v12249_v59 = vld [vmem:[#allocation147_spill] sm:$0xff]  ;;  %v12260_v63 = vld [vmem:[#allocation38_spill] sm:$0xff] }
 0x118   : > { %12235 = vst [vmem:[#allocation20_spill] sm:$0xff] %v5143_v40  ;;  %v5163_v3 = vadd.f32 %v12249_v59, %v12248_v46  ;;  %v12252_v40 = vld [vmem:[#allocation148_spill] sm:$0xff]  ;;  %v12263_v5 = vld [vmem:[#allocation39_spill] sm:$0xff] }
 0x119   : > { %12238 = vst [vmem:[#allocation133_spill] sm:$0xff] %v5147_v31  ;;  %v5167_v32 = vadd.f32 %v12252_v40, %v12251_v6  ;;  %v12255_v31 = vld [vmem:[#allocation149_spill] sm:$0xff]  ;;  %v12266_v46 = vld [vmem:[#allocation40_spill] sm:$0xff] }
 0x11a   : > { %12241 = vst [vmem:[#allocation21_spill] sm:$0xff] %v5151_v55  ;;  %v5171_v54 = vadd.f32 %v12255_v31, %v12254_v57  ;;  %v12258_v55 = vld [vmem:[#allocation150_spill] sm:$0xff]  ;;  %v12269_v6 = vld [vmem:[#allocation41_spill] sm:$0xff] }
 0x11b   : > { %12244 = vst [vmem:[#allocation134_spill] sm:$0xff] %v5155_v62  ;;  %v5175_v0 = vadd.f32 %v12258_v55, %v12257_v8  ;;  %v12261_v62 = vld [vmem:[#allocation151_spill] sm:$0xff]  ;;  %v12272_v57 = vld [vmem:[#allocation42_spill] sm:$0xff] }
 0x11c   : > { %12247 = vst [vmem:[#allocation22_spill] sm:$0xff] %v5159_v7  ;;  %v5179_v61 = vadd.f32 %v12261_v62, %v12260_v63  ;;  %v12264_v7 = vld [vmem:[#allocation152_spill] sm:$0xff]  ;;  %v12275_v8 = vld [vmem:[#allocation43_spill] sm:$0xff] }
 0x11d   : > { %12250 = vst [vmem:[#allocation135_spill] sm:$0xff] %v5163_v3  ;;  %v5183_v59 = vadd.f32 %v12264_v7, %v12263_v5  ;;  %v12267_v3 = vld [vmem:[#allocation153_spill] sm:$0xff]  ;;  %v12278_v63 = vld [vmem:[#allocation44_spill] sm:$0xff] }
 0x11e   : > { %12253 = vst [vmem:[#allocation23_spill] sm:$0xff] %v5167_v32  ;;  %v5187_v40 = vadd.f32 %v12267_v3, %v12266_v46  ;;  %v12270_v32 = vld [vmem:[#allocation154_spill] sm:$0xff]  ;;  %v12281_v5 = vld [vmem:[#allocation45_spill] sm:$0xff] }
 0x11f   : > { %12256 = vst [vmem:[#allocation136_spill] sm:$0xff] %v5171_v54  ;;  %v5191_v31 = vadd.f32 %v12270_v32, %v12269_v6  ;;  %v12273_v54 = vld [vmem:[#allocation155_spill] sm:$0xff]  ;;  %v12284_v46 = vld [vmem:[#allocation46_spill] sm:$0xff] }
 0x120   : > { %12259 = vst [vmem:[#allocation24_spill] sm:$0xff] %v5175_v0  ;;  %v5195_v55 = vadd.f32 %v12273_v54, %v12272_v57  ;;  %v12276_v0 = vld [vmem:[#allocation156_spill] sm:$0xff]  ;;  %v12287_v6 = vld [vmem:[#allocation47_spill] sm:$0xff] }
 0x121   : > { %12262 = vst [vmem:[#allocation137_spill] sm:$0xff] %v5179_v61  ;;  %v5199_v62 = vadd.f32 %v12276_v0, %v12275_v8  ;;  %v12279_v61 = vld [vmem:[#allocation157_spill] sm:$0xff]  ;;  %v12290_v57 = vld [vmem:[#allocation48_spill] sm:$0xff] }
 0x122   : > { %12265 = vst [vmem:[#allocation25_spill] sm:$0xff] %v5183_v59  ;;  %v5203_v7 = vadd.f32 %v12279_v61, %v12278_v63  ;;  %v12282_v59 = vld [vmem:[#allocation158_spill] sm:$0xff]  ;;  %v12293_v8 = vld [vmem:[#allocation49_spill] sm:$0xff] }
 0x123   : > { %12268 = vst [vmem:[#allocation138_spill] sm:$0xff] %v5187_v40  ;;  %v5207_v3 = vadd.f32 %v12282_v59, %v12281_v5  ;;  %v12285_v40 = vld [vmem:[#allocation159_spill] sm:$0xff]  ;;  %v12296_v63 = vld [vmem:[#allocation50_spill] sm:$0xff] }
 0x124   : > { %12271 = vst [vmem:[#allocation26_spill] sm:$0xff] %v5191_v31  ;;  %v5211_v32 = vadd.f32 %v12285_v40, %v12284_v46  ;;  %v12288_v31 = vld [vmem:[#allocation160_spill] sm:$0xff]  ;;  %v12299_v5 = vld [vmem:[#allocation51_spill] sm:$0xff] }
 0x125   : > { %12274 = vst [vmem:[#allocation139_spill] sm:$0xff] %v5195_v55  ;;  %v5215_v54 = vadd.f32 %v12288_v31, %v12287_v6  ;;  %v12291_v55 = vld [vmem:[#allocation161_spill] sm:$0xff]  ;;  %v12302_v46 = vld [vmem:[#allocation52_spill] sm:$0xff] }
 0x126   : > { %12277 = vst [vmem:[#allocation27_spill] sm:$0xff] %v5199_v62  ;;  %v5219_v0 = vadd.f32 %v12291_v55, %v12290_v57  ;;  %v12294_v62 = vld [vmem:[#allocation162_spill] sm:$0xff]  ;;  %v12305_v6 = vld [vmem:[#allocation53_spill] sm:$0xff] }
 0x127   : > { %12280 = vst [vmem:[#allocation140_spill] sm:$0xff] %v5203_v7  ;;  %v5223_v61 = vadd.f32 %v12294_v62, %v12293_v8  ;;  %v12297_v7 = vld [vmem:[#allocation163_spill] sm:$0xff]  ;;  %v12308_v57 = vld [vmem:[#allocation54_spill] sm:$0xff] }
 0x128   : > { %12283 = vst [vmem:[#allocation28_spill] sm:$0xff] %v5207_v3  ;;  %v5227_v59 = vadd.f32 %v12297_v7, %v12296_v63  ;;  %v12300_v3 = vld [vmem:[#allocation164_spill] sm:$0xff]  ;;  %v12311_v8 = vld [vmem:[#allocation55_spill] sm:$0xff] }
 0x129   : > { %12286 = vst [vmem:[#allocation141_spill] sm:$0xff] %v5211_v32  ;;  %v5231_v40 = vadd.f32 %v12300_v3, %v12299_v5  ;;  %v12303_v32 = vld [vmem:[#allocation165_spill] sm:$0xff]  ;;  %v12314_v63 = vld [vmem:[#allocation56_spill] sm:$0xff] }
 0x12a   : > { %12289 = vst [vmem:[#allocation29_spill] sm:$0xff] %v5215_v54  ;;  %v5235_v31 = vadd.f32 %v12303_v32, %v12302_v46  ;;  %v12306_v54 = vld [vmem:[#allocation166_spill] sm:$0xff]  ;;  %v12317_v5 = vld [vmem:[#allocation57_spill] sm:$0xff] }
 0x12b   : > { %12292 = vst [vmem:[#allocation142_spill] sm:$0xff] %v5219_v0  ;;  %v5239_v55 = vadd.f32 %v12306_v54, %v12305_v6  ;;  %v12309_v0 = vld [vmem:[#allocation167_spill] sm:$0xff]  ;;  %v12320_v46 = vld [vmem:[#allocation58_spill] sm:$0xff] }
 0x12c   : > { %12295 = vst [vmem:[#allocation30_spill] sm:$0xff] %v5223_v61  ;;  %v5243_v62 = vadd.f32 %v12309_v0, %v12308_v57  ;;  %v12312_v61 = vld [vmem:[#allocation168_spill] sm:$0xff]  ;;  %v12323_v6 = vld [vmem:[#allocation59_spill] sm:$0xff] }
 0x12d   : > { %12298 = vst [vmem:[#allocation143_spill] sm:$0xff] %v5227_v59  ;;  %v5247_v7 = vadd.f32 %v12312_v61, %v12311_v8  ;;  %v12315_v59 = vld [vmem:[#allocation169_spill] sm:$0xff]  ;;  %v12326_v57 = vld [vmem:[#allocation60_spill] sm:$0xff] }
 0x12e   : > { %12301 = vst [vmem:[#allocation31_spill] sm:$0xff] %v5231_v40  ;;  %v5251_v3 = vadd.f32 %v12315_v59, %v12314_v63  ;;  %v12318_v40 = vld [vmem:[#allocation170_spill] sm:$0xff]  ;;  %v12329_v8 = vld [vmem:[#allocation61_spill] sm:$0xff] }
 0x12f   : > { %12304 = vst [vmem:[#allocation144_spill] sm:$0xff] %v5235_v31  ;;  %v5255_v32 = vadd.f32 %v12318_v40, %v12317_v5  ;;  %v12321_v31 = vld [vmem:[#allocation171_spill] sm:$0xff]  ;;  %v12332_v63 = vld [vmem:[#allocation62_spill] sm:$0xff] }
 0x130   : > { %12307 = vst [vmem:[#allocation32_spill] sm:$0xff] %v5239_v55  ;;  %v5259_v54 = vadd.f32 %v12321_v31, %v12320_v46  ;;  %v12324_v55 = vld [vmem:[#allocation172_spill] sm:$0xff]  ;;  %v12335_v5 = vld [vmem:[#allocation63_spill] sm:$0xff] }
 0x131   : > { %12310 = vst [vmem:[#allocation145_spill] sm:$0xff] %v5243_v62  ;;  %v5263_v0 = vadd.f32 %v12324_v55, %v12323_v6  ;;  %v12327_v62 = vld [vmem:[#allocation173_spill] sm:$0xff]  ;;  %v12338_v46 = vld [vmem:[#allocation64_spill] sm:$0xff] }
 0x132   : > { %12313 = vst [vmem:[#allocation33_spill] sm:$0xff] %v5247_v7  ;;  %v5267_v61 = vadd.f32 %v12327_v62, %v12326_v57  ;;  %v12330_v7 = vld [vmem:[#allocation174_spill] sm:$0xff]  ;;  %v12341_v6 = vld [vmem:[#allocation65_spill] sm:$0xff] }
 0x133   : > { %12316 = vst [vmem:[#allocation146_spill] sm:$0xff] %v5251_v3  ;;  %v5271_v59 = vadd.f32 %v12330_v7, %v12329_v8  ;;  %v12333_v3 = vld [vmem:[#allocation175_spill] sm:$0xff]  ;;  %v12344_v57 = vld [vmem:[#allocation66_spill] sm:$0xff] }
 0x134   : > { %12319 = vst [vmem:[#allocation34_spill] sm:$0xff] %v5255_v32  ;;  %v5275_v40 = vadd.f32 %v12333_v3, %v12332_v63  ;;  %v12336_v32 = vld [vmem:[#allocation176_spill] sm:$0xff]  ;;  %v12347_v8 = vld [vmem:[#allocation67_spill] sm:$0xff] }
 0x135   : > { %12322 = vst [vmem:[#allocation147_spill] sm:$0xff] %v5259_v54  ;;  %v5279_v31 = vadd.f32 %v12336_v32, %v12335_v5  ;;  %v12339_v54 = vld [vmem:[#allocation177_spill] sm:$0xff]  ;;  %v12350_v63 = vld [vmem:[#allocation68_spill] sm:$0xff] }
 0x136   : > { %12325 = vst [vmem:[#allocation35_spill] sm:$0xff] %v5263_v0  ;;  %v5283_v55 = vadd.f32 %v12339_v54, %v12338_v46  ;;  %v12342_v0 = vld [vmem:[#allocation178_spill] sm:$0xff]  ;;  %v12353_v5 = vld [vmem:[#allocation69_spill] sm:$0xff] }
 0x137   : > { %12328 = vst [vmem:[#allocation148_spill] sm:$0xff] %v5267_v61  ;;  %v5287_v62 = vadd.f32 %v12342_v0, %v12341_v6  ;;  %v12345_v61 = vld [vmem:[#allocation179_spill] sm:$0xff]  ;;  %v12356_v46 = vld [vmem:[#allocation70_spill] sm:$0xff] }
 0x138   : > { %12331 = vst [vmem:[#allocation36_spill] sm:$0xff] %v5271_v59  ;;  %v5291_v7 = vadd.f32 %v12345_v61, %v12344_v57  ;;  %v12348_v59 = vld [vmem:[#allocation180_spill] sm:$0xff]  ;;  %v12359_v6 = vld [vmem:[#allocation71_spill] sm:$0xff] }
 0x139   : > { %12334 = vst [vmem:[#allocation149_spill] sm:$0xff] %v5275_v40  ;;  %v5295_v3 = vadd.f32 %v12348_v59, %v12347_v8  ;;  %v12351_v40 = vld [vmem:[#allocation181_spill] sm:$0xff]  ;;  %v12362_v57 = vld [vmem:[#allocation72_spill] sm:$0xff] }
 0x13a   : > { %12337 = vst [vmem:[#allocation37_spill] sm:$0xff] %v5279_v31  ;;  %v5299_v32 = vadd.f32 %v12351_v40, %v12350_v63  ;;  %v12354_v31 = vld [vmem:[#allocation182_spill] sm:$0xff]  ;;  %v5315_v59 = vadd.f32 %v4826_v52, %v12362_v57  ;;  %v12364_v8 = vld [vmem:[#allocation73_spill] sm:$0xff] }
 0x13b   : > { %12340 = vst [vmem:[#allocation150_spill] sm:$0xff] %v5283_v55  ;;  %v5303_v54 = vadd.f32 %v12354_v31, %v12353_v5  ;;  %v12357_v55 = vld [vmem:[#allocation183_spill] sm:$0xff]  ;;  %v12367_v63 = vld [vmem:[#allocation74_spill] sm:$0xff] }
 0x13c   : > { %12343 = vst [vmem:[#allocation38_spill] sm:$0xff] %v5287_v62  ;;  %v5307_v0 = vadd.f32 %v12357_v55, %v12356_v46  ;;  %v12360_v62 = vld [vmem:[#allocation184_spill] sm:$0xff]  ;;  %v12370_v5 = vld [vmem:[#allocation75_spill] sm:$0xff]  ;;  %v12378_v57 = vld [vmem:[#allocation78_spill] sm:$0xff] }
 0x13d   : > { %12346 = vst [vmem:[#allocation151_spill] sm:$0xff] %v5291_v7  ;;  %v5311_v61 = vadd.f32 %v12360_v62, %v12359_v6  ;;  %v12373_v46 = vld [vmem:[#allocation76_spill] sm:$0xff]  ;;  %v12375_v6 = vld [vmem:[#allocation77_spill] sm:$0xff]  ;;  %v862_v7 = vld [vmem:[%s3971_s14 + $0x12a] sm:$0x1] }
 0x13e   : > { %12349 = vst [vmem:[#allocation39_spill] sm:$0xff] %v5295_v3  ;;  %v12365_v3 = vld [vmem:[#allocation185_spill] sm:$0xff]  ;;  %v5331_v62 = vadd.f32 %v4842_v60, %v12373_v46  ;;  %v12389_v46 = vld [vmem:[#allocation82_spill] sm:$0xff] }
 0x13f   : > { %12352 = vst [vmem:[#allocation152_spill] sm:$0xff] %v5299_v32  ;;  %v5319_v40 = vadd.f32 %v12365_v3, %v12364_v8  ;;  %v12368_v32 = vld [vmem:[#allocation186_spill] sm:$0xff]  ;;  %v12381_v8 = vld [vmem:[#allocation79_spill] sm:$0xff] }
 0x140   : > { %12355 = vst [vmem:[#allocation40_spill] sm:$0xff] %v5303_v54  ;;  %v5323_v31 = vadd.f32 %v12368_v32, %v12367_v63  ;;  %v12371_v54 = vld [vmem:[#allocation187_spill] sm:$0xff]  ;;  %v12384_v63 = vld [vmem:[#allocation80_spill] sm:$0xff] }
 0x141   : > { %12358 = vst [vmem:[#allocation153_spill] sm:$0xff] %v5307_v0  ;;  %v5327_v55 = vadd.f32 %v12371_v54, %v12370_v5  ;;  %v5347_v54 = vadd.f32 %v4857_v56, %v12384_v63  ;;  %v12386_v5 = vld [vmem:[#allocation81_spill] sm:$0xff]  ;;  %v12400_v63 = vld [vmem:[#allocation86_spill] sm:$0xff] }
 0x142   : > { %12361 = vst [vmem:[#allocation41_spill] sm:$0xff] %v5311_v61  ;;  %v12376_v61 = vld [vmem:[#allocation188_spill] sm:$0xff]  ;;  %v861_v0 = vld [vmem:[%s3971_s14 + $0x122] sm:$0x1] }
 0x143   : > { %12363 = vst [vmem:[#allocation154_spill] sm:$0xff] %v5315_v59  ;;  %v5335_v52 = vadd.f32 %v12376_v61, %v12375_v6  ;;  %v12379_v59 = vld [vmem:[#allocation189_spill] sm:$0xff]  ;;  %v12392_v6 = vld [vmem:[#allocation83_spill] sm:$0xff] }
 0x144   : > { %12366 = vst [vmem:[#allocation42_spill] sm:$0xff] %v5319_v40  ;;  %v5339_v3 = vadd.f32 %v12379_v59, %v12378_v57  ;;  %v12382_v40 = vld [vmem:[#allocation190_spill] sm:$0xff]  ;;  %v12395_v57 = vld [vmem:[#allocation84_spill] sm:$0xff] }
 0x145   : > { %12369 = vst [vmem:[#allocation155_spill] sm:$0xff] %v5323_v31  ;;  %v5343_v32 = vadd.f32 %v12382_v40, %v12381_v8  ;;  %v5363_v40 = vadd.f32 %v4872_v17, %v12395_v57  ;;  %v12397_v8 = vld [vmem:[#allocation85_spill] sm:$0xff]  ;;  %v12411_v57 = vld [vmem:[#allocation90_spill] sm:$0xff] }
 0x146   : > { %12372 = vst [vmem:[#allocation43_spill] sm:$0xff] %v5327_v55  ;;  %v12387_v55 = vld [vmem:[#allocation191_spill] sm:$0xff]  ;;  %v860_v31 = vld [vmem:[%s3971_s14 + $0x11a] sm:$0x1] }
 0x147   : > { %12374 = vst [vmem:[#allocation156_spill] sm:$0xff] %v5331_v62  ;;  %v5351_v60 = vadd.f32 %v12387_v55, %v12386_v5  ;;  %v12390_v62 = vld [vmem:[#allocation192_spill] sm:$0xff]  ;;  %v12403_v5 = vld [vmem:[#allocation87_spill] sm:$0xff] }
 0x148   : > { %12377 = vst [vmem:[#allocation44_spill] sm:$0xff] %v5335_v52  ;;  %v5355_v61 = vadd.f32 %v12390_v62, %v12389_v46  ;;  %v12393_v52 = vld [vmem:[#allocation193_spill] sm:$0xff]  ;;  %v12406_v46 = vld [vmem:[#allocation88_spill] sm:$0xff] }
 0x149   : > { %12380 = vst [vmem:[#allocation157_spill] sm:$0xff] %v5339_v3  ;;  %v5359_v59 = vadd.f32 %v12393_v52, %v12392_v6  ;;  %v5379_v52 = vadd.f32 %v4887_v29, %v12406_v46  ;;  %v12408_v6 = vld [vmem:[#allocation89_spill] sm:$0xff]  ;;  %v12422_v46 = vld [vmem:[#allocation94_spill] sm:$0xff]  ;;  %v859_v3 = vld [vmem:[%s3971_s14 + $0x112] sm:$0x1] }
 0x14a   : > { %12383 = vst [vmem:[#allocation45_spill] sm:$0xff] %v5343_v32  ;;  %v12398_v32 = vld [vmem:[#allocation194_spill] sm:$0xff] }
 0x14b   : > { %12385 = vst [vmem:[#allocation158_spill] sm:$0xff] %v5347_v54  ;;  %v5367_v56 = vadd.f32 %v12398_v32, %v12397_v8  ;;  %v12401_v54 = vld [vmem:[#allocation195_spill] sm:$0xff] }
 0x14c   : > { %12388 = vst [vmem:[#allocation46_spill] sm:$0xff] %v5351_v60  ;;  %v5371_v55 = vadd.f32 %v12401_v54, %v12400_v63  ;;  %v12404_v60 = vld [vmem:[#allocation196_spill] sm:$0xff]  ;;  %v12414_v8 = vld [vmem:[#allocation91_spill] sm:$0xff] }
 0x14d   : > { %12391 = vst [vmem:[#allocation159_spill] sm:$0xff] %v5355_v61  ;;  %v5375_v62 = vadd.f32 %v12404_v60, %v12403_v5  ;;  %v12417_v63 = vld [vmem:[#allocation92_spill] sm:$0xff]  ;;  %v12419_v5 = vld [vmem:[#allocation93_spill] sm:$0xff]  ;;  %v858_v61 = vld [vmem:[%s3971_s14 + $0x10a] sm:$0x1] }
 0x14e   : > { %12394 = vst [vmem:[#allocation47_spill] sm:$0xff] %v5359_v59  ;;  %v12409_v59 = vld [vmem:[#allocation197_spill] sm:$0xff]  ;;  %v5395_v60 = vadd.f32 %v4902_v53, %v12417_v63 }
 0x14f   : > { %12396 = vst [vmem:[#allocation160_spill] sm:$0xff] %v5363_v40  ;;  %v5383_v17 = vadd.f32 %v12409_v59, %v12408_v6  ;;  %v12412_v40 = vld [vmem:[#allocation198_spill] sm:$0xff]  ;;  %v12423_v59 = vld [vmem:[#allocation201_spill] sm:$0xff] }
 0x150   : > { %12399 = vst [vmem:[#allocation48_spill] sm:$0xff] %v5367_v56  ;;  %v5387_v32 = vadd.f32 %v12412_v40, %v12411_v57  ;;  %v12415_v56 = vld [vmem:[#allocation199_spill] sm:$0xff]  ;;  %v5403_v6 = vadd.f32 %v12423_v59, %v12422_v46  ;;  %v12426_v57 = vld [vmem:[#allocation202_spill] sm:$0xff]  ;;  %v12431_v63 = vld [vmem:[#allocation97_spill] sm:$0xff] }
 0x151   : > { %12402 = vst [vmem:[#allocation161_spill] sm:$0xff] %v5371_v55  ;;  %v5391_v54 = vadd.f32 %v12415_v56, %v12414_v8  ;;  %v12425_v40 = vld [vmem:[#allocation95_spill] sm:$0xff]  ;;  %v12428_v56 = vld [vmem:[#allocation96_spill] sm:$0xff]  ;;  %v12438_v59 = vld [vmem:[#allocation206_spill] sm:$0xff] }
 0x152   : > { %12405 = vst [vmem:[#allocation49_spill] sm:$0xff] %v5375_v62  ;;  %v12420_v62 = vld [vmem:[#allocation200_spill] sm:$0xff]  ;;  %v12429_v8 = vld [vmem:[#allocation203_spill] sm:$0xff]  ;;  %v857_v55 = vld [vmem:[%s3971_s14 + $0x102] sm:$0x1] }
 0x153   : > { %12407 = vst [vmem:[#allocation162_spill] sm:$0xff] %v5379_v52  ;;  %v5399_v29 = vadd.f32 %v12420_v62, %v12419_v5  ;;  %v5411_v53 = vadd.f32 %v12429_v8, %v12428_v56  ;;  %v12434_v62 = vld [vmem:[#allocation98_spill] sm:$0xff]  ;;  %v12435_v5 = vld [vmem:[#allocation205_spill] sm:$0xff]  ;;  %v12437_v46 = vld [vmem:[#allocation99_spill] sm:$0xff] }
 0x154   : > { %12410 = vst [vmem:[#allocation50_spill] sm:$0xff] %v5383_v17  ;;  %v12440_v17 = vld [vmem:[#allocation100_spill] sm:$0xff]  ;;  %v12445_v8 = vld [vmem:[#allocation102_spill] sm:$0xff]  ;;  %v856_v52 = vld [vmem:[%s3971_s14 + $0xfa] sm:$0x1] }
 0x155   : > { %12413 = vst [vmem:[#allocation163_spill] sm:$0xff] %v5387_v32  ;;  %v5407_v32 = vadd.f32 %v12426_v57, %v12425_v40  ;;  %v5427_v40 = vadd.f32 %v4932_v30, %v12440_v17  ;;  %v12442_v57 = vld [vmem:[#allocation101_spill] sm:$0xff] }
 0x156   : > { %12416 = vst [vmem:[#allocation51_spill] sm:$0xff] %v5391_v54  ;;  %v12453_v30 = vld [vmem:[#allocation105_spill] sm:$0xff] }
 0x157   : > { %12418 = vst [vmem:[#allocation164_spill] sm:$0xff] %v5395_v60  ;;  %v12432_v60 = vld [vmem:[#allocation204_spill] sm:$0xff]  ;;  %v5447_v17 = vadd.f32 %v4950_v21, %v12453_v30  ;;  %v12462_v30 = vld [vmem:[#allocation109_spill] sm:$0xff] }
 0x158   : > { %12421 = vst [vmem:[#allocation52_spill] sm:$0xff] %v5399_v29  ;;  %v5415_v54 = vadd.f32 %v12432_v60, %v12431_v63  ;;  %v5419_v29 = vadd.f32 %v12435_v5, %v12434_v62  ;;  %v12446_v60 = vld [vmem:[#allocation208_spill] sm:$0xff]  ;;  %v12448_v62 = vld [vmem:[#allocation103_spill] sm:$0xff]  ;;  %v12449_v5 = vld [vmem:[#allocation209_spill] sm:$0xff] }
 0x159   : > { %12424 = vst [vmem:[#allocation165_spill] sm:$0xff] %v5403_v6  ;;  %v5423_v6 = vadd.f32 %v12438_v59, %v12437_v46  ;;  %v5435_v63 = vadd.f32 %v12446_v60, %v12445_v8  ;;  %v12451_v46 = vld [vmem:[#allocation104_spill] sm:$0xff]  ;;  %v12458_v8 = vld [vmem:[#allocation210_spill] sm:$0xff] }
 0x15a   : > { %12427 = vst [vmem:[#allocation53_spill] sm:$0xff] %v5407_v32  ;;  %v12443_v32 = vld [vmem:[#allocation207_spill] sm:$0xff]  ;;  %v5443_v59 = vadd.f32 %v4947_v12, %v12451_v46  ;;  %v828_v12 = vld [vmem:[%s3971_s14 + $0x1a] sm:$0x1]  ;;  %v12460_v46 = vld [vmem:[#allocation108_spill] sm:$0xff] }
 0x15b   : > { %12430 = vst [vmem:[#allocation166_spill] sm:$0xff] %v5411_v53  ;;  %v5431_v56 = vadd.f32 %v12443_v32, %v12442_v57  ;;  %v12455_v32 = vld [vmem:[#allocation106_spill] sm:$0xff]  ;;  %v5463_v21 = vadd.f32 %v4962_v22, %v12460_v46  ;;  %v12468_v46 = vld [vmem:[#allocation112_spill] sm:$0xff] }
 0x15c   : > { %12433 = vst [vmem:[#allocation54_spill] sm:$0xff] %v5415_v54  ;;  %v5451_v57 = vadd.f32 %v4953_v15, %v12455_v32  ;;  %v5467_v15 = vadd.f32 %v4965_v2, %v12462_v30  ;;  %v12464_v32 = vld [vmem:[#allocation110_spill] sm:$0xff]  ;;  %v5484_v2 = vadd.f32 %v4974_v37, %v12468_v46  ;;  %v12470_v30 = vld [vmem:[#allocation113_spill] sm:$0xff]  ;;  %v835_v37 = vld [vmem:[%s3971_s14 + $0x52] sm:$0x1] }
 0x15d   : > { %12436 = vst [vmem:[#allocation167_spill] sm:$0xff] %v5419_v29  ;;  %v5439_v29 = vadd.f32 %v12449_v5, %v12448_v62  ;;  %v826_v62 = vld [vmem:[%s3971_s14 + $0xa] sm:$0x1]  ;;  %v827_v5 = vld [vmem:[%s3971_s14 + $0x12] sm:$0x1] }
 0x15e   : > { %12439 = vst [vmem:[#allocation55_spill] sm:$0xff] %v5423_v6  ;;  %v5480_v22 = vld [vmem:[#allocation5 + $0x2] ss:$0 sm:$0xff]  ;;  %v836_v46 = vld [vmem:[%s3971_s14 + $0x5a] sm:$0x1] }
 0x15f   : > { %12441 = vst [vmem:[#allocation168_spill] sm:$0xff] %v5427_v40  ;;  %v852_v40 = vld [vmem:[%s3971_s14 + $0xda] sm:$0x1]  ;;  %v853_v6 = vld [vmem:[%s3971_s14 + $0xe2] sm:$0x1] }
 0x160   : > { %12444 = vst [vmem:[#allocation56_spill] sm:$0xff] %v5431_v56  ;;  %v12457_v56 = vld [vmem:[#allocation107_spill] sm:$0xff]  ;;  %v855_v53 = vld [vmem:[%s3971_s14 + $0xf2] sm:$0x1] }
 0x161   : > { %12447 = vst [vmem:[#allocation169_spill] sm:$0xff] %v5435_v63  ;;  %v5455_v60 = vadd.f32 %v12458_v8, %v12457_v56  ;;  %v825_v63 = vld [vmem:[%s3971_s14 + $0x2] sm:$0x1]  ;;  %v5471_v56 = vadd.f32 %v4968_v14, %v12464_v32  ;;  %v12466_v8 = vld [vmem:[#allocation111_spill] sm:$0xff]  ;;  %v5488_v14 = vadd.f32 %v4977_v23, %v12470_v30 }
 0x162   : > { %12450 = vst [vmem:[#allocation57_spill] sm:$0xff] %v5439_v29  ;;  %v12472_v32 = vld [vmem:[#allocation114_spill] sm:$0xff]  ;;  %v851_v29 = vld [vmem:[%s3971_s14 + $0xd2] sm:$0x1]  ;;  %v854_v54 = vld [vmem:[%s3971_s14 + $0xea] sm:$0x1] }
 0x163   : > { %12452 = vst [vmem:[#allocation170_spill] sm:$0xff] %v5443_v59  ;;  %v831_v59 = vld [vmem:[%s3971_s14 + $0x32] sm:$0x1] }
 0x164   : > { %12454 = vst [vmem:[#allocation58_spill] sm:$0xff] %v5447_v17  ;;  %v830_v17 = vld [vmem:[%s3971_s14 + $0x2a] sm:$0x1] }
 0x165   : > { %12456 = vst [vmem:[#allocation171_spill] sm:$0xff] %v5451_v57  ;;  %v829_v57 = vld [vmem:[%s3971_s14 + $0x22] sm:$0x1] }
 0x166   : > { %12459 = vst [vmem:[#allocation59_spill] sm:$0xff] %v5455_v60  ;;  %v5475_v60 = vadd.f32 %v4971_v16, %v12466_v8  ;;  %v5492_v16 = vadd.f32 %v4980_v58, %v12472_v32  ;;  %v12474_v8 = vld [vmem:[#allocation115_spill] sm:$0xff]  ;;  %v12478_v58 = vld [vmem:[#allocation117_spill] sm:$0xff] }
 0x167   : > { %12461 = vst [vmem:[#allocation172_spill] sm:$0xff] %v5463_v21  ;;  %v834_v21 = vld [vmem:[%s3971_s14 + $0x4a] sm:$0x1]  ;;  %v5509_v30 = vadd.f32 %v4989_v38, %v12478_v58  ;;  %v12486_v38 = vld [vmem:[#allocation121_spill] sm:$0xff] }
 0x168   : > { %12463 = vst [vmem:[#allocation60_spill] sm:$0xff] %v5467_v15  ;;  %v833_v15 = vld [vmem:[%s3971_s14 + $0x42] sm:$0x1]  ;;  %v5528_v58 = vadd.f32 %v5001_v39, %v12486_v38  ;;  %v846_v39 = vld [vmem:[%s3971_s14 + $0xaa] sm:$0x1] }
 0x169   : > { %12465 = vst [vmem:[#allocation173_spill] sm:$0xff] %v5471_v56  ;;  %v832_v56 = vld [vmem:[%s3971_s14 + $0x3a] sm:$0x1]  ;;  %v847_v38 = vld [vmem:[%s3971_s14 + $0xb2] sm:$0x1] }
 0x16a   : > { %12467 = vst [vmem:[#allocation61_spill] sm:$0xff] %v5475_v60  ;;  %v5496_v60 = vadd.f32 %v4983_v24, %v12474_v8  ;;  %v12480_v24 = vld [vmem:[#allocation118_spill] sm:$0xff]  ;;  %v12482_v8 = vld [vmem:[#allocation119_spill] sm:$0xff] }
 0x16b   : > { %12469 = vst [vmem:[#allocation174_spill] sm:$0xff] %v5484_v2  ;;  %v12476_v2 = vld [vmem:[#allocation116_spill] sm:$0xff]  ;;  %v5513_v32 = vadd.f32 %v4992_v48, %v12480_v24  ;;  %v12490_v24 = vld [vmem:[#allocation123_spill] sm:$0xff] }
 0x16c   : > { %12471 = vst [vmem:[#allocation62_spill] sm:$0xff] %v5488_v14  ;;  %v5505_v23 = vadd.f32 %v4986_v20, %v12476_v2  ;;  %v838_v14 = vld [vmem:[%s3971_s14 + $0x6a] sm:$0x1]  ;;  %v839_v20 = vld [vmem:[%s3971_s14 + $0x72] sm:$0x1] }
 0x16d   : > { %12473 = vst [vmem:[#allocation175_spill] sm:$0xff] %v5492_v16  ;;  %v837_v16 = vld [vmem:[%s3971_s14 + $0x62] sm:$0x1]  ;;  %v12484_v2 = vld [vmem:[#allocation120_spill] sm:$0xff] }
 0x16e   : > { %12475 = vst [vmem:[#allocation63_spill] sm:$0xff] %v5496_v60  ;;  %v5517_v60 = vadd.f32 %v4995_v13, %v12482_v8  ;;  %v5536_v13 = vadd.f32 %v5007_v18, %v12490_v24  ;;  %v840_v8 = vld [vmem:[%s3971_s14 + $0x7a] sm:$0x1]  ;;  %v5551_v18 = vmul.f32 %v5480_v22, %v826_v62  ;;  %v5554_v24 = vmul.f32 %v5480_v22, %v827_v5 }
 0x16f   : > { %12477 = vst [vmem:[#allocation176_spill] sm:$0xff] %v5505_v23  ;;  %v5524_v23 = vadd.f32 %v4998_v45, %v12484_v2  ;;  %v842_v45 = vld [vmem:[%s3971_s14 + $0x8a] sm:$0x1]  ;;  %v843_v2 = vld [vmem:[%s3971_s14 + $0x92] sm:$0x1]  ;;  %v5567_v62 = vmul.f32 %v5480_v22, %v830_v17  ;;  %v5570_v5 = vmul.f32 %v5480_v22, %v831_v59  ;;  %v5583_v17 = vmul.f32 %v5480_v22, %v834_v21 }
 0x170   : > { %12479 = vst [vmem:[#allocation64_spill] sm:$0xff] %v5509_v30  ;;  %v12488_v30 = vld [vmem:[#allocation122_spill] sm:$0xff]  ;;  %v5586_v59 = vmul.f32 %v5480_v22, %v835_v37  ;;  %v5599_v21 = vmul.f32 %v5480_v22, %v838_v14  ;;  %v5602_v37 = vmul.f32 %v5480_v22, %v839_v20  ;;  %v5615_v14 = vmul.f32 %v5480_v22, %v842_v45 }
 0x171   : > { %12481 = vst [vmem:[#allocation177_spill] sm:$0xff] %v5513_v32  ;;  %v5532_v48 = vadd.f32 %v5004_v4, %v12488_v30  ;;  %v845_v32 = vld [vmem:[%s3971_s14 + $0xa2] sm:$0x1]  ;;  %v848_v4 = vld [vmem:[%s3971_s14 + $0xba] sm:$0x1]  ;;  %v5548_v30 = vmul.f32 %v5480_v22, %v825_v63  ;;  %v5564_v63 = vmul.f32 %v5480_v22, %v829_v57  ;;  %v5580_v57 = vmul.f32 %v5480_v22, %v833_v15 }
 0x172   : > { %12483 = vst [vmem:[#allocation65_spill] sm:$0xff] %v5517_v60  ;;  %v841_v60 = vld [vmem:[%s3971_s14 + $0x82] sm:$0x1]  ;;  %v5596_v15 = vmul.f32 %v5480_v22, %v837_v16  ;;  %v5618_v20 = vmul.f32 %v5480_v22, %v843_v2  ;;  %v5631_v45 = vmul.f32 %v5480_v22, %v846_v39  ;;  %v5634_v2 = vmul.f32 %v5480_v22, %v847_v38 }
 0x173   : > { %12485 = vst [vmem:[#allocation178_spill] sm:$0xff] %v5524_v23  ;;  %v844_v23 = vld [vmem:[%s3971_s14 + $0x9a] sm:$0x1]  ;;  %v5612_v16 = vmul.f32 %v5480_v22, %v841_v60  ;;  %v5628_v60 = vmul.f32 %v5480_v22, %v845_v32  ;;  %v5650_v38 = vmul.f32 %v5480_v22, %v851_v29  ;;  %v5666_v29 = vmul.f32 %v5480_v22, %v855_v53 }
 0x174   : > { %12487 = vst [vmem:[#allocation66_spill] sm:$0xff] %v5528_v58  ;;  %v850_v58 = vld [vmem:[%s3971_s14 + $0xca] sm:$0x1]  ;;  %v5682_v53 = vmul.f32 %v5480_v22, %v859_v3  ;;  %v5698_v3 = vmul.f32 %v5480_v22, %v863_v9  ;;  %v5714_v9 = vmul.f32 %v5480_v22, %v867_v44 }
 0x175   : > { %12489 = vst [vmem:[#allocation179_spill] sm:$0xff] %v5532_v48  ;;  %v849_v48 = vld [vmem:[%s3971_s14 + $0xc2] sm:$0x1]  ;;  %v5647_v39 = vmul.f32 %v5480_v22, %v850_v58  ;;  %v5663_v58 = vmul.f32 %v5480_v22, %v854_v54  ;;  %v5679_v54 = vmul.f32 %v5480_v22, %v858_v61  ;;  %v5695_v61 = vmul.f32 %v5480_v22, %v862_v7 }
 0x176   : > { %12491 = vst [vmem:[#allocation67_spill] sm:$0xff] %v5536_v13  ;;  %v5557_v13 = vmul.f32 %v5480_v22, %v828_v12  ;;  %v5573_v12 = vmul.f32 %v5480_v22, %v832_v56  ;;  %v5589_v56 = vmul.f32 %v5480_v22, %v836_v46  ;;  %v5605_v46 = vmul.f32 %v5480_v22, %v840_v8 }
 0x177   : > { %12493 = vst [vmem:[#allocation68_spill] sm:$0xff] %v5612_v16  ;;  %v5621_v8 = vmul.f32 %v5480_v22, %v844_v23  ;;  %v5637_v23 = vmul.f32 %v5480_v22, %v848_v4  ;;  %v872_v16 = vld [vmem:[%s3971_s14 + $0x17a] sm:$0x1]  ;;  %v5644_v32 = vmul.f32 %v5480_v22, %v849_v48  ;;  %v5653_v4 = vmul.f32 %v5480_v22, %v852_v40 }
 0x178   : > { %12492 = vst [vmem:[#allocation180_spill] sm:$0xff] %v5605_v46  ;;  %v868_v46 = vld [vmem:[%s3971_s14 + $0x15a] sm:$0x1]  ;;  %v5660_v48 = vmul.f32 %v5480_v22, %v853_v6  ;;  %v5669_v40 = vmul.f32 %v5480_v22, %v856_v52  ;;  %v5676_v6 = vmul.f32 %v5480_v22, %v857_v55  ;;  %v5685_v52 = vmul.f32 %v5480_v22, %v860_v31 }
 0x179   : > { %12494 = vst [vmem:[#allocation181_spill] sm:$0xff] %v5615_v14  ;;  %v871_v14 = vld [vmem:[%s3971_s14 + $0x172] sm:$0x1]  ;;  %v5692_v55 = vmul.f32 %v5480_v22, %v861_v0  ;;  %v5701_v31 = vmul.f32 %v5480_v22, %v864_v51  ;;  %v5708_v0 = vmul.f32 %v5480_v22, %v865_v50  ;;  %v5711_v7 = vmul.f32 %v5480_v22, %v866_v49 }
 0x17a   : > { %12495 = vst [vmem:[#allocation69_spill] sm:$0xff] %v5618_v20  ;;  %v870_v20 = vld [vmem:[%s3971_s14 + $0x16a] sm:$0x1]  ;;  %v5717_v51 = vmul.f32 %v5480_v22, %v868_v46  ;;  %v5730_v44 = vmul.f32 %v5480_v22, %v871_v14  ;;  %v5733_v46 = vmul.f32 %v5480_v22, %v872_v16 }
 0x17b   : > { %12496 = vst [vmem:[#allocation182_spill] sm:$0xff] %v5621_v8  ;;  %v869_v8 = vld [vmem:[%s3971_s14 + $0x162] sm:$0x1]  ;;  %v5727_v49 = vmul.f32 %v5480_v22, %v870_v20 }
 0x17c   : > { %12497 = vst [vmem:[#allocation70_spill] sm:$0xff] %v5628_v60  ;;  %v876_v60 = vld [vmem:[%s3971_s14 + $0x19a] sm:$0x1]  ;;  %v5724_v50 = vmul.f32 %v5480_v22, %v869_v8 }
 0x17d   : > { %12498 = vst [vmem:[#allocation183_spill] sm:$0xff] %v5631_v45  ;;  %v875_v45 = vld [vmem:[%s3971_s14 + $0x192] sm:$0x1]  ;;  %v5749_v16 = vmul.f32 %v5480_v22, %v876_v60 }
 0x17e   : > { %12499 = vst [vmem:[#allocation71_spill] sm:$0xff] %v5634_v2  ;;  %v874_v2 = vld [vmem:[%s3971_s14 + $0x18a] sm:$0x1]  ;;  %v5746_v14 = vmul.f32 %v5480_v22, %v875_v45 }
 0x17f   : > { %12500 = vst [vmem:[#allocation184_spill] sm:$0xff] %v5637_v23  ;;  %v873_v23 = vld [vmem:[%s3971_s14 + $0x182] sm:$0x1]  ;;  %v5743_v20 = vmul.f32 %v5480_v22, %v874_v2 }
 0x180   : > { %12501 = vst [vmem:[#allocation72_spill] sm:$0xff] %v5644_v32  ;;  %v880_v32 = vld [vmem:[%s3971_s14 + $0x1ba] sm:$0x1]  ;;  %v5740_v8 = vmul.f32 %v5480_v22, %v873_v23 }
 0x181   : > { %12502 = vst [vmem:[#allocation73_spill] sm:$0xff] %v5647_v39  ;;  %v879_v39 = vld [vmem:[%s3971_s14 + $0x1b2] sm:$0x1]  ;;  %v5765_v60 = vmul.f32 %v5480_v22, %v880_v32 }
 0x182   : > { %12503 = vst [vmem:[#allocation185_spill] sm:$0xff] %v5650_v38  ;;  %v878_v38 = vld [vmem:[%s3971_s14 + $0x1aa] sm:$0x1]  ;;  %v5762_v45 = vmul.f32 %v5480_v22, %v879_v39 }
 0x183   : > { %12504 = vst [vmem:[#allocation74_spill] sm:$0xff] %v5653_v4  ;;  %v877_v4 = vld [vmem:[%s3971_s14 + $0x1a2] sm:$0x1]  ;;  %v5759_v2 = vmul.f32 %v5480_v22, %v878_v38 }
 0x184   : > { %12505 = vst [vmem:[#allocation186_spill] sm:$0xff] %v5660_v48  ;;  %v884_v48 = vld [vmem:[%s3971_s14 + $0x1da] sm:$0x1]  ;;  %v5756_v23 = vmul.f32 %v5480_v22, %v877_v4 }
 0x185   : > { %12506 = vst [vmem:[#allocation75_spill] sm:$0xff] %v5663_v58  ;;  %v883_v58 = vld [vmem:[%s3971_s14 + $0x1d2] sm:$0x1]  ;;  %v5781_v32 = vmul.f32 %v5480_v22, %v884_v48 }
 0x186   : > { %12507 = vst [vmem:[#allocation187_spill] sm:$0xff] %v5666_v29  ;;  %v882_v29 = vld [vmem:[%s3971_s14 + $0x1ca] sm:$0x1]  ;;  %v5778_v39 = vmul.f32 %v5480_v22, %v883_v58 }
 0x187   : > { %12508 = vst [vmem:[#allocation76_spill] sm:$0xff] %v5669_v40  ;;  %v881_v40 = vld [vmem:[%s3971_s14 + $0x1c2] sm:$0x1]  ;;  %v5775_v38 = vmul.f32 %v5480_v22, %v882_v29 }
 0x188   : > { %12509 = vst [vmem:[#allocation77_spill] sm:$0xff] %v5676_v6  ;;  %v888_v6 = vld [vmem:[%s3971_s14 + $0x1fa] sm:$0x1]  ;;  %v5772_v4 = vmul.f32 %v5480_v22, %v881_v40 }
 0x189   : > { %12510 = vst [vmem:[#allocation188_spill] sm:$0xff] %v5679_v54  ;;  %v887_v54 = vld [vmem:[%s3971_s14 + $0x1f2] sm:$0x1]  ;;  %v5797_v48 = vmul.f32 %v5480_v22, %v888_v6 }
 0x18a   : > { %12511 = vst [vmem:[#allocation78_spill] sm:$0xff] %v5682_v53  ;;  %v886_v53 = vld [vmem:[%s3971_s14 + $0x1ea] sm:$0x1]  ;;  %v5794_v58 = vmul.f32 %v5480_v22, %v887_v54 }
 0x18b   : > { %12512 = vst [vmem:[#allocation189_spill] sm:$0xff] %v5685_v52  ;;  %v885_v52 = vld [vmem:[%s3971_s14 + $0x1e2] sm:$0x1]  ;;  %v5791_v29 = vmul.f32 %v5480_v22, %v886_v53 }
 0x18c   : > { %12513 = vst [vmem:[#allocation79_spill] sm:$0xff] %v5692_v55  ;;  %v892_v55 = vld [vmem:[%s3971_s14 + $0x21a] sm:$0x1]  ;;  %v5788_v40 = vmul.f32 %v5480_v22, %v885_v52 }
 0x18d   : > { %12514 = vst [vmem:[#allocation190_spill] sm:$0xff] %v5695_v61  ;;  %v891_v61 = vld [vmem:[%s3971_s14 + $0x212] sm:$0x1]  ;;  %v5813_v6 = vmul.f32 %v5480_v22, %v892_v55 }
 0x18e   : > { %12515 = vst [vmem:[#allocation80_spill] sm:$0xff] %v5698_v3  ;;  %v890_v3 = vld [vmem:[%s3971_s14 + $0x20a] sm:$0x1]  ;;  %v5810_v54 = vmul.f32 %v5480_v22, %v891_v61 }
 0x18f   : > { %12516 = vst [vmem:[#allocation81_spill] sm:$0xff] %v5701_v31  ;;  %v889_v31 = vld [vmem:[%s3971_s14 + $0x202] sm:$0x1]  ;;  %v5807_v53 = vmul.f32 %v5480_v22, %v890_v3 }
 0x190   : > { %12517 = vst [vmem:[#allocation191_spill] sm:$0xff] %v5708_v0  ;;  %v896_v0 = vld [vmem:[%s3971_s14 + $0x23a] sm:$0x1]  ;;  %v5804_v52 = vmul.f32 %v5480_v22, %v889_v31 }
 0x191   : > { %12518 = vst [vmem:[#allocation82_spill] sm:$0xff] %v5711_v7  ;;  %v895_v7 = vld [vmem:[%s3971_s14 + $0x232] sm:$0x1]  ;;  %v5829_v55 = vmul.f32 %v5480_v22, %v896_v0 }
 0x192   : > { %12519 = vst [vmem:[#allocation192_spill] sm:$0xff] %v5714_v9  ;;  %v894_v9 = vld [vmem:[%s3971_s14 + $0x22a] sm:$0x1]  ;;  %v5826_v61 = vmul.f32 %v5480_v22, %v895_v7 }
 0x193   : > { %12520 = vst [vmem:[#allocation83_spill] sm:$0xff] %v5717_v51  ;;  %v893_v51 = vld [vmem:[%s3971_s14 + $0x222] sm:$0x1]  ;;  %v5823_v3 = vmul.f32 %v5480_v22, %v894_v9 }
 0x194   : > { %12521 = vst [vmem:[#allocation193_spill] sm:$0xff] %v5724_v50  ;;  %v900_v50 = vld [vmem:[%s3971_s14 + $0x25a] sm:$0x1]  ;;  %v5820_v31 = vmul.f32 %v5480_v22, %v893_v51 }
 0x195   : > { %12522 = vst [vmem:[#allocation84_spill] sm:$0xff] %v5727_v49  ;;  %v899_v49 = vld [vmem:[%s3971_s14 + $0x252] sm:$0x1]  ;;  %v5845_v0 = vmul.f32 %v5480_v22, %v900_v50  ;;  %v925_v50 = vld [vmem:[%s3971_s14 + $0x322] sm:$0x1] }
 0x196   : > { %12523 = vst [vmem:[#allocation85_spill] sm:$0xff] %v5730_v44  ;;  %v898_v44 = vld [vmem:[%s3971_s14 + $0x24a] sm:$0x1]  ;;  %v5842_v7 = vmul.f32 %v5480_v22, %v899_v49 }
 0x197   : > { %12524 = vst [vmem:[#allocation194_spill] sm:$0xff] %v5733_v46  ;;  %v897_v46 = vld [vmem:[%s3971_s14 + $0x242] sm:$0x1]  ;;  %v5839_v9 = vmul.f32 %v5480_v22, %v898_v44 }
 0x198   : > { %12525 = vst [vmem:[#allocation86_spill] sm:$0xff] %v5740_v8  ;;  %v904_v8 = vld [vmem:[%s3971_s14 + $0x27a] sm:$0x1]  ;;  %v5836_v51 = vmul.f32 %v5480_v22, %v897_v46 }
 0x199   : > { %12526 = vst [vmem:[#allocation195_spill] sm:$0xff] %v5743_v20  ;;  %v903_v20 = vld [vmem:[%s3971_s14 + $0x272] sm:$0x1]  ;;  %v5861_v49 = vmul.f32 %v5480_v22, %v904_v8 }
 0x19a   : > { %12527 = vst [vmem:[#allocation87_spill] sm:$0xff] %v5746_v14  ;;  %v902_v14 = vld [vmem:[%s3971_s14 + $0x26a] sm:$0x1]  ;;  %v5858_v44 = vmul.f32 %v5480_v22, %v903_v20  ;;  %v929_v20 = vld [vmem:[%s3971_s14 + $0x342] sm:$0x1] }
 0x19b   : > { %12528 = vst [vmem:[#allocation196_spill] sm:$0xff] %v5749_v16  ;;  %v901_v16 = vld [vmem:[%s3971_s14 + $0x262] sm:$0x1]  ;;  %v5855_v46 = vmul.f32 %v5480_v22, %v902_v14 }
 0x19c   : > { %12529 = vst [vmem:[#allocation88_spill] sm:$0xff] %v5756_v23  ;;  %v908_v23 = vld [vmem:[%s3971_s14 + $0x29a] sm:$0x1]  ;;  %v5852_v43 = vmul.f32 %v5480_v22, %v901_v16 }
 0x19d   : > { %12530 = vst [vmem:[#allocation89_spill] sm:$0xff] %v5759_v2  ;;  %v907_v2 = vld [vmem:[%s3971_s14 + $0x292] sm:$0x1]  ;;  %v5877_v8 = vmul.f32 %v5480_v22, %v908_v23  ;;  %v932_v23 = vld [vmem:[%s3971_s14 + $0x35a] sm:$0x1] }
 0x19e   : > { %12531 = vst [vmem:[#allocation197_spill] sm:$0xff] %v5762_v45  ;;  %v906_v45 = vld [vmem:[%s3971_s14 + $0x28a] sm:$0x1]  ;;  %v5874_v14 = vmul.f32 %v5480_v22, %v907_v2 }
 0x19f   : > { %12532 = vst [vmem:[#allocation90_spill] sm:$0xff] %v5765_v60  ;;  %v905_v60 = vld [vmem:[%s3971_s14 + $0x282] sm:$0x1]  ;;  %v5871_v16 = vmul.f32 %v5480_v22, %v906_v45 }
 0x1a0   : > { %12533 = vst [vmem:[#allocation198_spill] sm:$0xff] %v5772_v4  ;;  %v912_v4 = vld [vmem:[%s3971_s14 + $0x2ba] sm:$0x1] }
 0x1a1   : > { %12534 = vst [vmem:[#allocation91_spill] sm:$0xff] %v5775_v38  ;;  %v911_v38 = vld [vmem:[%s3971_s14 + $0x2b2] sm:$0x1]  ;;  %v5892_v2 = vmul.f32 %v5480_v22, %v912_v4 }
 0x1a2   : > { %12535 = vst [vmem:[#allocation199_spill] sm:$0xff] %v5778_v39  ;;  %v910_v39 = vld [vmem:[%s3971_s14 + $0x2aa] sm:$0x1]  ;;  %v5889_v45 = vmul.f32 %v5480_v22, %v911_v38  ;;  %v935_v4 = vld [vmem:[%s3971_s14 + $0x372] sm:$0x1] }
 0x1a3   : > { %12536 = vst [vmem:[#allocation92_spill] sm:$0xff] %v5781_v32  ;;  %v909_v32 = vld [vmem:[%s3971_s14 + $0x2a2] sm:$0x1] }
 0x1a4   : > { %12537 = vst [vmem:[#allocation93_spill] sm:$0xff] %v5788_v40  ;;  %v916_v40 = vld [vmem:[%s3971_s14 + $0x2da] sm:$0x1] }
 0x1a5   : > { %12538 = vst [vmem:[#allocation200_spill] sm:$0xff] %v5791_v29  ;;  %v915_v29 = vld [vmem:[%s3971_s14 + $0x2d2] sm:$0x1]  ;;  %v5907_v38 = vmul.f32 %v5480_v22, %v916_v40  ;;  %v938_v40 = vld [vmem:[%s3971_s14 + $0x38a] sm:$0x1] }
 0x1a6   : > { %12539 = vst [vmem:[#allocation94_spill] sm:$0xff] %v5794_v58  ;;  %v914_v58 = vld [vmem:[%s3971_s14 + $0x2ca] sm:$0x1] }
 0x1a7   : > { %12540 = vst [vmem:[#allocation201_spill] sm:$0xff] %v5797_v48  ;;  %v913_v48 = vld [vmem:[%s3971_s14 + $0x2c2] sm:$0x1] }
 0x1a8   : > { %12541 = vst [vmem:[#allocation95_spill] sm:$0xff] %v5804_v52  ;;  %v920_v52 = vld [vmem:[%s3971_s14 + $0x2fa] sm:$0x1] }
 0x1a9   : > { %12542 = vst [vmem:[#allocation202_spill] sm:$0xff] %v5807_v53  ;;  %v919_v53 = vld [vmem:[%s3971_s14 + $0x2f2] sm:$0x1] }
 0x1aa   : > { %12543 = vst [vmem:[#allocation96_spill] sm:$0xff] %v5810_v54  ;;  %v918_v54 = vld [vmem:[%s3971_s14 + $0x2ea] sm:$0x1] }
 0x1ab   : > { %12544 = vst [vmem:[#allocation203_spill] sm:$0xff] %v5813_v6  ;;  %v917_v6 = vld [vmem:[%s3971_s14 + $0x2e2] sm:$0x1] }
 0x1ac   : > { %12545 = vst [vmem:[#allocation97_spill] sm:$0xff] %v5820_v31  ;;  %v924_v31 = vld [vmem:[%s3971_s14 + $0x31a] sm:$0x1] }
 0x1ad   : > { %12546 = vst [vmem:[#allocation204_spill] sm:$0xff] %v5823_v3  ;;  %v923_v3 = vld [vmem:[%s3971_s14 + $0x312] sm:$0x1] }
 0x1ae   : > { %12547 = vst [vmem:[#allocation98_spill] sm:$0xff] %v5826_v61  ;;  %v922_v61 = vld [vmem:[%s3971_s14 + $0x30a] sm:$0x1] }
 0x1af   : > { %12548 = vst [vmem:[#allocation205_spill] sm:$0xff] %v5829_v55  ;;  %v921_v55 = vld [vmem:[%s3971_s14 + $0x302] sm:$0x1] }
 0x1b0   : > { %12549 = vst [vmem:[#allocation99_spill] sm:$0xff] %v5836_v51  ;;  %v5868_v51 = vmul.f32 %v5480_v22, %v905_v60  ;;  %v5886_v60 = vmul.f32 %v5480_v22, %v910_v39  ;;  %v5904_v39 = vmul.f32 %v5480_v22, %v915_v29  ;;  %v5922_v29 = vmul.f32 %v5480_v22, %v920_v52  ;;  %v941_v52 = vld [vmem:[%s3971_s14 + $0x3a2] sm:$0x1] }
 0x1b1   : > { %12550 = vst [vmem:[#allocation206_spill] sm:$0xff] %v5839_v9  ;;  %v928_v9 = vld [vmem:[%s3971_s14 + $0x33a] sm:$0x1] }
 0x1b2   : > { %12551 = vst [vmem:[#allocation100_spill] sm:$0xff] %v5842_v7  ;;  %v927_v7 = vld [vmem:[%s3971_s14 + $0x332] sm:$0x1] }
 0x1b3   : > { %12552 = vst [vmem:[#allocation101_spill] sm:$0xff] %v5845_v0  ;;  %v926_v0 = vld [vmem:[%s3971_s14 + $0x32a] sm:$0x1] }
 0x1b4   : > { %12553 = vst [vmem:[#allocation207_spill] sm:$0xff] %v5855_v46  ;;  %v5883_v46 = vmul.f32 %v5480_v22, %v909_v32  ;;  %v5901_v32 = vmul.f32 %v5480_v22, %v914_v58  ;;  %v5919_v58 = vmul.f32 %v5480_v22, %v919_v53  ;;  %v5937_v53 = vmul.f32 %v5480_v22, %v924_v31  ;;  %v944_v31 = vld [vmem:[%s3971_s14 + $0x3ba] sm:$0x1] }
 0x1b5   : > { %12554 = vst [vmem:[#allocation102_spill] sm:$0xff] %v5858_v44  ;;  %v931_v44 = vld [vmem:[%s3971_s14 + $0x352] sm:$0x1] }
 0x1b6   : > { %12555 = vst [vmem:[#allocation208_spill] sm:$0xff] %v5861_v49  ;;  %v930_v49 = vld [vmem:[%s3971_s14 + $0x34a] sm:$0x1] }
 0x1b7   : > { %12556 = vst [vmem:[#allocation103_spill] sm:$0xff] %v5871_v16  ;;  %v5898_v16 = vmul.f32 %v5480_v22, %v913_v48  ;;  %v5916_v48 = vmul.f32 %v5480_v22, %v918_v54  ;;  %v5934_v54 = vmul.f32 %v5480_v22, %v923_v3  ;;  %v5952_v3 = vmul.f32 %v5480_v22, %v928_v9  ;;  %v948_v9 = vld [vmem:[%s3971_s14 + $0x3da] sm:$0x1] }
 0x1b8   : > { %12557 = vst [vmem:[#allocation209_spill] sm:$0xff] %v5874_v14  ;;  %v934_v14 = vld [vmem:[%s3971_s14 + $0x36a] sm:$0x1] }
 0x1b9   : > { %12558 = vst [vmem:[#allocation104_spill] sm:$0xff] %v5877_v8  ;;  %v933_v8 = vld [vmem:[%s3971_s14 + $0x362] sm:$0x1] }
 0x1ba   : > { %12559 = vst [vmem:[#allocation105_spill] sm:$0xff] %v5886_v60  ;;  %v5913_v60 = vmul.f32 %v5480_v22, %v917_v6  ;;  %v5931_v6 = vmul.f32 %v5480_v22, %v922_v61  ;;  %v5949_v61 = vmul.f32 %v5480_v22, %v927_v7  ;;  %v5967_v7 = vmul.f32 %v5480_v22, %v932_v23 }
 0x1bb   : > { %12560 = vst [vmem:[#allocation106_spill] sm:$0xff] %v5889_v45  ;;  %v937_v45 = vld [vmem:[%s3971_s14 + $0x382] sm:$0x1] }
 0x1bc   : > { %12561 = vst [vmem:[#allocation107_spill] sm:$0xff] %v5892_v2  ;;  %v936_v2 = vld [vmem:[%s3971_s14 + $0x37a] sm:$0x1]  ;;  %v5988_v23 = vmul.f32 %v5480_v22, %v937_v45  ;;  %v6009_v45 = vmul.f32 %v5480_v22, %v944_v31 }
 0x1bd   : > { %12562 = vst [vmem:[#allocation210_spill] sm:$0xff] %v5901_v32  ;;  %v5928_v32 = vmul.f32 %v5480_v22, %v921_v55  ;;  %v5946_v55 = vmul.f32 %v5480_v22, %v926_v0  ;;  %v5964_v0 = vmul.f32 %v5480_v22, %v931_v44  ;;  %v950_v44 = vld [vmem:[%s3971_s14 + $0x3ea] sm:$0x1] }
 0x1be   : > { %12563 = vst [vmem:[#allocation108_spill] sm:$0xff] %v5904_v39  ;;  %v940_v39 = vld [vmem:[%s3971_s14 + $0x39a] sm:$0x1] }
 0x1bf   : > { %12564 = vst [vmem:[#allocation109_spill] sm:$0xff] %v5907_v38  ;;  %v939_v38 = vld [vmem:[%s3971_s14 + $0x392] sm:$0x1] }
 0x1c0   : > { %12565 = vst [vmem:[#allocation110_spill] sm:$0xff] %v5916_v48  ;;  %v5943_v48 = vmul.f32 %v5480_v22, %v925_v50  ;;  %v5961_v50 = vmul.f32 %v5480_v22, %v930_v49  ;;  %v5982_v49 = vmul.f32 %v5480_v22, %v936_v2 }
 0x1c1   : > { %12566 = vst [vmem:[#allocation111_spill] sm:$0xff] %v5919_v58  ;;  %v943_v58 = vld [vmem:[%s3971_s14 + $0x3b2] sm:$0x1] }
 0x1c2   : > { %12567 = vst [vmem:[#allocation112_spill] sm:$0xff] %v5922_v29  ;;  %v942_v29 = vld [vmem:[%s3971_s14 + $0x3aa] sm:$0x1] }
 0x1c3   : > { %12568 = vst [vmem:[#allocation113_spill] sm:$0xff] %v5931_v6  ;;  %v5958_v6 = vmul.f32 %v5480_v22, %v929_v20  ;;  %v5979_v20 = vmul.f32 %v5480_v22, %v935_v4  ;;  %v6000_v4 = vmul.f32 %v5480_v22, %v941_v52  ;;  %v6003_v2 = vmul.f32 %v5480_v22, %v942_v29 }
 0x1c4   : > { %12569 = vst [vmem:[#allocation114_spill] sm:$0xff] %v5934_v54  ;;  %v946_v54 = vld [vmem:[%s3971_s14 + $0x3ca] sm:$0x1]  ;;  %v6021_v52 = vmul.f32 %v5480_v22, %v948_v9  ;;  %v6049_v9 = vadd.f32 %v5557_v13, %v5023_v1  ;;  %v6069_v1 = vadd.f32 %v5580_v57, %v5043_v28  ;;  %v6089_v28 = vadd.f32 %v5599_v21, %v5063_v41  ;;  %v12591_v57 = vld [vmem:[#allocation13_spill] sm:$0xff]  ;;  %v12597_v21 = vld [vmem:[#allocation14_spill] sm:$0xff] }
 0x1c5   : > { %12570 = vst [vmem:[#allocation115_spill] sm:$0xff] %v5937_v53  ;;  %v945_v53 = vld [vmem:[%s3971_s14 + $0x3c2] sm:$0x1]  ;;  %v12579_v13 = vld [vmem:[#allocation11_spill] sm:$0xff] }
 0x1c6   : > { %12571 = vst [vmem:[#allocation116_spill] sm:$0xff] %v5943_v48  ;;  %v5976_v48 = vmul.f32 %v5480_v22, %v934_v14  ;;  %v5997_v14 = vmul.f32 %v5480_v22, %v940_v39 }
 0x1c7   : > { %12572 = vst [vmem:[#allocation117_spill] sm:$0xff] %v5946_v55  ;;  %v5973_v55 = vmul.f32 %v5480_v22, %v933_v8  ;;  %v5994_v8 = vmul.f32 %v5480_v22, %v939_v38  ;;  %v6015_v38 = vmul.f32 %v5480_v22, %v946_v54  ;;  %v6037_v54 = vadd.f32 %v5548_v30, %v5011_v19  ;;  %v12580_v30 = vld [vmem:[#allocation180_spill] sm:$0xff] }
 0x1c8   : > { %12573 = vst [vmem:[#allocation118_spill] sm:$0xff] %v5949_v61  ;;  %v947_v61 = vld [vmem:[%s3971_s14 + $0x3d2] sm:$0x1]  ;;  %v6057_v19 = vadd.f32 %v5567_v62, %v5031_v25  ;;  %v6077_v25 = vadd.f32 %v5586_v59, %v5051_v34  ;;  %v6097_v34 = vadd.f32 %v12580_v30, %v12579_v13  ;;  %v12586_v62 = vld [vmem:[#allocation181_spill] sm:$0xff]  ;;  %v12594_v59 = vld [vmem:[#allocation126_spill] sm:$0xff] }
 0x1c9   : > { %12574 = vst [vmem:[#allocation119_spill] sm:$0xff] %v5952_v3  ;;  %v949_v3 = vld [vmem:[%s3971_s14 + $0x3e2] sm:$0x1]  ;;  %v6018_v39 = vmul.f32 %v5480_v22, %v947_v61  ;;  %v6041_v61 = vadd.f32 %v5551_v18, %v5015_v11  ;;  %v6061_v11 = vadd.f32 %v5570_v5, %v5035_v26  ;;  %v6081_v26 = vadd.f32 %v5589_v56, %v5055_v35  ;;  %v12582_v18 = vld [vmem:[#allocation124_spill] sm:$0xff]  ;;  %v12588_v5 = vld [vmem:[#allocation125_spill] sm:$0xff] }
 0x1ca   : > { %12575 = vst [vmem:[#allocation120_spill] sm:$0xff] %v5961_v50  ;;  %v952_v50 = vld [vmem:[%s3971_s14 + $0x3fa] sm:$0x1]  ;;  %v6024_v29 = vmul.f32 %v5480_v22, %v949_v3  ;;  %v6045_v3 = vadd.f32 %v5554_v24, %v5019_v10  ;;  %v6065_v10 = vadd.f32 %v5573_v12, %v5039_v27  ;;  %v6085_v27 = vadd.f32 %v5596_v15, %v5059_v36  ;;  %v12583_v24 = vld [vmem:[#allocation68_spill] sm:$0xff]  ;;  %v12595_v56 = vld [vmem:[#allocation70_spill] sm:$0xff] }
 0x1cb   : > { %12576 = vst [vmem:[#allocation121_spill] sm:$0xff] %v5964_v0  ;;  %v951_v0 = vld [vmem:[%s3971_s14 + $0x3f2] sm:$0x1]  ;;  %v6101_v35 = vadd.f32 %v12583_v24, %v12582_v18  ;;  %v12589_v12 = vld [vmem:[#allocation69_spill] sm:$0xff]  ;;  %v6117_v15 = vadd.f32 %v12595_v56, %v12594_v59  ;;  %v12603_v30 = vld [vmem:[#allocation15_spill] sm:$0xff] }
 0x1cc   : > { %12577 = vst [vmem:[#allocation122_spill] sm:$0xff] %v5967_v7  ;;  %v5991_v7 = vmul.f32 %v5480_v22, %v938_v40  ;;  %v6012_v40 = vmul.f32 %v5480_v22, %v945_v53  ;;  %v6030_v31 = vmul.f32 %v5480_v22, %v951_v0  ;;  %v6033_v53 = vmul.f32 %v5480_v22, %v952_v50  ;;  %v12600_v0 = vld [vmem:[#allocation127_spill] sm:$0xff]  ;;  %v12604_v18 = vld [vmem:[#allocation184_spill] sm:$0xff]  ;;  %v12612_v59 = vld [vmem:[#allocation129_spill] sm:$0xff] }
 0x1cd   : > { %12578 = vst [vmem:[#allocation123_spill] sm:$0xff] %v5982_v49  ;;  %v6006_v49 = vmul.f32 %v5480_v22, %v943_v58  ;;  %v6027_v58 = vmul.f32 %v5480_v22, %v950_v44  ;;  %v6053_v22 = vadd.f32 %v5564_v63, %v5027_v47  ;;  %v6073_v47 = vadd.f32 %v5583_v17, %v5047_v33  ;;  %v12585_v63 = vld [vmem:[#allocation12_spill] sm:$0xff]  ;;  %v12592_v17 = vld [vmem:[#allocation182_spill] sm:$0xff]  ;;  %v12601_v44 = vld [vmem:[#allocation71_spill] sm:$0xff] }
 0x1ce   : > { %v6093_v33 = vadd.f32 %v5602_v37, %v5067_v42  ;;  %12581 = vst [vmem:[#allocation11_spill] sm:$0xff] %v6097_v34  ;;  %v6105_v36 = vadd.f32 %v12586_v62, %v12585_v63  ;;  %v6109_v41 = vadd.f32 %v12589_v12, %v12588_v5  ;;  %v6113_v42 = vadd.f32 %v12592_v17, %v12591_v57  ;;  %v12598_v37 = vld [vmem:[#allocation183_spill] sm:$0xff]  ;;  %v12606_v63 = vld [vmem:[#allocation128_spill] sm:$0xff]  ;;  %v12610_v57 = vld [vmem:[#allocation73_spill] sm:$0xff] }
 0x1cf   : > { %12584 = vst [vmem:[#allocation180_spill] sm:$0xff] %v6101_v35  ;;  %v6121_v50 = vadd.f32 %v12598_v37, %v12597_v21  ;;  %v6125_v13 = vadd.f32 %v12601_v44, %v12600_v0  ;;  %v6129_v24 = vadd.f32 %v12604_v18, %v12603_v30  ;;  %v12607_v62 = vld [vmem:[#allocation72_spill] sm:$0xff]  ;;  %v12613_v56 = vld [vmem:[#allocation185_spill] sm:$0xff]  ;;  %v12618_v44 = vld [vmem:[#allocation130_spill] sm:$0xff] }
 0x1d0   : > { %12587 = vst [vmem:[#allocation124_spill] sm:$0xff] %v6105_v36  ;;  %v6133_v5 = vadd.f32 %v12607_v62, %v12606_v63  ;;  %v12609_v12 = vld [vmem:[#allocation16_spill] sm:$0xff]  ;;  %v6141_v21 = vadd.f32 %v12613_v56, %v12612_v59  ;;  %v12615_v37 = vld [vmem:[#allocation17_spill] sm:$0xff]  ;;  %v12621_v18 = vld [vmem:[#allocation18_spill] sm:$0xff] }
 0x1d1   : > { %12590 = vst [vmem:[#allocation68_spill] sm:$0xff] %v6109_v41  ;;  %v6137_v17 = vadd.f32 %v12610_v57, %v12609_v12  ;;  %v12624_v62 = vld [vmem:[#allocation131_spill] sm:$0xff]  ;;  %v12630_v56 = vld [vmem:[#allocation132_spill] sm:$0xff]  ;;  %v1251_v41 = vld [vmem:[%s3971_s14 + $0x143] sm:$0x1] }
 0x1d2   : > { %12593 = vst [vmem:[#allocation12_spill] sm:$0xff] %v6113_v42  ;;  %v12627_v57 = vld [vmem:[#allocation19_spill] sm:$0xff]  ;;  %v1250_v42 = vld [vmem:[%s3971_s14 + $0x13b] sm:$0x1]  ;;  %v1253_v35 = vld [vmem:[%s3971_s14 + $0x153] sm:$0x1] }
 0x1d3   : > { %12596 = vst [vmem:[#allocation181_spill] sm:$0xff] %v6117_v15  ;;  %v1249_v15 = vld [vmem:[%s3971_s14 + $0x133] sm:$0x1]  ;;  %v1252_v36 = vld [vmem:[%s3971_s14 + $0x14b] sm:$0x1] }
 0x1d4   : > { %12599 = vst [vmem:[#allocation125_spill] sm:$0xff] %v6121_v50  ;;  %v12616_v50 = vld [vmem:[#allocation74_spill] sm:$0xff] }
 0x1d5   : > { %12602 = vst [vmem:[#allocation69_spill] sm:$0xff] %v6125_v13  ;;  %v6145_v0 = vadd.f32 %v12616_v50, %v12615_v37  ;;  %v12619_v13 = vld [vmem:[#allocation186_spill] sm:$0xff]  ;;  %v12633_v37 = vld [vmem:[#allocation20_spill] sm:$0xff] }
 0x1d6   : > { %12605 = vst [vmem:[#allocation13_spill] sm:$0xff] %v6129_v24  ;;  %v6149_v30 = vadd.f32 %v12619_v13, %v12618_v44  ;;  %v12622_v24 = vld [vmem:[#allocation75_spill] sm:$0xff]  ;;  %v12636_v44 = vld [vmem:[#allocation133_spill] sm:$0xff] }
 0x1d7   : > { %12608 = vst [vmem:[#allocation182_spill] sm:$0xff] %v6133_v5  ;;  %v6153_v63 = vadd.f32 %v12622_v24, %v12621_v18  ;;  %v12625_v5 = vld [vmem:[#allocation187_spill] sm:$0xff]  ;;  %v12639_v18 = vld [vmem:[#allocation21_spill] sm:$0xff] }
 0x1d8   : > { %12611 = vst [vmem:[#allocation126_spill] sm:$0xff] %v6137_v17  ;;  %v6157_v12 = vadd.f32 %v12625_v5, %v12624_v62  ;;  %v12628_v17 = vld [vmem:[#allocation76_spill] sm:$0xff]  ;;  %v12642_v62 = vld [vmem:[#allocation134_spill] sm:$0xff] }
 0x1d9   : > { %12614 = vst [vmem:[#allocation70_spill] sm:$0xff] %v6141_v21  ;;  %v6161_v59 = vadd.f32 %v12628_v17, %v12627_v57  ;;  %v12631_v21 = vld [vmem:[#allocation77_spill] sm:$0xff]  ;;  %v12645_v57 = vld [vmem:[#allocation22_spill] sm:$0xff] }
 0x1da   : > { %12617 = vst [vmem:[#allocation14_spill] sm:$0xff] %v6145_v0  ;;  %v6165_v50 = vadd.f32 %v12631_v21, %v12630_v56  ;;  %v12634_v0 = vld [vmem:[#allocation188_spill] sm:$0xff]  ;;  %v12648_v56 = vld [vmem:[#allocation135_spill] sm:$0xff] }
 0x1db   : > { %12620 = vst [vmem:[#allocation183_spill] sm:$0xff] %v6149_v30  ;;  %v6169_v13 = vadd.f32 %v12634_v0, %v12633_v37  ;;  %v12637_v30 = vld [vmem:[#allocation78_spill] sm:$0xff]  ;;  %v12651_v37 = vld [vmem:[#allocation23_spill] sm:$0xff] }
 0x1dc   : > { %12623 = vst [vmem:[#allocation127_spill] sm:$0xff] %v6153_v63  ;;  %v6173_v24 = vadd.f32 %v12637_v30, %v12636_v44  ;;  %v12640_v63 = vld [vmem:[#allocation189_spill] sm:$0xff]  ;;  %v12654_v44 = vld [vmem:[#allocation136_spill] sm:$0xff] }
 0x1dd   : > { %12626 = vst [vmem:[#allocation71_spill] sm:$0xff] %v6157_v12  ;;  %v6177_v5 = vadd.f32 %v12640_v63, %v12639_v18  ;;  %v12643_v12 = vld [vmem:[#allocation79_spill] sm:$0xff]  ;;  %v12657_v18 = vld [vmem:[#allocation24_spill] sm:$0xff] }
 0x1de   : > { %12629 = vst [vmem:[#allocation15_spill] sm:$0xff] %v6161_v59  ;;  %v6181_v17 = vadd.f32 %v12643_v12, %v12642_v62  ;;  %v12646_v59 = vld [vmem:[#allocation190_spill] sm:$0xff]  ;;  %v12660_v62 = vld [vmem:[#allocation137_spill] sm:$0xff] }
 0x1df   : > { %12632 = vst [vmem:[#allocation184_spill] sm:$0xff] %v6165_v50  ;;  %v6185_v21 = vadd.f32 %v12646_v59, %v12645_v57  ;;  %v12649_v50 = vld [vmem:[#allocation80_spill] sm:$0xff]  ;;  %v12663_v57 = vld [vmem:[#allocation25_spill] sm:$0xff] }
 0x1e0   : > { %12635 = vst [vmem:[#allocation128_spill] sm:$0xff] %v6169_v13  ;;  %v6189_v0 = vadd.f32 %v12649_v50, %v12648_v56  ;;  %v12652_v13 = vld [vmem:[#allocation81_spill] sm:$0xff]  ;;  %v12666_v56 = vld [vmem:[#allocation138_spill] sm:$0xff] }
 0x1e1   : > { %12638 = vst [vmem:[#allocation72_spill] sm:$0xff] %v6173_v24  ;;  %v6193_v30 = vadd.f32 %v12652_v13, %v12651_v37  ;;  %v12655_v24 = vld [vmem:[#allocation191_spill] sm:$0xff]  ;;  %v12669_v37 = vld [vmem:[#allocation26_spill] sm:$0xff] }
 0x1e2   : > { %12641 = vst [vmem:[#allocation16_spill] sm:$0xff] %v6177_v5  ;;  %v6197_v63 = vadd.f32 %v12655_v24, %v12654_v44  ;;  %v12658_v5 = vld [vmem:[#allocation82_spill] sm:$0xff]  ;;  %v12672_v44 = vld [vmem:[#allocation139_spill] sm:$0xff] }
 0x1e3   : > { %12644 = vst [vmem:[#allocation73_spill] sm:$0xff] %v6181_v17  ;;  %v6201_v12 = vadd.f32 %v12658_v5, %v12657_v18  ;;  %v12661_v17 = vld [vmem:[#allocation192_spill] sm:$0xff]  ;;  %v12675_v18 = vld [vmem:[#allocation27_spill] sm:$0xff] }
 0x1e4   : > { %12647 = vst [vmem:[#allocation129_spill] sm:$0xff] %v6185_v21  ;;  %v6205_v59 = vadd.f32 %v12661_v17, %v12660_v62  ;;  %v12664_v21 = vld [vmem:[#allocation83_spill] sm:$0xff]  ;;  %v12678_v62 = vld [vmem:[#allocation140_spill] sm:$0xff] }
 0x1e5   : > { %12650 = vst [vmem:[#allocation185_spill] sm:$0xff] %v6189_v0  ;;  %v6209_v50 = vadd.f32 %v12664_v21, %v12663_v57  ;;  %v12667_v0 = vld [vmem:[#allocation193_spill] sm:$0xff]  ;;  %v12681_v57 = vld [vmem:[#allocation28_spill] sm:$0xff] }
 0x1e6   : > { %12653 = vst [vmem:[#allocation17_spill] sm:$0xff] %v6193_v30  ;;  %v6213_v13 = vadd.f32 %v12667_v0, %v12666_v56  ;;  %v12670_v30 = vld [vmem:[#allocation84_spill] sm:$0xff]  ;;  %v12684_v56 = vld [vmem:[#allocation141_spill] sm:$0xff] }
 0x1e7   : > { %12656 = vst [vmem:[#allocation74_spill] sm:$0xff] %v6197_v63  ;;  %v6217_v24 = vadd.f32 %v12670_v30, %v12669_v37  ;;  %v12673_v63 = vld [vmem:[#allocation85_spill] sm:$0xff] }
 0x1e8   : > { %12659 = vst [vmem:[#allocation130_spill] sm:$0xff] %v6201_v12  ;;  %v6221_v5 = vadd.f32 %v12673_v63, %v12672_v44  ;;  %v12676_v12 = vld [vmem:[#allocation194_spill] sm:$0xff]  ;;  %v12687_v37 = vld [vmem:[#allocation29_spill] sm:$0xff] }
 0x1e9   : > { %12662 = vst [vmem:[#allocation186_spill] sm:$0xff] %v6205_v59  ;;  %v6225_v17 = vadd.f32 %v12676_v12, %v12675_v18  ;;  %v12679_v59 = vld [vmem:[#allocation86_spill] sm:$0xff] }
 0x1ea   : > { %12665 = vst [vmem:[#allocation18_spill] sm:$0xff] %v6209_v50  ;;  %v6229_v21 = vadd.f32 %v12679_v59, %v12678_v62  ;;  %v12682_v50 = vld [vmem:[#allocation195_spill] sm:$0xff]  ;;  %v12690_v44 = vld [vmem:[#allocation142_spill] sm:$0xff] }
 0x1eb   : > { %12668 = vst [vmem:[#allocation75_spill] sm:$0xff] %v6213_v13  ;;  %v6233_v0 = vadd.f32 %v12682_v50, %v12681_v57  ;;  %v12685_v13 = vld [vmem:[#allocation87_spill] sm:$0xff]  ;;  %v12693_v18 = vld [vmem:[#allocation30_spill] sm:$0xff] }
 0x1ec   : > { %12671 = vst [vmem:[#allocation131_spill] sm:$0xff] %v6217_v24  ;;  %v6237_v30 = vadd.f32 %v12685_v13, %v12684_v56  ;;  %v12688_v24 = vld [vmem:[#allocation196_spill] sm:$0xff]  ;;  %v12696_v62 = vld [vmem:[#allocation143_spill] sm:$0xff] }
 0x1ed   : > { %12674 = vst [vmem:[#allocation187_spill] sm:$0xff] %v6221_v5  ;;  %v6241_v63 = vadd.f32 %v12688_v24, %v12687_v37  ;;  %v12691_v5 = vld [vmem:[#allocation88_spill] sm:$0xff]  ;;  %v12699_v57 = vld [vmem:[#allocation31_spill] sm:$0xff] }
 0x1ee   : > { %12677 = vst [vmem:[#allocation19_spill] sm:$0xff] %v6225_v17  ;;  %v6245_v12 = vadd.f32 %v12691_v5, %v12690_v44  ;;  %v12694_v17 = vld [vmem:[#allocation89_spill] sm:$0xff]  ;;  %v12702_v56 = vld [vmem:[#allocation144_spill] sm:$0xff] }
 0x1ef   : > { %12680 = vst [vmem:[#allocation76_spill] sm:$0xff] %v6229_v21  ;;  %v6249_v59 = vadd.f32 %v12694_v17, %v12693_v18  ;;  %v12697_v21 = vld [vmem:[#allocation197_spill] sm:$0xff]  ;;  %v12705_v37 = vld [vmem:[#allocation32_spill] sm:$0xff] }
 0x1f0   : > { %12683 = vst [vmem:[#allocation132_spill] sm:$0xff] %v6233_v0  ;;  %v6253_v50 = vadd.f32 %v12697_v21, %v12696_v62  ;;  %v12700_v0 = vld [vmem:[#allocation90_spill] sm:$0xff]  ;;  %v12708_v44 = vld [vmem:[#allocation145_spill] sm:$0xff] }
 0x1f1   : > { %12686 = vst [vmem:[#allocation77_spill] sm:$0xff] %v6237_v30  ;;  %v6257_v13 = vadd.f32 %v12700_v0, %v12699_v57  ;;  %v12703_v30 = vld [vmem:[#allocation198_spill] sm:$0xff]  ;;  %v12711_v18 = vld [vmem:[#allocation33_spill] sm:$0xff] }
 0x1f2   : > { %12689 = vst [vmem:[#allocation20_spill] sm:$0xff] %v6241_v63  ;;  %v6261_v24 = vadd.f32 %v12703_v30, %v12702_v56  ;;  %v12706_v63 = vld [vmem:[#allocation91_spill] sm:$0xff]  ;;  %v12714_v62 = vld [vmem:[#allocation146_spill] sm:$0xff] }
 0x1f3   : > { %12692 = vst [vmem:[#allocation188_spill] sm:$0xff] %v6245_v12  ;;  %v6265_v5 = vadd.f32 %v12706_v63, %v12705_v37  ;;  %v12709_v12 = vld [vmem:[#allocation199_spill] sm:$0xff]  ;;  %v12717_v57 = vld [vmem:[#allocation34_spill] sm:$0xff] }
 0x1f4   : > { %12695 = vst [vmem:[#allocation133_spill] sm:$0xff] %v6249_v59  ;;  %v6269_v17 = vadd.f32 %v12709_v12, %v12708_v44  ;;  %v12712_v59 = vld [vmem:[#allocation92_spill] sm:$0xff]  ;;  %v12720_v56 = vld [vmem:[#allocation147_spill] sm:$0xff] }
 0x1f5   : > { %12698 = vst [vmem:[#allocation78_spill] sm:$0xff] %v6253_v50  ;;  %v6273_v21 = vadd.f32 %v12712_v59, %v12711_v18  ;;  %v12715_v50 = vld [vmem:[#allocation93_spill] sm:$0xff]  ;;  %v12723_v37 = vld [vmem:[#allocation35_spill] sm:$0xff]  ;;  %v12726_v44 = vld [vmem:[#allocation148_spill] sm:$0xff] }
 0x1f6   : > { %12701 = vst [vmem:[#allocation21_spill] sm:$0xff] %v6257_v13  ;;  %v6277_v0 = vadd.f32 %v12715_v50, %v12714_v62  ;;  %v12718_v13 = vld [vmem:[#allocation200_spill] sm:$0xff]  ;;  %v12732_v62 = vld [vmem:[#allocation149_spill] sm:$0xff] }
 0x1f7   : > { %12704 = vst [vmem:[#allocation189_spill] sm:$0xff] %v6261_v24  ;;  %v6281_v30 = vadd.f32 %v12718_v13, %v12717_v57  ;;  %v12721_v24 = vld [vmem:[#allocation94_spill] sm:$0xff]  ;;  %v12729_v18 = vld [vmem:[#allocation36_spill] sm:$0xff]  ;;  %v12735_v57 = vld [vmem:[#allocation37_spill] sm:$0xff] }
 0x1f8   : > { %12707 = vst [vmem:[#allocation134_spill] sm:$0xff] %v6265_v5  ;;  %v6285_v63 = vadd.f32 %v12721_v24, %v12720_v56  ;;  %v12724_v5 = vld [vmem:[#allocation201_spill] sm:$0xff]  ;;  %v12738_v56 = vld [vmem:[#allocation150_spill] sm:$0xff] }
 0x1f9   : > { %12710 = vst [vmem:[#allocation79_spill] sm:$0xff] %v6269_v17  ;;  %v6289_v12 = vadd.f32 %v12724_v5, %v12723_v37  ;;  %v12727_v17 = vld [vmem:[#allocation95_spill] sm:$0xff]  ;;  %v12741_v37 = vld [vmem:[#allocation38_spill] sm:$0xff] }
 0x1fa   : > { %12713 = vst [vmem:[#allocation22_spill] sm:$0xff] %v6273_v21  ;;  %v6293_v59 = vadd.f32 %v12727_v17, %v12726_v44  ;;  %v12730_v21 = vld [vmem:[#allocation202_spill] sm:$0xff]  ;;  %v12744_v44 = vld [vmem:[#allocation151_spill] sm:$0xff] }
 0x1fb   : > { %12716 = vst [vmem:[#allocation190_spill] sm:$0xff] %v6277_v0  ;;  %v6297_v50 = vadd.f32 %v12730_v21, %v12729_v18  ;;  %v12733_v0 = vld [vmem:[#allocation96_spill] sm:$0xff]  ;;  %v12747_v18 = vld [vmem:[#allocation39_spill] sm:$0xff] }
 0x1fc   : > { %12719 = vst [vmem:[#allocation135_spill] sm:$0xff] %v6281_v30  ;;  %v6301_v13 = vadd.f32 %v12733_v0, %v12732_v62  ;;  %v12736_v30 = vld [vmem:[#allocation203_spill] sm:$0xff]  ;;  %v12750_v62 = vld [vmem:[#allocation152_spill] sm:$0xff] }
 0x1fd   : > { %12722 = vst [vmem:[#allocation80_spill] sm:$0xff] %v6285_v63  ;;  %v6305_v24 = vadd.f32 %v12736_v30, %v12735_v57  ;;  %v12739_v63 = vld [vmem:[#allocation97_spill] sm:$0xff]  ;;  %v12753_v57 = vld [vmem:[#allocation40_spill] sm:$0xff] }
 0x1fe   : > { %12725 = vst [vmem:[#allocation23_spill] sm:$0xff] %v6289_v12  ;;  %v6309_v5 = vadd.f32 %v12739_v63, %v12738_v56  ;;  %v12742_v12 = vld [vmem:[#allocation204_spill] sm:$0xff]  ;;  %v12756_v56 = vld [vmem:[#allocation153_spill] sm:$0xff] }
 0x1ff   : > { %12728 = vst [vmem:[#allocation81_spill] sm:$0xff] %v6293_v59  ;;  %v6313_v17 = vadd.f32 %v12742_v12, %v12741_v37  ;;  %v12745_v59 = vld [vmem:[#allocation98_spill] sm:$0xff]  ;;  %v12759_v37 = vld [vmem:[#allocation41_spill] sm:$0xff] }
 0x200   : > { %12731 = vst [vmem:[#allocation136_spill] sm:$0xff] %v6297_v50  ;;  %v6317_v21 = vadd.f32 %v12745_v59, %v12744_v44  ;;  %v12748_v50 = vld [vmem:[#allocation205_spill] sm:$0xff]  ;;  %v12762_v44 = vld [vmem:[#allocation154_spill] sm:$0xff] }
 0x201   : > { %12734 = vst [vmem:[#allocation191_spill] sm:$0xff] %v6301_v13  ;;  %v6321_v0 = vadd.f32 %v12748_v50, %v12747_v18  ;;  %v12751_v13 = vld [vmem:[#allocation99_spill] sm:$0xff]  ;;  %v6341_v50 = vadd.f32 %v5852_v43, %v12762_v44  ;;  %v12764_v18 = vld [vmem:[#allocation42_spill] sm:$0xff]  ;;  %v12778_v44 = vld [vmem:[#allocation157_spill] sm:$0xff] }
 0x202   : > { %12737 = vst [vmem:[#allocation24_spill] sm:$0xff] %v6305_v24  ;;  %v6325_v30 = vadd.f32 %v12751_v13, %v12750_v62  ;;  %v12754_v24 = vld [vmem:[#allocation206_spill] sm:$0xff]  ;;  %v12767_v62 = vld [vmem:[#allocation155_spill] sm:$0xff] }
 0x203   : > { %12740 = vst [vmem:[#allocation82_spill] sm:$0xff] %v6309_v5  ;;  %v6329_v63 = vadd.f32 %v12754_v24, %v12753_v57  ;;  %v12757_v5 = vld [vmem:[#allocation100_spill] sm:$0xff]  ;;  %v12770_v57 = vld [vmem:[#allocation43_spill] sm:$0xff] }
 0x204   : > { %12743 = vst [vmem:[#allocation137_spill] sm:$0xff] %v6313_v17  ;;  %v6333_v12 = vadd.f32 %v12757_v5, %v12756_v56  ;;  %v12760_v17 = vld [vmem:[#allocation101_spill] sm:$0xff]  ;;  %v12773_v56 = vld [vmem:[#allocation156_spill] sm:$0xff] }
 0x205   : > { %12746 = vst [vmem:[#allocation192_spill] sm:$0xff] %v6317_v21  ;;  %v6337_v59 = vadd.f32 %v12760_v17, %v12759_v37  ;;  %v6357_v17 = vadd.f32 %v5868_v51, %v12773_v56  ;;  %v12775_v37 = vld [vmem:[#allocation44_spill] sm:$0xff]  ;;  %v12789_v56 = vld [vmem:[#allocation159_spill] sm:$0xff] }
 0x206   : > { %12749 = vst [vmem:[#allocation25_spill] sm:$0xff] %v6321_v0  ;;  %v12765_v0 = vld [vmem:[#allocation207_spill] sm:$0xff] }
 0x207   : > { %12752 = vst [vmem:[#allocation83_spill] sm:$0xff] %v6325_v30  ;;  %v6345_v13 = vadd.f32 %v12765_v0, %v12764_v18  ;;  %v12768_v30 = vld [vmem:[#allocation102_spill] sm:$0xff]  ;;  %v12781_v18 = vld [vmem:[#allocation45_spill] sm:$0xff]  ;;  %v1248_v21 = vld [vmem:[%s3971_s14 + $0x12b] sm:$0x1] }
 0x208   : > { %12755 = vst [vmem:[#allocation138_spill] sm:$0xff] %v6329_v63  ;;  %v6349_v24 = vadd.f32 %v12768_v30, %v12767_v62  ;;  %v12771_v63 = vld [vmem:[#allocation208_spill] sm:$0xff]  ;;  %v12784_v62 = vld [vmem:[#allocation158_spill] sm:$0xff] }
 0x209   : > { %12758 = vst [vmem:[#allocation193_spill] sm:$0xff] %v6333_v12  ;;  %v6353_v5 = vadd.f32 %v12771_v63, %v12770_v57  ;;  %v6373_v63 = vadd.f32 %v5883_v46, %v12784_v62  ;;  %v12786_v57 = vld [vmem:[#allocation46_spill] sm:$0xff]  ;;  %v12800_v62 = vld [vmem:[#allocation161_spill] sm:$0xff] }
 0x20a   : > { %12761 = vst [vmem:[#allocation26_spill] sm:$0xff] %v6337_v59  ;;  %v12776_v59 = vld [vmem:[#allocation103_spill] sm:$0xff]  ;;  %v1247_v12 = vld [vmem:[%s3971_s14 + $0x123] sm:$0x1] }
 0x20b   : > { %12763 = vst [vmem:[#allocation84_spill] sm:$0xff] %v6341_v50  ;;  %v6361_v43 = vadd.f32 %v12776_v59, %v12775_v37  ;;  %v12779_v50 = vld [vmem:[#allocation209_spill] sm:$0xff]  ;;  %v12792_v37 = vld [vmem:[#allocation47_spill] sm:$0xff] }
 0x20c   : > { %12766 = vst [vmem:[#allocation139_spill] sm:$0xff] %v6345_v13  ;;  %v6365_v0 = vadd.f32 %v12779_v50, %v12778_v44  ;;  %v12782_v13 = vld [vmem:[#allocation104_spill] sm:$0xff] }
 0x20d   : > { %12769 = vst [vmem:[#allocation85_spill] sm:$0xff] %v6349_v24  ;;  %v6369_v30 = vadd.f32 %v12782_v13, %v12781_v18  ;;  %v12795_v44 = vld [vmem:[#allocation160_spill] sm:$0xff]  ;;  %v1246_v24 = vld [vmem:[%s3971_s14 + $0x11b] sm:$0x1] }
 0x20e   : > { %12772 = vst [vmem:[#allocation27_spill] sm:$0xff] %v6353_v5  ;;  %v12787_v5 = vld [vmem:[#allocation105_spill] sm:$0xff]  ;;  %v6389_v13 = vadd.f32 %v5898_v16, %v12795_v44  ;;  %v12797_v18 = vld [vmem:[#allocation48_spill] sm:$0xff]  ;;  %v12811_v44 = vld [vmem:[#allocation163_spill] sm:$0xff] }
 0x20f   : > { %12774 = vst [vmem:[#allocation194_spill] sm:$0xff] %v6357_v17  ;;  %v6377_v51 = vadd.f32 %v12787_v5, %v12786_v57  ;;  %v12790_v17 = vld [vmem:[#allocation106_spill] sm:$0xff]  ;;  %v12803_v57 = vld [vmem:[#allocation49_spill] sm:$0xff] }
 0x210   : > { %12777 = vst [vmem:[#allocation140_spill] sm:$0xff] %v6361_v43  ;;  %v6381_v59 = vadd.f32 %v12790_v17, %v12789_v56  ;;  %v12793_v43 = vld [vmem:[#allocation107_spill] sm:$0xff]  ;;  %v12806_v56 = vld [vmem:[#allocation162_spill] sm:$0xff] }
 0x211   : > { %12780 = vst [vmem:[#allocation86_spill] sm:$0xff] %v6365_v0  ;;  %v6385_v50 = vadd.f32 %v12793_v43, %v12792_v37  ;;  %v6405_v43 = vadd.f32 %v5913_v60, %v12806_v56  ;;  %v12808_v37 = vld [vmem:[#allocation50_spill] sm:$0xff]  ;;  %v12822_v56 = vld [vmem:[#allocation165_spill] sm:$0xff]  ;;  %v1245_v0 = vld [vmem:[%s3971_s14 + $0x113] sm:$0x1] }
 0x212   : > { %12783 = vst [vmem:[#allocation28_spill] sm:$0xff] %v6369_v30  ;;  %v12798_v30 = vld [vmem:[#allocation210_spill] sm:$0xff] }
 0x213   : > { %12785 = vst [vmem:[#allocation195_spill] sm:$0xff] %v6373_v63  ;;  %v6393_v46 = vadd.f32 %v12798_v30, %v12797_v18  ;;  %v12801_v63 = vld [vmem:[#allocation108_spill] sm:$0xff]  ;;  %v12814_v18 = vld [vmem:[#allocation51_spill] sm:$0xff] }
 0x214   : > { %12788 = vst [vmem:[#allocation141_spill] sm:$0xff] %v6377_v51  ;;  %v6397_v5 = vadd.f32 %v12801_v63, %v12800_v62  ;;  %v12804_v51 = vld [vmem:[#allocation109_spill] sm:$0xff]  ;;  %v12817_v62 = vld [vmem:[#allocation164_spill] sm:$0xff] }
 0x215   : > { %12791 = vst [vmem:[#allocation87_spill] sm:$0xff] %v6381_v59  ;;  %v6401_v17 = vadd.f32 %v12804_v51, %v12803_v57  ;;  %v6421_v51 = vadd.f32 %v5928_v32, %v12817_v62  ;;  %v12819_v57 = vld [vmem:[#allocation52_spill] sm:$0xff]  ;;  %v12831_v62 = vld [vmem:[#allocation54_spill] sm:$0xff]  ;;  %v1244_v59 = vld [vmem:[%s3971_s14 + $0x10b] sm:$0x1] }
 0x216   : > { %12794 = vst [vmem:[#allocation29_spill] sm:$0xff] %v6385_v50  ;;  %v12809_v50 = vld [vmem:[#allocation110_spill] sm:$0xff] }
 0x217   : > { %12796 = vst [vmem:[#allocation196_spill] sm:$0xff] %v6389_v13  ;;  %v6409_v16 = vadd.f32 %v12809_v50, %v12808_v37  ;;  %v12812_v13 = vld [vmem:[#allocation111_spill] sm:$0xff]  ;;  %v12823_v50 = vld [vmem:[#allocation114_spill] sm:$0xff] }
 0x218   : > { %12799 = vst [vmem:[#allocation142_spill] sm:$0xff] %v6393_v46  ;;  %v6413_v30 = vadd.f32 %v12812_v13, %v12811_v44  ;;  %v12815_v46 = vld [vmem:[#allocation112_spill] sm:$0xff]  ;;  %v6429_v37 = vadd.f32 %v12823_v50, %v12822_v56  ;;  %v12825_v13 = vld [vmem:[#allocation53_spill] sm:$0xff]  ;;  %v12826_v44 = vld [vmem:[#allocation115_spill] sm:$0xff] }
 0x219   : > { %12802 = vst [vmem:[#allocation88_spill] sm:$0xff] %v6397_v5  ;;  %v6417_v63 = vadd.f32 %v12815_v46, %v12814_v18  ;;  %v12828_v46 = vld [vmem:[#allocation166_spill] sm:$0xff]  ;;  %v12829_v18 = vld [vmem:[#allocation116_spill] sm:$0xff]  ;;  %v12837_v56 = vld [vmem:[#allocation55_spill] sm:$0xff] }
 0x21a   : > { %12805 = vst [vmem:[#allocation30_spill] sm:$0xff] %v6401_v17  ;;  %v12820_v17 = vld [vmem:[#allocation113_spill] sm:$0xff]  ;;  %v6437_v32 = vadd.f32 %v12829_v18, %v12828_v46  ;;  %v12838_v50 = vld [vmem:[#allocation119_spill] sm:$0xff]  ;;  %v1243_v5 = vld [vmem:[%s3971_s14 + $0x103] sm:$0x1] }
 0x21b   : > { %12807 = vst [vmem:[#allocation89_spill] sm:$0xff] %v6405_v43  ;;  %v6425_v60 = vadd.f32 %v12820_v17, %v12819_v57  ;;  %v12834_v17 = vld [vmem:[#allocation167_spill] sm:$0xff]  ;;  %v12835_v57 = vld [vmem:[#allocation118_spill] sm:$0xff]  ;;  %v12845_v18 = vld [vmem:[#allocation169_spill] sm:$0xff] }
 0x21c   : > { %12810 = vst [vmem:[#allocation143_spill] sm:$0xff] %v6409_v16  ;;  %v12840_v16 = vld [vmem:[#allocation168_spill] sm:$0xff]  ;;  %v1242_v43 = vld [vmem:[%s3971_s14 + $0xfb] sm:$0x1] }
 0x21d   : > { %12813 = vst [vmem:[#allocation197_spill] sm:$0xff] %v6413_v30  ;;  %v6433_v30 = vadd.f32 %v12826_v44, %v12825_v13  ;;  %v6453_v13 = vadd.f32 %v5958_v6, %v12840_v16  ;;  %v12842_v44 = vld [vmem:[#allocation56_spill] sm:$0xff]  ;;  %v12853_v6 = vld [vmem:[#allocation58_spill] sm:$0xff] }
 0x21e   : > { %12816 = vst [vmem:[#allocation31_spill] sm:$0xff] %v6417_v63  ;;  %v6473_v16 = vadd.f32 %v5976_v48, %v12853_v6  ;;  %v12862_v6 = vld [vmem:[#allocation60_spill] sm:$0xff] }
 0x21f   : > { %12818 = vst [vmem:[#allocation90_spill] sm:$0xff] %v6421_v51  ;;  %v12832_v51 = vld [vmem:[#allocation117_spill] sm:$0xff] }
 0x220   : > { %12821 = vst [vmem:[#allocation144_spill] sm:$0xff] %v6425_v60  ;;  %v6441_v63 = vadd.f32 %v12832_v51, %v12831_v62  ;;  %v6445_v60 = vadd.f32 %v12835_v57, %v12834_v17  ;;  %v12846_v51 = vld [vmem:[#allocation121_spill] sm:$0xff]  ;;  %v12849_v57 = vld [vmem:[#allocation122_spill] sm:$0xff] }
 0x221   : > { %12824 = vst [vmem:[#allocation198_spill] sm:$0xff] %v6429_v37  ;;  %v6449_v37 = vadd.f32 %v12838_v50, %v12837_v56  ;;  %v6461_v62 = vadd.f32 %v12846_v51, %v12845_v18  ;;  %v12848_v17 = vld [vmem:[#allocation57_spill] sm:$0xff]  ;;  %v12851_v56 = vld [vmem:[#allocation170_spill] sm:$0xff]  ;;  %v12858_v18 = vld [vmem:[#allocation123_spill] sm:$0xff] }
 0x222   : > { %12827 = vst [vmem:[#allocation32_spill] sm:$0xff] %v6433_v30  ;;  %v12843_v30 = vld [vmem:[#allocation120_spill] sm:$0xff]  ;;  %v6469_v50 = vadd.f32 %v5973_v55, %v12851_v56  ;;  %v1214_v55 = vld [vmem:[%s3971_s14 + $0x1b] sm:$0x1] }
 0x223   : > { %12830 = vst [vmem:[#allocation91_spill] sm:$0xff] %v6437_v32  ;;  %v6457_v46 = vadd.f32 %v12843_v30, %v12842_v44  ;;  %v12855_v30 = vld [vmem:[#allocation171_spill] sm:$0xff]  ;;  %v12860_v56 = vld [vmem:[#allocation172_spill] sm:$0xff] }
 0x224   : > { %12833 = vst [vmem:[#allocation145_spill] sm:$0xff] %v6441_v63  ;;  %v6477_v44 = vadd.f32 %v5979_v20, %v12855_v30  ;;  %v6489_v48 = vadd.f32 %v5988_v23, %v12860_v56  ;;  %v6493_v20 = vadd.f32 %v5991_v7, %v12862_v6  ;;  %v12864_v30 = vld [vmem:[#allocation173_spill] sm:$0xff]  ;;  %v6506_v23 = vld [vmem:[#allocation5 + $0x3] ss:$0 sm:$0xff]  ;;  %v1240_v63 = vld [vmem:[%s3971_s14 + $0xeb] sm:$0x1] }
 0x225   : > { %12836 = vst [vmem:[#allocation199_spill] sm:$0xff] %v6445_v60  ;;  %v6465_v60 = vadd.f32 %v12849_v57, %v12848_v17  ;;  %v1212_v17 = vld [vmem:[%s3971_s14 + $0xb] sm:$0x1]  ;;  %v1213_v57 = vld [vmem:[%s3971_s14 + $0x13] sm:$0x1]  ;;  %v12868_v56 = vld [vmem:[#allocation174_spill] sm:$0xff] }
 0x226   : > { %12839 = vst [vmem:[#allocation33_spill] sm:$0xff] %v6449_v37  ;;  %v6510_v7 = vadd.f32 %v6000_v4, %v12868_v56  ;;  %v12870_v6 = vld [vmem:[#allocation62_spill] sm:$0xff]  ;;  %v1221_v4 = vld [vmem:[%s3971_s14 + $0x53] sm:$0x1]  ;;  %v1222_v56 = vld [vmem:[%s3971_s14 + $0x5b] sm:$0x1] }
 0x227   : > { %12841 = vst [vmem:[#allocation92_spill] sm:$0xff] %v6453_v13  ;;  %v1238_v13 = vld [vmem:[%s3971_s14 + $0xdb] sm:$0x1]  ;;  %v1239_v37 = vld [vmem:[%s3971_s14 + $0xe3] sm:$0x1] }
 0x228   : > { %12844 = vst [vmem:[#allocation146_spill] sm:$0xff] %v6457_v46  ;;  %v12857_v46 = vld [vmem:[#allocation59_spill] sm:$0xff]  ;;  %v1241_v32 = vld [vmem:[%s3971_s14 + $0xf3] sm:$0x1] }
 0x229   : > { %12847 = vst [vmem:[#allocation93_spill] sm:$0xff] %v6461_v62  ;;  %v6481_v51 = vadd.f32 %v12858_v18, %v12857_v46  ;;  %v1211_v62 = vld [vmem:[%s3971_s14 + $0x3] sm:$0x1]  ;;  %v6497_v46 = vadd.f32 %v5994_v8, %v12864_v30  ;;  %v12866_v18 = vld [vmem:[#allocation61_spill] sm:$0xff]  ;;  %v6514_v8 = vadd.f32 %v6003_v2, %v12870_v6  ;;  %v12872_v30 = vld [vmem:[#allocation175_spill] sm:$0xff] }
 0x22a   : > { %12850 = vst [vmem:[#allocation34_spill] sm:$0xff] %v6465_v60  ;;  %v1237_v60 = vld [vmem:[%s3971_s14 + $0xd3] sm:$0x1] }
 0x22b   : > { %12852 = vst [vmem:[#allocation200_spill] sm:$0xff] %v6469_v50  ;;  %v1217_v50 = vld [vmem:[%s3971_s14 + $0x33] sm:$0x1] }
 0x22c   : > { %12854 = vst [vmem:[#allocation147_spill] sm:$0xff] %v6473_v16  ;;  %v1216_v16 = vld [vmem:[%s3971_s14 + $0x2b] sm:$0x1] }
 0x22d   : > { %12856 = vst [vmem:[#allocation94_spill] sm:$0xff] %v6477_v44  ;;  %v1215_v44 = vld [vmem:[%s3971_s14 + $0x23] sm:$0x1] }
 0x22e   : > { %12859 = vst [vmem:[#allocation35_spill] sm:$0xff] %v6481_v51  ;;  %v6501_v51 = vadd.f32 %v5997_v14, %v12866_v18  ;;  %v6518_v14 = vadd.f32 %v6006_v49, %v12872_v30  ;;  %v12874_v18 = vld [vmem:[#allocation63_spill] sm:$0xff]  ;;  %v12878_v49 = vld [vmem:[#allocation64_spill] sm:$0xff] }
 0x22f   : > { %12861 = vst [vmem:[#allocation201_spill] sm:$0xff] %v6489_v48  ;;  %v1220_v48 = vld [vmem:[%s3971_s14 + $0x4b] sm:$0x1]  ;;  %v6535_v6 = vadd.f32 %v6015_v38, %v12878_v49  ;;  %v12886_v38 = vld [vmem:[#allocation66_spill] sm:$0xff] }
 0x230   : > { %12863 = vst [vmem:[#allocation148_spill] sm:$0xff] %v6493_v20  ;;  %v1219_v20 = vld [vmem:[%s3971_s14 + $0x43] sm:$0x1]  ;;  %v6554_v49 = vadd.f32 %v6027_v58, %v12886_v38  ;;  %v1232_v58 = vld [vmem:[%s3971_s14 + $0xab] sm:$0x1] }
 0x231   : > { %12865 = vst [vmem:[#allocation95_spill] sm:$0xff] %v6497_v46  ;;  %v1218_v46 = vld [vmem:[%s3971_s14 + $0x3b] sm:$0x1]  ;;  %v1233_v38 = vld [vmem:[%s3971_s14 + $0xb3] sm:$0x1] }
 0x232   : > { %12867 = vst [vmem:[#allocation36_spill] sm:$0xff] %v6501_v51  ;;  %v6522_v51 = vadd.f32 %v6009_v45, %v12874_v18  ;;  %v12880_v45 = vld [vmem:[#allocation177_spill] sm:$0xff] }
 0x233   : > { %12869 = vst [vmem:[#allocation202_spill] sm:$0xff] %v6510_v7  ;;  %v12876_v7 = vld [vmem:[#allocation176_spill] sm:$0xff]  ;;  %v6539_v30 = vadd.f32 %v6018_v39, %v12880_v45  ;;  %v12882_v18 = vld [vmem:[#allocation65_spill] sm:$0xff]  ;;  %v12890_v45 = vld [vmem:[#allocation67_spill] sm:$0xff] }
 0x234   : > { %12871 = vst [vmem:[#allocation149_spill] sm:$0xff] %v6514_v8  ;;  %v6531_v2 = vadd.f32 %v6012_v40, %v12876_v7  ;;  %v1224_v8 = vld [vmem:[%s3971_s14 + $0x6b] sm:$0x1]  ;;  %v1225_v40 = vld [vmem:[%s3971_s14 + $0x73] sm:$0x1]  ;;  %v12884_v7 = vld [vmem:[#allocation178_spill] sm:$0xff] }
 0x235   : > { %12873 = vst [vmem:[#allocation96_spill] sm:$0xff] %v6518_v14  ;;  %v1223_v14 = vld [vmem:[%s3971_s14 + $0x63] sm:$0x1] }
 0x236   : > { %12875 = vst [vmem:[#allocation37_spill] sm:$0xff] %v6522_v51  ;;  %v6543_v51 = vadd.f32 %v6021_v52, %v12882_v18  ;;  %v6562_v52 = vadd.f32 %v6033_v53, %v12890_v45  ;;  %v1226_v18 = vld [vmem:[%s3971_s14 + $0x7b] sm:$0x1]  ;;  %v6577_v53 = vmul.f32 %v6506_v23, %v1212_v17  ;;  %v6580_v45 = vmul.f32 %v6506_v23, %v1213_v57 }
 0x237   : > { %12877 = vst [vmem:[#allocation203_spill] sm:$0xff] %v6531_v2  ;;  %v6550_v2 = vadd.f32 %v6024_v29, %v12884_v7  ;;  %v1228_v29 = vld [vmem:[%s3971_s14 + $0x8b] sm:$0x1]  ;;  %v1229_v7 = vld [vmem:[%s3971_s14 + $0x93] sm:$0x1]  ;;  %v6593_v17 = vmul.f32 %v6506_v23, %v1216_v16  ;;  %v6596_v57 = vmul.f32 %v6506_v23, %v1217_v50  ;;  %v6609_v16 = vmul.f32 %v6506_v23, %v1220_v48 }
 0x238   : > { %12879 = vst [vmem:[#allocation150_spill] sm:$0xff] %v6535_v6  ;;  %v12888_v6 = vld [vmem:[#allocation179_spill] sm:$0xff]  ;;  %v6612_v50 = vmul.f32 %v6506_v23, %v1221_v4  ;;  %v6625_v48 = vmul.f32 %v6506_v23, %v1224_v8  ;;  %v6628_v4 = vmul.f32 %v6506_v23, %v1225_v40  ;;  %v6641_v8 = vmul.f32 %v6506_v23, %v1228_v29 }
 0x239   : > { %12881 = vst [vmem:[#allocation97_spill] sm:$0xff] %v6539_v30  ;;  %v6558_v39 = vadd.f32 %v6030_v31, %v12888_v6  ;;  %v1231_v30 = vld [vmem:[%s3971_s14 + $0xa3] sm:$0x1]  ;;  %v1234_v31 = vld [vmem:[%s3971_s14 + $0xbb] sm:$0x1]  ;;  %v6574_v6 = vmul.f32 %v6506_v23, %v1211_v62  ;;  %v6590_v62 = vmul.f32 %v6506_v23, %v1215_v44  ;;  %v6606_v44 = vmul.f32 %v6506_v23, %v1219_v20 }
 0x23a   : > { %12883 = vst [vmem:[#allocation38_spill] sm:$0xff] %v6543_v51  ;;  %v1227_v51 = vld [vmem:[%s3971_s14 + $0x83] sm:$0x1]  ;;  %v6622_v20 = vmul.f32 %v6506_v23, %v1223_v14  ;;  %v6644_v40 = vmul.f32 %v6506_v23, %v1229_v7  ;;  %v6657_v29 = vmul.f32 %v6506_v23, %v1232_v58  ;;  %v6660_v7 = vmul.f32 %v6506_v23, %v1233_v38 }
 0x23b   : > { %12885 = vst [vmem:[#allocation204_spill] sm:$0xff] %v6550_v2  ;;  %v1230_v2 = vld [vmem:[%s3971_s14 + $0x9b] sm:$0x1]  ;;  %v6638_v14 = vmul.f32 %v6506_v23, %v1227_v51  ;;  %v6654_v51 = vmul.f32 %v6506_v23, %v1231_v30  ;;  %v6676_v38 = vmul.f32 %v6506_v23, %v1237_v60  ;;  %v6692_v60 = vmul.f32 %v6506_v23, %v1241_v32 }
 0x23c   : > { %12887 = vst [vmem:[#allocation151_spill] sm:$0xff] %v6554_v49  ;;  %v1236_v49 = vld [vmem:[%s3971_s14 + $0xcb] sm:$0x1]  ;;  %v6708_v32 = vmul.f32 %v6506_v23, %v1245_v0  ;;  %v6724_v0 = vmul.f32 %v6506_v23, %v1249_v15  ;;  %v6740_v15 = vmul.f32 %v6506_v23, %v1253_v35 }
 0x23d   : > { %12889 = vst [vmem:[#allocation98_spill] sm:$0xff] %v6558_v39  ;;  %v1235_v39 = vld [vmem:[%s3971_s14 + $0xc3] sm:$0x1]  ;;  %v6673_v58 = vmul.f32 %v6506_v23, %v1236_v49  ;;  %v6689_v49 = vmul.f32 %v6506_v23, %v1240_v63  ;;  %v6705_v63 = vmul.f32 %v6506_v23, %v1244_v59  ;;  %v6721_v59 = vmul.f32 %v6506_v23, %v1248_v21 }
 0x23e   : > { %12891 = vst [vmem:[#allocation39_spill] sm:$0xff] %v6562_v52  ;;  %v6583_v52 = vmul.f32 %v6506_v23, %v1214_v55  ;;  %v6599_v55 = vmul.f32 %v6506_v23, %v1218_v46  ;;  %v6615_v46 = vmul.f32 %v6506_v23, %v1222_v56  ;;  %v6631_v56 = vmul.f32 %v6506_v23, %v1226_v18 }
 0x23f   : > { %12893 = vst [vmem:[#allocation152_spill] sm:$0xff] %v6638_v14  ;;  %v6647_v18 = vmul.f32 %v6506_v23, %v1230_v2  ;;  %v6663_v2 = vmul.f32 %v6506_v23, %v1234_v31  ;;  %v1258_v14 = vld [vmem:[%s3971_s14 + $0x17b] sm:$0x1]  ;;  %v6670_v30 = vmul.f32 %v6506_v23, %v1235_v39  ;;  %v6679_v31 = vmul.f32 %v6506_v23, %v1238_v13 }
 0x240   : > { %12892 = vst [vmem:[#allocation205_spill] sm:$0xff] %v6631_v56  ;;  %v1254_v56 = vld [vmem:[%s3971_s14 + $0x15b] sm:$0x1]  ;;  %v6686_v39 = vmul.f32 %v6506_v23, %v1239_v37  ;;  %v6695_v13 = vmul.f32 %v6506_v23, %v1242_v43  ;;  %v6702_v37 = vmul.f32 %v6506_v23, %v1243_v5  ;;  %v6711_v43 = vmul.f32 %v6506_v23, %v1246_v24 }
 0x241   : > { %12894 = vst [vmem:[#allocation99_spill] sm:$0xff] %v6641_v8  ;;  %v1257_v8 = vld [vmem:[%s3971_s14 + $0x173] sm:$0x1]  ;;  %v6718_v5 = vmul.f32 %v6506_v23, %v1247_v12  ;;  %v6727_v24 = vmul.f32 %v6506_v23, %v1250_v42  ;;  %v6734_v12 = vmul.f32 %v6506_v23, %v1251_v41  ;;  %v6737_v21 = vmul.f32 %v6506_v23, %v1252_v36 }
 0x242   : > { %12895 = vst [vmem:[#allocation40_spill] sm:$0xff] %v6644_v40  ;;  %v1256_v40 = vld [vmem:[%s3971_s14 + $0x16b] sm:$0x1]  ;;  %v6743_v42 = vmul.f32 %v6506_v23, %v1254_v56  ;;  %v6756_v35 = vmul.f32 %v6506_v23, %v1257_v8  ;;  %v6759_v56 = vmul.f32 %v6506_v23, %v1258_v14 }
 0x243   : > { %12896 = vst [vmem:[#allocation206_spill] sm:$0xff] %v6647_v18  ;;  %v1255_v18 = vld [vmem:[%s3971_s14 + $0x163] sm:$0x1]  ;;  %v6753_v36 = vmul.f32 %v6506_v23, %v1256_v40 }
 0x244   : > { %12897 = vst [vmem:[#allocation153_spill] sm:$0xff] %v6654_v51  ;;  %v1262_v51 = vld [vmem:[%s3971_s14 + $0x19b] sm:$0x1]  ;;  %v6750_v41 = vmul.f32 %v6506_v23, %v1255_v18 }
 0x245   : > { %12898 = vst [vmem:[#allocation100_spill] sm:$0xff] %v6657_v29  ;;  %v1261_v29 = vld [vmem:[%s3971_s14 + $0x193] sm:$0x1]  ;;  %v6775_v14 = vmul.f32 %v6506_v23, %v1262_v51 }
 0x246   : > { %12899 = vst [vmem:[#allocation41_spill] sm:$0xff] %v6660_v7  ;;  %v1260_v7 = vld [vmem:[%s3971_s14 + $0x18b] sm:$0x1]  ;;  %v6772_v8 = vmul.f32 %v6506_v23, %v1261_v29 }
 0x247   : > { %12900 = vst [vmem:[#allocation101_spill] sm:$0xff] %v6663_v2  ;;  %v1259_v2 = vld [vmem:[%s3971_s14 + $0x183] sm:$0x1]  ;;  %v6769_v40 = vmul.f32 %v6506_v23, %v1260_v7 }
 0x248   : > { %12901 = vst [vmem:[#allocation154_spill] sm:$0xff] %v6670_v30  ;;  %v1266_v30 = vld [vmem:[%s3971_s14 + $0x1bb] sm:$0x1]  ;;  %v6766_v18 = vmul.f32 %v6506_v23, %v1259_v2 }
 0x249   : > { %12902 = vst [vmem:[#allocation42_spill] sm:$0xff] %v6673_v58  ;;  %v1265_v58 = vld [vmem:[%s3971_s14 + $0x1b3] sm:$0x1]  ;;  %v6791_v51 = vmul.f32 %v6506_v23, %v1266_v30 }
 0x24a   : > { %12903 = vst [vmem:[#allocation207_spill] sm:$0xff] %v6676_v38  ;;  %v1264_v38 = vld [vmem:[%s3971_s14 + $0x1ab] sm:$0x1]  ;;  %v6788_v29 = vmul.f32 %v6506_v23, %v1265_v58 }
 0x24b   : > { %12904 = vst [vmem:[#allocation155_spill] sm:$0xff] %v6679_v31  ;;  %v1263_v31 = vld [vmem:[%s3971_s14 + $0x1a3] sm:$0x1]  ;;  %v6785_v7 = vmul.f32 %v6506_v23, %v1264_v38 }
 0x24c   : > { %12905 = vst [vmem:[#allocation102_spill] sm:$0xff] %v6686_v39  ;;  %v1270_v39 = vld [vmem:[%s3971_s14 + $0x1db] sm:$0x1]  ;;  %v6782_v2 = vmul.f32 %v6506_v23, %v1263_v31 }
 0x24d   : > { %12906 = vst [vmem:[#allocation43_spill] sm:$0xff] %v6689_v49  ;;  %v1269_v49 = vld [vmem:[%s3971_s14 + $0x1d3] sm:$0x1]  ;;  %v6807_v30 = vmul.f32 %v6506_v23, %v1270_v39 }
 0x24e   : > { %12907 = vst [vmem:[#allocation208_spill] sm:$0xff] %v6692_v60  ;;  %v1268_v60 = vld [vmem:[%s3971_s14 + $0x1cb] sm:$0x1]  ;;  %v6804_v58 = vmul.f32 %v6506_v23, %v1269_v49 }
 0x24f   : > { %12908 = vst [vmem:[#allocation156_spill] sm:$0xff] %v6695_v13  ;;  %v1267_v13 = vld [vmem:[%s3971_s14 + $0x1c3] sm:$0x1]  ;;  %v6801_v38 = vmul.f32 %v6506_v23, %v1268_v60 }
 0x250   : > { %12909 = vst [vmem:[#allocation44_spill] sm:$0xff] %v6702_v37  ;;  %v1274_v37 = vld [vmem:[%s3971_s14 + $0x1fb] sm:$0x1]  ;;  %v6798_v31 = vmul.f32 %v6506_v23, %v1267_v13 }
 0x251   : > { %12910 = vst [vmem:[#allocation103_spill] sm:$0xff] %v6705_v63  ;;  %v1273_v63 = vld [vmem:[%s3971_s14 + $0x1f3] sm:$0x1]  ;;  %v6823_v39 = vmul.f32 %v6506_v23, %v1274_v37 }
 0x252   : > { %12911 = vst [vmem:[#allocation157_spill] sm:$0xff] %v6708_v32  ;;  %v1272_v32 = vld [vmem:[%s3971_s14 + $0x1eb] sm:$0x1]  ;;  %v6820_v49 = vmul.f32 %v6506_v23, %v1273_v63 }
 0x253   : > { %12912 = vst [vmem:[#allocation209_spill] sm:$0xff] %v6711_v43  ;;  %v1271_v43 = vld [vmem:[%s3971_s14 + $0x1e3] sm:$0x1]  ;;  %v6817_v60 = vmul.f32 %v6506_v23, %v1272_v32 }
 0x254   : > { %12913 = vst [vmem:[#allocation45_spill] sm:$0xff] %v6718_v5  ;;  %v1278_v5 = vld [vmem:[%s3971_s14 + $0x21b] sm:$0x1]  ;;  %v6814_v13 = vmul.f32 %v6506_v23, %v1271_v43 }
 0x255   : > { %12914 = vst [vmem:[#allocation104_spill] sm:$0xff] %v6721_v59  ;;  %v1277_v59 = vld [vmem:[%s3971_s14 + $0x213] sm:$0x1]  ;;  %v6839_v37 = vmul.f32 %v6506_v23, %v1278_v5 }
 0x256   : > { %12915 = vst [vmem:[#allocation158_spill] sm:$0xff] %v6724_v0  ;;  %v1276_v0 = vld [vmem:[%s3971_s14 + $0x20b] sm:$0x1]  ;;  %v6836_v63 = vmul.f32 %v6506_v23, %v1277_v59 }
 0x257   : > { %12916 = vst [vmem:[#allocation46_spill] sm:$0xff] %v6727_v24  ;;  %v1275_v24 = vld [vmem:[%s3971_s14 + $0x203] sm:$0x1]  ;;  %v6833_v32 = vmul.f32 %v6506_v23, %v1276_v0 }
 0x258   : > { %12917 = vst [vmem:[#allocation105_spill] sm:$0xff] %v6734_v12  ;;  %v1282_v12 = vld [vmem:[%s3971_s14 + $0x23b] sm:$0x1]  ;;  %v6830_v43 = vmul.f32 %v6506_v23, %v1275_v24 }
 0x259   : > { %12918 = vst [vmem:[#allocation159_spill] sm:$0xff] %v6737_v21  ;;  %v1281_v21 = vld [vmem:[%s3971_s14 + $0x233] sm:$0x1]  ;;  %v6855_v5 = vmul.f32 %v6506_v23, %v1282_v12 }
 0x25a   : > { %12919 = vst [vmem:[#allocation106_spill] sm:$0xff] %v6740_v15  ;;  %v1280_v15 = vld [vmem:[%s3971_s14 + $0x22b] sm:$0x1]  ;;  %v6852_v59 = vmul.f32 %v6506_v23, %v1281_v21 }
 0x25b   : > { %12920 = vst [vmem:[#allocation47_spill] sm:$0xff] %v6743_v42  ;;  %v1279_v42 = vld [vmem:[%s3971_s14 + $0x223] sm:$0x1]  ;;  %v6849_v0 = vmul.f32 %v6506_v23, %v1280_v15 }
 0x25c   : > { %12921 = vst [vmem:[#allocation107_spill] sm:$0xff] %v6750_v41  ;;  %v1286_v41 = vld [vmem:[%s3971_s14 + $0x25b] sm:$0x1]  ;;  %v6846_v24 = vmul.f32 %v6506_v23, %v1279_v42 }
 0x25d   : > { %12922 = vst [vmem:[#allocation160_spill] sm:$0xff] %v6753_v36  ;;  %v1285_v36 = vld [vmem:[%s3971_s14 + $0x253] sm:$0x1]  ;;  %v6871_v12 = vmul.f32 %v6506_v23, %v1286_v41  ;;  %v1311_v41 = vld [vmem:[%s3971_s14 + $0x323] sm:$0x1] }
 0x25e   : > { %12923 = vst [vmem:[#allocation48_spill] sm:$0xff] %v6756_v35  ;;  %v1284_v35 = vld [vmem:[%s3971_s14 + $0x24b] sm:$0x1]  ;;  %v6868_v21 = vmul.f32 %v6506_v23, %v1285_v36 }
 0x25f   : > { %12924 = vst [vmem:[#allocation210_spill] sm:$0xff] %v6759_v56  ;;  %v1283_v56 = vld [vmem:[%s3971_s14 + $0x243] sm:$0x1]  ;;  %v6865_v15 = vmul.f32 %v6506_v23, %v1284_v35 }
 0x260   : > { %12925 = vst [vmem:[#allocation161_spill] sm:$0xff] %v6766_v18  ;;  %v1290_v18 = vld [vmem:[%s3971_s14 + $0x27b] sm:$0x1]  ;;  %v6862_v42 = vmul.f32 %v6506_v23, %v1283_v56 }
 0x261   : > { %12926 = vst [vmem:[#allocation108_spill] sm:$0xff] %v6769_v40  ;;  %v1289_v40 = vld [vmem:[%s3971_s14 + $0x273] sm:$0x1]  ;;  %v6887_v36 = vmul.f32 %v6506_v23, %v1290_v18 }
 0x262   : > { %12927 = vst [vmem:[#allocation49_spill] sm:$0xff] %v6772_v8  ;;  %v1288_v8 = vld [vmem:[%s3971_s14 + $0x26b] sm:$0x1]  ;;  %v6884_v35 = vmul.f32 %v6506_v23, %v1289_v40  ;;  %v1315_v40 = vld [vmem:[%s3971_s14 + $0x343] sm:$0x1] }
 0x263   : > { %12928 = vst [vmem:[#allocation109_spill] sm:$0xff] %v6775_v14  ;;  %v1287_v14 = vld [vmem:[%s3971_s14 + $0x263] sm:$0x1]  ;;  %v6881_v56 = vmul.f32 %v6506_v23, %v1288_v8 }
 0x264   : > { %12929 = vst [vmem:[#allocation162_spill] sm:$0xff] %v6782_v2  ;;  %v1294_v2 = vld [vmem:[%s3971_s14 + $0x29b] sm:$0x1]  ;;  %v6878_v34 = vmul.f32 %v6506_v23, %v1287_v14 }
 0x265   : > { %12930 = vst [vmem:[#allocation50_spill] sm:$0xff] %v6785_v7  ;;  %v1293_v7 = vld [vmem:[%s3971_s14 + $0x293] sm:$0x1]  ;;  %v6903_v18 = vmul.f32 %v6506_v23, %v1294_v2  ;;  %v1318_v2 = vld [vmem:[%s3971_s14 + $0x35b] sm:$0x1] }
 0x266   : > { %12931 = vst [vmem:[#allocation110_spill] sm:$0xff] %v6788_v29  ;;  %v1292_v29 = vld [vmem:[%s3971_s14 + $0x28b] sm:$0x1]  ;;  %v6900_v8 = vmul.f32 %v6506_v23, %v1293_v7 }
 0x267   : > { %12932 = vst [vmem:[#allocation163_spill] sm:$0xff] %v6791_v51  ;;  %v1291_v51 = vld [vmem:[%s3971_s14 + $0x283] sm:$0x1]  ;;  %v6897_v14 = vmul.f32 %v6506_v23, %v1292_v29 }
 0x268   : > { %12933 = vst [vmem:[#allocation111_spill] sm:$0xff] %v6798_v31  ;;  %v1298_v31 = vld [vmem:[%s3971_s14 + $0x2bb] sm:$0x1] }
 0x269   : > { %12934 = vst [vmem:[#allocation51_spill] sm:$0xff] %v6801_v38  ;;  %v1297_v38 = vld [vmem:[%s3971_s14 + $0x2b3] sm:$0x1]  ;;  %v6918_v7 = vmul.f32 %v6506_v23, %v1298_v31 }
 0x26a   : > { %12935 = vst [vmem:[#allocation112_spill] sm:$0xff] %v6804_v58  ;;  %v1296_v58 = vld [vmem:[%s3971_s14 + $0x2ab] sm:$0x1]  ;;  %v6915_v29 = vmul.f32 %v6506_v23, %v1297_v38  ;;  %v1321_v31 = vld [vmem:[%s3971_s14 + $0x373] sm:$0x1] }
 0x26b   : > { %12936 = vst [vmem:[#allocation164_spill] sm:$0xff] %v6807_v30  ;;  %v1295_v30 = vld [vmem:[%s3971_s14 + $0x2a3] sm:$0x1] }
 0x26c   : > { %12937 = vst [vmem:[#allocation52_spill] sm:$0xff] %v6814_v13  ;;  %v1302_v13 = vld [vmem:[%s3971_s14 + $0x2db] sm:$0x1] }
 0x26d   : > { %12938 = vst [vmem:[#allocation113_spill] sm:$0xff] %v6817_v60  ;;  %v1301_v60 = vld [vmem:[%s3971_s14 + $0x2d3] sm:$0x1]  ;;  %v6933_v38 = vmul.f32 %v6506_v23, %v1302_v13  ;;  %v1324_v13 = vld [vmem:[%s3971_s14 + $0x38b] sm:$0x1] }
 0x26e   : > { %12939 = vst [vmem:[#allocation165_spill] sm:$0xff] %v6820_v49  ;;  %v1300_v49 = vld [vmem:[%s3971_s14 + $0x2cb] sm:$0x1] }
 0x26f   : > { %12940 = vst [vmem:[#allocation114_spill] sm:$0xff] %v6823_v39  ;;  %v1299_v39 = vld [vmem:[%s3971_s14 + $0x2c3] sm:$0x1] }
 0x270   : > { %12941 = vst [vmem:[#allocation53_spill] sm:$0xff] %v6830_v43  ;;  %v1306_v43 = vld [vmem:[%s3971_s14 + $0x2fb] sm:$0x1] }
 0x271   : > { %12942 = vst [vmem:[#allocation115_spill] sm:$0xff] %v6833_v32  ;;  %v1305_v32 = vld [vmem:[%s3971_s14 + $0x2f3] sm:$0x1] }
 0x272   : > { %12943 = vst [vmem:[#allocation166_spill] sm:$0xff] %v6836_v63  ;;  %v1304_v63 = vld [vmem:[%s3971_s14 + $0x2eb] sm:$0x1] }
 0x273   : > { %12944 = vst [vmem:[#allocation116_spill] sm:$0xff] %v6839_v37  ;;  %v1303_v37 = vld [vmem:[%s3971_s14 + $0x2e3] sm:$0x1] }
 0x274   : > { %12945 = vst [vmem:[#allocation54_spill] sm:$0xff] %v6846_v24  ;;  %v1310_v24 = vld [vmem:[%s3971_s14 + $0x31b] sm:$0x1] }
 0x275   : > { %12946 = vst [vmem:[#allocation117_spill] sm:$0xff] %v6849_v0  ;;  %v1309_v0 = vld [vmem:[%s3971_s14 + $0x313] sm:$0x1] }
 0x276   : > { %12947 = vst [vmem:[#allocation167_spill] sm:$0xff] %v6852_v59  ;;  %v1308_v59 = vld [vmem:[%s3971_s14 + $0x30b] sm:$0x1] }
 0x277   : > { %12948 = vst [vmem:[#allocation118_spill] sm:$0xff] %v6855_v5  ;;  %v1307_v5 = vld [vmem:[%s3971_s14 + $0x303] sm:$0x1] }
 0x278   : > { %12949 = vst [vmem:[#allocation55_spill] sm:$0xff] %v6862_v42  ;;  %v6894_v42 = vmul.f32 %v6506_v23, %v1291_v51  ;;  %v6912_v51 = vmul.f32 %v6506_v23, %v1296_v58  ;;  %v6930_v58 = vmul.f32 %v6506_v23, %v1301_v60  ;;  %v6948_v60 = vmul.f32 %v6506_v23, %v1306_v43  ;;  %v1327_v43 = vld [vmem:[%s3971_s14 + $0x3a3] sm:$0x1] }
 0x279   : > { %12950 = vst [vmem:[#allocation119_spill] sm:$0xff] %v6865_v15  ;;  %v1314_v15 = vld [vmem:[%s3971_s14 + $0x33b] sm:$0x1] }
 0x27a   : > { %12951 = vst [vmem:[#allocation168_spill] sm:$0xff] %v6868_v21  ;;  %v1313_v21 = vld [vmem:[%s3971_s14 + $0x333] sm:$0x1] }
 0x27b   : > { %12952 = vst [vmem:[#allocation56_spill] sm:$0xff] %v6871_v12  ;;  %v1312_v12 = vld [vmem:[%s3971_s14 + $0x32b] sm:$0x1] }
 0x27c   : > { %12953 = vst [vmem:[#allocation120_spill] sm:$0xff] %v6881_v56  ;;  %v6909_v56 = vmul.f32 %v6506_v23, %v1295_v30  ;;  %v6927_v30 = vmul.f32 %v6506_v23, %v1300_v49  ;;  %v6945_v49 = vmul.f32 %v6506_v23, %v1305_v32  ;;  %v6963_v32 = vmul.f32 %v6506_v23, %v1310_v24  ;;  %v1330_v24 = vld [vmem:[%s3971_s14 + $0x3bb] sm:$0x1] }
 0x27d   : > { %12954 = vst [vmem:[#allocation169_spill] sm:$0xff] %v6884_v35  ;;  %v1317_v35 = vld [vmem:[%s3971_s14 + $0x353] sm:$0x1] }
 0x27e   : > { %12955 = vst [vmem:[#allocation121_spill] sm:$0xff] %v6887_v36  ;;  %v1316_v36 = vld [vmem:[%s3971_s14 + $0x34b] sm:$0x1] }
 0x27f   : > { %12956 = vst [vmem:[#allocation57_spill] sm:$0xff] %v6897_v14  ;;  %v6924_v14 = vmul.f32 %v6506_v23, %v1299_v39  ;;  %v6942_v39 = vmul.f32 %v6506_v23, %v1304_v63  ;;  %v6960_v63 = vmul.f32 %v6506_v23, %v1309_v0  ;;  %v6978_v0 = vmul.f32 %v6506_v23, %v1314_v15  ;;  %v1334_v15 = vld [vmem:[%s3971_s14 + $0x3db] sm:$0x1] }
 0x280   : > { %12957 = vst [vmem:[#allocation122_spill] sm:$0xff] %v6900_v8  ;;  %v1320_v8 = vld [vmem:[%s3971_s14 + $0x36b] sm:$0x1] }
 0x281   : > { %12958 = vst [vmem:[#allocation170_spill] sm:$0xff] %v6903_v18  ;;  %v1319_v18 = vld [vmem:[%s3971_s14 + $0x363] sm:$0x1] }
 0x282   : > { %12959 = vst [vmem:[#allocation58_spill] sm:$0xff] %v6912_v51  ;;  %v6939_v51 = vmul.f32 %v6506_v23, %v1303_v37  ;;  %v6957_v37 = vmul.f32 %v6506_v23, %v1308_v59  ;;  %v6975_v59 = vmul.f32 %v6506_v23, %v1313_v21  ;;  %v6993_v21 = vmul.f32 %v6506_v23, %v1318_v2 }
 0x283   : > { %12960 = vst [vmem:[#allocation171_spill] sm:$0xff] %v6915_v29  ;;  %v1323_v29 = vld [vmem:[%s3971_s14 + $0x383] sm:$0x1] }
 0x284   : > { %12961 = vst [vmem:[#allocation59_spill] sm:$0xff] %v6918_v7  ;;  %v1322_v7 = vld [vmem:[%s3971_s14 + $0x37b] sm:$0x1]  ;;  %v7014_v2 = vmul.f32 %v6506_v23, %v1323_v29  ;;  %v7035_v29 = vmul.f32 %v6506_v23, %v1330_v24 }
 0x285   : > { %12962 = vst [vmem:[#allocation123_spill] sm:$0xff] %v6927_v30  ;;  %v6954_v30 = vmul.f32 %v6506_v23, %v1307_v5  ;;  %v6972_v5 = vmul.f32 %v6506_v23, %v1312_v12  ;;  %v6990_v12 = vmul.f32 %v6506_v23, %v1317_v35  ;;  %v1336_v35 = vld [vmem:[%s3971_s14 + $0x3eb] sm:$0x1] }
 0x286   : > { %12963 = vst [vmem:[#allocation172_spill] sm:$0xff] %v6930_v58  ;;  %v1326_v58 = vld [vmem:[%s3971_s14 + $0x39b] sm:$0x1] }
 0x287   : > { %12964 = vst [vmem:[#allocation60_spill] sm:$0xff] %v6933_v38  ;;  %v1325_v38 = vld [vmem:[%s3971_s14 + $0x393] sm:$0x1] }
 0x288   : > { %12965 = vst [vmem:[#allocation173_spill] sm:$0xff] %v6942_v39  ;;  %v6969_v39 = vmul.f32 %v6506_v23, %v1311_v41  ;;  %v6987_v41 = vmul.f32 %v6506_v23, %v1316_v36  ;;  %v7008_v36 = vmul.f32 %v6506_v23, %v1322_v7 }
 0x289   : > { %12966 = vst [vmem:[#allocation61_spill] sm:$0xff] %v6945_v49  ;;  %v1329_v49 = vld [vmem:[%s3971_s14 + $0x3b3] sm:$0x1] }
 0x28a   : > { %12967 = vst [vmem:[#allocation174_spill] sm:$0xff] %v6948_v60  ;;  %v1328_v60 = vld [vmem:[%s3971_s14 + $0x3ab] sm:$0x1] }
 0x28b   : > { %12968 = vst [vmem:[#allocation62_spill] sm:$0xff] %v6957_v37  ;;  %v6984_v37 = vmul.f32 %v6506_v23, %v1315_v40  ;;  %v7005_v40 = vmul.f32 %v6506_v23, %v1321_v31  ;;  %v7026_v31 = vmul.f32 %v6506_v23, %v1327_v43  ;;  %v7029_v7 = vmul.f32 %v6506_v23, %v1328_v60 }
 0x28c   : > { %12969 = vst [vmem:[#allocation175_spill] sm:$0xff] %v6960_v63  ;;  %v1332_v63 = vld [vmem:[%s3971_s14 + $0x3cb] sm:$0x1]  ;;  %v7047_v43 = vmul.f32 %v6506_v23, %v1334_v15  ;;  %v7075_v15 = vadd.f32 %v6583_v52, %v6049_v9  ;;  %v7095_v9 = vadd.f32 %v6606_v44, %v6069_v1  ;;  %v7115_v1 = vadd.f32 %v6625_v48, %v6089_v28  ;;  %v12991_v44 = vld [vmem:[#allocation12_spill] sm:$0xff]  ;;  %v12997_v48 = vld [vmem:[#allocation125_spill] sm:$0xff] }
 0x28d   : > { %12970 = vst [vmem:[#allocation63_spill] sm:$0xff] %v6963_v32  ;;  %v1331_v32 = vld [vmem:[%s3971_s14 + $0x3c3] sm:$0x1]  ;;  %v12979_v52 = vld [vmem:[#allocation11_spill] sm:$0xff] }
 0x28e   : > { %12971 = vst [vmem:[#allocation176_spill] sm:$0xff] %v6969_v39  ;;  %v7002_v39 = vmul.f32 %v6506_v23, %v1320_v8  ;;  %v7023_v8 = vmul.f32 %v6506_v23, %v1326_v58 }
 0x28f   : > { %12972 = vst [vmem:[#allocation64_spill] sm:$0xff] %v6972_v5  ;;  %v6999_v5 = vmul.f32 %v6506_v23, %v1319_v18  ;;  %v7020_v18 = vmul.f32 %v6506_v23, %v1325_v38  ;;  %v7041_v38 = vmul.f32 %v6506_v23, %v1332_v63  ;;  %v7063_v63 = vadd.f32 %v6574_v6, %v6037_v54  ;;  %v12980_v6 = vld [vmem:[#allocation205_spill] sm:$0xff] }
 0x290   : > { %12973 = vst [vmem:[#allocation177_spill] sm:$0xff] %v6975_v59  ;;  %v1333_v59 = vld [vmem:[%s3971_s14 + $0x3d3] sm:$0x1]  ;;  %v7083_v54 = vadd.f32 %v6593_v17, %v6057_v19  ;;  %v7103_v19 = vadd.f32 %v6612_v50, %v6077_v25  ;;  %v7123_v25 = vadd.f32 %v12980_v6, %v12979_v52  ;;  %v12986_v17 = vld [vmem:[#allocation99_spill] sm:$0xff]  ;;  %v12994_v50 = vld [vmem:[#allocation181_spill] sm:$0xff] }
 0x291   : > { %12974 = vst [vmem:[#allocation65_spill] sm:$0xff] %v6978_v0  ;;  %v1335_v0 = vld [vmem:[%s3971_s14 + $0x3e3] sm:$0x1]  ;;  %v7044_v58 = vmul.f32 %v6506_v23, %v1333_v59  ;;  %v7067_v59 = vadd.f32 %v6577_v53, %v6041_v61  ;;  %v7087_v61 = vadd.f32 %v6596_v57, %v6061_v11  ;;  %v7107_v11 = vadd.f32 %v6615_v46, %v6081_v26  ;;  %v12982_v53 = vld [vmem:[#allocation180_spill] sm:$0xff]  ;;  %v12995_v46 = vld [vmem:[#allocation153_spill] sm:$0xff] }
 0x292   : > { %12975 = vst [vmem:[#allocation178_spill] sm:$0xff] %v6987_v41  ;;  %v1338_v41 = vld [vmem:[%s3971_s14 + $0x3fb] sm:$0x1]  ;;  %v7050_v60 = vmul.f32 %v6506_v23, %v1335_v0  ;;  %v7071_v0 = vadd.f32 %v6580_v45, %v6045_v3  ;;  %v7091_v3 = vadd.f32 %v6599_v55, %v6065_v10  ;;  %v7111_v10 = vadd.f32 %v6622_v20, %v6085_v27  ;;  %v12983_v45 = vld [vmem:[#allocation152_spill] sm:$0xff] }
 0x293   : > { %12976 = vst [vmem:[#allocation66_spill] sm:$0xff] %v6990_v12  ;;  %v1337_v12 = vld [vmem:[%s3971_s14 + $0x3f3] sm:$0x1]  ;;  %v7127_v26 = vadd.f32 %v12983_v45, %v12982_v53  ;;  %v7143_v20 = vadd.f32 %v12995_v46, %v12994_v50  ;;  %v13003_v6 = vld [vmem:[#allocation13_spill] sm:$0xff]  ;;  %v13012_v50 = vld [vmem:[#allocation70_spill] sm:$0xff] }
 0x294   : > { %12977 = vst [vmem:[#allocation179_spill] sm:$0xff] %v6993_v21  ;;  %v7017_v21 = vmul.f32 %v6506_v23, %v1324_v13  ;;  %v7038_v13 = vmul.f32 %v6506_v23, %v1331_v32  ;;  %v7056_v24 = vmul.f32 %v6506_v23, %v1337_v12  ;;  %v7059_v32 = vmul.f32 %v6506_v23, %v1338_v41  ;;  %v12988_v57 = vld [vmem:[#allocation68_spill] sm:$0xff]  ;;  %v13000_v12 = vld [vmem:[#allocation69_spill] sm:$0xff]  ;;  %v13013_v46 = vld [vmem:[#allocation207_spill] sm:$0xff] }
 0x295   : > { %12978 = vst [vmem:[#allocation67_spill] sm:$0xff] %v7008_v36  ;;  %v7032_v36 = vmul.f32 %v6506_v23, %v1329_v49  ;;  %v7053_v49 = vmul.f32 %v6506_v23, %v1336_v35  ;;  %v7079_v23 = vadd.f32 %v6590_v62, %v6053_v22  ;;  %v7099_v22 = vadd.f32 %v6609_v16, %v6073_v47  ;;  %v12985_v62 = vld [vmem:[#allocation124_spill] sm:$0xff]  ;;  %v12992_v16 = vld [vmem:[#allocation206_spill] sm:$0xff]  ;;  %v13001_v35 = vld [vmem:[#allocation41_spill] sm:$0xff] }
 0x296   : > { %v7119_v47 = vadd.f32 %v6628_v4, %v6093_v33  ;;  %12981 = vst [vmem:[#allocation11_spill] sm:$0xff] %v7123_v25  ;;  %v7131_v27 = vadd.f32 %v12986_v17, %v12985_v62  ;;  %v12989_v55 = vld [vmem:[#allocation40_spill] sm:$0xff]  ;;  %v7139_v33 = vadd.f32 %v12992_v16, %v12991_v44  ;;  %v7151_v52 = vadd.f32 %v13001_v35, %v13000_v12  ;;  %v13004_v53 = vld [vmem:[#allocation101_spill] sm:$0xff]  ;;  %v13006_v62 = vld [vmem:[#allocation182_spill] sm:$0xff] }
 0x297   : > { %12984 = vst [vmem:[#allocation205_spill] sm:$0xff] %v7127_v26  ;;  %v7135_v28 = vadd.f32 %v12989_v55, %v12988_v57  ;;  %v12998_v4 = vld [vmem:[#allocation100_spill] sm:$0xff]  ;;  %v7155_v45 = vadd.f32 %v13004_v53, %v13003_v6  ;;  %v13007_v17 = vld [vmem:[#allocation154_spill] sm:$0xff]  ;;  %v13018_v35 = vld [vmem:[#allocation183_spill] sm:$0xff] }
 0x298   : > { %12987 = vst [vmem:[#allocation180_spill] sm:$0xff] %v7131_v27  ;;  %v7147_v41 = vadd.f32 %v12998_v4, %v12997_v48  ;;  %v7159_v57 = vadd.f32 %v13007_v17, %v13006_v62  ;;  %v13009_v55 = vld [vmem:[#allocation126_spill] sm:$0xff]  ;;  %v7167_v48 = vadd.f32 %v13013_v46, %v13012_v50  ;;  %v13021_v53 = vld [vmem:[#allocation127_spill] sm:$0xff]  ;;  %v13030_v46 = vld [vmem:[#allocation184_spill] sm:$0xff] }
 0x299   : > { %12990 = vst [vmem:[#allocation152_spill] sm:$0xff] %v7135_v28  ;;  %v13010_v44 = vld [vmem:[#allocation42_spill] sm:$0xff]  ;;  %v13024_v17 = vld [vmem:[#allocation71_spill] sm:$0xff]  ;;  %v1639_v26 = vld [vmem:[%s3971_s14 + $0x154] sm:$0x1] }
 0x29a   : > { %12993 = vst [vmem:[#allocation124_spill] sm:$0xff] %v7139_v33  ;;  %v7163_v16 = vadd.f32 %v13010_v44, %v13009_v55  ;;  %v13015_v4 = vld [vmem:[#allocation14_spill] sm:$0xff]  ;;  %v13027_v44 = vld [vmem:[#allocation15_spill] sm:$0xff]  ;;  %v1636_v33 = vld [vmem:[%s3971_s14 + $0x13c] sm:$0x1] }
 0x29b   : > { %12996 = vst [vmem:[#allocation99_spill] sm:$0xff] %v7143_v20  ;;  %v1635_v20 = vld [vmem:[%s3971_s14 + $0x134] sm:$0x1]  ;;  %v1637_v28 = vld [vmem:[%s3971_s14 + $0x144] sm:$0x1] }
 0x29c   : > { %12999 = vst [vmem:[#allocation68_spill] sm:$0xff] %v7147_v41  ;;  %v13016_v41 = vld [vmem:[#allocation155_spill] sm:$0xff] }
 0x29d   : > { %13002 = vst [vmem:[#allocation40_spill] sm:$0xff] %v7151_v52  ;;  %v7171_v12 = vadd.f32 %v13016_v41, %v13015_v4  ;;  %v13019_v52 = vld [vmem:[#allocation102_spill] sm:$0xff]  ;;  %v13033_v4 = vld [vmem:[#allocation128_spill] sm:$0xff]  ;;  %v1638_v27 = vld [vmem:[%s3971_s14 + $0x14c] sm:$0x1] }
 0x29e   : > { %13005 = vst [vmem:[#allocation12_spill] sm:$0xff] %v7155_v45  ;;  %v7175_v6 = vadd.f32 %v13019_v52, %v13018_v35  ;;  %v13022_v45 = vld [vmem:[#allocation43_spill] sm:$0xff]  ;;  %v13036_v35 = vld [vmem:[#allocation72_spill] sm:$0xff] }
 0x29f   : > { %13008 = vst [vmem:[#allocation206_spill] sm:$0xff] %v7159_v57  ;;  %v7179_v62 = vadd.f32 %v13022_v45, %v13021_v53  ;;  %v13025_v57 = vld [vmem:[#allocation208_spill] sm:$0xff] }
 0x2a0   : > { %13011 = vst [vmem:[#allocation181_spill] sm:$0xff] %v7163_v16  ;;  %v7183_v55 = vadd.f32 %v13025_v57, %v13024_v17  ;;  %v13028_v16 = vld [vmem:[#allocation156_spill] sm:$0xff]  ;;  %v13042_v17 = vld [vmem:[#allocation73_spill] sm:$0xff] }
 0x2a1   : > { %13014 = vst [vmem:[#allocation153_spill] sm:$0xff] %v7167_v48  ;;  %v7187_v50 = vadd.f32 %v13028_v16, %v13027_v44  ;;  %v13031_v48 = vld [vmem:[#allocation44_spill] sm:$0xff]  ;;  %v13045_v44 = vld [vmem:[#allocation129_spill] sm:$0xff] }
 0x2a2   : > { %13017 = vst [vmem:[#allocation125_spill] sm:$0xff] %v7171_v12  ;;  %v7191_v41 = vadd.f32 %v13031_v48, %v13030_v46  ;;  %v13034_v12 = vld [vmem:[#allocation103_spill] sm:$0xff]  ;;  %v13039_v53 = vld [vmem:[#allocation16_spill] sm:$0xff]  ;;  %v13048_v46 = vld [vmem:[#allocation185_spill] sm:$0xff] }
 0x2a3   : > { %13020 = vst [vmem:[#allocation100_spill] sm:$0xff] %v7175_v6  ;;  %v7195_v52 = vadd.f32 %v13034_v12, %v13033_v4  ;;  %v13037_v6 = vld [vmem:[#allocation157_spill] sm:$0xff] }
 0x2a4   : > { %13023 = vst [vmem:[#allocation69_spill] sm:$0xff] %v7179_v62  ;;  %v7199_v45 = vadd.f32 %v13037_v6, %v13036_v35  ;;  %v13040_v62 = vld [vmem:[#allocation209_spill] sm:$0xff]  ;;  %v13054_v35 = vld [vmem:[#allocation74_spill] sm:$0xff] }
 0x2a5   : > { %13026 = vst [vmem:[#allocation41_spill] sm:$0xff] %v7183_v55  ;;  %v7203_v57 = vadd.f32 %v13040_v62, %v13039_v53  ;;  %v13043_v55 = vld [vmem:[#allocation45_spill] sm:$0xff]  ;;  %v13057_v53 = vld [vmem:[#allocation130_spill] sm:$0xff] }
 0x2a6   : > { %13029 = vst [vmem:[#allocation13_spill] sm:$0xff] %v7187_v50  ;;  %v7207_v16 = vadd.f32 %v13043_v55, %v13042_v17  ;;  %v13046_v50 = vld [vmem:[#allocation104_spill] sm:$0xff]  ;;  %v13051_v4 = vld [vmem:[#allocation17_spill] sm:$0xff]  ;;  %v13060_v17 = vld [vmem:[#allocation186_spill] sm:$0xff] }
 0x2a7   : > { %13032 = vst [vmem:[#allocation101_spill] sm:$0xff] %v7191_v41  ;;  %v7211_v48 = vadd.f32 %v13046_v50, %v13045_v44  ;;  %v13049_v41 = vld [vmem:[#allocation158_spill] sm:$0xff] }
 0x2a8   : > { %13035 = vst [vmem:[#allocation182_spill] sm:$0xff] %v7195_v52  ;;  %v7215_v12 = vadd.f32 %v13049_v41, %v13048_v46  ;;  %v13052_v52 = vld [vmem:[#allocation46_spill] sm:$0xff]  ;;  %v13066_v46 = vld [vmem:[#allocation75_spill] sm:$0xff] }
 0x2a9   : > { %13038 = vst [vmem:[#allocation154_spill] sm:$0xff] %v7199_v45  ;;  %v7219_v6 = vadd.f32 %v13052_v52, %v13051_v4  ;;  %v13055_v45 = vld [vmem:[#allocation105_spill] sm:$0xff]  ;;  %v13063_v44 = vld [vmem:[#allocation18_spill] sm:$0xff]  ;;  %v13069_v4 = vld [vmem:[#allocation131_spill] sm:$0xff] }
 0x2aa   : > { %13041 = vst [vmem:[#allocation126_spill] sm:$0xff] %v7203_v57  ;;  %v7223_v62 = vadd.f32 %v13055_v45, %v13054_v35  ;;  %v13058_v57 = vld [vmem:[#allocation159_spill] sm:$0xff] }
 0x2ab   : > { %13044 = vst [vmem:[#allocation42_spill] sm:$0xff] %v7207_v16  ;;  %v7227_v55 = vadd.f32 %v13058_v57, %v13057_v53  ;;  %v13061_v16 = vld [vmem:[#allocation106_spill] sm:$0xff]  ;;  %v13072_v35 = vld [vmem:[#allocation187_spill] sm:$0xff] }
 0x2ac   : > { %13047 = vst [vmem:[#allocation70_spill] sm:$0xff] %v7211_v48  ;;  %v7231_v50 = vadd.f32 %v13061_v16, %v13060_v17  ;;  %v13064_v48 = vld [vmem:[#allocation47_spill] sm:$0xff]  ;;  %v13078_v17 = vld [vmem:[#allocation76_spill] sm:$0xff] }
 0x2ad   : > { %13050 = vst [vmem:[#allocation207_spill] sm:$0xff] %v7215_v12  ;;  %v7235_v41 = vadd.f32 %v13064_v48, %v13063_v44  ;;  %v13067_v12 = vld [vmem:[#allocation107_spill] sm:$0xff]  ;;  %v13081_v44 = vld [vmem:[#allocation132_spill] sm:$0xff] }
 0x2ae   : > { %13053 = vst [vmem:[#allocation14_spill] sm:$0xff] %v7219_v6  ;;  %v7239_v52 = vadd.f32 %v13067_v12, %v13066_v46  ;;  %v13070_v6 = vld [vmem:[#allocation160_spill] sm:$0xff]  ;;  %v13075_v53 = vld [vmem:[#allocation19_spill] sm:$0xff]  ;;  %v13084_v46 = vld [vmem:[#allocation77_spill] sm:$0xff] }
 0x2af   : > { %13056 = vst [vmem:[#allocation155_spill] sm:$0xff] %v7223_v62  ;;  %v7243_v45 = vadd.f32 %v13070_v6, %v13069_v4  ;;  %v13073_v62 = vld [vmem:[#allocation48_spill] sm:$0xff] }
 0x2b0   : > { %13059 = vst [vmem:[#allocation183_spill] sm:$0xff] %v7227_v55  ;;  %v7247_v57 = vadd.f32 %v13073_v62, %v13072_v35  ;;  %v13076_v55 = vld [vmem:[#allocation210_spill] sm:$0xff]  ;;  %v13087_v4 = vld [vmem:[#allocation20_spill] sm:$0xff] }
 0x2b1   : > { %13062 = vst [vmem:[#allocation102_spill] sm:$0xff] %v7231_v50  ;;  %v7251_v16 = vadd.f32 %v13076_v55, %v13075_v53  ;;  %v13079_v50 = vld [vmem:[#allocation161_spill] sm:$0xff]  ;;  %v13090_v35 = vld [vmem:[#allocation188_spill] sm:$0xff] }
 0x2b2   : > { %13065 = vst [vmem:[#allocation127_spill] sm:$0xff] %v7235_v41  ;;  %v7255_v48 = vadd.f32 %v13079_v50, %v13078_v17  ;;  %v13082_v41 = vld [vmem:[#allocation108_spill] sm:$0xff]  ;;  %v13093_v53 = vld [vmem:[#allocation133_spill] sm:$0xff]  ;;  %v13096_v17 = vld [vmem:[#allocation78_spill] sm:$0xff] }
 0x2b3   : > { %13068 = vst [vmem:[#allocation43_spill] sm:$0xff] %v7239_v52  ;;  %v7259_v12 = vadd.f32 %v13082_v41, %v13081_v44  ;;  %v13085_v52 = vld [vmem:[#allocation49_spill] sm:$0xff] }
 0x2b4   : > { %13071 = vst [vmem:[#allocation71_spill] sm:$0xff] %v7243_v45  ;;  %v7263_v6 = vadd.f32 %v13085_v52, %v13084_v46  ;;  %v13088_v45 = vld [vmem:[#allocation109_spill] sm:$0xff] }
 0x2b5   : > { %13074 = vst [vmem:[#allocation208_spill] sm:$0xff] %v7247_v57  ;;  %v7267_v62 = vadd.f32 %v13088_v45, %v13087_v4  ;;  %v13091_v57 = vld [vmem:[#allocation162_spill] sm:$0xff]  ;;  %v13099_v44 = vld [vmem:[#allocation21_spill] sm:$0xff] }
 0x2b6   : > { %13077 = vst [vmem:[#allocation15_spill] sm:$0xff] %v7251_v16  ;;  %v7271_v55 = vadd.f32 %v13091_v57, %v13090_v35  ;;  %v13094_v16 = vld [vmem:[#allocation50_spill] sm:$0xff]  ;;  %v13102_v46 = vld [vmem:[#allocation189_spill] sm:$0xff]  ;;  %v13108_v35 = vld [vmem:[#allocation79_spill] sm:$0xff] }
 0x2b7   : > { %13080 = vst [vmem:[#allocation156_spill] sm:$0xff] %v7255_v48  ;;  %v7275_v50 = vadd.f32 %v13094_v16, %v13093_v53  ;;  %v13097_v48 = vld [vmem:[#allocation110_spill] sm:$0xff] }
 0x2b8   : > { %13083 = vst [vmem:[#allocation184_spill] sm:$0xff] %v7259_v12  ;;  %v7279_v41 = vadd.f32 %v13097_v48, %v13096_v17  ;;  %v13100_v12 = vld [vmem:[#allocation163_spill] sm:$0xff]  ;;  %v13105_v4 = vld [vmem:[#allocation134_spill] sm:$0xff] }
 0x2b9   : > { %13086 = vst [vmem:[#allocation44_spill] sm:$0xff] %v7263_v6  ;;  %v7283_v52 = vadd.f32 %v13100_v12, %v13099_v44  ;;  %v13103_v6 = vld [vmem:[#allocation111_spill] sm:$0xff]  ;;  %v13111_v53 = vld [vmem:[#allocation22_spill] sm:$0xff] }
 0x2ba   : > { %13089 = vst [vmem:[#allocation128_spill] sm:$0xff] %v7267_v62  ;;  %v7287_v45 = vadd.f32 %v13103_v6, %v13102_v46  ;;  %v13106_v62 = vld [vmem:[#allocation51_spill] sm:$0xff]  ;;  %v13114_v17 = vld [vmem:[#allocation190_spill] sm:$0xff]  ;;  %v13120_v46 = vld [vmem:[#allocation80_spill] sm:$0xff] }
 0x2bb   : > { %13092 = vst [vmem:[#allocation103_spill] sm:$0xff] %v7271_v55  ;;  %v7291_v57 = vadd.f32 %v13106_v62, %v13105_v4  ;;  %v13109_v55 = vld [vmem:[#allocation112_spill] sm:$0xff]  ;;  %v13117_v44 = vld [vmem:[#allocation135_spill] sm:$0xff] }
 0x2bc   : > { %13095 = vst [vmem:[#allocation72_spill] sm:$0xff] %v7275_v50  ;;  %v7295_v16 = vadd.f32 %v13109_v55, %v13108_v35  ;;  %v13112_v50 = vld [vmem:[#allocation164_spill] sm:$0xff]  ;;  %v13123_v4 = vld [vmem:[#allocation23_spill] sm:$0xff]  ;;  %v13126_v35 = vld [vmem:[#allocation81_spill] sm:$0xff] }
 0x2bd   : > { %13098 = vst [vmem:[#allocation157_spill] sm:$0xff] %v7279_v41  ;;  %v7299_v48 = vadd.f32 %v13112_v50, %v13111_v53  ;;  %v13115_v41 = vld [vmem:[#allocation52_spill] sm:$0xff] }
 0x2be   : > { %13101 = vst [vmem:[#allocation16_spill] sm:$0xff] %v7283_v52  ;;  %v7303_v12 = vadd.f32 %v13115_v41, %v13114_v17  ;;  %v13118_v52 = vld [vmem:[#allocation113_spill] sm:$0xff]  ;;  %v13129_v53 = vld [vmem:[#allocation136_spill] sm:$0xff]  ;;  %v13132_v17 = vld [vmem:[#allocation191_spill] sm:$0xff] }
 0x2bf   : > { %13104 = vst [vmem:[#allocation209_spill] sm:$0xff] %v7287_v45  ;;  %v7307_v6 = vadd.f32 %v13118_v52, %v13117_v44  ;;  %v13121_v45 = vld [vmem:[#allocation165_spill] sm:$0xff]  ;;  %v13135_v44 = vld [vmem:[#allocation24_spill] sm:$0xff] }
 0x2c0   : > { %13107 = vst [vmem:[#allocation73_spill] sm:$0xff] %v7291_v57  ;;  %v7311_v62 = vadd.f32 %v13121_v45, %v13120_v46  ;;  %v13124_v57 = vld [vmem:[#allocation114_spill] sm:$0xff] }
 0x2c1   : > { %13110 = vst [vmem:[#allocation45_spill] sm:$0xff] %v7295_v16  ;;  %v7315_v55 = vadd.f32 %v13124_v57, %v13123_v4  ;;  %v13127_v16 = vld [vmem:[#allocation53_spill] sm:$0xff]  ;;  %v13138_v46 = vld [vmem:[#allocation82_spill] sm:$0xff] }
 0x2c2   : > { %13113 = vst [vmem:[#allocation129_spill] sm:$0xff] %v7299_v48  ;;  %v7319_v50 = vadd.f32 %v13127_v16, %v13126_v35  ;;  %v13130_v48 = vld [vmem:[#allocation115_spill] sm:$0xff]  ;;  %v13141_v4 = vld [vmem:[#allocation137_spill] sm:$0xff]  ;;  %v13144_v35 = vld [vmem:[#allocation192_spill] sm:$0xff] }
 0x2c3   : > { %13116 = vst [vmem:[#allocation104_spill] sm:$0xff] %v7303_v12  ;;  %v7323_v41 = vadd.f32 %v13130_v48, %v13129_v53  ;;  %v13133_v12 = vld [vmem:[#allocation166_spill] sm:$0xff]  ;;  %v13147_v53 = vld [vmem:[#allocation25_spill] sm:$0xff] }
 0x2c4   : > { %13119 = vst [vmem:[#allocation185_spill] sm:$0xff] %v7307_v6  ;;  %v7327_v52 = vadd.f32 %v13133_v12, %v13132_v17  ;;  %v13136_v6 = vld [vmem:[#allocation116_spill] sm:$0xff]  ;;  %v13150_v17 = vld [vmem:[#allocation83_spill] sm:$0xff] }
 0x2c5   : > { %13122 = vst [vmem:[#allocation158_spill] sm:$0xff] %v7311_v62  ;;  %v7331_v45 = vadd.f32 %v13136_v6, %v13135_v44  ;;  %v13139_v62 = vld [vmem:[#allocation54_spill] sm:$0xff] }
 0x2c6   : > { %13125 = vst [vmem:[#allocation17_spill] sm:$0xff] %v7315_v55  ;;  %v7335_v57 = vadd.f32 %v13139_v62, %v13138_v46  ;;  %v13142_v55 = vld [vmem:[#allocation117_spill] sm:$0xff]  ;;  %v13153_v44 = vld [vmem:[#allocation138_spill] sm:$0xff] }
 0x2c7   : > { %13128 = vst [vmem:[#allocation46_spill] sm:$0xff] %v7319_v50  ;;  %v7339_v16 = vadd.f32 %v13142_v55, %v13141_v4  ;;  %v13145_v50 = vld [vmem:[#allocation167_spill] sm:$0xff]  ;;  %v13156_v46 = vld [vmem:[#allocation193_spill] sm:$0xff]  ;;  %v13159_v4 = vld [vmem:[#allocation26_spill] sm:$0xff] }
 0x2c8   : > { %13131 = vst [vmem:[#allocation74_spill] sm:$0xff] %v7323_v41  ;;  %v7343_v48 = vadd.f32 %v13145_v50, %v13144_v35  ;;  %v13148_v41 = vld [vmem:[#allocation118_spill] sm:$0xff]  ;;  %v13162_v35 = vld [vmem:[#allocation84_spill] sm:$0xff] }
 0x2c9   : > { %13134 = vst [vmem:[#allocation105_spill] sm:$0xff] %v7327_v52  ;;  %v7347_v12 = vadd.f32 %v13148_v41, %v13147_v53  ;;  %v13151_v52 = vld [vmem:[#allocation55_spill] sm:$0xff]  ;;  %v7367_v41 = vadd.f32 %v6878_v34, %v13162_v35  ;;  %v13178_v35 = vld [vmem:[#allocation86_spill] sm:$0xff] }
 0x2ca   : > { %13137 = vst [vmem:[#allocation130_spill] sm:$0xff] %v7331_v45  ;;  %v7351_v6 = vadd.f32 %v13151_v52, %v13150_v17  ;;  %v13154_v45 = vld [vmem:[#allocation119_spill] sm:$0xff]  ;;  %v13167_v17 = vld [vmem:[#allocation85_spill] sm:$0xff] }
 0x2cb   : > { %13140 = vst [vmem:[#allocation159_spill] sm:$0xff] %v7335_v57  ;;  %v7355_v62 = vadd.f32 %v13154_v45, %v13153_v44  ;;  %v13157_v57 = vld [vmem:[#allocation168_spill] sm:$0xff]  ;;  %v13164_v53 = vld [vmem:[#allocation139_spill] sm:$0xff] }
 0x2cc   : > { %13143 = vst [vmem:[#allocation186_spill] sm:$0xff] %v7339_v16  ;;  %v7359_v55 = vadd.f32 %v13157_v57, %v13156_v46  ;;  %v13160_v16 = vld [vmem:[#allocation56_spill] sm:$0xff]  ;;  %v13170_v44 = vld [vmem:[#allocation27_spill] sm:$0xff]  ;;  %v13173_v46 = vld [vmem:[#allocation194_spill] sm:$0xff] }
 0x2cd   : > { %13146 = vst [vmem:[#allocation106_spill] sm:$0xff] %v7343_v48  ;;  %v7363_v50 = vadd.f32 %v13160_v16, %v13159_v4  ;;  %v7383_v16 = vadd.f32 %v6894_v42, %v13173_v46  ;;  %v13175_v4 = vld [vmem:[#allocation140_spill] sm:$0xff]  ;;  %v13189_v46 = vld [vmem:[#allocation87_spill] sm:$0xff] }
 0x2ce   : > { %13149 = vst [vmem:[#allocation18_spill] sm:$0xff] %v7347_v12  ;;  %v13165_v12 = vld [vmem:[#allocation120_spill] sm:$0xff]  ;;  %v1634_v48 = vld [vmem:[%s3971_s14 + $0x12c] sm:$0x1] }
 0x2cf   : > { %13152 = vst [vmem:[#allocation47_spill] sm:$0xff] %v7351_v6  ;;  %v7371_v52 = vadd.f32 %v13165_v12, %v13164_v53  ;;  %v13168_v6 = vld [vmem:[#allocation169_spill] sm:$0xff]  ;;  %v13181_v53 = vld [vmem:[#allocation28_spill] sm:$0xff] }
 0x2d0   : > { %13155 = vst [vmem:[#allocation75_spill] sm:$0xff] %v7355_v62  ;;  %v7375_v45 = vadd.f32 %v13168_v6, %v13167_v17  ;;  %v13171_v62 = vld [vmem:[#allocation121_spill] sm:$0xff]  ;;  %v13184_v17 = vld [vmem:[#allocation195_spill] sm:$0xff] }
 0x2d1   : > { %13158 = vst [vmem:[#allocation107_spill] sm:$0xff] %v7359_v55  ;;  %v7379_v57 = vadd.f32 %v13171_v62, %v13170_v44  ;;  %v7399_v62 = vadd.f32 %v6909_v56, %v13184_v17  ;;  %v13186_v44 = vld [vmem:[#allocation141_spill] sm:$0xff]  ;;  %v13200_v17 = vld [vmem:[#allocation88_spill] sm:$0xff]  ;;  %v1633_v55 = vld [vmem:[%s3971_s14 + $0x124] sm:$0x1] }
 0x2d2   : > { %13161 = vst [vmem:[#allocation131_spill] sm:$0xff] %v7363_v50  ;;  %v13176_v50 = vld [vmem:[#allocation57_spill] sm:$0xff] }
 0x2d3   : > { %13163 = vst [vmem:[#allocation160_spill] sm:$0xff] %v7367_v41  ;;  %v7387_v34 = vadd.f32 %v13176_v50, %v13175_v4  ;;  %v13179_v41 = vld [vmem:[#allocation122_spill] sm:$0xff]  ;;  %v13192_v4 = vld [vmem:[#allocation29_spill] sm:$0xff] }
 0x2d4   : > { %13166 = vst [vmem:[#allocation187_spill] sm:$0xff] %v7371_v52  ;;  %v7391_v12 = vadd.f32 %v13179_v41, %v13178_v35  ;;  %v13182_v52 = vld [vmem:[#allocation170_spill] sm:$0xff]  ;;  %v13195_v35 = vld [vmem:[#allocation196_spill] sm:$0xff] }
 0x2d5   : > { %13169 = vst [vmem:[#allocation48_spill] sm:$0xff] %v7375_v45  ;;  %v7395_v6 = vadd.f32 %v13182_v52, %v13181_v53  ;;  %v7415_v52 = vadd.f32 %v6924_v14, %v13195_v35  ;;  %v13197_v53 = vld [vmem:[#allocation142_spill] sm:$0xff]  ;;  %v13211_v35 = vld [vmem:[#allocation197_spill] sm:$0xff] }
 0x2d6   : > { %13172 = vst [vmem:[#allocation19_spill] sm:$0xff] %v7379_v57  ;;  %v13187_v57 = vld [vmem:[#allocation58_spill] sm:$0xff]  ;;  %v1632_v45 = vld [vmem:[%s3971_s14 + $0x11c] sm:$0x1] }
 0x2d7   : > { %13174 = vst [vmem:[#allocation210_spill] sm:$0xff] %v7383_v16  ;;  %v7403_v42 = vadd.f32 %v13187_v57, %v13186_v44  ;;  %v13190_v16 = vld [vmem:[#allocation171_spill] sm:$0xff]  ;;  %v13203_v44 = vld [vmem:[#allocation30_spill] sm:$0xff] }
 0x2d8   : > { %13177 = vst [vmem:[#allocation76_spill] sm:$0xff] %v7387_v34  ;;  %v7407_v50 = vadd.f32 %v13190_v16, %v13189_v46  ;;  %v13193_v34 = vld [vmem:[#allocation59_spill] sm:$0xff]  ;;  %v13206_v46 = vld [vmem:[#allocation89_spill] sm:$0xff] }
 0x2d9   : > { %13180 = vst [vmem:[#allocation161_spill] sm:$0xff] %v7391_v12  ;;  %v7411_v41 = vadd.f32 %v13193_v34, %v13192_v4  ;;  %v7431_v34 = vadd.f32 %v6939_v51, %v13206_v46  ;;  %v13208_v4 = vld [vmem:[#allocation143_spill] sm:$0xff]  ;;  %v13222_v46 = vld [vmem:[#allocation198_spill] sm:$0xff]  ;;  %v1631_v12 = vld [vmem:[%s3971_s14 + $0x114] sm:$0x1] }
 0x2da   : > { %13183 = vst [vmem:[#allocation132_spill] sm:$0xff] %v7395_v6  ;;  %v13198_v6 = vld [vmem:[#allocation123_spill] sm:$0xff] }
 0x2db   : > { %13185 = vst [vmem:[#allocation108_spill] sm:$0xff] %v7399_v62  ;;  %v7419_v56 = vadd.f32 %v13198_v6, %v13197_v53  ;;  %v13201_v62 = vld [vmem:[#allocation172_spill] sm:$0xff]  ;;  %v13214_v53 = vld [vmem:[#allocation31_spill] sm:$0xff] }
 0x2dc   : > { %13188 = vst [vmem:[#allocation77_spill] sm:$0xff] %v7403_v42  ;;  %v7423_v57 = vadd.f32 %v13201_v62, %v13200_v17  ;;  %v13204_v42 = vld [vmem:[#allocation60_spill] sm:$0xff]  ;;  %v13217_v17 = vld [vmem:[#allocation90_spill] sm:$0xff] }
 0x2dd   : > { %13191 = vst [vmem:[#allocation49_spill] sm:$0xff] %v7407_v50  ;;  %v7427_v16 = vadd.f32 %v13204_v42, %v13203_v44  ;;  %v7447_v42 = vadd.f32 %v6954_v30, %v13217_v17  ;;  %v13219_v44 = vld [vmem:[#allocation144_spill] sm:$0xff]  ;;  %v13231_v17 = vld [vmem:[#allocation145_spill] sm:$0xff]  ;;  %v1630_v50 = vld [vmem:[%s3971_s14 + $0x10c] sm:$0x1] }
 0x2de   : > { %13194 = vst [vmem:[#allocation20_spill] sm:$0xff] %v7411_v41  ;;  %v13209_v41 = vld [vmem:[#allocation173_spill] sm:$0xff] }
 0x2df   : > { %13196 = vst [vmem:[#allocation109_spill] sm:$0xff] %v7415_v52  ;;  %v7435_v14 = vadd.f32 %v13209_v41, %v13208_v4  ;;  %v13212_v52 = vld [vmem:[#allocation61_spill] sm:$0xff]  ;;  %v13223_v41 = vld [vmem:[#allocation175_spill] sm:$0xff] }
 0x2e0   : > { %13199 = vst [vmem:[#allocation188_spill] sm:$0xff] %v7419_v56  ;;  %v7439_v6 = vadd.f32 %v13212_v52, %v13211_v35  ;;  %v13215_v56 = vld [vmem:[#allocation174_spill] sm:$0xff]  ;;  %v7455_v4 = vadd.f32 %v13223_v41, %v13222_v46  ;;  %v13225_v52 = vld [vmem:[#allocation32_spill] sm:$0xff]  ;;  %v13226_v35 = vld [vmem:[#allocation63_spill] sm:$0xff] }
 0x2e1   : > { %13202 = vst [vmem:[#allocation162_spill] sm:$0xff] %v7423_v57  ;;  %v7443_v62 = vadd.f32 %v13215_v56, %v13214_v53  ;;  %v13228_v56 = vld [vmem:[#allocation91_spill] sm:$0xff]  ;;  %v13229_v53 = vld [vmem:[#allocation176_spill] sm:$0xff]  ;;  %v13237_v46 = vld [vmem:[#allocation33_spill] sm:$0xff] }
 0x2e2   : > { %13205 = vst [vmem:[#allocation133_spill] sm:$0xff] %v7427_v16  ;;  %v13220_v16 = vld [vmem:[#allocation62_spill] sm:$0xff]  ;;  %v7463_v30 = vadd.f32 %v13229_v53, %v13228_v56  ;;  %v13238_v41 = vld [vmem:[#allocation65_spill] sm:$0xff] }
 0x2e3   : > { %13207 = vst [vmem:[#allocation50_spill] sm:$0xff] %v7431_v34  ;;  %v7451_v51 = vadd.f32 %v13220_v16, %v13219_v44  ;;  %v13234_v16 = vld [vmem:[#allocation199_spill] sm:$0xff]  ;;  %v13235_v44 = vld [vmem:[#allocation177_spill] sm:$0xff]  ;;  %v1629_v57 = vld [vmem:[%s3971_s14 + $0x104] sm:$0x1] }
 0x2e4   : > { %13210 = vst [vmem:[#allocation78_spill] sm:$0xff] %v7435_v14  ;;  %v13240_v14 = vld [vmem:[#allocation92_spill] sm:$0xff]  ;;  %v13245_v53 = vld [vmem:[#allocation93_spill] sm:$0xff] }
 0x2e5   : > { %13213 = vst [vmem:[#allocation110_spill] sm:$0xff] %v7439_v6  ;;  %v7459_v6 = vadd.f32 %v13226_v35, %v13225_v52  ;;  %v7479_v52 = vadd.f32 %v6984_v37, %v13240_v14  ;;  %v13242_v35 = vld [vmem:[#allocation146_spill] sm:$0xff]  ;;  %v13253_v37 = vld [vmem:[#allocation147_spill] sm:$0xff]  ;;  %v1628_v34 = vld [vmem:[%s3971_s14 + $0xfc] sm:$0x1] }
 0x2e6   : > { %13216 = vst [vmem:[#allocation21_spill] sm:$0xff] %v7443_v62  ;;  %v7499_v14 = vadd.f32 %v7002_v39, %v13253_v37  ;;  %v13262_v37 = vld [vmem:[#allocation148_spill] sm:$0xff] }
 0x2e7   : > { %13218 = vst [vmem:[#allocation163_spill] sm:$0xff] %v7447_v42  ;;  %v13232_v42 = vld [vmem:[#allocation64_spill] sm:$0xff] }
 0x2e8   : > { %13221 = vst [vmem:[#allocation189_spill] sm:$0xff] %v7451_v51  ;;  %v7467_v62 = vadd.f32 %v13232_v42, %v13231_v17  ;;  %v7471_v51 = vadd.f32 %v13235_v44, %v13234_v16  ;;  %v13246_v42 = vld [vmem:[#allocation66_spill] sm:$0xff]  ;;  %v13249_v44 = vld [vmem:[#allocation179_spill] sm:$0xff] }
 0x2e9   : > { %13224 = vst [vmem:[#allocation111_spill] sm:$0xff] %v7455_v4  ;;  %v7475_v4 = vadd.f32 %v13238_v41, %v13237_v46  ;;  %v7487_v17 = vadd.f32 %v13246_v42, %v13245_v53  ;;  %v13248_v16 = vld [vmem:[#allocation34_spill] sm:$0xff]  ;;  %v13251_v46 = vld [vmem:[#allocation200_spill] sm:$0xff]  ;;  %v13258_v53 = vld [vmem:[#allocation67_spill] sm:$0xff] }
 0x2ea   : > { %13227 = vst [vmem:[#allocation134_spill] sm:$0xff] %v7459_v6  ;;  %v13243_v6 = vld [vmem:[#allocation178_spill] sm:$0xff]  ;;  %v7495_v41 = vadd.f32 %v6999_v5, %v13251_v46  ;;  %v1600_v5 = vld [vmem:[%s3971_s14 + $0x1c] sm:$0x1] }
 0x2eb   : > { %13230 = vst [vmem:[#allocation51_spill] sm:$0xff] %v7463_v30  ;;  %v7483_v56 = vadd.f32 %v13243_v6, %v13242_v35  ;;  %v13255_v6 = vld [vmem:[#allocation94_spill] sm:$0xff]  ;;  %v13260_v46 = vld [vmem:[#allocation201_spill] sm:$0xff]  ;;  %v1627_v30 = vld [vmem:[%s3971_s14 + $0xf4] sm:$0x1] }
 0x2ec   : > { %13233 = vst [vmem:[#allocation79_spill] sm:$0xff] %v7467_v62  ;;  %v7503_v35 = vadd.f32 %v7005_v40, %v13255_v6  ;;  %v7515_v39 = vadd.f32 %v7014_v2, %v13260_v46  ;;  %v7519_v40 = vadd.f32 %v7017_v21, %v13262_v37  ;;  %v13264_v6 = vld [vmem:[#allocation95_spill] sm:$0xff]  ;;  %v7532_v2 = vld [vmem:[#allocation5 + $0x4] ss:$0 sm:$0xff]  ;;  %v13270_v37 = vld [vmem:[#allocation149_spill] sm:$0xff] }
 0x2ed   : > { %13236 = vst [vmem:[#allocation112_spill] sm:$0xff] %v7471_v51  ;;  %v7491_v51 = vadd.f32 %v13249_v44, %v13248_v16  ;;  %v1598_v16 = vld [vmem:[%s3971_s14 + $0xc] sm:$0x1]  ;;  %v1599_v44 = vld [vmem:[%s3971_s14 + $0x14] sm:$0x1]  ;;  %v13268_v46 = vld [vmem:[#allocation202_spill] sm:$0xff] }
 0x2ee   : > { %13239 = vst [vmem:[#allocation22_spill] sm:$0xff] %v7475_v4  ;;  %v7536_v21 = vadd.f32 %v7026_v31, %v13268_v46  ;;  %v1607_v31 = vld [vmem:[%s3971_s14 + $0x54] sm:$0x1]  ;;  %v1608_v46 = vld [vmem:[%s3971_s14 + $0x5c] sm:$0x1] }
 0x2ef   : > { %13241 = vst [vmem:[#allocation164_spill] sm:$0xff] %v7479_v52  ;;  %v1624_v52 = vld [vmem:[%s3971_s14 + $0xdc] sm:$0x1]  ;;  %v1625_v4 = vld [vmem:[%s3971_s14 + $0xe4] sm:$0x1] }
 0x2f0   : > { %13244 = vst [vmem:[#allocation190_spill] sm:$0xff] %v7483_v56  ;;  %v13257_v56 = vld [vmem:[#allocation35_spill] sm:$0xff] }
 0x2f1   : > { %13247 = vst [vmem:[#allocation52_spill] sm:$0xff] %v7487_v17  ;;  %v7507_v42 = vadd.f32 %v13258_v53, %v13257_v56  ;;  %v1597_v17 = vld [vmem:[%s3971_s14 + $0x4] sm:$0x1]  ;;  %v7523_v56 = vadd.f32 %v7020_v18, %v13264_v6  ;;  %v13266_v53 = vld [vmem:[#allocation36_spill] sm:$0xff]  ;;  %v7540_v18 = vadd.f32 %v7029_v7, %v13270_v37  ;;  %v1626_v62 = vld [vmem:[%s3971_s14 + $0xec] sm:$0x1] }
 0x2f2   : > { %13250 = vst [vmem:[#allocation135_spill] sm:$0xff] %v7491_v51  ;;  %v13272_v6 = vld [vmem:[#allocation96_spill] sm:$0xff] }
 0x2f3   : > { %13252 = vst [vmem:[#allocation113_spill] sm:$0xff] %v7495_v41  ;;  %v1603_v41 = vld [vmem:[%s3971_s14 + $0x34] sm:$0x1] }
 0x2f4   : > { %13254 = vst [vmem:[#allocation80_spill] sm:$0xff] %v7499_v14  ;;  %v1602_v14 = vld [vmem:[%s3971_s14 + $0x2c] sm:$0x1]  ;;  %v1623_v51 = vld [vmem:[%s3971_s14 + $0xd4] sm:$0x1] }
 0x2f5   : > { %13256 = vst [vmem:[#allocation165_spill] sm:$0xff] %v7503_v35  ;;  %v1601_v35 = vld [vmem:[%s3971_s14 + $0x24] sm:$0x1] }
 0x2f6   : > { %13259 = vst [vmem:[#allocation23_spill] sm:$0xff] %v7507_v42  ;;  %v7527_v42 = vadd.f32 %v7023_v8, %v13266_v53  ;;  %v7544_v8 = vadd.f32 %v7032_v36, %v13272_v6  ;;  %v13274_v53 = vld [vmem:[#allocation37_spill] sm:$0xff]  ;;  %v13278_v36 = vld [vmem:[#allocation150_spill] sm:$0xff] }
 0x2f7   : > { %13261 = vst [vmem:[#allocation114_spill] sm:$0xff] %v7515_v39  ;;  %v1606_v39 = vld [vmem:[%s3971_s14 + $0x4c] sm:$0x1]  ;;  %v7561_v37 = vadd.f32 %v7041_v38, %v13278_v36 }
 0x2f8   : > { %13263 = vst [vmem:[#allocation81_spill] sm:$0xff] %v7519_v40  ;;  %v1605_v40 = vld [vmem:[%s3971_s14 + $0x44] sm:$0x1]  ;;  %v13286_v38 = vld [vmem:[#allocation151_spill] sm:$0xff] }
 0x2f9   : > { %13265 = vst [vmem:[#allocation53_spill] sm:$0xff] %v7523_v56  ;;  %v1604_v56 = vld [vmem:[%s3971_s14 + $0x3c] sm:$0x1]  ;;  %v7580_v36 = vadd.f32 %v7053_v49, %v13286_v38  ;;  %v1618_v49 = vld [vmem:[%s3971_s14 + $0xac] sm:$0x1] }
 0x2fa   : > { %13267 = vst [vmem:[#allocation136_spill] sm:$0xff] %v7527_v42  ;;  %v7548_v42 = vadd.f32 %v7035_v29, %v13274_v53  ;;  %v13280_v29 = vld [vmem:[#allocation97_spill] sm:$0xff]  ;;  %v13282_v53 = vld [vmem:[#allocation38_spill] sm:$0xff]  ;;  %v1619_v38 = vld [vmem:[%s3971_s14 + $0xb4] sm:$0x1] }
 0x2fb   : > { %13269 = vst [vmem:[#allocation115_spill] sm:$0xff] %v7536_v21  ;;  %v13276_v21 = vld [vmem:[#allocation203_spill] sm:$0xff]  ;;  %v7565_v6 = vadd.f32 %v7044_v58, %v13280_v29 }
 0x2fc   : > { %13271 = vst [vmem:[#allocation191_spill] sm:$0xff] %v7540_v18  ;;  %v7557_v7 = vadd.f32 %v7038_v13, %v13276_v21  ;;  %v1610_v18 = vld [vmem:[%s3971_s14 + $0x6c] sm:$0x1]  ;;  %v1611_v13 = vld [vmem:[%s3971_s14 + $0x74] sm:$0x1] }
 0x2fd   : > { %13273 = vst [vmem:[#allocation166_spill] sm:$0xff] %v7544_v8  ;;  %v1609_v8 = vld [vmem:[%s3971_s14 + $0x64] sm:$0x1]  ;;  %v13284_v21 = vld [vmem:[#allocation204_spill] sm:$0xff]  ;;  %v13290_v29 = vld [vmem:[#allocation39_spill] sm:$0xff] }
 0x2fe   : > { %13275 = vst [vmem:[#allocation24_spill] sm:$0xff] %v7548_v42  ;;  %v7569_v42 = vadd.f32 %v7047_v43, %v13282_v53  ;;  %v7588_v43 = vadd.f32 %v7059_v32, %v13290_v29  ;;  %v1612_v53 = vld [vmem:[%s3971_s14 + $0x7c] sm:$0x1]  ;;  %v7603_v32 = vmul.f32 %v7532_v2, %v1598_v16  ;;  %v7606_v29 = vmul.f32 %v7532_v2, %v1599_v44 }
 0x2ff   : > { %13277 = vst [vmem:[#allocation116_spill] sm:$0xff] %v7557_v7  ;;  %v7576_v7 = vadd.f32 %v7050_v60, %v13284_v21  ;;  %v1614_v60 = vld [vmem:[%s3971_s14 + $0x8c] sm:$0x1]  ;;  %v1615_v21 = vld [vmem:[%s3971_s14 + $0x94] sm:$0x1]  ;;  %v7619_v16 = vmul.f32 %v7532_v2, %v1602_v14  ;;  %v7622_v44 = vmul.f32 %v7532_v2, %v1603_v41  ;;  %v7635_v14 = vmul.f32 %v7532_v2, %v1606_v39 }
 0x300   : > { %13279 = vst [vmem:[#allocation82_spill] sm:$0xff] %v7561_v37  ;;  %v13288_v37 = vld [vmem:[#allocation98_spill] sm:$0xff]  ;;  %v7638_v41 = vmul.f32 %v7532_v2, %v1607_v31  ;;  %v7651_v39 = vmul.f32 %v7532_v2, %v1610_v18  ;;  %v7654_v31 = vmul.f32 %v7532_v2, %v1611_v13  ;;  %v7667_v18 = vmul.f32 %v7532_v2, %v1614_v60 }
 0x301   : > { %13281 = vst [vmem:[#allocation54_spill] sm:$0xff] %v7565_v6  ;;  %v7584_v58 = vadd.f32 %v7056_v24, %v13288_v37  ;;  %v1617_v6 = vld [vmem:[%s3971_s14 + $0xa4] sm:$0x1]  ;;  %v1620_v24 = vld [vmem:[%s3971_s14 + $0xbc] sm:$0x1]  ;;  %v7600_v37 = vmul.f32 %v7532_v2, %v1597_v17  ;;  %v7616_v17 = vmul.f32 %v7532_v2, %v1601_v35  ;;  %v7632_v35 = vmul.f32 %v7532_v2, %v1605_v40 }
 0x302   : > { %13283 = vst [vmem:[#allocation137_spill] sm:$0xff] %v7569_v42  ;;  %v1613_v42 = vld [vmem:[%s3971_s14 + $0x84] sm:$0x1]  ;;  %v7648_v40 = vmul.f32 %v7532_v2, %v1609_v8  ;;  %v7670_v13 = vmul.f32 %v7532_v2, %v1615_v21  ;;  %v7683_v60 = vmul.f32 %v7532_v2, %v1618_v49  ;;  %v7686_v21 = vmul.f32 %v7532_v2, %v1619_v38 }
 0x303   : > { %13285 = vst [vmem:[#allocation117_spill] sm:$0xff] %v7576_v7  ;;  %v1616_v7 = vld [vmem:[%s3971_s14 + $0x9c] sm:$0x1]  ;;  %v7664_v8 = vmul.f32 %v7532_v2, %v1613_v42  ;;  %v7680_v42 = vmul.f32 %v7532_v2, %v1617_v6  ;;  %v7702_v38 = vmul.f32 %v7532_v2, %v1623_v51  ;;  %v7718_v51 = vmul.f32 %v7532_v2, %v1627_v30 }
 0x304   : > { %13287 = vst [vmem:[#allocation192_spill] sm:$0xff] %v7580_v36  ;;  %v1622_v36 = vld [vmem:[%s3971_s14 + $0xcc] sm:$0x1]  ;;  %v7734_v30 = vmul.f32 %v7532_v2, %v1631_v12  ;;  %v7750_v12 = vmul.f32 %v7532_v2, %v1635_v20  ;;  %v7766_v20 = vmul.f32 %v7532_v2, %v1639_v26 }
 0x305   : > { %13289 = vst [vmem:[#allocation167_spill] sm:$0xff] %v7584_v58  ;;  %v1621_v58 = vld [vmem:[%s3971_s14 + $0xc4] sm:$0x1]  ;;  %v7699_v49 = vmul.f32 %v7532_v2, %v1622_v36  ;;  %v7715_v36 = vmul.f32 %v7532_v2, %v1626_v62  ;;  %v7731_v62 = vmul.f32 %v7532_v2, %v1630_v50  ;;  %v7747_v50 = vmul.f32 %v7532_v2, %v1634_v48 }
 0x306   : > { %13291 = vst [vmem:[#allocation25_spill] sm:$0xff] %v7588_v43  ;;  %v7609_v43 = vmul.f32 %v7532_v2, %v1600_v5  ;;  %v7625_v5 = vmul.f32 %v7532_v2, %v1604_v56  ;;  %v7641_v56 = vmul.f32 %v7532_v2, %v1608_v46  ;;  %v7657_v46 = vmul.f32 %v7532_v2, %v1612_v53 }
 0x307   : > { %13293 = vst [vmem:[#allocation83_spill] sm:$0xff] %v7664_v8  ;;  %v7673_v53 = vmul.f32 %v7532_v2, %v1616_v7  ;;  %v7689_v7 = vmul.f32 %v7532_v2, %v1620_v24  ;;  %v1644_v8 = vld [vmem:[%s3971_s14 + $0x17c] sm:$0x1]  ;;  %v7696_v6 = vmul.f32 %v7532_v2, %v1621_v58  ;;  %v7705_v24 = vmul.f32 %v7532_v2, %v1624_v52 }
 0x308   : > { %13292 = vst [vmem:[#allocation118_spill] sm:$0xff] %v7657_v46  ;;  %v1640_v46 = vld [vmem:[%s3971_s14 + $0x15c] sm:$0x1]  ;;  %v7712_v58 = vmul.f32 %v7532_v2, %v1625_v4  ;;  %v7721_v52 = vmul.f32 %v7532_v2, %v1628_v34  ;;  %v7728_v4 = vmul.f32 %v7532_v2, %v1629_v57  ;;  %v7737_v34 = vmul.f32 %v7532_v2, %v1632_v45 }
 0x309   : > { %13294 = vst [vmem:[#allocation55_spill] sm:$0xff] %v7667_v18  ;;  %v1643_v18 = vld [vmem:[%s3971_s14 + $0x174] sm:$0x1]  ;;  %v7744_v57 = vmul.f32 %v7532_v2, %v1633_v55  ;;  %v7753_v45 = vmul.f32 %v7532_v2, %v1636_v33  ;;  %v7760_v55 = vmul.f32 %v7532_v2, %v1637_v28  ;;  %v7763_v48 = vmul.f32 %v7532_v2, %v1638_v27 }
 0x30a   : > { %13295 = vst [vmem:[#allocation138_spill] sm:$0xff] %v7670_v13  ;;  %v1642_v13 = vld [vmem:[%s3971_s14 + $0x16c] sm:$0x1]  ;;  %v7769_v33 = vmul.f32 %v7532_v2, %v1640_v46  ;;  %v7782_v26 = vmul.f32 %v7532_v2, %v1643_v18  ;;  %v7785_v46 = vmul.f32 %v7532_v2, %v1644_v8 }
 0x30b   : > { %13296 = vst [vmem:[#allocation119_spill] sm:$0xff] %v7673_v53  ;;  %v1641_v53 = vld [vmem:[%s3971_s14 + $0x164] sm:$0x1]  ;;  %v7779_v27 = vmul.f32 %v7532_v2, %v1642_v13 }
 0x30c   : > { %13297 = vst [vmem:[#allocation193_spill] sm:$0xff] %v7680_v42  ;;  %v1648_v42 = vld [vmem:[%s3971_s14 + $0x19c] sm:$0x1]  ;;  %v7776_v28 = vmul.f32 %v7532_v2, %v1641_v53 }
 0x30d   : > { %13298 = vst [vmem:[#allocation168_spill] sm:$0xff] %v7683_v60  ;;  %v1647_v60 = vld [vmem:[%s3971_s14 + $0x194] sm:$0x1]  ;;  %v7801_v8 = vmul.f32 %v7532_v2, %v1648_v42 }
 0x30e   : > { %13299 = vst [vmem:[#allocation26_spill] sm:$0xff] %v7686_v21  ;;  %v1646_v21 = vld [vmem:[%s3971_s14 + $0x18c] sm:$0x1]  ;;  %v7798_v18 = vmul.f32 %v7532_v2, %v1647_v60 }
 0x30f   : > { %13300 = vst [vmem:[#allocation56_spill] sm:$0xff] %v7689_v7  ;;  %v1645_v7 = vld [vmem:[%s3971_s14 + $0x184] sm:$0x1]  ;;  %v7795_v13 = vmul.f32 %v7532_v2, %v1646_v21 }
 0x310   : > { %13301 = vst [vmem:[#allocation84_spill] sm:$0xff] %v7696_v6  ;;  %v1652_v6 = vld [vmem:[%s3971_s14 + $0x1bc] sm:$0x1]  ;;  %v7792_v53 = vmul.f32 %v7532_v2, %v1645_v7 }
 0x311   : > { %13302 = vst [vmem:[#allocation139_spill] sm:$0xff] %v7699_v49  ;;  %v1651_v49 = vld [vmem:[%s3971_s14 + $0x1b4] sm:$0x1]  ;;  %v7817_v42 = vmul.f32 %v7532_v2, %v1652_v6 }
 0x312   : > { %13303 = vst [vmem:[#allocation120_spill] sm:$0xff] %v7702_v38  ;;  %v1650_v38 = vld [vmem:[%s3971_s14 + $0x1ac] sm:$0x1]  ;;  %v7814_v60 = vmul.f32 %v7532_v2, %v1651_v49 }
 0x313   : > { %13304 = vst [vmem:[#allocation85_spill] sm:$0xff] %v7705_v24  ;;  %v1649_v24 = vld [vmem:[%s3971_s14 + $0x1a4] sm:$0x1]  ;;  %v7811_v21 = vmul.f32 %v7532_v2, %v1650_v38 }
 0x314   : > { %13305 = vst [vmem:[#allocation169_spill] sm:$0xff] %v7712_v58  ;;  %v1656_v58 = vld [vmem:[%s3971_s14 + $0x1dc] sm:$0x1]  ;;  %v7808_v7 = vmul.f32 %v7532_v2, %v1649_v24 }
 0x315   : > { %13306 = vst [vmem:[#allocation27_spill] sm:$0xff] %v7715_v36  ;;  %v1655_v36 = vld [vmem:[%s3971_s14 + $0x1d4] sm:$0x1]  ;;  %v7833_v6 = vmul.f32 %v7532_v2, %v1656_v58 }
 0x316   : > { %13307 = vst [vmem:[#allocation121_spill] sm:$0xff] %v7718_v51  ;;  %v1654_v51 = vld [vmem:[%s3971_s14 + $0x1cc] sm:$0x1]  ;;  %v7830_v49 = vmul.f32 %v7532_v2, %v1655_v36 }
 0x317   : > { %13308 = vst [vmem:[#allocation194_spill] sm:$0xff] %v7721_v52  ;;  %v1653_v52 = vld [vmem:[%s3971_s14 + $0x1c4] sm:$0x1]  ;;  %v7827_v38 = vmul.f32 %v7532_v2, %v1654_v51 }
 0x318   : > { %13309 = vst [vmem:[#allocation140_spill] sm:$0xff] %v7728_v4  ;;  %v1660_v4 = vld [vmem:[%s3971_s14 + $0x1fc] sm:$0x1]  ;;  %v7824_v24 = vmul.f32 %v7532_v2, %v1653_v52 }
 0x319   : > { %13310 = vst [vmem:[#allocation57_spill] sm:$0xff] %v7731_v62  ;;  %v1659_v62 = vld [vmem:[%s3971_s14 + $0x1f4] sm:$0x1]  ;;  %v7849_v58 = vmul.f32 %v7532_v2, %v1660_v4 }
 0x31a   : > { %13311 = vst [vmem:[#allocation86_spill] sm:$0xff] %v7734_v30  ;;  %v1658_v30 = vld [vmem:[%s3971_s14 + $0x1ec] sm:$0x1]  ;;  %v7846_v36 = vmul.f32 %v7532_v2, %v1659_v62 }
 0x31b   : > { %13312 = vst [vmem:[#allocation122_spill] sm:$0xff] %v7737_v34  ;;  %v1657_v34 = vld [vmem:[%s3971_s14 + $0x1e4] sm:$0x1]  ;;  %v7843_v51 = vmul.f32 %v7532_v2, %v1658_v30 }
 0x31c   : > { %13313 = vst [vmem:[#allocation28_spill] sm:$0xff] %v7744_v57  ;;  %v1664_v57 = vld [vmem:[%s3971_s14 + $0x21c] sm:$0x1]  ;;  %v7840_v52 = vmul.f32 %v7532_v2, %v1657_v34 }
 0x31d   : > { %13314 = vst [vmem:[#allocation170_spill] sm:$0xff] %v7747_v50  ;;  %v1663_v50 = vld [vmem:[%s3971_s14 + $0x214] sm:$0x1]  ;;  %v7865_v4 = vmul.f32 %v7532_v2, %v1664_v57 }
 0x31e   : > { %13315 = vst [vmem:[#allocation195_spill] sm:$0xff] %v7750_v12  ;;  %v1662_v12 = vld [vmem:[%s3971_s14 + $0x20c] sm:$0x1]  ;;  %v7862_v62 = vmul.f32 %v7532_v2, %v1663_v50 }
 0x31f   : > { %13316 = vst [vmem:[#allocation141_spill] sm:$0xff] %v7753_v45  ;;  %v1661_v45 = vld [vmem:[%s3971_s14 + $0x204] sm:$0x1]  ;;  %v7859_v30 = vmul.f32 %v7532_v2, %v1662_v12 }
 0x320   : > { %13317 = vst [vmem:[#allocation58_spill] sm:$0xff] %v7760_v55  ;;  %v1668_v55 = vld [vmem:[%s3971_s14 + $0x23c] sm:$0x1]  ;;  %v7856_v34 = vmul.f32 %v7532_v2, %v1661_v45 }
 0x321   : > { %13318 = vst [vmem:[#allocation87_spill] sm:$0xff] %v7763_v48  ;;  %v1667_v48 = vld [vmem:[%s3971_s14 + $0x234] sm:$0x1]  ;;  %v7881_v57 = vmul.f32 %v7532_v2, %v1668_v55 }
 0x322   : > { %13319 = vst [vmem:[#allocation171_spill] sm:$0xff] %v7766_v20  ;;  %v1666_v20 = vld [vmem:[%s3971_s14 + $0x22c] sm:$0x1]  ;;  %v7878_v50 = vmul.f32 %v7532_v2, %v1667_v48 }
 0x323   : > { %13320 = vst [vmem:[#allocation29_spill] sm:$0xff] %v7769_v33  ;;  %v1665_v33 = vld [vmem:[%s3971_s14 + $0x224] sm:$0x1]  ;;  %v7875_v12 = vmul.f32 %v7532_v2, %v1666_v20 }
 0x324   : > { %13321 = vst [vmem:[#allocation59_spill] sm:$0xff] %v7776_v28  ;;  %v1672_v28 = vld [vmem:[%s3971_s14 + $0x25c] sm:$0x1]  ;;  %v7872_v45 = vmul.f32 %v7532_v2, %v1665_v33 }
 0x325   : > { %13322 = vst [vmem:[#allocation196_spill] sm:$0xff] %v7779_v27  ;;  %v1671_v27 = vld [vmem:[%s3971_s14 + $0x254] sm:$0x1]  ;;  %v7897_v55 = vmul.f32 %v7532_v2, %v1672_v28  ;;  %v1697_v28 = vld [vmem:[%s3971_s14 + $0x324] sm:$0x1] }
 0x326   : > { %13323 = vst [vmem:[#allocation142_spill] sm:$0xff] %v7782_v26  ;;  %v1670_v26 = vld [vmem:[%s3971_s14 + $0x24c] sm:$0x1]  ;;  %v7894_v48 = vmul.f32 %v7532_v2, %v1671_v27 }
 0x327   : > { %13324 = vst [vmem:[#allocation123_spill] sm:$0xff] %v7785_v46  ;;  %v1669_v46 = vld [vmem:[%s3971_s14 + $0x244] sm:$0x1]  ;;  %v7891_v20 = vmul.f32 %v7532_v2, %v1670_v26 }
 0x328   : > { %13325 = vst [vmem:[#allocation88_spill] sm:$0xff] %v7792_v53  ;;  %v1676_v53 = vld [vmem:[%s3971_s14 + $0x27c] sm:$0x1]  ;;  %v7888_v33 = vmul.f32 %v7532_v2, %v1669_v46 }
 0x329   : > { %13326 = vst [vmem:[#allocation172_spill] sm:$0xff] %v7795_v13  ;;  %v1675_v13 = vld [vmem:[%s3971_s14 + $0x274] sm:$0x1]  ;;  %v7913_v27 = vmul.f32 %v7532_v2, %v1676_v53 }
 0x32a   : > { %13327 = vst [vmem:[#allocation30_spill] sm:$0xff] %v7798_v18  ;;  %v1674_v18 = vld [vmem:[%s3971_s14 + $0x26c] sm:$0x1]  ;;  %v7910_v26 = vmul.f32 %v7532_v2, %v1675_v13  ;;  %v1701_v13 = vld [vmem:[%s3971_s14 + $0x344] sm:$0x1] }
 0x32b   : > { %13328 = vst [vmem:[#allocation60_spill] sm:$0xff] %v7801_v8  ;;  %v1673_v8 = vld [vmem:[%s3971_s14 + $0x264] sm:$0x1]  ;;  %v7907_v46 = vmul.f32 %v7532_v2, %v1674_v18 }
 0x32c   : > { %13329 = vst [vmem:[#allocation89_spill] sm:$0xff] %v7808_v7  ;;  %v1680_v7 = vld [vmem:[%s3971_s14 + $0x29c] sm:$0x1]  ;;  %v7904_v25 = vmul.f32 %v7532_v2, %v1673_v8 }
 0x32d   : > { %13330 = vst [vmem:[#allocation143_spill] sm:$0xff] %v7811_v21  ;;  %v1679_v21 = vld [vmem:[%s3971_s14 + $0x294] sm:$0x1]  ;;  %v7929_v53 = vmul.f32 %v7532_v2, %v1680_v7  ;;  %v1704_v7 = vld [vmem:[%s3971_s14 + $0x35c] sm:$0x1] }
 0x32e   : > { %13331 = vst [vmem:[#allocation173_spill] sm:$0xff] %v7814_v60  ;;  %v1678_v60 = vld [vmem:[%s3971_s14 + $0x28c] sm:$0x1]  ;;  %v7926_v18 = vmul.f32 %v7532_v2, %v1679_v21 }
 0x32f   : > { %13332 = vst [vmem:[#allocation197_spill] sm:$0xff] %v7817_v42  ;;  %v1677_v42 = vld [vmem:[%s3971_s14 + $0x284] sm:$0x1]  ;;  %v7923_v8 = vmul.f32 %v7532_v2, %v1678_v60 }
 0x330   : > { %13333 = vst [vmem:[#allocation61_spill] sm:$0xff] %v7824_v24  ;;  %v1684_v24 = vld [vmem:[%s3971_s14 + $0x2bc] sm:$0x1] }
 0x331   : > { %13334 = vst [vmem:[#allocation31_spill] sm:$0xff] %v7827_v38  ;;  %v1683_v38 = vld [vmem:[%s3971_s14 + $0x2b4] sm:$0x1]  ;;  %v7944_v21 = vmul.f32 %v7532_v2, %v1684_v24 }
 0x332   : > { %13335 = vst [vmem:[#allocation174_spill] sm:$0xff] %v7830_v49  ;;  %v1682_v49 = vld [vmem:[%s3971_s14 + $0x2ac] sm:$0x1]  ;;  %v7941_v60 = vmul.f32 %v7532_v2, %v1683_v38  ;;  %v1707_v24 = vld [vmem:[%s3971_s14 + $0x374] sm:$0x1] }
 0x333   : > { %13336 = vst [vmem:[#allocation90_spill] sm:$0xff] %v7833_v6  ;;  %v1681_v6 = vld [vmem:[%s3971_s14 + $0x2a4] sm:$0x1] }
 0x334   : > { %13337 = vst [vmem:[#allocation144_spill] sm:$0xff] %v7840_v52  ;;  %v1688_v52 = vld [vmem:[%s3971_s14 + $0x2dc] sm:$0x1] }
 0x335   : > { %13338 = vst [vmem:[#allocation62_spill] sm:$0xff] %v7843_v51  ;;  %v1687_v51 = vld [vmem:[%s3971_s14 + $0x2d4] sm:$0x1]  ;;  %v7959_v38 = vmul.f32 %v7532_v2, %v1688_v52  ;;  %v1710_v52 = vld [vmem:[%s3971_s14 + $0x38c] sm:$0x1] }
 0x336   : > { %13339 = vst [vmem:[#allocation198_spill] sm:$0xff] %v7846_v36  ;;  %v1686_v36 = vld [vmem:[%s3971_s14 + $0x2cc] sm:$0x1] }
 0x337   : > { %13340 = vst [vmem:[#allocation175_spill] sm:$0xff] %v7849_v58  ;;  %v1685_v58 = vld [vmem:[%s3971_s14 + $0x2c4] sm:$0x1] }
 0x338   : > { %13341 = vst [vmem:[#allocation32_spill] sm:$0xff] %v7856_v34  ;;  %v1692_v34 = vld [vmem:[%s3971_s14 + $0x2fc] sm:$0x1] }
 0x339   : > { %13342 = vst [vmem:[#allocation63_spill] sm:$0xff] %v7859_v30  ;;  %v1691_v30 = vld [vmem:[%s3971_s14 + $0x2f4] sm:$0x1] }
 0x33a   : > { %13343 = vst [vmem:[#allocation91_spill] sm:$0xff] %v7862_v62  ;;  %v1690_v62 = vld [vmem:[%s3971_s14 + $0x2ec] sm:$0x1] }
 0x33b   : > { %13344 = vst [vmem:[#allocation176_spill] sm:$0xff] %v7865_v4  ;;  %v1689_v4 = vld [vmem:[%s3971_s14 + $0x2e4] sm:$0x1] }
 0x33c   : > { %13345 = vst [vmem:[#allocation145_spill] sm:$0xff] %v7872_v45  ;;  %v1696_v45 = vld [vmem:[%s3971_s14 + $0x31c] sm:$0x1] }
 0x33d   : > { %13346 = vst [vmem:[#allocation64_spill] sm:$0xff] %v7875_v12  ;;  %v1695_v12 = vld [vmem:[%s3971_s14 + $0x314] sm:$0x1] }
 0x33e   : > { %13347 = vst [vmem:[#allocation199_spill] sm:$0xff] %v7878_v50  ;;  %v1694_v50 = vld [vmem:[%s3971_s14 + $0x30c] sm:$0x1] }
 0x33f   : > { %13348 = vst [vmem:[#allocation177_spill] sm:$0xff] %v7881_v57  ;;  %v1693_v57 = vld [vmem:[%s3971_s14 + $0x304] sm:$0x1] }
 0x340   : > { %13349 = vst [vmem:[#allocation33_spill] sm:$0xff] %v7888_v33  ;;  %v7920_v33 = vmul.f32 %v7532_v2, %v1677_v42  ;;  %v7938_v42 = vmul.f32 %v7532_v2, %v1682_v49  ;;  %v7956_v49 = vmul.f32 %v7532_v2, %v1687_v51  ;;  %v7974_v51 = vmul.f32 %v7532_v2, %v1692_v34  ;;  %v1713_v34 = vld [vmem:[%s3971_s14 + $0x3a4] sm:$0x1] }
 0x341   : > { %13350 = vst [vmem:[#allocation65_spill] sm:$0xff] %v7891_v20  ;;  %v1700_v20 = vld [vmem:[%s3971_s14 + $0x33c] sm:$0x1] }
 0x342   : > { %13351 = vst [vmem:[#allocation92_spill] sm:$0xff] %v7894_v48  ;;  %v1699_v48 = vld [vmem:[%s3971_s14 + $0x334] sm:$0x1] }
 0x343   : > { %13352 = vst [vmem:[#allocation146_spill] sm:$0xff] %v7897_v55  ;;  %v1698_v55 = vld [vmem:[%s3971_s14 + $0x32c] sm:$0x1] }
 0x344   : > { %13353 = vst [vmem:[#allocation178_spill] sm:$0xff] %v7907_v46  ;;  %v7935_v46 = vmul.f32 %v7532_v2, %v1681_v6  ;;  %v7953_v6 = vmul.f32 %v7532_v2, %v1686_v36  ;;  %v7971_v36 = vmul.f32 %v7532_v2, %v1691_v30  ;;  %v7989_v30 = vmul.f32 %v7532_v2, %v1696_v45  ;;  %v1716_v45 = vld [vmem:[%s3971_s14 + $0x3bc] sm:$0x1] }
 0x345   : > { %13354 = vst [vmem:[#allocation93_spill] sm:$0xff] %v7910_v26  ;;  %v1703_v26 = vld [vmem:[%s3971_s14 + $0x354] sm:$0x1] }
 0x346   : > { %13355 = vst [vmem:[#allocation66_spill] sm:$0xff] %v7913_v27  ;;  %v1702_v27 = vld [vmem:[%s3971_s14 + $0x34c] sm:$0x1] }
 0x347   : > { %13356 = vst [vmem:[#allocation34_spill] sm:$0xff] %v7923_v8  ;;  %v7950_v8 = vmul.f32 %v7532_v2, %v1685_v58  ;;  %v7968_v58 = vmul.f32 %v7532_v2, %v1690_v62  ;;  %v7986_v62 = vmul.f32 %v7532_v2, %v1695_v12  ;;  %v8004_v12 = vmul.f32 %v7532_v2, %v1700_v20  ;;  %v1720_v20 = vld [vmem:[%s3971_s14 + $0x3dc] sm:$0x1] }
 0x348   : > { %13357 = vst [vmem:[#allocation179_spill] sm:$0xff] %v7926_v18  ;;  %v1706_v18 = vld [vmem:[%s3971_s14 + $0x36c] sm:$0x1] }
 0x349   : > { %13358 = vst [vmem:[#allocation200_spill] sm:$0xff] %v7929_v53  ;;  %v1705_v53 = vld [vmem:[%s3971_s14 + $0x364] sm:$0x1] }
 0x34a   : > { %13359 = vst [vmem:[#allocation147_spill] sm:$0xff] %v7938_v42  ;;  %v7965_v42 = vmul.f32 %v7532_v2, %v1689_v4  ;;  %v7983_v4 = vmul.f32 %v7532_v2, %v1694_v50  ;;  %v8001_v50 = vmul.f32 %v7532_v2, %v1699_v48  ;;  %v8019_v48 = vmul.f32 %v7532_v2, %v1704_v7 }
 0x34b   : > { %13360 = vst [vmem:[#allocation94_spill] sm:$0xff] %v7941_v60  ;;  %v1709_v60 = vld [vmem:[%s3971_s14 + $0x384] sm:$0x1] }
 0x34c   : > { %13361 = vst [vmem:[#allocation35_spill] sm:$0xff] %v7944_v21  ;;  %v1708_v21 = vld [vmem:[%s3971_s14 + $0x37c] sm:$0x1]  ;;  %v8040_v7 = vmul.f32 %v7532_v2, %v1709_v60  ;;  %v8061_v60 = vmul.f32 %v7532_v2, %v1716_v45 }
 0x34d   : > { %13362 = vst [vmem:[#allocation67_spill] sm:$0xff] %v7953_v6  ;;  %v7980_v6 = vmul.f32 %v7532_v2, %v1693_v57  ;;  %v7998_v57 = vmul.f32 %v7532_v2, %v1698_v55  ;;  %v8016_v55 = vmul.f32 %v7532_v2, %v1703_v26  ;;  %v1722_v26 = vld [vmem:[%s3971_s14 + $0x3ec] sm:$0x1] }
 0x34e   : > { %13363 = vst [vmem:[#allocation201_spill] sm:$0xff] %v7956_v49  ;;  %v1712_v49 = vld [vmem:[%s3971_s14 + $0x39c] sm:$0x1] }
 0x34f   : > { %13364 = vst [vmem:[#allocation148_spill] sm:$0xff] %v7959_v38  ;;  %v1711_v38 = vld [vmem:[%s3971_s14 + $0x394] sm:$0x1] }
 0x350   : > { %13365 = vst [vmem:[#allocation95_spill] sm:$0xff] %v7968_v58  ;;  %v7995_v58 = vmul.f32 %v7532_v2, %v1697_v28  ;;  %v8013_v28 = vmul.f32 %v7532_v2, %v1702_v27  ;;  %v8034_v27 = vmul.f32 %v7532_v2, %v1708_v21 }
 0x351   : > { %13366 = vst [vmem:[#allocation36_spill] sm:$0xff] %v7971_v36  ;;  %v1715_v36 = vld [vmem:[%s3971_s14 + $0x3b4] sm:$0x1] }
 0x352   : > { %13367 = vst [vmem:[#allocation202_spill] sm:$0xff] %v7974_v51  ;;  %v1714_v51 = vld [vmem:[%s3971_s14 + $0x3ac] sm:$0x1] }
 0x353   : > { %13368 = vst [vmem:[#allocation149_spill] sm:$0xff] %v7983_v4  ;;  %v8010_v4 = vmul.f32 %v7532_v2, %v1701_v13  ;;  %v8031_v13 = vmul.f32 %v7532_v2, %v1707_v24  ;;  %v8052_v24 = vmul.f32 %v7532_v2, %v1713_v34  ;;  %v8055_v21 = vmul.f32 %v7532_v2, %v1714_v51 }
 0x354   : > { %13369 = vst [vmem:[#allocation96_spill] sm:$0xff] %v7986_v62  ;;  %v1718_v62 = vld [vmem:[%s3971_s14 + $0x3cc] sm:$0x1]  ;;  %v8073_v34 = vmul.f32 %v7532_v2, %v1720_v20  ;;  %v8101_v20 = vadd.f32 %v7609_v43, %v7075_v15  ;;  %v8121_v15 = vadd.f32 %v7632_v35, %v7095_v9  ;;  %v8141_v9 = vadd.f32 %v7651_v39, %v7115_v1  ;;  %v13391_v35 = vld [vmem:[#allocation124_spill] sm:$0xff] }
 0x355   : > { %13370 = vst [vmem:[#allocation37_spill] sm:$0xff] %v7989_v30  ;;  %v1717_v30 = vld [vmem:[%s3971_s14 + $0x3c4] sm:$0x1]  ;;  %v13379_v43 = vld [vmem:[#allocation11_spill] sm:$0xff]  ;;  %v13397_v39 = vld [vmem:[#allocation68_spill] sm:$0xff] }
 0x356   : > { %13371 = vst [vmem:[#allocation203_spill] sm:$0xff] %v7995_v58  ;;  %v8028_v58 = vmul.f32 %v7532_v2, %v1706_v18  ;;  %v8049_v18 = vmul.f32 %v7532_v2, %v1712_v49 }
 0x357   : > { %13372 = vst [vmem:[#allocation150_spill] sm:$0xff] %v7998_v57  ;;  %v8025_v57 = vmul.f32 %v7532_v2, %v1705_v53  ;;  %v8046_v53 = vmul.f32 %v7532_v2, %v1711_v38  ;;  %v8067_v38 = vmul.f32 %v7532_v2, %v1718_v62  ;;  %v8089_v62 = vadd.f32 %v7600_v37, %v7063_v63  ;;  %v13380_v37 = vld [vmem:[#allocation118_spill] sm:$0xff] }
 0x358   : > { %13373 = vst [vmem:[#allocation97_spill] sm:$0xff] %v8001_v50  ;;  %v1719_v50 = vld [vmem:[%s3971_s14 + $0x3d4] sm:$0x1]  ;;  %v8109_v63 = vadd.f32 %v7619_v16, %v7083_v54  ;;  %v8129_v54 = vadd.f32 %v7638_v41, %v7103_v19  ;;  %v8149_v19 = vadd.f32 %v13380_v37, %v13379_v43  ;;  %v13386_v16 = vld [vmem:[#allocation55_spill] sm:$0xff] }
 0x359   : > { %13374 = vst [vmem:[#allocation38_spill] sm:$0xff] %v8004_v12  ;;  %v1721_v12 = vld [vmem:[%s3971_s14 + $0x3e4] sm:$0x1]  ;;  %v8070_v49 = vmul.f32 %v7532_v2, %v1719_v50  ;;  %v8093_v50 = vadd.f32 %v7603_v32, %v7067_v59  ;;  %v8113_v59 = vadd.f32 %v7622_v44, %v7087_v61  ;;  %v8133_v61 = vadd.f32 %v7641_v56, %v7107_v11  ;;  %v13382_v32 = vld [vmem:[#allocation205_spill] sm:$0xff]  ;;  %v13388_v44 = vld [vmem:[#allocation152_spill] sm:$0xff] }
 0x35a   : > { %13375 = vst [vmem:[#allocation204_spill] sm:$0xff] %v8013_v28  ;;  %v1724_v28 = vld [vmem:[%s3971_s14 + $0x3fc] sm:$0x1]  ;;  %v8076_v51 = vmul.f32 %v7532_v2, %v1721_v12  ;;  %v8097_v12 = vadd.f32 %v7606_v29, %v7071_v0  ;;  %v8117_v0 = vadd.f32 %v7625_v5, %v7091_v3  ;;  %v8137_v3 = vadd.f32 %v7648_v40, %v7111_v10  ;;  %v13383_v29 = vld [vmem:[#allocation83_spill] sm:$0xff]  ;;  %v13389_v5 = vld [vmem:[#allocation138_spill] sm:$0xff] }
 0x35b   : > { %13376 = vst [vmem:[#allocation151_spill] sm:$0xff] %v8016_v55  ;;  %v1723_v55 = vld [vmem:[%s3971_s14 + $0x3f4] sm:$0x1]  ;;  %v8153_v11 = vadd.f32 %v13383_v29, %v13382_v32  ;;  %v8161_v1 = vadd.f32 %v13389_v5, %v13388_v44  ;;  %v13394_v41 = vld [vmem:[#allocation99_spill] sm:$0xff]  ;;  %v13395_v56 = vld [vmem:[#allocation193_spill] sm:$0xff] }
 0x35c   : > { %13377 = vst [vmem:[#allocation98_spill] sm:$0xff] %v8019_v48  ;;  %v8043_v48 = vmul.f32 %v7532_v2, %v1710_v52  ;;  %v8064_v52 = vmul.f32 %v7532_v2, %v1717_v30  ;;  %v8082_v45 = vmul.f32 %v7532_v2, %v1723_v55  ;;  %v8085_v30 = vmul.f32 %v7532_v2, %v1724_v28  ;;  %v13400_v55 = vld [vmem:[#allocation40_spill] sm:$0xff]  ;;  %v13409_v5 = vld [vmem:[#allocation181_spill] sm:$0xff] }
 0x35d   : > { %13378 = vst [vmem:[#allocation39_spill] sm:$0xff] %v8034_v27  ;;  %v8058_v27 = vmul.f32 %v7532_v2, %v1715_v36  ;;  %v8079_v36 = vmul.f32 %v7532_v2, %v1722_v26  ;;  %v8105_v2 = vadd.f32 %v7616_v17, %v7079_v23  ;;  %v8125_v23 = vadd.f32 %v7635_v14, %v7099_v22  ;;  %v13385_v17 = vld [vmem:[#allocation180_spill] sm:$0xff]  ;;  %v13392_v14 = vld [vmem:[#allocation119_spill] sm:$0xff]  ;;  %v13401_v26 = vld [vmem:[#allocation26_spill] sm:$0xff] }
 0x35e   : > { %v8145_v22 = vadd.f32 %v7654_v31, %v7119_v47  ;;  %13381 = vst [vmem:[#allocation11_spill] sm:$0xff] %v8149_v19  ;;  %v8157_v10 = vadd.f32 %v13386_v16, %v13385_v17  ;;  %v8165_v47 = vadd.f32 %v13392_v14, %v13391_v35  ;;  %v8169_v40 = vadd.f32 %v13395_v56, %v13394_v41  ;;  %v13398_v31 = vld [vmem:[#allocation168_spill] sm:$0xff]  ;;  %v13406_v17 = vld [vmem:[#allocation206_spill] sm:$0xff]  ;;  %v13410_v35 = vld [vmem:[#allocation139_spill] sm:$0xff] }
 0x35f   : > { %13384 = vst [vmem:[#allocation118_spill] sm:$0xff] %v8153_v11  ;;  %v8173_v28 = vadd.f32 %v13398_v31, %v13397_v39  ;;  %v8177_v43 = vadd.f32 %v13401_v26, %v13400_v55  ;;  %v13403_v37 = vld [vmem:[#allocation12_spill] sm:$0xff]  ;;  %v8189_v14 = vadd.f32 %v13410_v35, %v13409_v5  ;;  %v13412_v41 = vld [vmem:[#allocation153_spill] sm:$0xff] }
 0x360   : > { %13387 = vst [vmem:[#allocation205_spill] sm:$0xff] %v8157_v10  ;;  %v13404_v32 = vld [vmem:[#allocation56_spill] sm:$0xff]  ;;  %v13415_v31 = vld [vmem:[#allocation125_spill] sm:$0xff]  ;;  %v2024_v10 = vld [vmem:[%s3971_s14 + $0x14d] sm:$0x1] }
 0x361   : > { %13390 = vst [vmem:[#allocation83_spill] sm:$0xff] %v8161_v1  ;;  %v8181_v29 = vadd.f32 %v13404_v32, %v13403_v37  ;;  %v13407_v16 = vld [vmem:[#allocation84_spill] sm:$0xff]  ;;  %v13421_v32 = vld [vmem:[#allocation69_spill] sm:$0xff]  ;;  %v2023_v1 = vld [vmem:[%s3971_s14 + $0x145] sm:$0x1] }
 0x362   : > { %13393 = vst [vmem:[#allocation180_spill] sm:$0xff] %v8165_v47  ;;  %v8185_v44 = vadd.f32 %v13407_v16, %v13406_v17  ;;  %v13413_v56 = vld [vmem:[#allocation120_spill] sm:$0xff]  ;;  %v13424_v16 = vld [vmem:[#allocation41_spill] sm:$0xff] }
 0x363   : > { %13396 = vst [vmem:[#allocation55_spill] sm:$0xff] %v8169_v40  ;;  %v8193_v39 = vadd.f32 %v13413_v56, %v13412_v41  ;;  %v13418_v26 = vld [vmem:[#allocation100_spill] sm:$0xff]  ;;  %v13427_v35 = vld [vmem:[#allocation13_spill] sm:$0xff] }
 0x364   : > { %13399 = vst [vmem:[#allocation152_spill] sm:$0xff] %v8173_v28  ;;  %v13416_v28 = vld [vmem:[#allocation85_spill] sm:$0xff]  ;;  %v2021_v40 = vld [vmem:[%s3971_s14 + $0x135] sm:$0x1] }
 0x365   : > { %13402 = vst [vmem:[#allocation138_spill] sm:$0xff] %v8177_v43  ;;  %v8197_v55 = vadd.f32 %v13416_v28, %v13415_v31  ;;  %v13419_v43 = vld [vmem:[#allocation169_spill] sm:$0xff]  ;;  %v13433_v31 = vld [vmem:[#allocation182_spill] sm:$0xff]  ;;  %v2025_v11 = vld [vmem:[%s3971_s14 + $0x155] sm:$0x1] }
 0x366   : > { %13405 = vst [vmem:[#allocation124_spill] sm:$0xff] %v8181_v29  ;;  %v8201_v37 = vadd.f32 %v13419_v43, %v13418_v26  ;;  %v13422_v29 = vld [vmem:[#allocation27_spill] sm:$0xff]  ;;  %v13430_v56 = vld [vmem:[#allocation101_spill] sm:$0xff]  ;;  %v13436_v26 = vld [vmem:[#allocation154_spill] sm:$0xff] }
 0x367   : > { %13408 = vst [vmem:[#allocation119_spill] sm:$0xff] %v8185_v44  ;;  %v8205_v17 = vadd.f32 %v13422_v29, %v13421_v32  ;;  %v13425_v44 = vld [vmem:[#allocation121_spill] sm:$0xff]  ;;  %v13439_v32 = vld [vmem:[#allocation126_spill] sm:$0xff] }
 0x368   : > { %13411 = vst [vmem:[#allocation99_spill] sm:$0xff] %v8189_v14  ;;  %v8209_v5 = vadd.f32 %v13425_v44, %v13424_v16  ;;  %v13428_v14 = vld [vmem:[#allocation194_spill] sm:$0xff]  ;;  %v2022_v47 = vld [vmem:[%s3971_s14 + $0x13d] sm:$0x1] }
 0x369   : > { %13414 = vst [vmem:[#allocation193_spill] sm:$0xff] %v8193_v39  ;;  %v8213_v41 = vadd.f32 %v13428_v14, %v13427_v35  ;;  %v13431_v39 = vld [vmem:[#allocation140_spill] sm:$0xff]  ;;  %v13442_v16 = vld [vmem:[#allocation42_spill] sm:$0xff] }
 0x36a   : > { %13417 = vst [vmem:[#allocation68_spill] sm:$0xff] %v8197_v55  ;;  %v8217_v28 = vadd.f32 %v13431_v39, %v13430_v56  ;;  %v13434_v55 = vld [vmem:[#allocation57_spill] sm:$0xff]  ;;  %v13445_v35 = vld [vmem:[#allocation70_spill] sm:$0xff]  ;;  %v13448_v56 = vld [vmem:[#allocation207_spill] sm:$0xff] }
 0x36b   : > { %13420 = vst [vmem:[#allocation168_spill] sm:$0xff] %v8201_v37  ;;  %v8221_v43 = vadd.f32 %v13434_v55, %v13433_v31  ;;  %v13437_v37 = vld [vmem:[#allocation86_spill] sm:$0xff] }
 0x36c   : > { %13423 = vst [vmem:[#allocation40_spill] sm:$0xff] %v8205_v17  ;;  %v8225_v29 = vadd.f32 %v13437_v37, %v13436_v26  ;;  %v13440_v17 = vld [vmem:[#allocation122_spill] sm:$0xff]  ;;  %v13454_v26 = vld [vmem:[#allocation155_spill] sm:$0xff] }
 0x36d   : > { %13426 = vst [vmem:[#allocation26_spill] sm:$0xff] %v8209_v5  ;;  %v8229_v44 = vadd.f32 %v13440_v17, %v13439_v32  ;;  %v13443_v5 = vld [vmem:[#allocation28_spill] sm:$0xff]  ;;  %v13451_v31 = vld [vmem:[#allocation14_spill] sm:$0xff]  ;;  %v13457_v32 = vld [vmem:[#allocation183_spill] sm:$0xff] }
 0x36e   : > { %13429 = vst [vmem:[#allocation12_spill] sm:$0xff] %v8213_v41  ;;  %v8233_v14 = vadd.f32 %v13443_v5, %v13442_v16  ;;  %v13446_v41 = vld [vmem:[#allocation170_spill] sm:$0xff] }
 0x36f   : > { %13432 = vst [vmem:[#allocation56_spill] sm:$0xff] %v8217_v28  ;;  %v8237_v39 = vadd.f32 %v13446_v41, %v13445_v35  ;;  %v13449_v28 = vld [vmem:[#allocation195_spill] sm:$0xff]  ;;  %v13460_v16 = vld [vmem:[#allocation102_spill] sm:$0xff] }
 0x370   : > { %13435 = vst [vmem:[#allocation206_spill] sm:$0xff] %v8221_v43  ;;  %v8241_v55 = vadd.f32 %v13449_v28, %v13448_v56  ;;  %v13452_v43 = vld [vmem:[#allocation141_spill] sm:$0xff]  ;;  %v13463_v35 = vld [vmem:[#allocation127_spill] sm:$0xff] }
 0x371   : > { %13438 = vst [vmem:[#allocation84_spill] sm:$0xff] %v8225_v29  ;;  %v8245_v37 = vadd.f32 %v13452_v43, %v13451_v31  ;;  %v13455_v29 = vld [vmem:[#allocation58_spill] sm:$0xff]  ;;  %v13466_v56 = vld [vmem:[#allocation43_spill] sm:$0xff] }
 0x372   : > { %13441 = vst [vmem:[#allocation181_spill] sm:$0xff] %v8229_v44  ;;  %v8249_v17 = vadd.f32 %v13455_v29, %v13454_v26  ;;  %v13458_v44 = vld [vmem:[#allocation87_spill] sm:$0xff]  ;;  %v13472_v26 = vld [vmem:[#allocation208_spill] sm:$0xff] }
 0x373   : > { %13444 = vst [vmem:[#allocation139_spill] sm:$0xff] %v8233_v14  ;;  %v8253_v5 = vadd.f32 %v13458_v44, %v13457_v32  ;;  %v13461_v14 = vld [vmem:[#allocation171_spill] sm:$0xff] }
 0x374   : > { %13447 = vst [vmem:[#allocation153_spill] sm:$0xff] %v8237_v39  ;;  %v8257_v41 = vadd.f32 %v13461_v14, %v13460_v16  ;;  %v13464_v39 = vld [vmem:[#allocation29_spill] sm:$0xff]  ;;  %v13469_v31 = vld [vmem:[#allocation71_spill] sm:$0xff]  ;;  %v13478_v16 = vld [vmem:[#allocation156_spill] sm:$0xff] }
 0x375   : > { %13450 = vst [vmem:[#allocation120_spill] sm:$0xff] %v8241_v55  ;;  %v8261_v28 = vadd.f32 %v13464_v39, %v13463_v35  ;;  %v13467_v55 = vld [vmem:[#allocation59_spill] sm:$0xff]  ;;  %v13481_v35 = vld [vmem:[#allocation184_spill] sm:$0xff] }
 0x376   : > { %13453 = vst [vmem:[#allocation125_spill] sm:$0xff] %v8245_v37  ;;  %v8265_v43 = vadd.f32 %v13467_v55, %v13466_v56  ;;  %v13470_v37 = vld [vmem:[#allocation196_spill] sm:$0xff]  ;;  %v13475_v32 = vld [vmem:[#allocation15_spill] sm:$0xff] }
 0x377   : > { %13456 = vst [vmem:[#allocation85_spill] sm:$0xff] %v8249_v17  ;;  %v8269_v29 = vadd.f32 %v13470_v37, %v13469_v31  ;;  %v13473_v17 = vld [vmem:[#allocation142_spill] sm:$0xff]  ;;  %v13484_v56 = vld [vmem:[#allocation44_spill] sm:$0xff] }
 0x378   : > { %13459 = vst [vmem:[#allocation100_spill] sm:$0xff] %v8253_v5  ;;  %v8273_v44 = vadd.f32 %v13473_v17, %v13472_v26  ;;  %v13476_v5 = vld [vmem:[#allocation123_spill] sm:$0xff]  ;;  %v13487_v31 = vld [vmem:[#allocation128_spill] sm:$0xff] }
 0x379   : > { %13462 = vst [vmem:[#allocation169_spill] sm:$0xff] %v8257_v41  ;;  %v8277_v14 = vadd.f32 %v13476_v5, %v13475_v32  ;;  %v13479_v41 = vld [vmem:[#allocation88_spill] sm:$0xff]  ;;  %v13490_v26 = vld [vmem:[#allocation103_spill] sm:$0xff] }
 0x37a   : > { %13465 = vst [vmem:[#allocation69_spill] sm:$0xff] %v8261_v28  ;;  %v8281_v39 = vadd.f32 %v13479_v41, %v13478_v16  ;;  %v13482_v28 = vld [vmem:[#allocation172_spill] sm:$0xff]  ;;  %v13496_v16 = vld [vmem:[#allocation157_spill] sm:$0xff] }
 0x37b   : > { %13468 = vst [vmem:[#allocation27_spill] sm:$0xff] %v8265_v43  ;;  %v8285_v55 = vadd.f32 %v13482_v28, %v13481_v35  ;;  %v13485_v43 = vld [vmem:[#allocation30_spill] sm:$0xff]  ;;  %v13493_v32 = vld [vmem:[#allocation72_spill] sm:$0xff] }
 0x37c   : > { %13471 = vst [vmem:[#allocation41_spill] sm:$0xff] %v8269_v29  ;;  %v8289_v37 = vadd.f32 %v13485_v43, %v13484_v56  ;;  %v13488_v29 = vld [vmem:[#allocation60_spill] sm:$0xff]  ;;  %v13502_v56 = vld [vmem:[#allocation209_spill] sm:$0xff] }
 0x37d   : > { %13474 = vst [vmem:[#allocation121_spill] sm:$0xff] %v8273_v44  ;;  %v8293_v17 = vadd.f32 %v13488_v29, %v13487_v31  ;;  %v13491_v44 = vld [vmem:[#allocation89_spill] sm:$0xff]  ;;  %v13499_v35 = vld [vmem:[#allocation16_spill] sm:$0xff] }
 0x37e   : > { %13477 = vst [vmem:[#allocation13_spill] sm:$0xff] %v8277_v14  ;;  %v8297_v5 = vadd.f32 %v13491_v44, %v13490_v26  ;;  %v13494_v14 = vld [vmem:[#allocation143_spill] sm:$0xff]  ;;  %v13505_v31 = vld [vmem:[#allocation73_spill] sm:$0xff] }
 0x37f   : > { %13480 = vst [vmem:[#allocation194_spill] sm:$0xff] %v8281_v39  ;;  %v8301_v41 = vadd.f32 %v13494_v14, %v13493_v32  ;;  %v13497_v39 = vld [vmem:[#allocation173_spill] sm:$0xff] }
 0x380   : > { %13483 = vst [vmem:[#allocation101_spill] sm:$0xff] %v8285_v55  ;;  %v8305_v28 = vadd.f32 %v13497_v39, %v13496_v16  ;;  %v13500_v55 = vld [vmem:[#allocation197_spill] sm:$0xff]  ;;  %v13514_v16 = vld [vmem:[#allocation104_spill] sm:$0xff] }
 0x381   : > { %13486 = vst [vmem:[#allocation140_spill] sm:$0xff] %v8289_v37  ;;  %v8309_v43 = vadd.f32 %v13500_v55, %v13499_v35  ;;  %v13503_v37 = vld [vmem:[#allocation61_spill] sm:$0xff] }
 0x382   : > { %13489 = vst [vmem:[#allocation182_spill] sm:$0xff] %v8293_v17  ;;  %v8313_v29 = vadd.f32 %v13503_v37, %v13502_v56  ;;  %v13506_v17 = vld [vmem:[#allocation31_spill] sm:$0xff]  ;;  %v13508_v26 = vld [vmem:[#allocation45_spill] sm:$0xff]  ;;  %v13520_v56 = vld [vmem:[#allocation158_spill] sm:$0xff] }
 0x383   : > { %13492 = vst [vmem:[#allocation57_spill] sm:$0xff] %v8297_v5  ;;  %v8317_v44 = vadd.f32 %v13506_v17, %v13505_v31  ;;  %v13509_v5 = vld [vmem:[#allocation174_spill] sm:$0xff]  ;;  %v13511_v32 = vld [vmem:[#allocation129_spill] sm:$0xff] }
 0x384   : > { %13495 = vst [vmem:[#allocation154_spill] sm:$0xff] %v8301_v41  ;;  %v8321_v14 = vadd.f32 %v13509_v5, %v13508_v26  ;;  %v13512_v41 = vld [vmem:[#allocation90_spill] sm:$0xff]  ;;  %v13517_v35 = vld [vmem:[#allocation185_spill] sm:$0xff] }
 0x385   : > { %13498 = vst [vmem:[#allocation86_spill] sm:$0xff] %v8305_v28  ;;  %v8325_v39 = vadd.f32 %v13512_v41, %v13511_v32  ;;  %v13515_v28 = vld [vmem:[#allocation144_spill] sm:$0xff]  ;;  %v13523_v31 = vld [vmem:[#allocation17_spill] sm:$0xff]  ;;  %v13526_v26 = vld [vmem:[#allocation46_spill] sm:$0xff] }
 0x386   : > { %13501 = vst [vmem:[#allocation126_spill] sm:$0xff] %v8309_v43  ;;  %v8329_v55 = vadd.f32 %v13515_v28, %v13514_v16  ;;  %v13518_v43 = vld [vmem:[#allocation62_spill] sm:$0xff]  ;;  %v13532_v16 = vld [vmem:[#allocation105_spill] sm:$0xff] }
 0x387   : > { %13504 = vst [vmem:[#allocation122_spill] sm:$0xff] %v8313_v29  ;;  %v8333_v37 = vadd.f32 %v13518_v43, %v13517_v35  ;;  %v13521_v29 = vld [vmem:[#allocation198_spill] sm:$0xff] }
 0x388   : > { %13507 = vst [vmem:[#allocation42_spill] sm:$0xff] %v8317_v44  ;;  %v8337_v17 = vadd.f32 %v13521_v29, %v13520_v56  ;;  %v13524_v44 = vld [vmem:[#allocation175_spill] sm:$0xff]  ;;  %v13529_v32 = vld [vmem:[#allocation74_spill] sm:$0xff] }
 0x389   : > { %13510 = vst [vmem:[#allocation28_spill] sm:$0xff] %v8321_v14  ;;  %v8341_v5 = vadd.f32 %v13524_v44, %v13523_v31  ;;  %v13527_v14 = vld [vmem:[#allocation32_spill] sm:$0xff]  ;;  %v13535_v35 = vld [vmem:[#allocation130_spill] sm:$0xff]  ;;  %v13538_v56 = vld [vmem:[#allocation159_spill] sm:$0xff] }
 0x38a   : > { %13513 = vst [vmem:[#allocation70_spill] sm:$0xff] %v8325_v39  ;;  %v8345_v41 = vadd.f32 %v13527_v14, %v13526_v26  ;;  %v13530_v39 = vld [vmem:[#allocation63_spill] sm:$0xff]  ;;  %v13541_v31 = vld [vmem:[#allocation186_spill] sm:$0xff] }
 0x38b   : > { %13516 = vst [vmem:[#allocation170_spill] sm:$0xff] %v8329_v55  ;;  %v8349_v28 = vadd.f32 %v13530_v39, %v13529_v32  ;;  %v13533_v55 = vld [vmem:[#allocation91_spill] sm:$0xff]  ;;  %v13544_v26 = vld [vmem:[#allocation106_spill] sm:$0xff] }
 0x38c   : > { %13519 = vst [vmem:[#allocation207_spill] sm:$0xff] %v8333_v37  ;;  %v8353_v43 = vadd.f32 %v13533_v55, %v13532_v16  ;;  %v13536_v37 = vld [vmem:[#allocation176_spill] sm:$0xff]  ;;  %v13547_v32 = vld [vmem:[#allocation18_spill] sm:$0xff]  ;;  %v13550_v16 = vld [vmem:[#allocation47_spill] sm:$0xff] }
 0x38d   : > { %13522 = vst [vmem:[#allocation195_spill] sm:$0xff] %v8337_v17  ;;  %v8357_v29 = vadd.f32 %v13536_v37, %v13535_v35  ;;  %v13539_v17 = vld [vmem:[#allocation145_spill] sm:$0xff]  ;;  %v13553_v35 = vld [vmem:[#allocation75_spill] sm:$0xff] }
 0x38e   : > { %13525 = vst [vmem:[#allocation14_spill] sm:$0xff] %v8341_v5  ;;  %v8361_v44 = vadd.f32 %v13539_v17, %v13538_v56  ;;  %v13542_v5 = vld [vmem:[#allocation64_spill] sm:$0xff]  ;;  %v13556_v56 = vld [vmem:[#allocation107_spill] sm:$0xff] }
 0x38f   : > { %13528 = vst [vmem:[#allocation141_spill] sm:$0xff] %v8345_v41  ;;  %v8365_v14 = vadd.f32 %v13542_v5, %v13541_v31  ;;  %v13545_v41 = vld [vmem:[#allocation199_spill] sm:$0xff] }
 0x390   : > { %13531 = vst [vmem:[#allocation155_spill] sm:$0xff] %v8349_v28  ;;  %v8369_v39 = vadd.f32 %v13545_v41, %v13544_v26  ;;  %v13548_v28 = vld [vmem:[#allocation177_spill] sm:$0xff]  ;;  %v13559_v31 = vld [vmem:[#allocation131_spill] sm:$0xff]  ;;  %v13562_v26 = vld [vmem:[#allocation160_spill] sm:$0xff] }
 0x391   : > { %13534 = vst [vmem:[#allocation58_spill] sm:$0xff] %v8353_v43  ;;  %v8373_v55 = vadd.f32 %v13548_v28, %v13547_v32  ;;  %v13551_v43 = vld [vmem:[#allocation33_spill] sm:$0xff]  ;;  %v8393_v28 = vadd.f32 %v7904_v25, %v13562_v26  ;;  %v13564_v32 = vld [vmem:[#allocation187_spill] sm:$0xff] }
 0x392   : > { %13537 = vst [vmem:[#allocation183_spill] sm:$0xff] %v8357_v29  ;;  %v8377_v37 = vadd.f32 %v13551_v43, %v13550_v16  ;;  %v13554_v29 = vld [vmem:[#allocation65_spill] sm:$0xff]  ;;  %v13567_v16 = vld [vmem:[#allocation48_spill] sm:$0xff] }
 0x393   : > { %13540 = vst [vmem:[#allocation87_spill] sm:$0xff] %v8361_v44  ;;  %v8381_v17 = vadd.f32 %v13554_v29, %v13553_v35  ;;  %v13557_v44 = vld [vmem:[#allocation92_spill] sm:$0xff]  ;;  %v13570_v35 = vld [vmem:[#allocation19_spill] sm:$0xff]  ;;  %v13578_v26 = vld [vmem:[#allocation161_spill] sm:$0xff] }
 0x394   : > { %13543 = vst [vmem:[#allocation102_spill] sm:$0xff] %v8365_v14  ;;  %v8385_v5 = vadd.f32 %v13557_v44, %v13556_v56  ;;  %v13560_v14 = vld [vmem:[#allocation146_spill] sm:$0xff] }
 0x395   : > { %13546 = vst [vmem:[#allocation171_spill] sm:$0xff] %v8369_v39  ;;  %v8389_v41 = vadd.f32 %v13560_v14, %v13559_v31  ;;  %v13573_v56 = vld [vmem:[#allocation210_spill] sm:$0xff]  ;;  %v13575_v31 = vld [vmem:[#allocation76_spill] sm:$0xff]  ;;  %v2020_v39 = vld [vmem:[%s3971_s14 + $0x12d] sm:$0x1] }
 0x396   : > { %13549 = vst [vmem:[#allocation127_spill] sm:$0xff] %v8373_v55  ;;  %v13565_v55 = vld [vmem:[#allocation178_spill] sm:$0xff]  ;;  %v8409_v14 = vadd.f32 %v7920_v33, %v13573_v56  ;;  %v13589_v56 = vld [vmem:[#allocation49_spill] sm:$0xff] }
 0x397   : > { %13552 = vst [vmem:[#allocation29_spill] sm:$0xff] %v8377_v37  ;;  %v8397_v43 = vadd.f32 %v13565_v55, %v13564_v32  ;;  %v13568_v37 = vld [vmem:[#allocation93_spill] sm:$0xff]  ;;  %v13581_v32 = vld [vmem:[#allocation132_spill] sm:$0xff] }
 0x398   : > { %13555 = vst [vmem:[#allocation43_spill] sm:$0xff] %v8381_v17  ;;  %v8401_v29 = vadd.f32 %v13568_v37, %v13567_v16  ;;  %v13571_v17 = vld [vmem:[#allocation66_spill] sm:$0xff]  ;;  %v13584_v16 = vld [vmem:[#allocation108_spill] sm:$0xff] }
 0x399   : > { %13558 = vst [vmem:[#allocation59_spill] sm:$0xff] %v8385_v5  ;;  %v8405_v44 = vadd.f32 %v13571_v17, %v13570_v35  ;;  %v8425_v17 = vadd.f32 %v7935_v46, %v13584_v16  ;;  %v13586_v35 = vld [vmem:[#allocation77_spill] sm:$0xff]  ;;  %v13600_v16 = vld [vmem:[#allocation162_spill] sm:$0xff] }
 0x39a   : > { %13561 = vst [vmem:[#allocation71_spill] sm:$0xff] %v8389_v41  ;;  %v13576_v41 = vld [vmem:[#allocation34_spill] sm:$0xff] }
 0x39b   : > { %13563 = vst [vmem:[#allocation196_spill] sm:$0xff] %v8393_v28  ;;  %v8413_v25 = vadd.f32 %v13576_v41, %v13575_v31  ;;  %v13579_v28 = vld [vmem:[#allocation179_spill] sm:$0xff]  ;;  %v13592_v31 = vld [vmem:[#allocation20_spill] sm:$0xff]  ;;  %v2019_v5 = vld [vmem:[%s3971_s14 + $0x125] sm:$0x1] }
 0x39c   : > { %13566 = vst [vmem:[#allocation208_spill] sm:$0xff] %v8397_v43  ;;  %v8417_v55 = vadd.f32 %v13579_v28, %v13578_v26  ;;  %v13582_v43 = vld [vmem:[#allocation200_spill] sm:$0xff]  ;;  %v13595_v26 = vld [vmem:[#allocation109_spill] sm:$0xff] }
 0x39d   : > { %13569 = vst [vmem:[#allocation142_spill] sm:$0xff] %v8401_v29  ;;  %v8421_v37 = vadd.f32 %v13582_v43, %v13581_v32  ;;  %v8441_v43 = vadd.f32 %v7950_v8, %v13595_v26  ;;  %v13597_v32 = vld [vmem:[#allocation188_spill] sm:$0xff]  ;;  %v13611_v26 = vld [vmem:[#allocation110_spill] sm:$0xff]  ;;  %v2018_v29 = vld [vmem:[%s3971_s14 + $0x11d] sm:$0x1] }
 0x39e   : > { %13572 = vst [vmem:[#allocation15_spill] sm:$0xff] %v8405_v44  ;;  %v13587_v44 = vld [vmem:[#allocation147_spill] sm:$0xff] }
 0x39f   : > { %13574 = vst [vmem:[#allocation123_spill] sm:$0xff] %v8409_v14  ;;  %v8429_v33 = vadd.f32 %v13587_v44, %v13586_v35  ;;  %v13590_v14 = vld [vmem:[#allocation94_spill] sm:$0xff]  ;;  %v13603_v35 = vld [vmem:[#allocation133_spill] sm:$0xff] }
 0x3a0   : > { %13577 = vst [vmem:[#allocation156_spill] sm:$0xff] %v8413_v25  ;;  %v8433_v41 = vadd.f32 %v13590_v14, %v13589_v56  ;;  %v13593_v25 = vld [vmem:[#allocation35_spill] sm:$0xff]  ;;  %v13606_v56 = vld [vmem:[#allocation50_spill] sm:$0xff] }
 0x3a1   : > { %13580 = vst [vmem:[#allocation88_spill] sm:$0xff] %v8417_v55  ;;  %v8437_v28 = vadd.f32 %v13593_v25, %v13592_v31  ;;  %v8457_v25 = vadd.f32 %v7965_v42, %v13606_v56  ;;  %v13608_v31 = vld [vmem:[#allocation78_spill] sm:$0xff]  ;;  %v13622_v56 = vld [vmem:[#allocation111_spill] sm:$0xff]  ;;  %v2017_v55 = vld [vmem:[%s3971_s14 + $0x115] sm:$0x1] }
 0x3a2   : > { %13583 = vst [vmem:[#allocation184_spill] sm:$0xff] %v8421_v37  ;;  %v13598_v37 = vld [vmem:[#allocation67_spill] sm:$0xff] }
 0x3a3   : > { %13585 = vst [vmem:[#allocation172_spill] sm:$0xff] %v8425_v17  ;;  %v8445_v46 = vadd.f32 %v13598_v37, %v13597_v32  ;;  %v13601_v17 = vld [vmem:[#allocation201_spill] sm:$0xff] }
 0x3a4   : > { %13588 = vst [vmem:[#allocation44_spill] sm:$0xff] %v8429_v33  ;;  %v8449_v44 = vadd.f32 %v13601_v17, %v13600_v16  ;;  %v13604_v33 = vld [vmem:[#allocation148_spill] sm:$0xff]  ;;  %v13614_v32 = vld [vmem:[#allocation21_spill] sm:$0xff]  ;;  %v13617_v16 = vld [vmem:[#allocation163_spill] sm:$0xff] }
 0x3a5   : > { %13591 = vst [vmem:[#allocation30_spill] sm:$0xff] %v8433_v41  ;;  %v8453_v14 = vadd.f32 %v13604_v33, %v13603_v35  ;;  %v8473_v33 = vadd.f32 %v7980_v6, %v13617_v16  ;;  %v13619_v35 = vld [vmem:[#allocation189_spill] sm:$0xff]  ;;  %v13631_v16 = vld [vmem:[#allocation79_spill] sm:$0xff] }
 0x3a6   : > { %13594 = vst [vmem:[#allocation128_spill] sm:$0xff] %v8437_v28  ;;  %v13609_v28 = vld [vmem:[#allocation95_spill] sm:$0xff] }
 0x3a7   : > { %13596 = vst [vmem:[#allocation60_spill] sm:$0xff] %v8441_v43  ;;  %v8461_v8 = vadd.f32 %v13609_v28, %v13608_v31  ;;  %v13612_v43 = vld [vmem:[#allocation36_spill] sm:$0xff]  ;;  %v2016_v41 = vld [vmem:[%s3971_s14 + $0x10d] sm:$0x1] }
 0x3a8   : > { %13599 = vst [vmem:[#allocation103_spill] sm:$0xff] %v8445_v46  ;;  %v8465_v37 = vadd.f32 %v13612_v43, %v13611_v26  ;;  %v13615_v46 = vld [vmem:[#allocation202_spill] sm:$0xff]  ;;  %v13623_v28 = vld [vmem:[#allocation96_spill] sm:$0xff]  ;;  %v13626_v26 = vld [vmem:[#allocation37_spill] sm:$0xff] }
 0x3a9   : > { %13602 = vst [vmem:[#allocation89_spill] sm:$0xff] %v8449_v44  ;;  %v8469_v17 = vadd.f32 %v13615_v46, %v13614_v32  ;;  %v8481_v31 = vadd.f32 %v13623_v28, %v13622_v56  ;;  %v13625_v43 = vld [vmem:[#allocation134_spill] sm:$0xff]  ;;  %v13628_v46 = vld [vmem:[#allocation51_spill] sm:$0xff] }
 0x3aa   : > { %13605 = vst [vmem:[#allocation72_spill] sm:$0xff] %v8453_v14  ;;  %v13620_v14 = vld [vmem:[#allocation149_spill] sm:$0xff]  ;;  %v13629_v32 = vld [vmem:[#allocation203_spill] sm:$0xff]  ;;  %v13637_v56 = vld [vmem:[#allocation22_spill] sm:$0xff] }
 0x3ab   : > { %13607 = vst [vmem:[#allocation143_spill] sm:$0xff] %v8457_v25  ;;  %v8477_v42 = vadd.f32 %v13620_v14, %v13619_v35  ;;  %v8489_v6 = vadd.f32 %v13629_v32, %v13628_v46  ;;  %v13634_v14 = vld [vmem:[#allocation112_spill] sm:$0xff]  ;;  %v13635_v35 = vld [vmem:[#allocation97_spill] sm:$0xff]  ;;  %v13638_v28 = vld [vmem:[#allocation38_spill] sm:$0xff] }
 0x3ac   : > { %13610 = vst [vmem:[#allocation157_spill] sm:$0xff] %v8461_v8  ;;  %v13640_v8 = vld [vmem:[#allocation164_spill] sm:$0xff]  ;;  %v2014_v25 = vld [vmem:[%s3971_s14 + $0xfd] sm:$0x1]  ;;  %v2015_v44 = vld [vmem:[%s3971_s14 + $0x105] sm:$0x1] }
 0x3ad   : > { %13613 = vst [vmem:[#allocation173_spill] sm:$0xff] %v8465_v37  ;;  %v8485_v37 = vadd.f32 %v13626_v26, %v13625_v43  ;;  %v8505_v43 = vadd.f32 %v8010_v4, %v13640_v8  ;;  %v13642_v26 = vld [vmem:[#allocation190_spill] sm:$0xff]  ;;  %v13645_v32 = vld [vmem:[#allocation52_spill] sm:$0xff] }
 0x3ae   : > { %13616 = vst [vmem:[#allocation16_spill] sm:$0xff] %v8469_v17  ;;  %v13653_v4 = vld [vmem:[#allocation80_spill] sm:$0xff] }
 0x3af   : > { %13618 = vst [vmem:[#allocation197_spill] sm:$0xff] %v8473_v33  ;;  %v13632_v33 = vld [vmem:[#allocation150_spill] sm:$0xff]  ;;  %v8525_v8 = vadd.f32 %v8028_v58, %v13653_v4  ;;  %v13662_v4 = vld [vmem:[#allocation81_spill] sm:$0xff] }
 0x3b0   : > { %13621 = vst [vmem:[#allocation209_spill] sm:$0xff] %v8477_v42  ;;  %v8493_v17 = vadd.f32 %v13632_v33, %v13631_v16  ;;  %v8497_v42 = vadd.f32 %v13635_v35, %v13634_v14  ;;  %v13646_v33 = vld [vmem:[#allocation151_spill] sm:$0xff]  ;;  %v13649_v35 = vld [vmem:[#allocation98_spill] sm:$0xff] }
 0x3b1   : > { %13624 = vst [vmem:[#allocation61_spill] sm:$0xff] %v8481_v31  ;;  %v8501_v31 = vadd.f32 %v13638_v28, %v13637_v56  ;;  %v8513_v16 = vadd.f32 %v13646_v33, %v13645_v32  ;;  %v13648_v14 = vld [vmem:[#allocation135_spill] sm:$0xff]  ;;  %v13651_v56 = vld [vmem:[#allocation113_spill] sm:$0xff] }
 0x3b2   : > { %13627 = vst [vmem:[#allocation73_spill] sm:$0xff] %v8485_v37  ;;  %v13643_v37 = vld [vmem:[#allocation204_spill] sm:$0xff]  ;;  %v8521_v28 = vadd.f32 %v8025_v57, %v13651_v56  ;;  %v13658_v32 = vld [vmem:[#allocation39_spill] sm:$0xff]  ;;  %v1986_v57 = vld [vmem:[%s3971_s14 + $0x1d] sm:$0x1] }
 0x3b3   : > { %13630 = vst [vmem:[#allocation31_spill] sm:$0xff] %v8489_v6  ;;  %v8509_v46 = vadd.f32 %v13643_v37, %v13642_v26  ;;  %v13655_v37 = vld [vmem:[#allocation165_spill] sm:$0xff]  ;;  %v13660_v56 = vld [vmem:[#allocation114_spill] sm:$0xff]  ;;  %v2013_v6 = vld [vmem:[%s3971_s14 + $0xf5] sm:$0x1] }
 0x3b4   : > { %13633 = vst [vmem:[#allocation45_spill] sm:$0xff] %v8493_v17  ;;  %v8529_v26 = vadd.f32 %v8031_v13, %v13655_v37  ;;  %v8541_v58 = vadd.f32 %v8040_v7, %v13660_v56  ;;  %v8545_v13 = vadd.f32 %v8043_v48, %v13662_v4  ;;  %v13664_v37 = vld [vmem:[#allocation53_spill] sm:$0xff]  ;;  %v8558_v7 = vld [vmem:[#allocation5 + $0x5] ss:$0 sm:$0xff]  ;;  %v13668_v56 = vld [vmem:[#allocation115_spill] sm:$0xff] }
 0x3b5   : > { %13636 = vst [vmem:[#allocation174_spill] sm:$0xff] %v8497_v42  ;;  %v8517_v42 = vadd.f32 %v13649_v35, %v13648_v14  ;;  %v1984_v14 = vld [vmem:[%s3971_s14 + $0xd] sm:$0x1]  ;;  %v1985_v35 = vld [vmem:[%s3971_s14 + $0x15] sm:$0x1]  ;;  %v8562_v48 = vadd.f32 %v8052_v24, %v13668_v56 }
 0x3b6   : > { %13639 = vst [vmem:[#allocation129_spill] sm:$0xff] %v8501_v31  ;;  %v13670_v4 = vld [vmem:[#allocation191_spill] sm:$0xff]  ;;  %v1993_v24 = vld [vmem:[%s3971_s14 + $0x55] sm:$0x1]  ;;  %v1994_v56 = vld [vmem:[%s3971_s14 + $0x5d] sm:$0x1] }
 0x3b7   : > { %13641 = vst [vmem:[#allocation90_spill] sm:$0xff] %v8505_v43  ;;  %v2010_v43 = vld [vmem:[%s3971_s14 + $0xdd] sm:$0x1]  ;;  %v2011_v31 = vld [vmem:[%s3971_s14 + $0xe5] sm:$0x1] }
 0x3b8   : > { %13644 = vst [vmem:[#allocation104_spill] sm:$0xff] %v8509_v46  ;;  %v13657_v46 = vld [vmem:[#allocation23_spill] sm:$0xff] }
 0x3b9   : > { %13647 = vst [vmem:[#allocation144_spill] sm:$0xff] %v8513_v16  ;;  %v8533_v33 = vadd.f32 %v13658_v32, %v13657_v46  ;;  %v1983_v16 = vld [vmem:[%s3971_s14 + $0x5] sm:$0x1]  ;;  %v8549_v46 = vadd.f32 %v8046_v53, %v13664_v37  ;;  %v13666_v32 = vld [vmem:[#allocation136_spill] sm:$0xff]  ;;  %v8566_v53 = vadd.f32 %v8055_v21, %v13670_v4  ;;  %v2012_v17 = vld [vmem:[%s3971_s14 + $0xed] sm:$0x1] }
 0x3ba   : > { %13650 = vst [vmem:[#allocation185_spill] sm:$0xff] %v8517_v42  ;;  %v13672_v37 = vld [vmem:[#allocation166_spill] sm:$0xff]  ;;  %v2009_v42 = vld [vmem:[%s3971_s14 + $0xd5] sm:$0x1] }
 0x3bb   : > { %13652 = vst [vmem:[#allocation62_spill] sm:$0xff] %v8521_v28  ;;  %v1989_v28 = vld [vmem:[%s3971_s14 + $0x35] sm:$0x1] }
 0x3bc   : > { %13654 = vst [vmem:[#allocation158_spill] sm:$0xff] %v8525_v8  ;;  %v1988_v8 = vld [vmem:[%s3971_s14 + $0x2d] sm:$0x1] }
 0x3bd   : > { %13656 = vst [vmem:[#allocation198_spill] sm:$0xff] %v8529_v26  ;;  %v1987_v26 = vld [vmem:[%s3971_s14 + $0x25] sm:$0x1] }
 0x3be   : > { %13659 = vst [vmem:[#allocation17_spill] sm:$0xff] %v8533_v33  ;;  %v8553_v33 = vadd.f32 %v8049_v18, %v13666_v32  ;;  %v8570_v18 = vadd.f32 %v8058_v27, %v13672_v37  ;;  %v13674_v32 = vld [vmem:[#allocation24_spill] sm:$0xff]  ;;  %v13678_v27 = vld [vmem:[#allocation82_spill] sm:$0xff] }
 0x3bf   : > { %13661 = vst [vmem:[#allocation175_spill] sm:$0xff] %v8541_v58  ;;  %v1992_v58 = vld [vmem:[%s3971_s14 + $0x4d] sm:$0x1]  ;;  %v8587_v4 = vadd.f32 %v8067_v38, %v13678_v27  ;;  %v13686_v38 = vld [vmem:[#allocation192_spill] sm:$0xff] }
 0x3c0   : > { %13663 = vst [vmem:[#allocation46_spill] sm:$0xff] %v8545_v13  ;;  %v1991_v13 = vld [vmem:[%s3971_s14 + $0x45] sm:$0x1]  ;;  %v8606_v27 = vadd.f32 %v8079_v36, %v13686_v38  ;;  %v2004_v36 = vld [vmem:[%s3971_s14 + $0xad] sm:$0x1] }
 0x3c1   : > { %13665 = vst [vmem:[#allocation32_spill] sm:$0xff] %v8549_v46  ;;  %v1990_v46 = vld [vmem:[%s3971_s14 + $0x3d] sm:$0x1]  ;;  %v2005_v38 = vld [vmem:[%s3971_s14 + $0xb5] sm:$0x1] }
 0x3c2   : > { %13667 = vst [vmem:[#allocation74_spill] sm:$0xff] %v8553_v33  ;;  %v8574_v33 = vadd.f32 %v8061_v60, %v13674_v32  ;;  %v13680_v60 = vld [vmem:[#allocation54_spill] sm:$0xff]  ;;  %v13682_v32 = vld [vmem:[#allocation137_spill] sm:$0xff] }
 0x3c3   : > { %13669 = vst [vmem:[#allocation63_spill] sm:$0xff] %v8562_v48  ;;  %v13676_v48 = vld [vmem:[#allocation116_spill] sm:$0xff]  ;;  %v8591_v37 = vadd.f32 %v8070_v49, %v13680_v60  ;;  %v13690_v60 = vld [vmem:[#allocation25_spill] sm:$0xff] }
 0x3c4   : > { %13671 = vst [vmem:[#allocation105_spill] sm:$0xff] %v8566_v53  ;;  %v8583_v21 = vadd.f32 %v8064_v52, %v13676_v48  ;;  %v1996_v53 = vld [vmem:[%s3971_s14 + $0x6d] sm:$0x1]  ;;  %v1997_v52 = vld [vmem:[%s3971_s14 + $0x75] sm:$0x1]  ;;  %v13684_v48 = vld [vmem:[#allocation117_spill] sm:$0xff] }
 0x3c5   : > { %13673 = vst [vmem:[#allocation91_spill] sm:$0xff] %v8570_v18  ;;  %v1995_v18 = vld [vmem:[%s3971_s14 + $0x65] sm:$0x1] }
 0x3c6   : > { %13675 = vst [vmem:[#allocation130_spill] sm:$0xff] %v8574_v33  ;;  %v8595_v33 = vadd.f32 %v8073_v34, %v13682_v32  ;;  %v8614_v34 = vadd.f32 %v8085_v30, %v13690_v60  ;;  %v1998_v32 = vld [vmem:[%s3971_s14 + $0x7d] sm:$0x1]  ;;  %v8629_v30 = vmul.f32 %v8558_v7, %v1984_v14  ;;  %v8632_v60 = vmul.f32 %v8558_v7, %v1985_v35 }
 0x3c7   : > { %13677 = vst [vmem:[#allocation176_spill] sm:$0xff] %v8583_v21  ;;  %v8602_v21 = vadd.f32 %v8076_v51, %v13684_v48  ;;  %v2000_v51 = vld [vmem:[%s3971_s14 + $0x8d] sm:$0x1]  ;;  %v2001_v48 = vld [vmem:[%s3971_s14 + $0x95] sm:$0x1]  ;;  %v8645_v14 = vmul.f32 %v8558_v7, %v1988_v8  ;;  %v8648_v35 = vmul.f32 %v8558_v7, %v1989_v28  ;;  %v8661_v8 = vmul.f32 %v8558_v7, %v1992_v58 }
 0x3c8   : > { %13679 = vst [vmem:[#allocation159_spill] sm:$0xff] %v8587_v4  ;;  %v13688_v4 = vld [vmem:[#allocation167_spill] sm:$0xff]  ;;  %v8664_v28 = vmul.f32 %v8558_v7, %v1993_v24  ;;  %v8677_v58 = vmul.f32 %v8558_v7, %v1996_v53  ;;  %v8680_v24 = vmul.f32 %v8558_v7, %v1997_v52  ;;  %v8693_v53 = vmul.f32 %v8558_v7, %v2000_v51 }
 0x3c9   : > { %13681 = vst [vmem:[#allocation145_spill] sm:$0xff] %v8591_v37  ;;  %v8610_v49 = vadd.f32 %v8082_v45, %v13688_v4  ;;  %v2003_v37 = vld [vmem:[%s3971_s14 + $0xa5] sm:$0x1]  ;;  %v2006_v45 = vld [vmem:[%s3971_s14 + $0xbd] sm:$0x1]  ;;  %v8626_v4 = vmul.f32 %v8558_v7, %v1983_v16  ;;  %v8642_v16 = vmul.f32 %v8558_v7, %v1987_v26  ;;  %v8658_v26 = vmul.f32 %v8558_v7, %v1991_v13 }
 0x3ca   : > { %13683 = vst [vmem:[#allocation186_spill] sm:$0xff] %v8595_v33  ;;  %v1999_v33 = vld [vmem:[%s3971_s14 + $0x85] sm:$0x1]  ;;  %v8674_v13 = vmul.f32 %v8558_v7, %v1995_v18  ;;  %v8696_v52 = vmul.f32 %v8558_v7, %v2001_v48  ;;  %v8709_v51 = vmul.f32 %v8558_v7, %v2004_v36  ;;  %v8712_v48 = vmul.f32 %v8558_v7, %v2005_v38 }
 0x3cb   : > { %13685 = vst [vmem:[#allocation64_spill] sm:$0xff] %v8602_v21  ;;  %v2002_v21 = vld [vmem:[%s3971_s14 + $0x9d] sm:$0x1]  ;;  %v8690_v18 = vmul.f32 %v8558_v7, %v1999_v33  ;;  %v8706_v33 = vmul.f32 %v8558_v7, %v2003_v37  ;;  %v8728_v38 = vmul.f32 %v8558_v7, %v2009_v42  ;;  %v8744_v42 = vmul.f32 %v8558_v7, %v2013_v6 }
 0x3cc   : > { %13687 = vst [vmem:[#allocation106_spill] sm:$0xff] %v8606_v27  ;;  %v2008_v27 = vld [vmem:[%s3971_s14 + $0xcd] sm:$0x1]  ;;  %v8760_v6 = vmul.f32 %v8558_v7, %v2017_v55  ;;  %v8776_v55 = vmul.f32 %v8558_v7, %v2021_v40  ;;  %v8792_v40 = vmul.f32 %v8558_v7, %v2025_v11 }
 0x3cd   : > { %13689 = vst [vmem:[#allocation199_spill] sm:$0xff] %v8610_v49  ;;  %v2007_v49 = vld [vmem:[%s3971_s14 + $0xc5] sm:$0x1]  ;;  %v8725_v36 = vmul.f32 %v8558_v7, %v2008_v27  ;;  %v8741_v27 = vmul.f32 %v8558_v7, %v2012_v17  ;;  %v8757_v17 = vmul.f32 %v8558_v7, %v2016_v41  ;;  %v8773_v41 = vmul.f32 %v8558_v7, %v2020_v39 }
 0x3ce   : > { %13691 = vst [vmem:[#allocation18_spill] sm:$0xff] %v8614_v34  ;;  %v8635_v34 = vmul.f32 %v8558_v7, %v1986_v57  ;;  %v8651_v57 = vmul.f32 %v8558_v7, %v1990_v46  ;;  %v8667_v46 = vmul.f32 %v8558_v7, %v1994_v56  ;;  %v8683_v56 = vmul.f32 %v8558_v7, %v1998_v32 }
 0x3cf   : > { %13693 = vst [vmem:[#allocation47_spill] sm:$0xff] %v8690_v18  ;;  %v8699_v32 = vmul.f32 %v8558_v7, %v2002_v21  ;;  %v8715_v21 = vmul.f32 %v8558_v7, %v2006_v45  ;;  %v2030_v18 = vld [vmem:[%s3971_s14 + $0x17d] sm:$0x1]  ;;  %v8722_v37 = vmul.f32 %v8558_v7, %v2007_v49  ;;  %v8731_v45 = vmul.f32 %v8558_v7, %v2010_v43 }
 0x3d0   : > { %13692 = vst [vmem:[#allocation177_spill] sm:$0xff] %v8683_v56  ;;  %v2026_v56 = vld [vmem:[%s3971_s14 + $0x15d] sm:$0x1]  ;;  %v8738_v49 = vmul.f32 %v8558_v7, %v2011_v31  ;;  %v8747_v43 = vmul.f32 %v8558_v7, %v2014_v25  ;;  %v8754_v31 = vmul.f32 %v8558_v7, %v2015_v44  ;;  %v8763_v25 = vmul.f32 %v8558_v7, %v2018_v29 }
 0x3d1   : > { %13694 = vst [vmem:[#allocation33_spill] sm:$0xff] %v8693_v53  ;;  %v2029_v53 = vld [vmem:[%s3971_s14 + $0x175] sm:$0x1]  ;;  %v8770_v44 = vmul.f32 %v8558_v7, %v2019_v5  ;;  %v8779_v29 = vmul.f32 %v8558_v7, %v2022_v47  ;;  %v8786_v5 = vmul.f32 %v8558_v7, %v2023_v1  ;;  %v8789_v39 = vmul.f32 %v8558_v7, %v2024_v10 }
 0x3d2   : > { %13695 = vst [vmem:[#allocation75_spill] sm:$0xff] %v8696_v52  ;;  %v2028_v52 = vld [vmem:[%s3971_s14 + $0x16d] sm:$0x1]  ;;  %v8795_v47 = vmul.f32 %v8558_v7, %v2026_v56  ;;  %v8808_v11 = vmul.f32 %v8558_v7, %v2029_v53  ;;  %v8811_v56 = vmul.f32 %v8558_v7, %v2030_v18 }
 0x3d3   : > { %13696 = vst [vmem:[#allocation65_spill] sm:$0xff] %v8699_v32  ;;  %v2027_v32 = vld [vmem:[%s3971_s14 + $0x165] sm:$0x1]  ;;  %v8805_v10 = vmul.f32 %v8558_v7, %v2028_v52 }
 0x3d4   : > { %13697 = vst [vmem:[#allocation107_spill] sm:$0xff] %v8706_v33  ;;  %v2034_v33 = vld [vmem:[%s3971_s14 + $0x19d] sm:$0x1]  ;;  %v8802_v1 = vmul.f32 %v8558_v7, %v2027_v32 }
 0x3d5   : > { %13698 = vst [vmem:[#allocation92_spill] sm:$0xff] %v8709_v51  ;;  %v2033_v51 = vld [vmem:[%s3971_s14 + $0x195] sm:$0x1]  ;;  %v8827_v18 = vmul.f32 %v8558_v7, %v2034_v33 }
 0x3d6   : > { %13699 = vst [vmem:[#allocation131_spill] sm:$0xff] %v8712_v48  ;;  %v2032_v48 = vld [vmem:[%s3971_s14 + $0x18d] sm:$0x1]  ;;  %v8824_v53 = vmul.f32 %v8558_v7, %v2033_v51 }
 0x3d7   : > { %13700 = vst [vmem:[#allocation146_spill] sm:$0xff] %v8715_v21  ;;  %v2031_v21 = vld [vmem:[%s3971_s14 + $0x185] sm:$0x1]  ;;  %v8821_v52 = vmul.f32 %v8558_v7, %v2032_v48 }
 0x3d8   : > { %13701 = vst [vmem:[#allocation160_spill] sm:$0xff] %v8722_v37  ;;  %v2038_v37 = vld [vmem:[%s3971_s14 + $0x1bd] sm:$0x1]  ;;  %v8818_v32 = vmul.f32 %v8558_v7, %v2031_v21 }
 0x3d9   : > { %13702 = vst [vmem:[#allocation187_spill] sm:$0xff] %v8725_v36  ;;  %v2037_v36 = vld [vmem:[%s3971_s14 + $0x1b5] sm:$0x1]  ;;  %v8843_v33 = vmul.f32 %v8558_v7, %v2038_v37 }
 0x3da   : > { %13703 = vst [vmem:[#allocation178_spill] sm:$0xff] %v8728_v38  ;;  %v2036_v38 = vld [vmem:[%s3971_s14 + $0x1ad] sm:$0x1]  ;;  %v8840_v51 = vmul.f32 %v8558_v7, %v2037_v36 }
 0x3db   : > { %13704 = vst [vmem:[#allocation48_spill] sm:$0xff] %v8731_v45  ;;  %v2035_v45 = vld [vmem:[%s3971_s14 + $0x1a5] sm:$0x1]  ;;  %v8837_v48 = vmul.f32 %v8558_v7, %v2036_v38 }
 0x3dc   : > { %13705 = vst [vmem:[#allocation93_spill] sm:$0xff] %v8738_v49  ;;  %v2042_v49 = vld [vmem:[%s3971_s14 + $0x1dd] sm:$0x1]  ;;  %v8834_v21 = vmul.f32 %v8558_v7, %v2035_v45 }
 0x3dd   : > { %13706 = vst [vmem:[#allocation19_spill] sm:$0xff] %v8741_v27  ;;  %v2041_v27 = vld [vmem:[%s3971_s14 + $0x1d5] sm:$0x1]  ;;  %v8859_v37 = vmul.f32 %v8558_v7, %v2042_v49 }
 0x3de   : > { %13707 = vst [vmem:[#allocation66_spill] sm:$0xff] %v8744_v42  ;;  %v2040_v42 = vld [vmem:[%s3971_s14 + $0x1cd] sm:$0x1]  ;;  %v8856_v36 = vmul.f32 %v8558_v7, %v2041_v27 }
 0x3df   : > { %13708 = vst [vmem:[#allocation210_spill] sm:$0xff] %v8747_v43  ;;  %v2039_v43 = vld [vmem:[%s3971_s14 + $0x1c5] sm:$0x1]  ;;  %v8853_v38 = vmul.f32 %v8558_v7, %v2040_v42 }
 0x3e0   : > { %13709 = vst [vmem:[#allocation76_spill] sm:$0xff] %v8754_v31  ;;  %v2046_v31 = vld [vmem:[%s3971_s14 + $0x1fd] sm:$0x1]  ;;  %v8850_v45 = vmul.f32 %v8558_v7, %v2039_v43 }
 0x3e1   : > { %13710 = vst [vmem:[#allocation34_spill] sm:$0xff] %v8757_v17  ;;  %v2045_v17 = vld [vmem:[%s3971_s14 + $0x1f5] sm:$0x1]  ;;  %v8875_v49 = vmul.f32 %v8558_v7, %v2046_v31 }
 0x3e2   : > { %13711 = vst [vmem:[#allocation161_spill] sm:$0xff] %v8760_v6  ;;  %v2044_v6 = vld [vmem:[%s3971_s14 + $0x1ed] sm:$0x1]  ;;  %v8872_v27 = vmul.f32 %v8558_v7, %v2045_v17 }
 0x3e3   : > { %13712 = vst [vmem:[#allocation179_spill] sm:$0xff] %v8763_v25  ;;  %v2043_v25 = vld [vmem:[%s3971_s14 + $0x1e5] sm:$0x1]  ;;  %v8869_v42 = vmul.f32 %v8558_v7, %v2044_v6 }
 0x3e4   : > { %13713 = vst [vmem:[#allocation132_spill] sm:$0xff] %v8770_v44  ;;  %v2050_v44 = vld [vmem:[%s3971_s14 + $0x21d] sm:$0x1]  ;;  %v8866_v43 = vmul.f32 %v8558_v7, %v2043_v25 }
 0x3e5   : > { %13714 = vst [vmem:[#allocation200_spill] sm:$0xff] %v8773_v41  ;;  %v2049_v41 = vld [vmem:[%s3971_s14 + $0x215] sm:$0x1]  ;;  %v8891_v31 = vmul.f32 %v8558_v7, %v2050_v44 }
 0x3e6   : > { %13715 = vst [vmem:[#allocation108_spill] sm:$0xff] %v8776_v55  ;;  %v2048_v55 = vld [vmem:[%s3971_s14 + $0x20d] sm:$0x1]  ;;  %v8888_v17 = vmul.f32 %v8558_v7, %v2049_v41 }
 0x3e7   : > { %13716 = vst [vmem:[#allocation77_spill] sm:$0xff] %v8779_v29  ;;  %v2047_v29 = vld [vmem:[%s3971_s14 + $0x205] sm:$0x1]  ;;  %v8885_v6 = vmul.f32 %v8558_v7, %v2048_v55 }
 0x3e8   : > { %13717 = vst [vmem:[#allocation147_spill] sm:$0xff] %v8786_v5  ;;  %v2054_v5 = vld [vmem:[%s3971_s14 + $0x23d] sm:$0x1]  ;;  %v8882_v25 = vmul.f32 %v8558_v7, %v2047_v29 }
 0x3e9   : > { %13718 = vst [vmem:[#allocation49_spill] sm:$0xff] %v8789_v39  ;;  %v2053_v39 = vld [vmem:[%s3971_s14 + $0x235] sm:$0x1]  ;;  %v8907_v44 = vmul.f32 %v8558_v7, %v2054_v5 }
 0x3ea   : > { %13719 = vst [vmem:[#allocation94_spill] sm:$0xff] %v8792_v40  ;;  %v2052_v40 = vld [vmem:[%s3971_s14 + $0x22d] sm:$0x1]  ;;  %v8904_v41 = vmul.f32 %v8558_v7, %v2053_v39 }
 0x3eb   : > { %13720 = vst [vmem:[#allocation20_spill] sm:$0xff] %v8795_v47  ;;  %v2051_v47 = vld [vmem:[%s3971_s14 + $0x225] sm:$0x1]  ;;  %v8901_v55 = vmul.f32 %v8558_v7, %v2052_v40 }
 0x3ec   : > { %13721 = vst [vmem:[#allocation35_spill] sm:$0xff] %v8802_v1  ;;  %v2058_v1 = vld [vmem:[%s3971_s14 + $0x25d] sm:$0x1]  ;;  %v8898_v29 = vmul.f32 %v8558_v7, %v2051_v47 }
 0x3ed   : > { %13722 = vst [vmem:[#allocation109_spill] sm:$0xff] %v8805_v10  ;;  %v2057_v10 = vld [vmem:[%s3971_s14 + $0x255] sm:$0x1]  ;;  %v8923_v5 = vmul.f32 %v8558_v7, %v2058_v1  ;;  %v2083_v1 = vld [vmem:[%s3971_s14 + $0x325] sm:$0x1] }
 0x3ee   : > { %13723 = vst [vmem:[#allocation188_spill] sm:$0xff] %v8808_v11  ;;  %v2056_v11 = vld [vmem:[%s3971_s14 + $0x24d] sm:$0x1]  ;;  %v8920_v39 = vmul.f32 %v8558_v7, %v2057_v10 }
 0x3ef   : > { %13724 = vst [vmem:[#allocation67_spill] sm:$0xff] %v8811_v56  ;;  %v2055_v56 = vld [vmem:[%s3971_s14 + $0x245] sm:$0x1]  ;;  %v8917_v40 = vmul.f32 %v8558_v7, %v2056_v11 }
 0x3f0   : > { %13725 = vst [vmem:[#allocation162_spill] sm:$0xff] %v8818_v32  ;;  %v2062_v32 = vld [vmem:[%s3971_s14 + $0x27d] sm:$0x1]  ;;  %v8914_v47 = vmul.f32 %v8558_v7, %v2055_v56 }
 0x3f1   : > { %13726 = vst [vmem:[#allocation201_spill] sm:$0xff] %v8821_v52  ;;  %v2061_v52 = vld [vmem:[%s3971_s14 + $0x275] sm:$0x1]  ;;  %v8939_v10 = vmul.f32 %v8558_v7, %v2062_v32 }
 0x3f2   : > { %13727 = vst [vmem:[#allocation133_spill] sm:$0xff] %v8824_v53  ;;  %v2060_v53 = vld [vmem:[%s3971_s14 + $0x26d] sm:$0x1]  ;;  %v8936_v11 = vmul.f32 %v8558_v7, %v2061_v52  ;;  %v2087_v52 = vld [vmem:[%s3971_s14 + $0x345] sm:$0x1] }
 0x3f3   : > { %13728 = vst [vmem:[#allocation148_spill] sm:$0xff] %v8827_v18  ;;  %v2059_v18 = vld [vmem:[%s3971_s14 + $0x265] sm:$0x1]  ;;  %v8933_v56 = vmul.f32 %v8558_v7, %v2060_v53 }
 0x3f4   : > { %13729 = vst [vmem:[#allocation50_spill] sm:$0xff] %v8834_v21  ;;  %v2066_v21 = vld [vmem:[%s3971_s14 + $0x29d] sm:$0x1]  ;;  %v8930_v19 = vmul.f32 %v8558_v7, %v2059_v18 }
 0x3f5   : > { %13730 = vst [vmem:[#allocation78_spill] sm:$0xff] %v8837_v48  ;;  %v2065_v48 = vld [vmem:[%s3971_s14 + $0x295] sm:$0x1]  ;;  %v8955_v32 = vmul.f32 %v8558_v7, %v2066_v21  ;;  %v2090_v21 = vld [vmem:[%s3971_s14 + $0x35d] sm:$0x1] }
 0x3f6   : > { %13731 = vst [vmem:[#allocation95_spill] sm:$0xff] %v8840_v51  ;;  %v2064_v51 = vld [vmem:[%s3971_s14 + $0x28d] sm:$0x1]  ;;  %v8952_v53 = vmul.f32 %v8558_v7, %v2065_v48 }
 0x3f7   : > { %13732 = vst [vmem:[#allocation110_spill] sm:$0xff] %v8843_v33  ;;  %v2063_v33 = vld [vmem:[%s3971_s14 + $0x285] sm:$0x1]  ;;  %v8949_v18 = vmul.f32 %v8558_v7, %v2064_v51 }
 0x3f8   : > { %13733 = vst [vmem:[#allocation36_spill] sm:$0xff] %v8850_v45  ;;  %v2070_v45 = vld [vmem:[%s3971_s14 + $0x2bd] sm:$0x1] }
 0x3f9   : > { %13734 = vst [vmem:[#allocation21_spill] sm:$0xff] %v8853_v38  ;;  %v2069_v38 = vld [vmem:[%s3971_s14 + $0x2b5] sm:$0x1]  ;;  %v8970_v48 = vmul.f32 %v8558_v7, %v2070_v45 }
 0x3fa   : > { %13735 = vst [vmem:[#allocation202_spill] sm:$0xff] %v8856_v36  ;;  %v2068_v36 = vld [vmem:[%s3971_s14 + $0x2ad] sm:$0x1]  ;;  %v8967_v51 = vmul.f32 %v8558_v7, %v2069_v38  ;;  %v2093_v45 = vld [vmem:[%s3971_s14 + $0x375] sm:$0x1] }
 0x3fb   : > { %13736 = vst [vmem:[#allocation163_spill] sm:$0xff] %v8859_v37  ;;  %v2067_v37 = vld [vmem:[%s3971_s14 + $0x2a5] sm:$0x1] }
 0x3fc   : > { %13737 = vst [vmem:[#allocation189_spill] sm:$0xff] %v8866_v43  ;;  %v2074_v43 = vld [vmem:[%s3971_s14 + $0x2dd] sm:$0x1] }
 0x3fd   : > { %13738 = vst [vmem:[#allocation149_spill] sm:$0xff] %v8869_v42  ;;  %v2073_v42 = vld [vmem:[%s3971_s14 + $0x2d5] sm:$0x1]  ;;  %v8985_v38 = vmul.f32 %v8558_v7, %v2074_v43  ;;  %v2096_v43 = vld [vmem:[%s3971_s14 + $0x38d] sm:$0x1] }
 0x3fe   : > { %13739 = vst [vmem:[#allocation111_spill] sm:$0xff] %v8872_v27  ;;  %v2072_v27 = vld [vmem:[%s3971_s14 + $0x2cd] sm:$0x1] }
 0x3ff   : > { %13740 = vst [vmem:[#allocation96_spill] sm:$0xff] %v8875_v49  ;;  %v2071_v49 = vld [vmem:[%s3971_s14 + $0x2c5] sm:$0x1] }
 0x400   : > { %13741 = vst [vmem:[#allocation134_spill] sm:$0xff] %v8882_v25  ;;  %v2078_v25 = vld [vmem:[%s3971_s14 + $0x2fd] sm:$0x1] }
 0x401   : > { %13742 = vst [vmem:[#allocation37_spill] sm:$0xff] %v8885_v6  ;;  %v2077_v6 = vld [vmem:[%s3971_s14 + $0x2f5] sm:$0x1] }
 0x402   : > { %13743 = vst [vmem:[#allocation51_spill] sm:$0xff] %v8888_v17  ;;  %v2076_v17 = vld [vmem:[%s3971_s14 + $0x2ed] sm:$0x1] }
 0x403   : > { %13744 = vst [vmem:[#allocation203_spill] sm:$0xff] %v8891_v31  ;;  %v2075_v31 = vld [vmem:[%s3971_s14 + $0x2e5] sm:$0x1] }
 0x404   : > { %13745 = vst [vmem:[#allocation79_spill] sm:$0xff] %v8898_v29  ;;  %v2082_v29 = vld [vmem:[%s3971_s14 + $0x31d] sm:$0x1] }
 0x405   : > { %13746 = vst [vmem:[#allocation150_spill] sm:$0xff] %v8901_v55  ;;  %v2081_v55 = vld [vmem:[%s3971_s14 + $0x315] sm:$0x1] }
 0x406   : > { %13747 = vst [vmem:[#allocation112_spill] sm:$0xff] %v8904_v41  ;;  %v2080_v41 = vld [vmem:[%s3971_s14 + $0x30d] sm:$0x1] }
 0x407   : > { %13748 = vst [vmem:[#allocation97_spill] sm:$0xff] %v8907_v44  ;;  %v2079_v44 = vld [vmem:[%s3971_s14 + $0x305] sm:$0x1] }
 0x408   : > { %13749 = vst [vmem:[#allocation22_spill] sm:$0xff] %v8914_v47  ;;  %v8946_v47 = vmul.f32 %v8558_v7, %v2063_v33  ;;  %v8964_v33 = vmul.f32 %v8558_v7, %v2068_v36  ;;  %v8982_v36 = vmul.f32 %v8558_v7, %v2073_v42  ;;  %v9000_v42 = vmul.f32 %v8558_v7, %v2078_v25  ;;  %v2099_v25 = vld [vmem:[%s3971_s14 + $0x3a5] sm:$0x1] }
 0x409   : > { %13750 = vst [vmem:[#allocation38_spill] sm:$0xff] %v8917_v40  ;;  %v2086_v40 = vld [vmem:[%s3971_s14 + $0x33d] sm:$0x1] }
 0x40a   : > { %13751 = vst [vmem:[#allocation164_spill] sm:$0xff] %v8920_v39  ;;  %v2085_v39 = vld [vmem:[%s3971_s14 + $0x335] sm:$0x1] }
 0x40b   : > { %13752 = vst [vmem:[#allocation190_spill] sm:$0xff] %v8923_v5  ;;  %v2084_v5 = vld [vmem:[%s3971_s14 + $0x32d] sm:$0x1] }
 0x40c   : > { %13753 = vst [vmem:[#allocation204_spill] sm:$0xff] %v8933_v56  ;;  %v8961_v56 = vmul.f32 %v8558_v7, %v2067_v37  ;;  %v8979_v37 = vmul.f32 %v8558_v7, %v2072_v27  ;;  %v8997_v27 = vmul.f32 %v8558_v7, %v2077_v6  ;;  %v9015_v6 = vmul.f32 %v8558_v7, %v2082_v29  ;;  %v2102_v29 = vld [vmem:[%s3971_s14 + $0x3bd] sm:$0x1] }
 0x40d   : > { %13754 = vst [vmem:[#allocation52_spill] sm:$0xff] %v8936_v11  ;;  %v2089_v11 = vld [vmem:[%s3971_s14 + $0x355] sm:$0x1] }
 0x40e   : > { %13755 = vst [vmem:[#allocation151_spill] sm:$0xff] %v8939_v10  ;;  %v2088_v10 = vld [vmem:[%s3971_s14 + $0x34d] sm:$0x1] }
 0x40f   : > { %13756 = vst [vmem:[#allocation135_spill] sm:$0xff] %v8949_v18  ;;  %v8976_v18 = vmul.f32 %v8558_v7, %v2071_v49  ;;  %v8994_v49 = vmul.f32 %v8558_v7, %v2076_v17  ;;  %v9012_v17 = vmul.f32 %v8558_v7, %v2081_v55  ;;  %v9030_v55 = vmul.f32 %v8558_v7, %v2086_v40  ;;  %v2106_v40 = vld [vmem:[%s3971_s14 + $0x3dd] sm:$0x1] }
 0x410   : > { %13757 = vst [vmem:[#allocation98_spill] sm:$0xff] %v8952_v53  ;;  %v2092_v53 = vld [vmem:[%s3971_s14 + $0x36d] sm:$0x1] }
 0x411   : > { %13758 = vst [vmem:[#allocation113_spill] sm:$0xff] %v8955_v32  ;;  %v2091_v32 = vld [vmem:[%s3971_s14 + $0x365] sm:$0x1] }
 0x412   : > { %13759 = vst [vmem:[#allocation80_spill] sm:$0xff] %v8964_v33  ;;  %v8991_v33 = vmul.f32 %v8558_v7, %v2075_v31  ;;  %v9009_v31 = vmul.f32 %v8558_v7, %v2080_v41  ;;  %v9027_v41 = vmul.f32 %v8558_v7, %v2085_v39  ;;  %v9045_v39 = vmul.f32 %v8558_v7, %v2090_v21 }
 0x413   : > { %13760 = vst [vmem:[#allocation165_spill] sm:$0xff] %v8967_v51  ;;  %v2095_v51 = vld [vmem:[%s3971_s14 + $0x385] sm:$0x1] }
 0x414   : > { %13761 = vst [vmem:[#allocation23_spill] sm:$0xff] %v8970_v48  ;;  %v2094_v48 = vld [vmem:[%s3971_s14 + $0x37d] sm:$0x1]  ;;  %v9066_v21 = vmul.f32 %v8558_v7, %v2095_v51  ;;  %v9087_v51 = vmul.f32 %v8558_v7, %v2102_v29 }
 0x415   : > { %13762 = vst [vmem:[#allocation39_spill] sm:$0xff] %v8979_v37  ;;  %v9006_v37 = vmul.f32 %v8558_v7, %v2079_v44  ;;  %v9024_v44 = vmul.f32 %v8558_v7, %v2084_v5  ;;  %v9042_v5 = vmul.f32 %v8558_v7, %v2089_v11  ;;  %v2108_v11 = vld [vmem:[%s3971_s14 + $0x3ed] sm:$0x1] }
 0x416   : > { %13763 = vst [vmem:[#allocation114_spill] sm:$0xff] %v8982_v36  ;;  %v2098_v36 = vld [vmem:[%s3971_s14 + $0x39d] sm:$0x1] }
 0x417   : > { %13764 = vst [vmem:[#allocation81_spill] sm:$0xff] %v8985_v38  ;;  %v2097_v38 = vld [vmem:[%s3971_s14 + $0x395] sm:$0x1] }
 0x418   : > { %13765 = vst [vmem:[#allocation53_spill] sm:$0xff] %v8994_v49  ;;  %v9021_v49 = vmul.f32 %v8558_v7, %v2083_v1  ;;  %v9039_v1 = vmul.f32 %v8558_v7, %v2088_v10  ;;  %v9060_v10 = vmul.f32 %v8558_v7, %v2094_v48 }
 0x419   : > { %13766 = vst [vmem:[#allocation136_spill] sm:$0xff] %v8997_v27  ;;  %v2101_v27 = vld [vmem:[%s3971_s14 + $0x3b5] sm:$0x1] }
 0x41a   : > { %13767 = vst [vmem:[#allocation115_spill] sm:$0xff] %v9000_v42  ;;  %v2100_v42 = vld [vmem:[%s3971_s14 + $0x3ad] sm:$0x1] }
 0x41b   : > { %13768 = vst [vmem:[#allocation191_spill] sm:$0xff] %v9009_v31  ;;  %v9036_v31 = vmul.f32 %v8558_v7, %v2087_v52  ;;  %v9057_v52 = vmul.f32 %v8558_v7, %v2093_v45  ;;  %v9078_v45 = vmul.f32 %v8558_v7, %v2099_v25  ;;  %v9081_v48 = vmul.f32 %v8558_v7, %v2100_v42 }
 0x41c   : > { %13769 = vst [vmem:[#allocation166_spill] sm:$0xff] %v9012_v17  ;;  %v2104_v17 = vld [vmem:[%s3971_s14 + $0x3cd] sm:$0x1]  ;;  %v9099_v25 = vmul.f32 %v8558_v7, %v2106_v40  ;;  %v9127_v40 = vadd.f32 %v8635_v34, %v8101_v20  ;;  %v9147_v20 = vadd.f32 %v8658_v26, %v8121_v15  ;;  %v9167_v15 = vadd.f32 %v8677_v58, %v8141_v9  ;;  %v13791_v26 = vld [vmem:[#allocation180_spill] sm:$0xff] }
 0x41d   : > { %13770 = vst [vmem:[#allocation24_spill] sm:$0xff] %v9015_v6  ;;  %v2103_v6 = vld [vmem:[%s3971_s14 + $0x3c5] sm:$0x1]  ;;  %v13779_v34 = vld [vmem:[#allocation11_spill] sm:$0xff]  ;;  %v13797_v58 = vld [vmem:[#allocation152_spill] sm:$0xff] }
 0x41e   : > { %13771 = vst [vmem:[#allocation116_spill] sm:$0xff] %v9021_v49  ;;  %v9054_v49 = vmul.f32 %v8558_v7, %v2092_v53  ;;  %v9075_v53 = vmul.f32 %v8558_v7, %v2098_v36 }
 0x41f   : > { %13772 = vst [vmem:[#allocation82_spill] sm:$0xff] %v9024_v44  ;;  %v9051_v44 = vmul.f32 %v8558_v7, %v2091_v32  ;;  %v9072_v32 = vmul.f32 %v8558_v7, %v2097_v38  ;;  %v9093_v38 = vmul.f32 %v8558_v7, %v2104_v17  ;;  %v9115_v17 = vadd.f32 %v8626_v4, %v8089_v62  ;;  %v13780_v4 = vld [vmem:[#allocation177_spill] sm:$0xff] }
 0x420   : > { %13773 = vst [vmem:[#allocation54_spill] sm:$0xff] %v9027_v41  ;;  %v2105_v41 = vld [vmem:[%s3971_s14 + $0x3d5] sm:$0x1]  ;;  %v9135_v62 = vadd.f32 %v8645_v14, %v8109_v63  ;;  %v9155_v63 = vadd.f32 %v8664_v28, %v8129_v54  ;;  %v9175_v54 = vadd.f32 %v13780_v4, %v13779_v34  ;;  %v13786_v14 = vld [vmem:[#allocation33_spill] sm:$0xff]  ;;  %v13794_v28 = vld [vmem:[#allocation55_spill] sm:$0xff] }
 0x421   : > { %13774 = vst [vmem:[#allocation137_spill] sm:$0xff] %v9030_v55  ;;  %v2107_v55 = vld [vmem:[%s3971_s14 + $0x3e5] sm:$0x1]  ;;  %v9096_v36 = vmul.f32 %v8558_v7, %v2105_v41  ;;  %v9119_v41 = vadd.f32 %v8629_v30, %v8093_v50  ;;  %v9139_v50 = vadd.f32 %v8648_v35, %v8113_v59  ;;  %v9159_v59 = vadd.f32 %v8667_v46, %v8133_v61  ;;  %v13788_v35 = vld [vmem:[#allocation83_spill] sm:$0xff]  ;;  %v13803_v4 = vld [vmem:[#allocation124_spill] sm:$0xff] }
 0x422   : > { %13775 = vst [vmem:[#allocation117_spill] sm:$0xff] %v9039_v1  ;;  %v2110_v1 = vld [vmem:[%s3971_s14 + $0x3fd] sm:$0x1]  ;;  %v9102_v42 = vmul.f32 %v8558_v7, %v2107_v55  ;;  %v9123_v55 = vadd.f32 %v8632_v60, %v8097_v12  ;;  %v9143_v12 = vadd.f32 %v8651_v57, %v8117_v0  ;;  %v9163_v0 = vadd.f32 %v8674_v13, %v8137_v3  ;;  %v13782_v30 = vld [vmem:[#allocation118_spill] sm:$0xff]  ;;  %v13783_v60 = vld [vmem:[#allocation47_spill] sm:$0xff] }
 0x423   : > { %13776 = vst [vmem:[#allocation192_spill] sm:$0xff] %v9042_v5  ;;  %v2109_v5 = vld [vmem:[%s3971_s14 + $0x3f5] sm:$0x1]  ;;  %v9179_v61 = vadd.f32 %v13783_v60, %v13782_v30  ;;  %v13789_v57 = vld [vmem:[#allocation75_spill] sm:$0xff]  ;;  %v13804_v30 = vld [vmem:[#allocation146_spill] sm:$0xff] }
 0x424   : > { %13777 = vst [vmem:[#allocation167_spill] sm:$0xff] %v9045_v39  ;;  %v9069_v39 = vmul.f32 %v8558_v7, %v2096_v43  ;;  %v9090_v43 = vmul.f32 %v8558_v7, %v2103_v6  ;;  %v9108_v29 = vmul.f32 %v8558_v7, %v2109_v5  ;;  %v9111_v6 = vmul.f32 %v8558_v7, %v2110_v1  ;;  %v13795_v46 = vld [vmem:[#allocation107_spill] sm:$0xff]  ;;  %v13800_v5 = vld [vmem:[#allocation138_spill] sm:$0xff] }
 0x425   : > { %13778 = vst [vmem:[#allocation25_spill] sm:$0xff] %v9060_v10  ;;  %v9084_v10 = vmul.f32 %v8558_v7, %v2101_v27  ;;  %v9105_v27 = vmul.f32 %v8558_v7, %v2108_v11  ;;  %v9131_v7 = vadd.f32 %v8642_v16, %v8105_v2  ;;  %v9151_v2 = vadd.f32 %v8661_v8, %v8125_v23  ;;  %v13785_v16 = vld [vmem:[#allocation205_spill] sm:$0xff]  ;;  %v13801_v11 = vld [vmem:[#allocation131_spill] sm:$0xff] }
 0x426   : > { %v9171_v23 = vadd.f32 %v8680_v24, %v8145_v22  ;;  %13781 = vst [vmem:[#allocation11_spill] sm:$0xff] %v9175_v54  ;;  %v9183_v3 = vadd.f32 %v13786_v14, %v13785_v16  ;;  %v9187_v9 = vadd.f32 %v13789_v57, %v13788_v35  ;;  %v13792_v8 = vld [vmem:[#allocation65_spill] sm:$0xff]  ;;  %v9195_v13 = vadd.f32 %v13795_v46, %v13794_v28  ;;  %v13798_v24 = vld [vmem:[#allocation92_spill] sm:$0xff]  ;;  %v13806_v16 = vld [vmem:[#allocation119_spill] sm:$0xff] }
 0x427   : > { %13784 = vst [vmem:[#allocation177_spill] sm:$0xff] %v9179_v61  ;;  %v9191_v22 = vadd.f32 %v13792_v8, %v13791_v26  ;;  %v9199_v1 = vadd.f32 %v13798_v24, %v13797_v58  ;;  %v9203_v34 = vadd.f32 %v13801_v11, %v13800_v5  ;;  %v9207_v60 = vadd.f32 %v13804_v30, %v13803_v4  ;;  %v13807_v14 = vld [vmem:[#allocation160_spill] sm:$0xff]  ;;  %v13809_v57 = vld [vmem:[#allocation99_spill] sm:$0xff]  ;;  %v13812_v28 = vld [vmem:[#allocation193_spill] sm:$0xff] }
 0x428   : > { %13787 = vst [vmem:[#allocation118_spill] sm:$0xff] %v9183_v3  ;;  %v9211_v35 = vadd.f32 %v13807_v14, %v13806_v16  ;;  %v13810_v26 = vld [vmem:[#allocation187_spill] sm:$0xff]  ;;  %v13813_v46 = vld [vmem:[#allocation178_spill] sm:$0xff]  ;;  %v13815_v24 = vld [vmem:[#allocation68_spill] sm:$0xff] }
 0x429   : > { %13790 = vst [vmem:[#allocation47_spill] sm:$0xff] %v9187_v9  ;;  %v9215_v8 = vadd.f32 %v13810_v26, %v13809_v57  ;;  %v9219_v58 = vadd.f32 %v13813_v46, %v13812_v28  ;;  %v13818_v11 = vld [vmem:[#allocation168_spill] sm:$0xff]  ;;  %v13824_v14 = vld [vmem:[#allocation26_spill] sm:$0xff]  ;;  %v2410_v3 = vld [vmem:[%s3971_s14 + $0x14e] sm:$0x1] }
 0x42a   : > { %13793 = vst [vmem:[#allocation205_spill] sm:$0xff] %v9191_v22  ;;  %v13821_v30 = vld [vmem:[#allocation40_spill] sm:$0xff]  ;;  %v2408_v22 = vld [vmem:[%s3971_s14 + $0x13e] sm:$0x1]  ;;  %v2409_v9 = vld [vmem:[%s3971_s14 + $0x146] sm:$0x1] }
 0x42b   : > { %13796 = vst [vmem:[#allocation33_spill] sm:$0xff] %v9195_v13  ;;  %v13827_v26 = vld [vmem:[#allocation12_spill] sm:$0xff] }
 0x42c   : > { %13799 = vst [vmem:[#allocation83_spill] sm:$0xff] %v9199_v1  ;;  %v13816_v1 = vld [vmem:[#allocation48_spill] sm:$0xff] }
 0x42d   : > { %13802 = vst [vmem:[#allocation75_spill] sm:$0xff] %v9203_v34  ;;  %v9223_v5 = vadd.f32 %v13816_v1, %v13815_v24  ;;  %v13819_v34 = vld [vmem:[#allocation93_spill] sm:$0xff]  ;;  %v13830_v46 = vld [vmem:[#allocation56_spill] sm:$0xff]  ;;  %v13833_v24 = vld [vmem:[#allocation206_spill] sm:$0xff] }
 0x42e   : > { %13805 = vst [vmem:[#allocation180_spill] sm:$0xff] %v9207_v60  ;;  %v9227_v4 = vadd.f32 %v13819_v34, %v13818_v11  ;;  %v13822_v60 = vld [vmem:[#allocation19_spill] sm:$0xff]  ;;  %v13836_v11 = vld [vmem:[#allocation84_spill] sm:$0xff] }
 0x42f   : > { %13808 = vst [vmem:[#allocation65_spill] sm:$0xff] %v9211_v35  ;;  %v9231_v16 = vadd.f32 %v13822_v60, %v13821_v30  ;;  %v13825_v35 = vld [vmem:[#allocation66_spill] sm:$0xff]  ;;  %v13839_v30 = vld [vmem:[#allocation181_spill] sm:$0xff]  ;;  %v2407_v13 = vld [vmem:[%s3971_s14 + $0x136] sm:$0x1] }
 0x430   : > { %13811 = vst [vmem:[#allocation55_spill] sm:$0xff] %v9215_v8  ;;  %v9235_v57 = vadd.f32 %v13825_v35, %v13824_v14  ;;  %v13828_v8 = vld [vmem:[#allocation210_spill] sm:$0xff]  ;;  %v13842_v14 = vld [vmem:[#allocation139_spill] sm:$0xff]  ;;  %v2411_v61 = vld [vmem:[%s3971_s14 + $0x156] sm:$0x1] }
 0x431   : > { %13814 = vst [vmem:[#allocation107_spill] sm:$0xff] %v9219_v58  ;;  %v9239_v28 = vadd.f32 %v13828_v8, %v13827_v26  ;;  %v13831_v58 = vld [vmem:[#allocation76_spill] sm:$0xff]  ;;  %v13845_v26 = vld [vmem:[#allocation153_spill] sm:$0xff] }
 0x432   : > { %13817 = vst [vmem:[#allocation152_spill] sm:$0xff] %v9223_v5  ;;  %v9243_v1 = vadd.f32 %v13831_v58, %v13830_v46  ;;  %v13834_v5 = vld [vmem:[#allocation34_spill] sm:$0xff]  ;;  %v13848_v46 = vld [vmem:[#allocation120_spill] sm:$0xff] }
 0x433   : > { %13820 = vst [vmem:[#allocation92_spill] sm:$0xff] %v9227_v4  ;;  %v9247_v34 = vadd.f32 %v13834_v5, %v13833_v24  ;;  %v13837_v4 = vld [vmem:[#allocation161_spill] sm:$0xff] }
 0x434   : > { %13823 = vst [vmem:[#allocation138_spill] sm:$0xff] %v9231_v16  ;;  %v9251_v60 = vadd.f32 %v13837_v4, %v13836_v11  ;;  %v13840_v16 = vld [vmem:[#allocation179_spill] sm:$0xff]  ;;  %v13851_v24 = vld [vmem:[#allocation125_spill] sm:$0xff] }
 0x435   : > { %13826 = vst [vmem:[#allocation131_spill] sm:$0xff] %v9235_v57  ;;  %v9255_v35 = vadd.f32 %v13840_v16, %v13839_v30  ;;  %v13843_v57 = vld [vmem:[#allocation132_spill] sm:$0xff]  ;;  %v13854_v11 = vld [vmem:[#allocation85_spill] sm:$0xff] }
 0x436   : > { %13829 = vst [vmem:[#allocation124_spill] sm:$0xff] %v9239_v28  ;;  %v9259_v8 = vadd.f32 %v13843_v57, %v13842_v14  ;;  %v13846_v28 = vld [vmem:[#allocation200_spill] sm:$0xff]  ;;  %v13860_v14 = vld [vmem:[#allocation169_spill] sm:$0xff] }
 0x437   : > { %13832 = vst [vmem:[#allocation146_spill] sm:$0xff] %v9243_v1  ;;  %v9263_v58 = vadd.f32 %v13846_v28, %v13845_v26  ;;  %v13849_v1 = vld [vmem:[#allocation108_spill] sm:$0xff]  ;;  %v13863_v26 = vld [vmem:[#allocation69_spill] sm:$0xff] }
 0x438   : > { %13835 = vst [vmem:[#allocation119_spill] sm:$0xff] %v9247_v34  ;;  %v9267_v5 = vadd.f32 %v13849_v1, %v13848_v46  ;;  %v13852_v34 = vld [vmem:[#allocation77_spill] sm:$0xff]  ;;  %v13857_v30 = vld [vmem:[#allocation100_spill] sm:$0xff]  ;;  %v13866_v46 = vld [vmem:[#allocation27_spill] sm:$0xff] }
 0x439   : > { %13838 = vst [vmem:[#allocation160_spill] sm:$0xff] %v9251_v60  ;;  %v9271_v4 = vadd.f32 %v13852_v34, %v13851_v24  ;;  %v13855_v60 = vld [vmem:[#allocation147_spill] sm:$0xff]  ;;  %v13869_v24 = vld [vmem:[#allocation41_spill] sm:$0xff] }
 0x43a   : > { %13841 = vst [vmem:[#allocation99_spill] sm:$0xff] %v9255_v35  ;;  %v9275_v16 = vadd.f32 %v13855_v60, %v13854_v11  ;;  %v13858_v35 = vld [vmem:[#allocation49_spill] sm:$0xff] }
 0x43b   : > { %13844 = vst [vmem:[#allocation187_spill] sm:$0xff] %v9259_v8  ;;  %v9279_v57 = vadd.f32 %v13858_v35, %v13857_v30  ;;  %v13861_v8 = vld [vmem:[#allocation94_spill] sm:$0xff]  ;;  %v13872_v11 = vld [vmem:[#allocation121_spill] sm:$0xff] }
 0x43c   : > { %13847 = vst [vmem:[#allocation193_spill] sm:$0xff] %v9263_v58  ;;  %v9283_v28 = vadd.f32 %v13861_v8, %v13860_v14  ;;  %v13864_v58 = vld [vmem:[#allocation20_spill] sm:$0xff]  ;;  %v13875_v30 = vld [vmem:[#allocation13_spill] sm:$0xff]  ;;  %v13878_v14 = vld [vmem:[#allocation194_spill] sm:$0xff] }
 0x43d   : > { %13850 = vst [vmem:[#allocation178_spill] sm:$0xff] %v9267_v5  ;;  %v9287_v1 = vadd.f32 %v13864_v58, %v13863_v26  ;;  %v13867_v5 = vld [vmem:[#allocation35_spill] sm:$0xff]  ;;  %v13881_v26 = vld [vmem:[#allocation101_spill] sm:$0xff] }
 0x43e   : > { %13853 = vst [vmem:[#allocation68_spill] sm:$0xff] %v9271_v4  ;;  %v9291_v34 = vadd.f32 %v13867_v5, %v13866_v46  ;;  %v13870_v4 = vld [vmem:[#allocation109_spill] sm:$0xff]  ;;  %v13884_v46 = vld [vmem:[#allocation140_spill] sm:$0xff] }
 0x43f   : > { %13856 = vst [vmem:[#allocation48_spill] sm:$0xff] %v9275_v16  ;;  %v9295_v60 = vadd.f32 %v13870_v4, %v13869_v24  ;;  %v13873_v16 = vld [vmem:[#allocation188_spill] sm:$0xff]  ;;  %v13887_v24 = vld [vmem:[#allocation182_spill] sm:$0xff] }
 0x440   : > { %13859 = vst [vmem:[#allocation168_spill] sm:$0xff] %v9279_v57  ;;  %v9299_v35 = vadd.f32 %v13873_v16, %v13872_v11  ;;  %v13876_v57 = vld [vmem:[#allocation67_spill] sm:$0xff]  ;;  %v13890_v11 = vld [vmem:[#allocation57_spill] sm:$0xff] }
 0x441   : > { %13862 = vst [vmem:[#allocation93_spill] sm:$0xff] %v9283_v28  ;;  %v9303_v8 = vadd.f32 %v13876_v57, %v13875_v30  ;;  %v13879_v28 = vld [vmem:[#allocation162_spill] sm:$0xff] }
 0x442   : > { %13865 = vst [vmem:[#allocation40_spill] sm:$0xff] %v9287_v1  ;;  %v9307_v58 = vadd.f32 %v13879_v28, %v13878_v14  ;;  %v13882_v1 = vld [vmem:[#allocation201_spill] sm:$0xff]  ;;  %v13893_v30 = vld [vmem:[#allocation154_spill] sm:$0xff] }
 0x443   : > { %13868 = vst [vmem:[#allocation19_spill] sm:$0xff] %v9291_v34  ;;  %v9311_v5 = vadd.f32 %v13882_v1, %v13881_v26  ;;  %v13885_v34 = vld [vmem:[#allocation133_spill] sm:$0xff]  ;;  %v13896_v14 = vld [vmem:[#allocation86_spill] sm:$0xff] }
 0x444   : > { %13871 = vst [vmem:[#allocation26_spill] sm:$0xff] %v9295_v60  ;;  %v9315_v4 = vadd.f32 %v13885_v34, %v13884_v46  ;;  %v13888_v60 = vld [vmem:[#allocation148_spill] sm:$0xff]  ;;  %v13899_v26 = vld [vmem:[#allocation126_spill] sm:$0xff] }
 0x445   : > { %13874 = vst [vmem:[#allocation66_spill] sm:$0xff] %v9299_v35  ;;  %v9319_v16 = vadd.f32 %v13888_v60, %v13887_v24  ;;  %v13891_v35 = vld [vmem:[#allocation50_spill] sm:$0xff] }
 0x446   : > { %13877 = vst [vmem:[#allocation12_spill] sm:$0xff] %v9303_v8  ;;  %v9323_v57 = vadd.f32 %v13891_v35, %v13890_v11  ;;  %v13894_v8 = vld [vmem:[#allocation78_spill] sm:$0xff]  ;;  %v13908_v11 = vld [vmem:[#allocation28_spill] sm:$0xff] }
 0x447   : > { %13880 = vst [vmem:[#allocation210_spill] sm:$0xff] %v9307_v58  ;;  %v9327_v28 = vadd.f32 %v13894_v8, %v13893_v30  ;;  %v13897_v58 = vld [vmem:[#allocation95_spill] sm:$0xff]  ;;  %v13902_v46 = vld [vmem:[#allocation122_spill] sm:$0xff] }
 0x448   : > { %13883 = vst [vmem:[#allocation56_spill] sm:$0xff] %v9311_v5  ;;  %v9331_v1 = vadd.f32 %v13897_v58, %v13896_v14  ;;  %v13900_v5 = vld [vmem:[#allocation110_spill] sm:$0xff] }
 0x449   : > { %13886 = vst [vmem:[#allocation76_spill] sm:$0xff] %v9315_v4  ;;  %v9335_v34 = vadd.f32 %v13900_v5, %v13899_v26  ;;  %v13903_v4 = vld [vmem:[#allocation36_spill] sm:$0xff]  ;;  %v13905_v24 = vld [vmem:[#allocation42_spill] sm:$0xff]  ;;  %v13917_v26 = vld [vmem:[#allocation207_spill] sm:$0xff] }
 0x44a   : > { %13889 = vst [vmem:[#allocation206_spill] sm:$0xff] %v9319_v16  ;;  %v9339_v60 = vadd.f32 %v13903_v4, %v13902_v46  ;;  %v13906_v16 = vld [vmem:[#allocation21_spill] sm:$0xff]  ;;  %v13911_v30 = vld [vmem:[#allocation70_spill] sm:$0xff]  ;;  %v13920_v46 = vld [vmem:[#allocation195_spill] sm:$0xff] }
 0x44b   : > { %13892 = vst [vmem:[#allocation34_spill] sm:$0xff] %v9323_v57  ;;  %v9343_v35 = vadd.f32 %v13906_v16, %v13905_v24  ;;  %v13909_v57 = vld [vmem:[#allocation202_spill] sm:$0xff] }
 0x44c   : > { %13895 = vst [vmem:[#allocation84_spill] sm:$0xff] %v9327_v28  ;;  %v9347_v8 = vadd.f32 %v13909_v57, %v13908_v11  ;;  %v13912_v28 = vld [vmem:[#allocation163_spill] sm:$0xff]  ;;  %v13914_v14 = vld [vmem:[#allocation170_spill] sm:$0xff]  ;;  %v13926_v11 = vld [vmem:[#allocation141_spill] sm:$0xff] }
 0x44d   : > { %13898 = vst [vmem:[#allocation161_spill] sm:$0xff] %v9331_v1  ;;  %v9351_v58 = vadd.f32 %v13912_v28, %v13911_v30  ;;  %v13915_v1 = vld [vmem:[#allocation189_spill] sm:$0xff]  ;;  %v13923_v24 = vld [vmem:[#allocation14_spill] sm:$0xff]  ;;  %v13929_v30 = vld [vmem:[#allocation155_spill] sm:$0xff] }
 0x44e   : > { %13901 = vst [vmem:[#allocation181_spill] sm:$0xff] %v9335_v34  ;;  %v9355_v5 = vadd.f32 %v13915_v1, %v13914_v14  ;;  %v13918_v34 = vld [vmem:[#allocation149_spill] sm:$0xff]  ;;  %v13932_v14 = vld [vmem:[#allocation58_spill] sm:$0xff] }
 0x44f   : > { %13904 = vst [vmem:[#allocation179_spill] sm:$0xff] %v9339_v60  ;;  %v9359_v4 = vadd.f32 %v13918_v34, %v13917_v26  ;;  %v13921_v60 = vld [vmem:[#allocation111_spill] sm:$0xff] }
 0x450   : > { %13907 = vst [vmem:[#allocation139_spill] sm:$0xff] %v9343_v35  ;;  %v9363_v16 = vadd.f32 %v13921_v60, %v13920_v46  ;;  %v13924_v35 = vld [vmem:[#allocation96_spill] sm:$0xff]  ;;  %v13935_v26 = vld [vmem:[#allocation183_spill] sm:$0xff] }
 0x451   : > { %13910 = vst [vmem:[#allocation132_spill] sm:$0xff] %v9347_v8  ;;  %v9367_v57 = vadd.f32 %v13924_v35, %v13923_v24  ;;  %v13927_v8 = vld [vmem:[#allocation134_spill] sm:$0xff]  ;;  %v13938_v46 = vld [vmem:[#allocation87_spill] sm:$0xff] }
 0x452   : > { %13913 = vst [vmem:[#allocation153_spill] sm:$0xff] %v9351_v58  ;;  %v9371_v28 = vadd.f32 %v13927_v8, %v13926_v11  ;;  %v13930_v58 = vld [vmem:[#allocation37_spill] sm:$0xff]  ;;  %v13941_v24 = vld [vmem:[#allocation102_spill] sm:$0xff]  ;;  %v13944_v11 = vld [vmem:[#allocation171_spill] sm:$0xff] }
 0x453   : > { %13916 = vst [vmem:[#allocation200_spill] sm:$0xff] %v9355_v5  ;;  %v9375_v1 = vadd.f32 %v13930_v58, %v13929_v30  ;;  %v13933_v5 = vld [vmem:[#allocation51_spill] sm:$0xff] }
 0x454   : > { %13919 = vst [vmem:[#allocation120_spill] sm:$0xff] %v9359_v4  ;;  %v9379_v34 = vadd.f32 %v13933_v5, %v13932_v14  ;;  %v13936_v4 = vld [vmem:[#allocation203_spill] sm:$0xff]  ;;  %v13950_v14 = vld [vmem:[#allocation29_spill] sm:$0xff] }
 0x455   : > { %13922 = vst [vmem:[#allocation108_spill] sm:$0xff] %v9363_v16  ;;  %v9383_v60 = vadd.f32 %v13936_v4, %v13935_v26  ;;  %v13939_v16 = vld [vmem:[#allocation79_spill] sm:$0xff] }
 0x456   : > { %13925 = vst [vmem:[#allocation125_spill] sm:$0xff] %v9367_v57  ;;  %v9387_v35 = vadd.f32 %v13939_v16, %v13938_v46  ;;  %v13942_v57 = vld [vmem:[#allocation150_spill] sm:$0xff]  ;;  %v13947_v30 = vld [vmem:[#allocation127_spill] sm:$0xff] }
 0x457   : > { %13928 = vst [vmem:[#allocation77_spill] sm:$0xff] %v9371_v28  ;;  %v9391_v8 = vadd.f32 %v13942_v57, %v13941_v24  ;;  %v13945_v28 = vld [vmem:[#allocation112_spill] sm:$0xff]  ;;  %v13953_v26 = vld [vmem:[#allocation43_spill] sm:$0xff] }
 0x458   : > { %13931 = vst [vmem:[#allocation85_spill] sm:$0xff] %v9375_v1  ;;  %v9395_v58 = vadd.f32 %v13945_v28, %v13944_v11  ;;  %v13948_v1 = vld [vmem:[#allocation97_spill] sm:$0xff]  ;;  %v13956_v46 = vld [vmem:[#allocation59_spill] sm:$0xff]  ;;  %v13962_v11 = vld [vmem:[#allocation196_spill] sm:$0xff] }
 0x459   : > { %13934 = vst [vmem:[#allocation147_spill] sm:$0xff] %v9379_v34  ;;  %v9399_v5 = vadd.f32 %v13948_v1, %v13947_v30  ;;  %v13951_v34 = vld [vmem:[#allocation22_spill] sm:$0xff]  ;;  %v13959_v24 = vld [vmem:[#allocation71_spill] sm:$0xff]  ;;  %v9419_v1 = vadd.f32 %v8930_v19, %v13962_v11  ;;  %v13964_v30 = vld [vmem:[#allocation208_spill] sm:$0xff] }
 0x45a   : > { %13937 = vst [vmem:[#allocation100_spill] sm:$0xff] %v9383_v60  ;;  %v9403_v4 = vadd.f32 %v13951_v34, %v13950_v14  ;;  %v13954_v60 = vld [vmem:[#allocation38_spill] sm:$0xff]  ;;  %v13978_v11 = vld [vmem:[#allocation88_spill] sm:$0xff] }
 0x45b   : > { %13940 = vst [vmem:[#allocation49_spill] sm:$0xff] %v9387_v35  ;;  %v9407_v16 = vadd.f32 %v13954_v60, %v13953_v26  ;;  %v13957_v35 = vld [vmem:[#allocation164_spill] sm:$0xff]  ;;  %v13967_v14 = vld [vmem:[#allocation142_spill] sm:$0xff]  ;;  %v13970_v26 = vld [vmem:[#allocation15_spill] sm:$0xff] }
 0x45c   : > { %13943 = vst [vmem:[#allocation169_spill] sm:$0xff] %v9391_v8  ;;  %v9411_v57 = vadd.f32 %v13957_v35, %v13956_v46  ;;  %v13960_v8 = vld [vmem:[#allocation190_spill] sm:$0xff]  ;;  %v13973_v46 = vld [vmem:[#allocation123_spill] sm:$0xff] }
 0x45d   : > { %13946 = vst [vmem:[#allocation94_spill] sm:$0xff] %v9395_v58  ;;  %v9415_v28 = vadd.f32 %v13960_v8, %v13959_v24  ;;  %v9435_v8 = vadd.f32 %v8946_v47, %v13973_v46  ;;  %v13975_v24 = vld [vmem:[#allocation156_spill] sm:$0xff]  ;;  %v13989_v46 = vld [vmem:[#allocation30_spill] sm:$0xff]  ;;  %v2406_v58 = vld [vmem:[%s3971_s14 + $0x12e] sm:$0x1] }
 0x45e   : > { %13949 = vst [vmem:[#allocation69_spill] sm:$0xff] %v9399_v5  ;;  %v13965_v5 = vld [vmem:[#allocation204_spill] sm:$0xff] }
 0x45f   : > { %13952 = vst [vmem:[#allocation20_spill] sm:$0xff] %v9403_v4  ;;  %v9423_v34 = vadd.f32 %v13965_v5, %v13964_v30  ;;  %v13968_v4 = vld [vmem:[#allocation52_spill] sm:$0xff] }
 0x460   : > { %13955 = vst [vmem:[#allocation27_spill] sm:$0xff] %v9407_v16  ;;  %v9427_v60 = vadd.f32 %v13968_v4, %v13967_v14  ;;  %v13971_v16 = vld [vmem:[#allocation151_spill] sm:$0xff]  ;;  %v13981_v30 = vld [vmem:[#allocation184_spill] sm:$0xff] }
 0x461   : > { %13958 = vst [vmem:[#allocation35_spill] sm:$0xff] %v9411_v57  ;;  %v9431_v35 = vadd.f32 %v13971_v16, %v13970_v26  ;;  %v13984_v14 = vld [vmem:[#allocation172_spill] sm:$0xff]  ;;  %v2405_v57 = vld [vmem:[%s3971_s14 + $0x126] sm:$0x1] }
 0x462   : > { %13961 = vst [vmem:[#allocation41_spill] sm:$0xff] %v9415_v28  ;;  %v13976_v28 = vld [vmem:[#allocation135_spill] sm:$0xff]  ;;  %v9451_v16 = vadd.f32 %v8961_v56, %v13984_v14  ;;  %v13986_v26 = vld [vmem:[#allocation44_spill] sm:$0xff]  ;;  %v14000_v14 = vld [vmem:[#allocation89_spill] sm:$0xff] }
 0x463   : > { %13963 = vst [vmem:[#allocation109_spill] sm:$0xff] %v9419_v1  ;;  %v9439_v19 = vadd.f32 %v13976_v28, %v13975_v24  ;;  %v13979_v1 = vld [vmem:[#allocation98_spill] sm:$0xff]  ;;  %v13992_v24 = vld [vmem:[#allocation128_spill] sm:$0xff] }
 0x464   : > { %13966 = vst [vmem:[#allocation121_spill] sm:$0xff] %v9423_v34  ;;  %v9443_v5 = vadd.f32 %v13979_v1, %v13978_v11  ;;  %v13982_v34 = vld [vmem:[#allocation113_spill] sm:$0xff]  ;;  %v13995_v11 = vld [vmem:[#allocation60_spill] sm:$0xff] }
 0x465   : > { %13969 = vst [vmem:[#allocation188_spill] sm:$0xff] %v9427_v60  ;;  %v9447_v4 = vadd.f32 %v13982_v34, %v13981_v30  ;;  %v9467_v34 = vadd.f32 %v8976_v18, %v13995_v11  ;;  %v13997_v30 = vld [vmem:[#allocation103_spill] sm:$0xff]  ;;  %v14011_v11 = vld [vmem:[#allocation173_spill] sm:$0xff] }
 0x466   : > { %13972 = vst [vmem:[#allocation13_spill] sm:$0xff] %v9431_v35  ;;  %v13987_v35 = vld [vmem:[#allocation80_spill] sm:$0xff]  ;;  %v2404_v60 = vld [vmem:[%s3971_s14 + $0x11e] sm:$0x1] }
 0x467   : > { %13974 = vst [vmem:[#allocation67_spill] sm:$0xff] %v9435_v8  ;;  %v9455_v47 = vadd.f32 %v13987_v35, %v13986_v26  ;;  %v13990_v8 = vld [vmem:[#allocation165_spill] sm:$0xff]  ;;  %v14003_v26 = vld [vmem:[#allocation72_spill] sm:$0xff] }
 0x468   : > { %13977 = vst [vmem:[#allocation194_spill] sm:$0xff] %v9439_v19  ;;  %v9459_v28 = vadd.f32 %v13990_v8, %v13989_v46  ;;  %v13993_v19 = vld [vmem:[#allocation23_spill] sm:$0xff] }
 0x469   : > { %13980 = vst [vmem:[#allocation162_spill] sm:$0xff] %v9443_v5  ;;  %v9463_v1 = vadd.f32 %v13993_v19, %v13992_v24  ;;  %v14006_v46 = vld [vmem:[#allocation143_spill] sm:$0xff]  ;;  %v14008_v24 = vld [vmem:[#allocation157_spill] sm:$0xff]  ;;  %v2403_v5 = vld [vmem:[%s3971_s14 + $0x116] sm:$0x1] }
 0x46a   : > { %13983 = vst [vmem:[#allocation101_spill] sm:$0xff] %v9447_v4  ;;  %v13998_v4 = vld [vmem:[#allocation39_spill] sm:$0xff]  ;;  %v9483_v19 = vadd.f32 %v8991_v33, %v14006_v46  ;;  %v14022_v46 = vld [vmem:[#allocation61_spill] sm:$0xff] }
 0x46b   : > { %13985 = vst [vmem:[#allocation201_spill] sm:$0xff] %v9451_v16  ;;  %v9471_v56 = vadd.f32 %v13998_v4, %v13997_v30  ;;  %v14001_v16 = vld [vmem:[#allocation114_spill] sm:$0xff]  ;;  %v14014_v30 = vld [vmem:[#allocation16_spill] sm:$0xff] }
 0x46c   : > { %13988 = vst [vmem:[#allocation140_spill] sm:$0xff] %v9455_v47  ;;  %v9475_v35 = vadd.f32 %v14001_v16, %v14000_v14  ;;  %v14004_v47 = vld [vmem:[#allocation81_spill] sm:$0xff] }
 0x46d   : > { %13991 = vst [vmem:[#allocation133_spill] sm:$0xff] %v9459_v28  ;;  %v9479_v8 = vadd.f32 %v14004_v47, %v14003_v26  ;;  %v14017_v14 = vld [vmem:[#allocation197_spill] sm:$0xff]  ;;  %v2402_v28 = vld [vmem:[%s3971_s14 + $0x10e] sm:$0x1] }
 0x46e   : > { %13994 = vst [vmem:[#allocation182_spill] sm:$0xff] %v9463_v1  ;;  %v14009_v1 = vld [vmem:[#allocation53_spill] sm:$0xff]  ;;  %v9499_v47 = vadd.f32 %v9006_v37, %v14017_v14 }
 0x46f   : > { %13996 = vst [vmem:[#allocation148_spill] sm:$0xff] %v9467_v34  ;;  %v9487_v18 = vadd.f32 %v14009_v1, %v14008_v24  ;;  %v14012_v34 = vld [vmem:[#allocation136_spill] sm:$0xff]  ;;  %v14019_v26 = vld [vmem:[#allocation209_spill] sm:$0xff]  ;;  %v14023_v1 = vld [vmem:[#allocation166_spill] sm:$0xff] }
 0x470   : > { %13999 = vst [vmem:[#allocation57_spill] sm:$0xff] %v9471_v56  ;;  %v9491_v4 = vadd.f32 %v14012_v34, %v14011_v11  ;;  %v14015_v56 = vld [vmem:[#allocation115_spill] sm:$0xff]  ;;  %v9507_v24 = vadd.f32 %v14023_v1, %v14022_v46  ;;  %v14025_v34 = vld [vmem:[#allocation73_spill] sm:$0xff]  ;;  %v14026_v11 = vld [vmem:[#allocation24_spill] sm:$0xff] }
 0x471   : > { %14002 = vst [vmem:[#allocation50_spill] sm:$0xff] %v9475_v35  ;;  %v9495_v16 = vadd.f32 %v14015_v56, %v14014_v30  ;;  %v14028_v56 = vld [vmem:[#allocation31_spill] sm:$0xff]  ;;  %v14029_v30 = vld [vmem:[#allocation116_spill] sm:$0xff]  ;;  %v14031_v14 = vld [vmem:[#allocation45_spill] sm:$0xff] }
 0x472   : > { %14005 = vst [vmem:[#allocation154_spill] sm:$0xff] %v9479_v8  ;;  %v14020_v8 = vld [vmem:[#allocation191_spill] sm:$0xff]  ;;  %v9515_v37 = vadd.f32 %v14029_v30, %v14028_v56  ;;  %v14037_v46 = vld [vmem:[#allocation129_spill] sm:$0xff]  ;;  %v14045_v30 = vld [vmem:[#allocation144_spill] sm:$0xff] }
 0x473   : > { %14007 = vst [vmem:[#allocation78_spill] sm:$0xff] %v9483_v19  ;;  %v9503_v33 = vadd.f32 %v14020_v8, %v14019_v26  ;;  %v14034_v8 = vld [vmem:[#allocation174_spill] sm:$0xff]  ;;  %v14038_v1 = vld [vmem:[#allocation137_spill] sm:$0xff] }
 0x474   : > { %14010 = vst [vmem:[#allocation86_spill] sm:$0xff] %v9487_v18  ;;  %v14035_v26 = vld [vmem:[#allocation54_spill] sm:$0xff]  ;;  %v2400_v19 = vld [vmem:[%s3971_s14 + $0xfe] sm:$0x1] }
 0x475   : > { %14013 = vst [vmem:[#allocation95_spill] sm:$0xff] %v9491_v4  ;;  %v9511_v4 = vadd.f32 %v14026_v11, %v14025_v34  ;;  %v14040_v18 = vld [vmem:[#allocation90_spill] sm:$0xff]  ;;  %v14042_v11 = vld [vmem:[#allocation104_spill] sm:$0xff] }
 0x476   : > { %14016 = vst [vmem:[#allocation126_spill] sm:$0xff] %v9495_v16  ;;  %v9531_v34 = vadd.f32 %v9036_v31, %v14040_v18  ;;  %v14053_v31 = vld [vmem:[#allocation158_spill] sm:$0xff] }
 0x477   : > { %14018 = vst [vmem:[#allocation110_spill] sm:$0xff] %v9499_v47  ;;  %v14032_v47 = vld [vmem:[#allocation82_spill] sm:$0xff]  ;;  %v9551_v18 = vadd.f32 %v9054_v49, %v14053_v31 }
 0x478   : > { %14021 = vst [vmem:[#allocation122_spill] sm:$0xff] %v9503_v33  ;;  %v9519_v16 = vadd.f32 %v14032_v47, %v14031_v14  ;;  %v9523_v33 = vadd.f32 %v14035_v26, %v14034_v8  ;;  %v14046_v47 = vld [vmem:[#allocation192_spill] sm:$0xff]  ;;  %v14048_v8 = vld [vmem:[#allocation185_spill] sm:$0xff]  ;;  %v14049_v26 = vld [vmem:[#allocation167_spill] sm:$0xff] }
 0x479   : > { %14024 = vst [vmem:[#allocation36_spill] sm:$0xff] %v9507_v24  ;;  %v9527_v24 = vadd.f32 %v14038_v1, %v14037_v46  ;;  %v9539_v14 = vadd.f32 %v14046_v47, %v14045_v30  ;;  %v14051_v46 = vld [vmem:[#allocation62_spill] sm:$0xff]  ;;  %v14058_v30 = vld [vmem:[#allocation25_spill] sm:$0xff] }
 0x47a   : > { %14027 = vst [vmem:[#allocation42_spill] sm:$0xff] %v9511_v4  ;;  %v14043_v4 = vld [vmem:[#allocation117_spill] sm:$0xff]  ;;  %v9547_v1 = vadd.f32 %v9051_v44, %v14051_v46  ;;  %v14060_v46 = vld [vmem:[#allocation175_spill] sm:$0xff]  ;;  %v14062_v31 = vld [vmem:[#allocation46_spill] sm:$0xff] }
 0x47b   : > { %14030 = vst [vmem:[#allocation21_spill] sm:$0xff] %v9515_v37  ;;  %v9535_v56 = vadd.f32 %v14043_v4, %v14042_v11  ;;  %v14055_v4 = vld [vmem:[#allocation198_spill] sm:$0xff]  ;;  %v2372_v44 = vld [vmem:[%s3971_s14 + $0x1e] sm:$0x1]  ;;  %v9567_v49 = vadd.f32 %v9066_v21, %v14060_v46  ;;  %v14068_v46 = vld [vmem:[#allocation63_spill] sm:$0xff] }
 0x47c   : > { %14033 = vst [vmem:[#allocation28_spill] sm:$0xff] %v9519_v16  ;;  %v9555_v11 = vadd.f32 %v9057_v52, %v14055_v4  ;;  %v9571_v52 = vadd.f32 %v9069_v39, %v14062_v31  ;;  %v14064_v4 = vld [vmem:[#allocation32_spill] sm:$0xff]  ;;  %v9584_v21 = vld [vmem:[#allocation5 + $0x6] ss:$0 sm:$0xff]  ;;  %v9588_v39 = vadd.f32 %v9078_v45, %v14068_v46  ;;  %v14070_v31 = vld [vmem:[#allocation105_spill] sm:$0xff] }
 0x47d   : > { %14036 = vst [vmem:[#allocation202_spill] sm:$0xff] %v9523_v33  ;;  %v9543_v33 = vadd.f32 %v14049_v26, %v14048_v8  ;;  %v2370_v8 = vld [vmem:[%s3971_s14 + $0xe] sm:$0x1]  ;;  %v2371_v26 = vld [vmem:[%s3971_s14 + $0x16] sm:$0x1] }
 0x47e   : > { %14039 = vst [vmem:[#allocation70_spill] sm:$0xff] %v9527_v24  ;;  %v2379_v45 = vld [vmem:[%s3971_s14 + $0x56] sm:$0x1]  ;;  %v2380_v46 = vld [vmem:[%s3971_s14 + $0x5e] sm:$0x1] }
 0x47f   : > { %14041 = vst [vmem:[#allocation163_spill] sm:$0xff] %v9531_v34  ;;  %v2396_v34 = vld [vmem:[%s3971_s14 + $0xde] sm:$0x1]  ;;  %v2397_v24 = vld [vmem:[%s3971_s14 + $0xe6] sm:$0x1] }
 0x480   : > { %14044 = vst [vmem:[#allocation170_spill] sm:$0xff] %v9535_v56  ;;  %v14057_v56 = vld [vmem:[#allocation17_spill] sm:$0xff]  ;;  %v2398_v16 = vld [vmem:[%s3971_s14 + $0xee] sm:$0x1]  ;;  %v2399_v37 = vld [vmem:[%s3971_s14 + $0xf6] sm:$0x1] }
 0x481   : > { %14047 = vst [vmem:[#allocation189_spill] sm:$0xff] %v9539_v14  ;;  %v9559_v47 = vadd.f32 %v14058_v30, %v14057_v56  ;;  %v2369_v14 = vld [vmem:[%s3971_s14 + $0x6] sm:$0x1]  ;;  %v9575_v56 = vadd.f32 %v9072_v32, %v14064_v4  ;;  %v9592_v32 = vadd.f32 %v9081_v48, %v14070_v31  ;;  %v14072_v4 = vld [vmem:[#allocation91_spill] sm:$0xff] }
 0x482   : > { %14050 = vst [vmem:[#allocation207_spill] sm:$0xff] %v9543_v33  ;;  %v14066_v30 = vld [vmem:[#allocation74_spill] sm:$0xff]  ;;  %v2395_v33 = vld [vmem:[%s3971_s14 + $0xd6] sm:$0x1] }
 0x483   : > { %14052 = vst [vmem:[#allocation149_spill] sm:$0xff] %v9547_v1  ;;  %v2375_v1 = vld [vmem:[%s3971_s14 + $0x36] sm:$0x1]  ;;  %v2401_v35 = vld [vmem:[%s3971_s14 + $0x106] sm:$0x1] }
 0x484   : > { %14054 = vst [vmem:[#allocation195_spill] sm:$0xff] %v9551_v18  ;;  %v2374_v18 = vld [vmem:[%s3971_s14 + $0x2e] sm:$0x1] }
 0x485   : > { %14056 = vst [vmem:[#allocation111_spill] sm:$0xff] %v9555_v11  ;;  %v2373_v11 = vld [vmem:[%s3971_s14 + $0x26] sm:$0x1] }
 0x486   : > { %14059 = vst [vmem:[#allocation14_spill] sm:$0xff] %v9559_v47  ;;  %v9579_v47 = vadd.f32 %v9075_v53, %v14066_v30  ;;  %v9596_v53 = vadd.f32 %v9084_v10, %v14072_v4  ;;  %v14074_v30 = vld [vmem:[#allocation130_spill] sm:$0xff]  ;;  %v14078_v10 = vld [vmem:[#allocation159_spill] sm:$0xff] }
 0x487   : > { %14061 = vst [vmem:[#allocation96_spill] sm:$0xff] %v9567_v49  ;;  %v2378_v49 = vld [vmem:[%s3971_s14 + $0x4e] sm:$0x1]  ;;  %v9613_v31 = vadd.f32 %v9093_v38, %v14078_v10  ;;  %v14086_v38 = vld [vmem:[#allocation106_spill] sm:$0xff] }
 0x488   : > { %14063 = vst [vmem:[#allocation141_spill] sm:$0xff] %v9571_v52  ;;  %v2377_v52 = vld [vmem:[%s3971_s14 + $0x46] sm:$0x1]  ;;  %v9632_v10 = vadd.f32 %v9105_v27, %v14086_v38  ;;  %v2390_v27 = vld [vmem:[%s3971_s14 + $0xae] sm:$0x1] }
 0x489   : > { %14065 = vst [vmem:[#allocation134_spill] sm:$0xff] %v9575_v56  ;;  %v2376_v56 = vld [vmem:[%s3971_s14 + $0x3e] sm:$0x1]  ;;  %v2391_v38 = vld [vmem:[%s3971_s14 + $0xb6] sm:$0x1] }
 0x48a   : > { %14067 = vst [vmem:[#allocation155_spill] sm:$0xff] %v9579_v47  ;;  %v9600_v47 = vadd.f32 %v9087_v51, %v14074_v30  ;;  %v14080_v51 = vld [vmem:[#allocation145_spill] sm:$0xff]  ;;  %v14082_v30 = vld [vmem:[#allocation186_spill] sm:$0xff] }
 0x48b   : > { %14069 = vst [vmem:[#allocation37_spill] sm:$0xff] %v9588_v39  ;;  %v14076_v39 = vld [vmem:[#allocation176_spill] sm:$0xff]  ;;  %v9617_v4 = vadd.f32 %v9096_v36, %v14080_v51  ;;  %v14090_v51 = vld [vmem:[#allocation18_spill] sm:$0xff] }
 0x48c   : > { %14071 = vst [vmem:[#allocation58_spill] sm:$0xff] %v9592_v32  ;;  %v9609_v48 = vadd.f32 %v9090_v43, %v14076_v39  ;;  %v2382_v32 = vld [vmem:[%s3971_s14 + $0x6e] sm:$0x1]  ;;  %v2383_v43 = vld [vmem:[%s3971_s14 + $0x76] sm:$0x1] }
 0x48d   : > { %14073 = vst [vmem:[#allocation51_spill] sm:$0xff] %v9596_v53  ;;  %v2381_v53 = vld [vmem:[%s3971_s14 + $0x66] sm:$0x1]  ;;  %v14084_v39 = vld [vmem:[#allocation64_spill] sm:$0xff] }
 0x48e   : > { %14075 = vst [vmem:[#allocation183_spill] sm:$0xff] %v9600_v47  ;;  %v9621_v47 = vadd.f32 %v9099_v25, %v14082_v30  ;;  %v9640_v25 = vadd.f32 %v9111_v6, %v14090_v51  ;;  %v2384_v30 = vld [vmem:[%s3971_s14 + $0x7e] sm:$0x1]  ;;  %v9655_v6 = vmul.f32 %v9584_v21, %v2370_v8  ;;  %v9658_v51 = vmul.f32 %v9584_v21, %v2371_v26 }
 0x48f   : > { %14077 = vst [vmem:[#allocation203_spill] sm:$0xff] %v9609_v48  ;;  %v9628_v48 = vadd.f32 %v9102_v42, %v14084_v39  ;;  %v2386_v42 = vld [vmem:[%s3971_s14 + $0x8e] sm:$0x1]  ;;  %v2387_v39 = vld [vmem:[%s3971_s14 + $0x96] sm:$0x1]  ;;  %v9671_v8 = vmul.f32 %v9584_v21, %v2374_v18  ;;  %v9674_v26 = vmul.f32 %v9584_v21, %v2375_v1  ;;  %v9687_v18 = vmul.f32 %v9584_v21, %v2378_v49 }
 0x490   : > { %14079 = vst [vmem:[#allocation87_spill] sm:$0xff] %v9613_v31  ;;  %v14088_v31 = vld [vmem:[#allocation199_spill] sm:$0xff]  ;;  %v9690_v1 = vmul.f32 %v9584_v21, %v2379_v45  ;;  %v9703_v49 = vmul.f32 %v9584_v21, %v2382_v32  ;;  %v9706_v45 = vmul.f32 %v9584_v21, %v2383_v43  ;;  %v9719_v32 = vmul.f32 %v9584_v21, %v2386_v42 }
 0x491   : > { %14081 = vst [vmem:[#allocation79_spill] sm:$0xff] %v9617_v4  ;;  %v9636_v36 = vadd.f32 %v9108_v29, %v14088_v31  ;;  %v2389_v4 = vld [vmem:[%s3971_s14 + $0xa6] sm:$0x1]  ;;  %v2392_v29 = vld [vmem:[%s3971_s14 + $0xbe] sm:$0x1]  ;;  %v9652_v31 = vmul.f32 %v9584_v21, %v2369_v14  ;;  %v9668_v14 = vmul.f32 %v9584_v21, %v2373_v11  ;;  %v9684_v11 = vmul.f32 %v9584_v21, %v2377_v52 }
 0x492   : > { %14083 = vst [vmem:[#allocation102_spill] sm:$0xff] %v9621_v47  ;;  %v2385_v47 = vld [vmem:[%s3971_s14 + $0x86] sm:$0x1]  ;;  %v9700_v52 = vmul.f32 %v9584_v21, %v2381_v53  ;;  %v9722_v43 = vmul.f32 %v9584_v21, %v2387_v39  ;;  %v9735_v42 = vmul.f32 %v9584_v21, %v2390_v27  ;;  %v9738_v39 = vmul.f32 %v9584_v21, %v2391_v38 }
 0x493   : > { %14085 = vst [vmem:[#allocation150_spill] sm:$0xff] %v9628_v48  ;;  %v2388_v48 = vld [vmem:[%s3971_s14 + $0x9e] sm:$0x1]  ;;  %v9716_v53 = vmul.f32 %v9584_v21, %v2385_v47  ;;  %v9732_v47 = vmul.f32 %v9584_v21, %v2389_v4  ;;  %v9754_v38 = vmul.f32 %v9584_v21, %v2395_v33  ;;  %v9770_v33 = vmul.f32 %v9584_v21, %v2399_v37 }
 0x494   : > { %14087 = vst [vmem:[#allocation171_spill] sm:$0xff] %v9632_v10  ;;  %v2394_v10 = vld [vmem:[%s3971_s14 + $0xce] sm:$0x1]  ;;  %v9786_v37 = vmul.f32 %v9584_v21, %v2403_v5  ;;  %v9802_v5 = vmul.f32 %v9584_v21, %v2407_v13  ;;  %v9818_v13 = vmul.f32 %v9584_v21, %v2411_v61 }
 0x495   : > { %14089 = vst [vmem:[#allocation112_spill] sm:$0xff] %v9636_v36  ;;  %v2393_v36 = vld [vmem:[%s3971_s14 + $0xc6] sm:$0x1]  ;;  %v9751_v27 = vmul.f32 %v9584_v21, %v2394_v10  ;;  %v9767_v10 = vmul.f32 %v9584_v21, %v2398_v16  ;;  %v9783_v16 = vmul.f32 %v9584_v21, %v2402_v28  ;;  %v9799_v28 = vmul.f32 %v9584_v21, %v2406_v58 }
 0x496   : > { %14091 = vst [vmem:[#allocation127_spill] sm:$0xff] %v9640_v25  ;;  %v9661_v25 = vmul.f32 %v9584_v21, %v2372_v44  ;;  %v9677_v44 = vmul.f32 %v9584_v21, %v2376_v56  ;;  %v9693_v56 = vmul.f32 %v9584_v21, %v2380_v46  ;;  %v9709_v46 = vmul.f32 %v9584_v21, %v2384_v30 }
 0x497   : > { %14093 = vst [vmem:[#allocation29_spill] sm:$0xff] %v9716_v53  ;;  %v9725_v30 = vmul.f32 %v9584_v21, %v2388_v48  ;;  %v9741_v48 = vmul.f32 %v9584_v21, %v2392_v29  ;;  %v2416_v53 = vld [vmem:[%s3971_s14 + $0x17e] sm:$0x1]  ;;  %v9748_v4 = vmul.f32 %v9584_v21, %v2393_v36  ;;  %v9757_v29 = vmul.f32 %v9584_v21, %v2396_v34 }
 0x498   : > { %14092 = vst [vmem:[#allocation97_spill] sm:$0xff] %v9709_v46  ;;  %v2412_v46 = vld [vmem:[%s3971_s14 + $0x15e] sm:$0x1]  ;;  %v9764_v36 = vmul.f32 %v9584_v21, %v2397_v24  ;;  %v9773_v34 = vmul.f32 %v9584_v21, %v2400_v19  ;;  %v9780_v24 = vmul.f32 %v9584_v21, %v2401_v35  ;;  %v9789_v19 = vmul.f32 %v9584_v21, %v2404_v60 }
 0x499   : > { %14094 = vst [vmem:[#allocation22_spill] sm:$0xff] %v9719_v32  ;;  %v2415_v32 = vld [vmem:[%s3971_s14 + $0x176] sm:$0x1]  ;;  %v9796_v35 = vmul.f32 %v9584_v21, %v2405_v57  ;;  %v9805_v60 = vmul.f32 %v9584_v21, %v2408_v22  ;;  %v9812_v57 = vmul.f32 %v9584_v21, %v2409_v9  ;;  %v9815_v58 = vmul.f32 %v9584_v21, %v2410_v3 }
 0x49a   : > { %14095 = vst [vmem:[#allocation43_spill] sm:$0xff] %v9722_v43  ;;  %v2414_v43 = vld [vmem:[%s3971_s14 + $0x16e] sm:$0x1]  ;;  %v9821_v22 = vmul.f32 %v9584_v21, %v2412_v46  ;;  %v9834_v61 = vmul.f32 %v9584_v21, %v2415_v32  ;;  %v9837_v46 = vmul.f32 %v9584_v21, %v2416_v53 }
 0x49b   : > { %14096 = vst [vmem:[#allocation38_spill] sm:$0xff] %v9725_v30  ;;  %v2413_v30 = vld [vmem:[%s3971_s14 + $0x166] sm:$0x1]  ;;  %v9831_v3 = vmul.f32 %v9584_v21, %v2414_v43 }
 0x49c   : > { %14097 = vst [vmem:[#allocation59_spill] sm:$0xff] %v9732_v47  ;;  %v2420_v47 = vld [vmem:[%s3971_s14 + $0x19e] sm:$0x1]  ;;  %v9828_v9 = vmul.f32 %v9584_v21, %v2413_v30 }
 0x49d   : > { %14098 = vst [vmem:[#allocation164_spill] sm:$0xff] %v9735_v42  ;;  %v2419_v42 = vld [vmem:[%s3971_s14 + $0x196] sm:$0x1]  ;;  %v9853_v53 = vmul.f32 %v9584_v21, %v2420_v47 }
 0x49e   : > { %14099 = vst [vmem:[#allocation71_spill] sm:$0xff] %v9738_v39  ;;  %v2418_v39 = vld [vmem:[%s3971_s14 + $0x18e] sm:$0x1]  ;;  %v9850_v32 = vmul.f32 %v9584_v21, %v2419_v42 }
 0x49f   : > { %14100 = vst [vmem:[#allocation190_spill] sm:$0xff] %v9741_v48  ;;  %v2417_v48 = vld [vmem:[%s3971_s14 + $0x186] sm:$0x1]  ;;  %v9847_v43 = vmul.f32 %v9584_v21, %v2418_v39 }
 0x4a0   : > { %14101 = vst [vmem:[#allocation196_spill] sm:$0xff] %v9748_v4  ;;  %v2424_v4 = vld [vmem:[%s3971_s14 + $0x1be] sm:$0x1]  ;;  %v9844_v30 = vmul.f32 %v9584_v21, %v2417_v48 }
 0x4a1   : > { %14102 = vst [vmem:[#allocation208_spill] sm:$0xff] %v9751_v27  ;;  %v2423_v27 = vld [vmem:[%s3971_s14 + $0x1b6] sm:$0x1]  ;;  %v9869_v47 = vmul.f32 %v9584_v21, %v2424_v4 }
 0x4a2   : > { %14103 = vst [vmem:[#allocation204_spill] sm:$0xff] %v9754_v38  ;;  %v2422_v38 = vld [vmem:[%s3971_s14 + $0x1ae] sm:$0x1]  ;;  %v9866_v42 = vmul.f32 %v9584_v21, %v2423_v27 }
 0x4a3   : > { %14104 = vst [vmem:[#allocation142_spill] sm:$0xff] %v9757_v29  ;;  %v2421_v29 = vld [vmem:[%s3971_s14 + $0x1a6] sm:$0x1]  ;;  %v9863_v39 = vmul.f32 %v9584_v21, %v2422_v38 }
 0x4a4   : > { %14105 = vst [vmem:[#allocation52_spill] sm:$0xff] %v9764_v36  ;;  %v2428_v36 = vld [vmem:[%s3971_s14 + $0x1de] sm:$0x1]  ;;  %v9860_v48 = vmul.f32 %v9584_v21, %v2421_v29 }
 0x4a5   : > { %14106 = vst [vmem:[#allocation15_spill] sm:$0xff] %v9767_v10  ;;  %v2427_v10 = vld [vmem:[%s3971_s14 + $0x1d6] sm:$0x1]  ;;  %v9885_v4 = vmul.f32 %v9584_v21, %v2428_v36 }
 0x4a6   : > { %14107 = vst [vmem:[#allocation151_spill] sm:$0xff] %v9770_v33  ;;  %v2426_v33 = vld [vmem:[%s3971_s14 + $0x1ce] sm:$0x1]  ;;  %v9882_v27 = vmul.f32 %v9584_v21, %v2427_v10 }
 0x4a7   : > { %14108 = vst [vmem:[#allocation123_spill] sm:$0xff] %v9773_v34  ;;  %v2425_v34 = vld [vmem:[%s3971_s14 + $0x1c6] sm:$0x1]  ;;  %v9879_v38 = vmul.f32 %v9584_v21, %v2426_v33 }
 0x4a8   : > { %14109 = vst [vmem:[#allocation156_spill] sm:$0xff] %v9780_v24  ;;  %v2432_v24 = vld [vmem:[%s3971_s14 + $0x1fe] sm:$0x1]  ;;  %v9876_v29 = vmul.f32 %v9584_v21, %v2425_v34 }
 0x4a9   : > { %14110 = vst [vmem:[#allocation135_spill] sm:$0xff] %v9783_v16  ;;  %v2431_v16 = vld [vmem:[%s3971_s14 + $0x1f6] sm:$0x1]  ;;  %v9901_v36 = vmul.f32 %v9584_v21, %v2432_v24 }
 0x4aa   : > { %14111 = vst [vmem:[#allocation88_spill] sm:$0xff] %v9786_v37  ;;  %v2430_v37 = vld [vmem:[%s3971_s14 + $0x1ee] sm:$0x1]  ;;  %v9898_v10 = vmul.f32 %v9584_v21, %v2431_v16 }
 0x4ab   : > { %14112 = vst [vmem:[#allocation98_spill] sm:$0xff] %v9789_v19  ;;  %v2429_v19 = vld [vmem:[%s3971_s14 + $0x1e6] sm:$0x1]  ;;  %v9895_v33 = vmul.f32 %v9584_v21, %v2430_v37 }
 0x4ac   : > { %14113 = vst [vmem:[#allocation184_spill] sm:$0xff] %v9796_v35  ;;  %v2436_v35 = vld [vmem:[%s3971_s14 + $0x21e] sm:$0x1]  ;;  %v9892_v34 = vmul.f32 %v9584_v21, %v2429_v19 }
 0x4ad   : > { %14114 = vst [vmem:[#allocation113_spill] sm:$0xff] %v9799_v28  ;;  %v2435_v28 = vld [vmem:[%s3971_s14 + $0x216] sm:$0x1]  ;;  %v9917_v24 = vmul.f32 %v9584_v21, %v2436_v35 }
 0x4ae   : > { %14115 = vst [vmem:[#allocation172_spill] sm:$0xff] %v9802_v5  ;;  %v2434_v5 = vld [vmem:[%s3971_s14 + $0x20e] sm:$0x1]  ;;  %v9914_v16 = vmul.f32 %v9584_v21, %v2435_v28 }
 0x4af   : > { %14116 = vst [vmem:[#allocation44_spill] sm:$0xff] %v9805_v60  ;;  %v2433_v60 = vld [vmem:[%s3971_s14 + $0x206] sm:$0x1]  ;;  %v9911_v37 = vmul.f32 %v9584_v21, %v2434_v5 }
 0x4b0   : > { %14117 = vst [vmem:[#allocation80_spill] sm:$0xff] %v9812_v57  ;;  %v2440_v57 = vld [vmem:[%s3971_s14 + $0x23e] sm:$0x1]  ;;  %v9908_v19 = vmul.f32 %v9584_v21, %v2433_v60 }
 0x4b1   : > { %14118 = vst [vmem:[#allocation30_spill] sm:$0xff] %v9815_v58  ;;  %v2439_v58 = vld [vmem:[%s3971_s14 + $0x236] sm:$0x1]  ;;  %v9933_v35 = vmul.f32 %v9584_v21, %v2440_v57 }
 0x4b2   : > { %14119 = vst [vmem:[#allocation165_spill] sm:$0xff] %v9818_v13  ;;  %v2438_v13 = vld [vmem:[%s3971_s14 + $0x22e] sm:$0x1]  ;;  %v9930_v28 = vmul.f32 %v9584_v21, %v2439_v58 }
 0x4b3   : > { %14120 = vst [vmem:[#allocation128_spill] sm:$0xff] %v9821_v22  ;;  %v2437_v22 = vld [vmem:[%s3971_s14 + $0x226] sm:$0x1]  ;;  %v9927_v5 = vmul.f32 %v9584_v21, %v2438_v13 }
 0x4b4   : > { %14121 = vst [vmem:[#allocation23_spill] sm:$0xff] %v9828_v9  ;;  %v2444_v9 = vld [vmem:[%s3971_s14 + $0x25e] sm:$0x1]  ;;  %v9924_v60 = vmul.f32 %v9584_v21, %v2437_v22 }
 0x4b5   : > { %14122 = vst [vmem:[#allocation60_spill] sm:$0xff] %v9831_v3  ;;  %v2443_v3 = vld [vmem:[%s3971_s14 + $0x256] sm:$0x1]  ;;  %v9949_v57 = vmul.f32 %v9584_v21, %v2444_v9  ;;  %v2469_v9 = vld [vmem:[%s3971_s14 + $0x326] sm:$0x1] }
 0x4b6   : > { %14123 = vst [vmem:[#allocation103_spill] sm:$0xff] %v9834_v61  ;;  %v2442_v61 = vld [vmem:[%s3971_s14 + $0x24e] sm:$0x1]  ;;  %v9946_v58 = vmul.f32 %v9584_v21, %v2443_v3 }
 0x4b7   : > { %14124 = vst [vmem:[#allocation39_spill] sm:$0xff] %v9837_v46  ;;  %v2441_v46 = vld [vmem:[%s3971_s14 + $0x246] sm:$0x1]  ;;  %v9943_v13 = vmul.f32 %v9584_v21, %v2442_v61 }
 0x4b8   : > { %14125 = vst [vmem:[#allocation89_spill] sm:$0xff] %v9844_v30  ;;  %v2448_v30 = vld [vmem:[%s3971_s14 + $0x27e] sm:$0x1]  ;;  %v9940_v22 = vmul.f32 %v9584_v21, %v2441_v46 }
 0x4b9   : > { %14126 = vst [vmem:[#allocation114_spill] sm:$0xff] %v9847_v43  ;;  %v2447_v43 = vld [vmem:[%s3971_s14 + $0x276] sm:$0x1]  ;;  %v9965_v3 = vmul.f32 %v9584_v21, %v2448_v30 }
 0x4ba   : > { %14127 = vst [vmem:[#allocation72_spill] sm:$0xff] %v9850_v32  ;;  %v2446_v32 = vld [vmem:[%s3971_s14 + $0x26e] sm:$0x1]  ;;  %v9962_v61 = vmul.f32 %v9584_v21, %v2447_v43  ;;  %v2473_v43 = vld [vmem:[%s3971_s14 + $0x346] sm:$0x1] }
 0x4bb   : > { %14128 = vst [vmem:[#allocation81_spill] sm:$0xff] %v9853_v53  ;;  %v2445_v53 = vld [vmem:[%s3971_s14 + $0x266] sm:$0x1]  ;;  %v9959_v46 = vmul.f32 %v9584_v21, %v2446_v32 }
 0x4bc   : > { %14129 = vst [vmem:[#allocation143_spill] sm:$0xff] %v9860_v48  ;;  %v2452_v48 = vld [vmem:[%s3971_s14 + $0x29e] sm:$0x1]  ;;  %v9956_v54 = vmul.f32 %v9584_v21, %v2445_v53 }
 0x4bd   : > { %14130 = vst [vmem:[#allocation157_spill] sm:$0xff] %v9863_v39  ;;  %v2451_v39 = vld [vmem:[%s3971_s14 + $0x296] sm:$0x1]  ;;  %v9981_v30 = vmul.f32 %v9584_v21, %v2452_v48  ;;  %v2476_v48 = vld [vmem:[%s3971_s14 + $0x35e] sm:$0x1] }
 0x4be   : > { %14131 = vst [vmem:[#allocation53_spill] sm:$0xff] %v9866_v42  ;;  %v2450_v42 = vld [vmem:[%s3971_s14 + $0x28e] sm:$0x1]  ;;  %v9978_v32 = vmul.f32 %v9584_v21, %v2451_v39 }
 0x4bf   : > { %14132 = vst [vmem:[#allocation173_spill] sm:$0xff] %v9869_v47  ;;  %v2449_v47 = vld [vmem:[%s3971_s14 + $0x286] sm:$0x1]  ;;  %v9975_v53 = vmul.f32 %v9584_v21, %v2450_v42 }
 0x4c0   : > { %14133 = vst [vmem:[#allocation136_spill] sm:$0xff] %v9876_v29  ;;  %v2456_v29 = vld [vmem:[%s3971_s14 + $0x2be] sm:$0x1] }
 0x4c1   : > { %14134 = vst [vmem:[#allocation16_spill] sm:$0xff] %v9879_v38  ;;  %v2455_v38 = vld [vmem:[%s3971_s14 + $0x2b6] sm:$0x1]  ;;  %v9996_v39 = vmul.f32 %v9584_v21, %v2456_v29 }
 0x4c2   : > { %14135 = vst [vmem:[#allocation115_spill] sm:$0xff] %v9882_v27  ;;  %v2454_v27 = vld [vmem:[%s3971_s14 + $0x2ae] sm:$0x1]  ;;  %v9993_v42 = vmul.f32 %v9584_v21, %v2455_v38  ;;  %v2479_v29 = vld [vmem:[%s3971_s14 + $0x376] sm:$0x1] }
 0x4c3   : > { %14136 = vst [vmem:[#allocation197_spill] sm:$0xff] %v9885_v4  ;;  %v2453_v4 = vld [vmem:[%s3971_s14 + $0x2a6] sm:$0x1] }
 0x4c4   : > { %14137 = vst [vmem:[#allocation209_spill] sm:$0xff] %v9892_v34  ;;  %v2460_v34 = vld [vmem:[%s3971_s14 + $0x2de] sm:$0x1] }
 0x4c5   : > { %14138 = vst [vmem:[#allocation191_spill] sm:$0xff] %v9895_v33  ;;  %v2459_v33 = vld [vmem:[%s3971_s14 + $0x2d6] sm:$0x1]  ;;  %v10011_v38 = vmul.f32 %v9584_v21, %v2460_v34  ;;  %v2482_v34 = vld [vmem:[%s3971_s14 + $0x38e] sm:$0x1] }
 0x4c6   : > { %14139 = vst [vmem:[#allocation61_spill] sm:$0xff] %v9898_v10  ;;  %v2458_v10 = vld [vmem:[%s3971_s14 + $0x2ce] sm:$0x1] }
 0x4c7   : > { %14140 = vst [vmem:[#allocation166_spill] sm:$0xff] %v9901_v36  ;;  %v2457_v36 = vld [vmem:[%s3971_s14 + $0x2c6] sm:$0x1] }
 0x4c8   : > { %14141 = vst [vmem:[#allocation73_spill] sm:$0xff] %v9908_v19  ;;  %v2464_v19 = vld [vmem:[%s3971_s14 + $0x2fe] sm:$0x1] }
 0x4c9   : > { %14142 = vst [vmem:[#allocation24_spill] sm:$0xff] %v9911_v37  ;;  %v2463_v37 = vld [vmem:[%s3971_s14 + $0x2f6] sm:$0x1] }
 0x4ca   : > { %14143 = vst [vmem:[#allocation31_spill] sm:$0xff] %v9914_v16  ;;  %v2462_v16 = vld [vmem:[%s3971_s14 + $0x2ee] sm:$0x1] }
 0x4cb   : > { %14144 = vst [vmem:[#allocation116_spill] sm:$0xff] %v9917_v24  ;;  %v2461_v24 = vld [vmem:[%s3971_s14 + $0x2e6] sm:$0x1] }
 0x4cc   : > { %14145 = vst [vmem:[#allocation45_spill] sm:$0xff] %v9924_v60  ;;  %v2468_v60 = vld [vmem:[%s3971_s14 + $0x31e] sm:$0x1] }
 0x4cd   : > { %14146 = vst [vmem:[#allocation82_spill] sm:$0xff] %v9927_v5  ;;  %v2467_v5 = vld [vmem:[%s3971_s14 + $0x316] sm:$0x1] }
 0x4ce   : > { %14147 = vst [vmem:[#allocation174_spill] sm:$0xff] %v9930_v28  ;;  %v2466_v28 = vld [vmem:[%s3971_s14 + $0x30e] sm:$0x1] }
 0x4cf   : > { %14148 = vst [vmem:[#allocation54_spill] sm:$0xff] %v9933_v35  ;;  %v2465_v35 = vld [vmem:[%s3971_s14 + $0x306] sm:$0x1] }
 0x4d0   : > { %14149 = vst [vmem:[#allocation129_spill] sm:$0xff] %v9940_v22  ;;  %v9972_v22 = vmul.f32 %v9584_v21, %v2449_v47  ;;  %v9990_v47 = vmul.f32 %v9584_v21, %v2454_v27  ;;  %v10008_v27 = vmul.f32 %v9584_v21, %v2459_v33  ;;  %v10026_v33 = vmul.f32 %v9584_v21, %v2464_v19  ;;  %v2485_v19 = vld [vmem:[%s3971_s14 + $0x3a6] sm:$0x1] }
 0x4d1   : > { %14150 = vst [vmem:[#allocation137_spill] sm:$0xff] %v9943_v13  ;;  %v2472_v13 = vld [vmem:[%s3971_s14 + $0x33e] sm:$0x1] }
 0x4d2   : > { %14151 = vst [vmem:[#allocation90_spill] sm:$0xff] %v9946_v58  ;;  %v2471_v58 = vld [vmem:[%s3971_s14 + $0x336] sm:$0x1] }
 0x4d3   : > { %14152 = vst [vmem:[#allocation104_spill] sm:$0xff] %v9949_v57  ;;  %v2470_v57 = vld [vmem:[%s3971_s14 + $0x32e] sm:$0x1] }
 0x4d4   : > { %14153 = vst [vmem:[#allocation117_spill] sm:$0xff] %v9959_v46  ;;  %v9987_v46 = vmul.f32 %v9584_v21, %v2453_v4  ;;  %v10005_v4 = vmul.f32 %v9584_v21, %v2458_v10  ;;  %v10023_v10 = vmul.f32 %v9584_v21, %v2463_v37  ;;  %v10041_v37 = vmul.f32 %v9584_v21, %v2468_v60  ;;  %v2488_v60 = vld [vmem:[%s3971_s14 + $0x3be] sm:$0x1] }
 0x4d5   : > { %14154 = vst [vmem:[#allocation144_spill] sm:$0xff] %v9962_v61  ;;  %v2475_v61 = vld [vmem:[%s3971_s14 + $0x356] sm:$0x1] }
 0x4d6   : > { %14155 = vst [vmem:[#allocation192_spill] sm:$0xff] %v9965_v3  ;;  %v2474_v3 = vld [vmem:[%s3971_s14 + $0x34e] sm:$0x1] }
 0x4d7   : > { %14156 = vst [vmem:[#allocation185_spill] sm:$0xff] %v9975_v53  ;;  %v10002_v53 = vmul.f32 %v9584_v21, %v2457_v36  ;;  %v10020_v36 = vmul.f32 %v9584_v21, %v2462_v16  ;;  %v10038_v16 = vmul.f32 %v9584_v21, %v2467_v5  ;;  %v10056_v5 = vmul.f32 %v9584_v21, %v2472_v13  ;;  %v2492_v13 = vld [vmem:[%s3971_s14 + $0x3de] sm:$0x1] }
 0x4d8   : > { %14157 = vst [vmem:[#allocation167_spill] sm:$0xff] %v9978_v32  ;;  %v2478_v32 = vld [vmem:[%s3971_s14 + $0x36e] sm:$0x1] }
 0x4d9   : > { %14158 = vst [vmem:[#allocation62_spill] sm:$0xff] %v9981_v30  ;;  %v2477_v30 = vld [vmem:[%s3971_s14 + $0x366] sm:$0x1] }
 0x4da   : > { %14159 = vst [vmem:[#allocation158_spill] sm:$0xff] %v9990_v47  ;;  %v10017_v47 = vmul.f32 %v9584_v21, %v2461_v24  ;;  %v10035_v24 = vmul.f32 %v9584_v21, %v2466_v28  ;;  %v10053_v28 = vmul.f32 %v9584_v21, %v2471_v58  ;;  %v10071_v58 = vmul.f32 %v9584_v21, %v2476_v48 }
 0x4db   : > { %14160 = vst [vmem:[#allocation198_spill] sm:$0xff] %v9993_v42  ;;  %v2481_v42 = vld [vmem:[%s3971_s14 + $0x386] sm:$0x1] }
 0x4dc   : > { %14161 = vst [vmem:[#allocation17_spill] sm:$0xff] %v9996_v39  ;;  %v2480_v39 = vld [vmem:[%s3971_s14 + $0x37e] sm:$0x1]  ;;  %v10092_v48 = vmul.f32 %v9584_v21, %v2481_v42  ;;  %v10113_v42 = vmul.f32 %v9584_v21, %v2488_v60 }
 0x4dd   : > { %14162 = vst [vmem:[#allocation25_spill] sm:$0xff] %v10005_v4  ;;  %v10032_v4 = vmul.f32 %v9584_v21, %v2465_v35  ;;  %v10050_v35 = vmul.f32 %v9584_v21, %v2470_v57  ;;  %v10068_v57 = vmul.f32 %v9584_v21, %v2475_v61  ;;  %v2494_v61 = vld [vmem:[%s3971_s14 + $0x3ee] sm:$0x1] }
 0x4de   : > { %14163 = vst [vmem:[#allocation175_spill] sm:$0xff] %v10008_v27  ;;  %v2484_v27 = vld [vmem:[%s3971_s14 + $0x39e] sm:$0x1] }
 0x4df   : > { %14164 = vst [vmem:[#allocation46_spill] sm:$0xff] %v10011_v38  ;;  %v2483_v38 = vld [vmem:[%s3971_s14 + $0x396] sm:$0x1] }
 0x4e0   : > { %14165 = vst [vmem:[#allocation32_spill] sm:$0xff] %v10020_v36  ;;  %v10047_v36 = vmul.f32 %v9584_v21, %v2469_v9  ;;  %v10065_v9 = vmul.f32 %v9584_v21, %v2474_v3  ;;  %v10086_v3 = vmul.f32 %v9584_v21, %v2480_v39 }
 0x4e1   : > { %14166 = vst [vmem:[#allocation74_spill] sm:$0xff] %v10023_v10  ;;  %v2487_v10 = vld [vmem:[%s3971_s14 + $0x3b6] sm:$0x1] }
 0x4e2   : > { %14167 = vst [vmem:[#allocation63_spill] sm:$0xff] %v10026_v33  ;;  %v2486_v33 = vld [vmem:[%s3971_s14 + $0x3ae] sm:$0x1] }
 0x4e3   : > { %14168 = vst [vmem:[#allocation105_spill] sm:$0xff] %v10035_v24  ;;  %v10062_v24 = vmul.f32 %v9584_v21, %v2473_v43  ;;  %v10083_v43 = vmul.f32 %v9584_v21, %v2479_v29  ;;  %v10104_v29 = vmul.f32 %v9584_v21, %v2485_v19  ;;  %v10107_v39 = vmul.f32 %v9584_v21, %v2486_v33 }
 0x4e4   : > { %14169 = vst [vmem:[#allocation91_spill] sm:$0xff] %v10038_v16  ;;  %v2490_v16 = vld [vmem:[%s3971_s14 + $0x3ce] sm:$0x1]  ;;  %v10125_v19 = vmul.f32 %v9584_v21, %v2492_v13  ;;  %v10153_v13 = vadd.f32 %v9661_v25, %v9127_v40  ;;  %v10173_v40 = vadd.f32 %v9684_v11, %v9147_v20  ;;  %v10193_v20 = vadd.f32 %v9703_v49, %v9167_v15  ;;  %v14191_v11 = vld [vmem:[#allocation205_spill] sm:$0xff] }
 0x4e5   : > { %14170 = vst [vmem:[#allocation130_spill] sm:$0xff] %v10041_v37  ;;  %v2489_v37 = vld [vmem:[%s3971_s14 + $0x3c6] sm:$0x1]  ;;  %v14179_v25 = vld [vmem:[#allocation11_spill] sm:$0xff] }
 0x4e6   : > { %14171 = vst [vmem:[#allocation176_spill] sm:$0xff] %v10047_v36  ;;  %v10080_v36 = vmul.f32 %v9584_v21, %v2478_v32  ;;  %v10101_v32 = vmul.f32 %v9584_v21, %v2484_v27  ;;  %v14197_v49 = vld [vmem:[#allocation83_spill] sm:$0xff] }
 0x4e7   : > { %14172 = vst [vmem:[#allocation159_spill] sm:$0xff] %v10050_v35  ;;  %v10077_v35 = vmul.f32 %v9584_v21, %v2477_v30  ;;  %v10098_v30 = vmul.f32 %v9584_v21, %v2483_v38  ;;  %v10119_v38 = vmul.f32 %v9584_v21, %v2490_v16  ;;  %v10141_v16 = vadd.f32 %v9652_v31, %v9115_v17  ;;  %v14180_v31 = vld [vmem:[#allocation97_spill] sm:$0xff] }
 0x4e8   : > { %14173 = vst [vmem:[#allocation145_spill] sm:$0xff] %v10053_v28  ;;  %v2491_v28 = vld [vmem:[%s3971_s14 + $0x3d6] sm:$0x1]  ;;  %v10161_v17 = vadd.f32 %v9671_v8, %v9135_v62  ;;  %v10181_v62 = vadd.f32 %v9690_v1, %v9155_v63  ;;  %v10201_v63 = vadd.f32 %v14180_v31, %v14179_v25  ;;  %v14186_v8 = vld [vmem:[#allocation22_spill] sm:$0xff]  ;;  %v14194_v1 = vld [vmem:[#allocation33_spill] sm:$0xff] }
 0x4e9   : > { %14174 = vst [vmem:[#allocation186_spill] sm:$0xff] %v10056_v5  ;;  %v2493_v5 = vld [vmem:[%s3971_s14 + $0x3e6] sm:$0x1]  ;;  %v10122_v27 = vmul.f32 %v9584_v21, %v2491_v28  ;;  %v10145_v28 = vadd.f32 %v9655_v6, %v9119_v41  ;;  %v10165_v41 = vadd.f32 %v9674_v26, %v9139_v50  ;;  %v10185_v50 = vadd.f32 %v9693_v56, %v9159_v59  ;;  %v14182_v6 = vld [vmem:[#allocation177_spill] sm:$0xff]  ;;  %v14188_v26 = vld [vmem:[#allocation47_spill] sm:$0xff] }
 0x4ea   : > { %14175 = vst [vmem:[#allocation64_spill] sm:$0xff] %v10065_v9  ;;  %v2496_v9 = vld [vmem:[%s3971_s14 + $0x3fe] sm:$0x1]  ;;  %v10128_v33 = vmul.f32 %v9584_v21, %v2493_v5  ;;  %v10149_v5 = vadd.f32 %v9658_v51, %v9123_v55  ;;  %v10169_v55 = vadd.f32 %v9677_v44, %v9143_v12  ;;  %v10189_v12 = vadd.f32 %v9700_v52, %v9163_v0  ;;  %v14189_v44 = vld [vmem:[#allocation43_spill] sm:$0xff]  ;;  %v14203_v31 = vld [vmem:[#allocation180_spill] sm:$0xff] }
 0x4eb   : > { %14176 = vst [vmem:[#allocation106_spill] sm:$0xff] %v10068_v57  ;;  %v2495_v57 = vld [vmem:[%s3971_s14 + $0x3f6] sm:$0x1]  ;;  %v14183_v51 = vld [vmem:[#allocation29_spill] sm:$0xff]  ;;  %v10213_v15 = vadd.f32 %v14189_v44, %v14188_v26  ;;  %v14195_v56 = vld [vmem:[#allocation59_spill] sm:$0xff] }
 0x4ec   : > { %14177 = vst [vmem:[#allocation199_spill] sm:$0xff] %v10071_v58  ;;  %v10095_v58 = vmul.f32 %v9584_v21, %v2482_v34  ;;  %v10116_v34 = vmul.f32 %v9584_v21, %v2489_v37  ;;  %v10134_v60 = vmul.f32 %v9584_v21, %v2495_v57  ;;  %v10137_v37 = vmul.f32 %v9584_v21, %v2496_v9  ;;  %v14200_v57 = vld [vmem:[#allocation75_spill] sm:$0xff] }
 0x4ed   : > { %14178 = vst [vmem:[#allocation18_spill] sm:$0xff] %v10086_v3  ;;  %v10110_v3 = vmul.f32 %v9584_v21, %v2487_v10  ;;  %v10131_v10 = vmul.f32 %v9584_v21, %v2494_v61  ;;  %v10157_v21 = vadd.f32 %v9668_v14, %v9131_v7  ;;  %v10177_v7 = vadd.f32 %v9687_v18, %v9151_v2  ;;  %v14185_v14 = vld [vmem:[#allocation118_spill] sm:$0xff]  ;;  %v14201_v61 = vld [vmem:[#allocation71_spill] sm:$0xff] }
 0x4ee   : > { %v10197_v2 = vadd.f32 %v9706_v45, %v9171_v23  ;;  %14181 = vst [vmem:[#allocation11_spill] sm:$0xff] %v10201_v63  ;;  %v10205_v59 = vadd.f32 %v14183_v51, %v14182_v6  ;;  %v10209_v0 = vadd.f32 %v14186_v8, %v14185_v14  ;;  %v14192_v18 = vld [vmem:[#allocation38_spill] sm:$0xff]  ;;  %v10221_v52 = vadd.f32 %v14195_v56, %v14194_v1  ;;  %v14198_v45 = vld [vmem:[#allocation164_spill] sm:$0xff]  ;;  %v14206_v14 = vld [vmem:[#allocation65_spill] sm:$0xff] }
 0x4ef   : > { %14190 = vst [vmem:[#allocation29_spill] sm:$0xff] %v10213_v15  ;;  %v10217_v23 = vadd.f32 %v14192_v18, %v14191_v11  ;;  %v10225_v9 = vadd.f32 %v14198_v45, %v14197_v49  ;;  %v10229_v25 = vadd.f32 %v14201_v61, %v14200_v57  ;;  %v14204_v6 = vld [vmem:[#allocation190_spill] sm:$0xff]  ;;  %v14207_v8 = vld [vmem:[#allocation196_spill] sm:$0xff]  ;;  %v14209_v44 = vld [vmem:[#allocation55_spill] sm:$0xff] }
 0x4f0   : > { %14184 = vst [vmem:[#allocation97_spill] sm:$0xff] %v10205_v59  ;;  %v10233_v51 = vadd.f32 %v14204_v6, %v14203_v31  ;;  %v10237_v26 = vadd.f32 %v14207_v8, %v14206_v14  ;;  %v14210_v11 = vld [vmem:[#allocation208_spill] sm:$0xff]  ;;  %v14212_v1 = vld [vmem:[#allocation107_spill] sm:$0xff]  ;;  %v14221_v6 = vld [vmem:[#allocation138_spill] sm:$0xff] }
 0x4f1   : > { %14187 = vst [vmem:[#allocation177_spill] sm:$0xff] %v10209_v0  ;;  %v10241_v18 = vadd.f32 %v14210_v11, %v14209_v44  ;;  %v14213_v56 = vld [vmem:[#allocation204_spill] sm:$0xff]  ;;  %v14224_v8 = vld [vmem:[#allocation131_spill] sm:$0xff]  ;;  %v2795_v15 = vld [vmem:[%s3971_s14 + $0x147] sm:$0x1] }
 0x4f2   : > { %14193 = vst [vmem:[#allocation118_spill] sm:$0xff] %v10217_v23  ;;  %v10245_v49 = vadd.f32 %v14213_v56, %v14212_v1  ;;  %v14215_v45 = vld [vmem:[#allocation152_spill] sm:$0xff]  ;;  %v14230_v56 = vld [vmem:[#allocation146_spill] sm:$0xff]  ;;  %v2794_v23 = vld [vmem:[%s3971_s14 + $0x13f] sm:$0x1] }
 0x4f3   : > { %14196 = vst [vmem:[#allocation22_spill] sm:$0xff] %v10221_v52  ;;  %v14218_v61 = vld [vmem:[#allocation92_spill] sm:$0xff]  ;;  %v2796_v0 = vld [vmem:[%s3971_s14 + $0x14f] sm:$0x1] }
 0x4f4   : > { %14199 = vst [vmem:[#allocation47_spill] sm:$0xff] %v10225_v9  ;;  %v14216_v9 = vld [vmem:[#allocation142_spill] sm:$0xff]  ;;  %v14227_v11 = vld [vmem:[#allocation124_spill] sm:$0xff] }
 0x4f5   : > { %14202 = vst [vmem:[#allocation43_spill] sm:$0xff] %v10229_v25  ;;  %v10249_v57 = vadd.f32 %v14216_v9, %v14215_v45  ;;  %v14219_v25 = vld [vmem:[#allocation52_spill] sm:$0xff]  ;;  %v14233_v45 = vld [vmem:[#allocation119_spill] sm:$0xff] }
 0x4f6   : > { %14205 = vst [vmem:[#allocation205_spill] sm:$0xff] %v10233_v51  ;;  %v10253_v31 = vadd.f32 %v14219_v25, %v14218_v61  ;;  %v14222_v51 = vld [vmem:[#allocation15_spill] sm:$0xff]  ;;  %v14236_v61 = vld [vmem:[#allocation160_spill] sm:$0xff] }
 0x4f7   : > { %14208 = vst [vmem:[#allocation38_spill] sm:$0xff] %v10237_v26  ;;  %v10257_v14 = vadd.f32 %v14222_v51, %v14221_v6  ;;  %v14225_v26 = vld [vmem:[#allocation151_spill] sm:$0xff]  ;;  %v2793_v52 = vld [vmem:[%s3971_s14 + $0x137] sm:$0x1] }
 0x4f8   : > { %14211 = vst [vmem:[#allocation33_spill] sm:$0xff] %v10241_v18  ;;  %v10261_v44 = vadd.f32 %v14225_v26, %v14224_v8  ;;  %v14228_v18 = vld [vmem:[#allocation123_spill] sm:$0xff]  ;;  %v2797_v59 = vld [vmem:[%s3971_s14 + $0x157] sm:$0x1] }
 0x4f9   : > { %14214 = vst [vmem:[#allocation59_spill] sm:$0xff] %v10245_v49  ;;  %v10265_v1 = vadd.f32 %v14228_v18, %v14227_v11  ;;  %v14231_v49 = vld [vmem:[#allocation156_spill] sm:$0xff]  ;;  %v14239_v6 = vld [vmem:[#allocation99_spill] sm:$0xff]  ;;  %v14245_v11 = vld [vmem:[#allocation193_spill] sm:$0xff] }
 0x4fa   : > { %14217 = vst [vmem:[#allocation83_spill] sm:$0xff] %v10249_v57  ;;  %v10269_v9 = vadd.f32 %v14231_v49, %v14230_v56  ;;  %v14234_v57 = vld [vmem:[#allocation135_spill] sm:$0xff]  ;;  %v14248_v56 = vld [vmem:[#allocation178_spill] sm:$0xff] }
 0x4fb   : > { %14220 = vst [vmem:[#allocation164_spill] sm:$0xff] %v10253_v31  ;;  %v10273_v25 = vadd.f32 %v14234_v57, %v14233_v45  ;;  %v14237_v31 = vld [vmem:[#allocation88_spill] sm:$0xff]  ;;  %v14242_v8 = vld [vmem:[#allocation187_spill] sm:$0xff] }
 0x4fc   : > { %14223 = vst [vmem:[#allocation75_spill] sm:$0xff] %v10257_v14  ;;  %v10277_v51 = vadd.f32 %v14237_v31, %v14236_v61  ;;  %v14240_v14 = vld [vmem:[#allocation98_spill] sm:$0xff]  ;;  %v14251_v45 = vld [vmem:[#allocation68_spill] sm:$0xff] }
 0x4fd   : > { %14226 = vst [vmem:[#allocation71_spill] sm:$0xff] %v10261_v44  ;;  %v10281_v26 = vadd.f32 %v14240_v14, %v14239_v6  ;;  %v14243_v44 = vld [vmem:[#allocation184_spill] sm:$0xff] }
 0x4fe   : > { %14229 = vst [vmem:[#allocation180_spill] sm:$0xff] %v10265_v1  ;;  %v10285_v18 = vadd.f32 %v14243_v44, %v14242_v8  ;;  %v14246_v1 = vld [vmem:[#allocation113_spill] sm:$0xff]  ;;  %v14254_v61 = vld [vmem:[#allocation48_spill] sm:$0xff] }
 0x4ff   : > { %14232 = vst [vmem:[#allocation190_spill] sm:$0xff] %v10269_v9  ;;  %v10289_v49 = vadd.f32 %v14246_v1, %v14245_v11  ;;  %v14249_v9 = vld [vmem:[#allocation172_spill] sm:$0xff]  ;;  %v14260_v8 = vld [vmem:[#allocation93_spill] sm:$0xff] }
 0x500   : > { %14235 = vst [vmem:[#allocation65_spill] sm:$0xff] %v10273_v25  ;;  %v10293_v57 = vadd.f32 %v14249_v9, %v14248_v56  ;;  %v14252_v25 = vld [vmem:[#allocation44_spill] sm:$0xff]  ;;  %v14266_v56 = vld [vmem:[#allocation19_spill] sm:$0xff] }
 0x501   : > { %14238 = vst [vmem:[#allocation196_spill] sm:$0xff] %v10277_v51  ;;  %v10297_v31 = vadd.f32 %v14252_v25, %v14251_v45  ;;  %v14255_v51 = vld [vmem:[#allocation80_spill] sm:$0xff]  ;;  %v14269_v45 = vld [vmem:[#allocation26_spill] sm:$0xff] }
 0x502   : > { %14241 = vst [vmem:[#allocation55_spill] sm:$0xff] %v10281_v26  ;;  %v10301_v14 = vadd.f32 %v14255_v51, %v14254_v61  ;;  %v14257_v6 = vld [vmem:[#allocation168_spill] sm:$0xff]  ;;  %v14258_v26 = vld [vmem:[#allocation30_spill] sm:$0xff] }
 0x503   : > { %14244 = vst [vmem:[#allocation208_spill] sm:$0xff] %v10285_v18  ;;  %v10305_v44 = vadd.f32 %v14258_v26, %v14257_v6  ;;  %v14261_v18 = vld [vmem:[#allocation165_spill] sm:$0xff]  ;;  %v14263_v11 = vld [vmem:[#allocation40_spill] sm:$0xff]  ;;  %v14272_v61 = vld [vmem:[#allocation66_spill] sm:$0xff] }
 0x504   : > { %14247 = vst [vmem:[#allocation107_spill] sm:$0xff] %v10289_v49  ;;  %v10309_v1 = vadd.f32 %v14261_v18, %v14260_v8  ;;  %v14264_v49 = vld [vmem:[#allocation128_spill] sm:$0xff]  ;;  %v14278_v8 = vld [vmem:[#allocation210_spill] sm:$0xff] }
 0x505   : > { %14250 = vst [vmem:[#allocation204_spill] sm:$0xff] %v10293_v57  ;;  %v10313_v9 = vadd.f32 %v14264_v49, %v14263_v11  ;;  %v14267_v57 = vld [vmem:[#allocation23_spill] sm:$0xff]  ;;  %v14275_v6 = vld [vmem:[#allocation12_spill] sm:$0xff] }
 0x506   : > { %14253 = vst [vmem:[#allocation152_spill] sm:$0xff] %v10297_v31  ;;  %v10317_v25 = vadd.f32 %v14267_v57, %v14266_v56  ;;  %v14270_v31 = vld [vmem:[#allocation60_spill] sm:$0xff] }
 0x507   : > { %14256 = vst [vmem:[#allocation142_spill] sm:$0xff] %v10301_v14  ;;  %v10321_v51 = vadd.f32 %v14270_v31, %v14269_v45  ;;  %v14273_v14 = vld [vmem:[#allocation103_spill] sm:$0xff]  ;;  %v14281_v11 = vld [vmem:[#allocation56_spill] sm:$0xff]  ;;  %v14287_v45 = vld [vmem:[#allocation206_spill] sm:$0xff] }
 0x508   : > { %14259 = vst [vmem:[#allocation92_spill] sm:$0xff] %v10305_v44  ;;  %v10325_v26 = vadd.f32 %v14273_v14, %v14272_v61  ;;  %v14276_v44 = vld [vmem:[#allocation39_spill] sm:$0xff]  ;;  %v14284_v56 = vld [vmem:[#allocation76_spill] sm:$0xff]  ;;  %v14290_v61 = vld [vmem:[#allocation34_spill] sm:$0xff] }
 0x509   : > { %14262 = vst [vmem:[#allocation52_spill] sm:$0xff] %v10309_v1  ;;  %v10329_v18 = vadd.f32 %v14276_v44, %v14275_v6  ;;  %v14279_v1 = vld [vmem:[#allocation89_spill] sm:$0xff]  ;;  %v14293_v6 = vld [vmem:[#allocation84_spill] sm:$0xff] }
 0x50a   : > { %14265 = vst [vmem:[#allocation138_spill] sm:$0xff] %v10313_v9  ;;  %v10333_v49 = vadd.f32 %v14279_v1, %v14278_v8  ;;  %v14282_v9 = vld [vmem:[#allocation114_spill] sm:$0xff]  ;;  %v14296_v8 = vld [vmem:[#allocation161_spill] sm:$0xff] }
 0x50b   : > { %14268 = vst [vmem:[#allocation15_spill] sm:$0xff] %v10317_v25  ;;  %v10337_v57 = vadd.f32 %v14282_v9, %v14281_v11  ;;  %v14285_v25 = vld [vmem:[#allocation72_spill] sm:$0xff]  ;;  %v14299_v11 = vld [vmem:[#allocation181_spill] sm:$0xff] }
 0x50c   : > { %14271 = vst [vmem:[#allocation131_spill] sm:$0xff] %v10321_v51  ;;  %v10341_v31 = vadd.f32 %v14285_v25, %v14284_v56  ;;  %v14288_v51 = vld [vmem:[#allocation81_spill] sm:$0xff]  ;;  %v14302_v56 = vld [vmem:[#allocation179_spill] sm:$0xff] }
 0x50d   : > { %14274 = vst [vmem:[#allocation151_spill] sm:$0xff] %v10325_v26  ;;  %v10345_v14 = vadd.f32 %v14288_v51, %v14287_v45  ;;  %v14291_v26 = vld [vmem:[#allocation143_spill] sm:$0xff] }
 0x50e   : > { %14277 = vst [vmem:[#allocation124_spill] sm:$0xff] %v10329_v18  ;;  %v10349_v44 = vadd.f32 %v14291_v26, %v14290_v61  ;;  %v14294_v18 = vld [vmem:[#allocation157_spill] sm:$0xff]  ;;  %v14305_v45 = vld [vmem:[#allocation139_spill] sm:$0xff]  ;;  %v14308_v61 = vld [vmem:[#allocation132_spill] sm:$0xff] }
 0x50f   : > { %14280 = vst [vmem:[#allocation123_spill] sm:$0xff] %v10333_v49  ;;  %v10353_v1 = vadd.f32 %v14294_v18, %v14293_v6  ;;  %v14297_v49 = vld [vmem:[#allocation53_spill] sm:$0xff] }
 0x510   : > { %14283 = vst [vmem:[#allocation146_spill] sm:$0xff] %v10337_v57  ;;  %v10357_v9 = vadd.f32 %v14297_v49, %v14296_v8  ;;  %v14300_v57 = vld [vmem:[#allocation173_spill] sm:$0xff]  ;;  %v14314_v8 = vld [vmem:[#allocation200_spill] sm:$0xff] }
 0x511   : > { %14286 = vst [vmem:[#allocation156_spill] sm:$0xff] %v10341_v31  ;;  %v10361_v25 = vadd.f32 %v14300_v57, %v14299_v11  ;;  %v14303_v31 = vld [vmem:[#allocation136_spill] sm:$0xff]  ;;  %v14311_v6 = vld [vmem:[#allocation153_spill] sm:$0xff] }
 0x512   : > { %14289 = vst [vmem:[#allocation119_spill] sm:$0xff] %v10345_v14  ;;  %v10365_v51 = vadd.f32 %v14303_v31, %v14302_v56  ;;  %v14306_v14 = vld [vmem:[#allocation16_spill] sm:$0xff] }
 0x513   : > { %14292 = vst [vmem:[#allocation135_spill] sm:$0xff] %v10349_v44  ;;  %v10369_v26 = vadd.f32 %v14306_v14, %v14305_v45  ;;  %v14309_v44 = vld [vmem:[#allocation115_spill] sm:$0xff]  ;;  %v14317_v11 = vld [vmem:[#allocation120_spill] sm:$0xff]  ;;  %v14323_v45 = vld [vmem:[#allocation125_spill] sm:$0xff] }
 0x514   : > { %14295 = vst [vmem:[#allocation160_spill] sm:$0xff] %v10353_v1  ;;  %v10373_v18 = vadd.f32 %v14309_v44, %v14308_v61  ;;  %v14312_v1 = vld [vmem:[#allocation197_spill] sm:$0xff]  ;;  %v14320_v56 = vld [vmem:[#allocation108_spill] sm:$0xff] }
 0x515   : > { %14298 = vst [vmem:[#allocation88_spill] sm:$0xff] %v10357_v9  ;;  %v10377_v49 = vadd.f32 %v14312_v1, %v14311_v6  ;;  %v14315_v9 = vld [vmem:[#allocation209_spill] sm:$0xff] }
 0x516   : > { %14301 = vst [vmem:[#allocation99_spill] sm:$0xff] %v10361_v25  ;;  %v10381_v57 = vadd.f32 %v14315_v9, %v14314_v8  ;;  %v14318_v25 = vld [vmem:[#allocation191_spill] sm:$0xff]  ;;  %v14326_v61 = vld [vmem:[#allocation77_spill] sm:$0xff] }
 0x517   : > { %14304 = vst [vmem:[#allocation98_spill] sm:$0xff] %v10365_v51  ;;  %v10385_v31 = vadd.f32 %v14318_v25, %v14317_v11  ;;  %v14321_v51 = vld [vmem:[#allocation61_spill] sm:$0xff]  ;;  %v14332_v8 = vld [vmem:[#allocation147_spill] sm:$0xff]  ;;  %v14335_v11 = vld [vmem:[#allocation100_spill] sm:$0xff] }
 0x518   : > { %14307 = vst [vmem:[#allocation187_spill] sm:$0xff] %v10369_v26  ;;  %v10389_v14 = vadd.f32 %v14321_v51, %v14320_v56  ;;  %v14324_v26 = vld [vmem:[#allocation166_spill] sm:$0xff]  ;;  %v14329_v6 = vld [vmem:[#allocation85_spill] sm:$0xff] }
 0x519   : > { %14310 = vst [vmem:[#allocation184_spill] sm:$0xff] %v10373_v18  ;;  %v10393_v44 = vadd.f32 %v14324_v26, %v14323_v45  ;;  %v14327_v18 = vld [vmem:[#allocation73_spill] sm:$0xff] }
 0x51a   : > { %14313 = vst [vmem:[#allocation193_spill] sm:$0xff] %v10377_v49  ;;  %v10397_v1 = vadd.f32 %v14327_v18, %v14326_v61  ;;  %v14330_v49 = vld [vmem:[#allocation24_spill] sm:$0xff]  ;;  %v14338_v56 = vld [vmem:[#allocation49_spill] sm:$0xff]  ;;  %v14344_v61 = vld [vmem:[#allocation94_spill] sm:$0xff] }
 0x51b   : > { %14316 = vst [vmem:[#allocation113_spill] sm:$0xff] %v10381_v57  ;;  %v10401_v9 = vadd.f32 %v14330_v49, %v14329_v6  ;;  %v14333_v57 = vld [vmem:[#allocation31_spill] sm:$0xff]  ;;  %v14341_v45 = vld [vmem:[#allocation169_spill] sm:$0xff] }
 0x51c   : > { %14319 = vst [vmem:[#allocation178_spill] sm:$0xff] %v10385_v31  ;;  %v10405_v25 = vadd.f32 %v14333_v57, %v14332_v8  ;;  %v14336_v31 = vld [vmem:[#allocation116_spill] sm:$0xff]  ;;  %v14347_v6 = vld [vmem:[#allocation69_spill] sm:$0xff] }
 0x51d   : > { %14322 = vst [vmem:[#allocation172_spill] sm:$0xff] %v10389_v14  ;;  %v10409_v51 = vadd.f32 %v14336_v31, %v14335_v11  ;;  %v14339_v14 = vld [vmem:[#allocation45_spill] sm:$0xff]  ;;  %v14350_v8 = vld [vmem:[#allocation20_spill] sm:$0xff]  ;;  %v14353_v11 = vld [vmem:[#allocation27_spill] sm:$0xff] }
 0x51e   : > { %14325 = vst [vmem:[#allocation68_spill] sm:$0xff] %v10393_v44  ;;  %v10413_v26 = vadd.f32 %v14339_v14, %v14338_v56  ;;  %v14342_v44 = vld [vmem:[#allocation82_spill] sm:$0xff]  ;;  %v14356_v56 = vld [vmem:[#allocation35_spill] sm:$0xff] }
 0x51f   : > { %14328 = vst [vmem:[#allocation44_spill] sm:$0xff] %v10397_v1  ;;  %v10417_v18 = vadd.f32 %v14342_v44, %v14341_v45  ;;  %v14345_v1 = vld [vmem:[#allocation174_spill] sm:$0xff]  ;;  %v14359_v45 = vld [vmem:[#allocation41_spill] sm:$0xff] }
 0x520   : > { %14331 = vst [vmem:[#allocation48_spill] sm:$0xff] %v10401_v9  ;;  %v10421_v49 = vadd.f32 %v14345_v1, %v14344_v61  ;;  %v14348_v9 = vld [vmem:[#allocation54_spill] sm:$0xff]  ;;  %v14362_v61 = vld [vmem:[#allocation109_spill] sm:$0xff] }
 0x521   : > { %14334 = vst [vmem:[#allocation80_spill] sm:$0xff] %v10405_v25  ;;  %v10425_v57 = vadd.f32 %v14348_v9, %v14347_v6  ;;  %v14351_v25 = vld [vmem:[#allocation129_spill] sm:$0xff]  ;;  %v10445_v9 = vadd.f32 %v9956_v54, %v14362_v61  ;;  %v14378_v61 = vld [vmem:[#allocation162_spill] sm:$0xff] }
 0x522   : > { %14337 = vst [vmem:[#allocation168_spill] sm:$0xff] %v10409_v51  ;;  %v10429_v31 = vadd.f32 %v14351_v25, %v14350_v8  ;;  %v14354_v51 = vld [vmem:[#allocation137_spill] sm:$0xff]  ;;  %v14367_v8 = vld [vmem:[#allocation188_spill] sm:$0xff] }
 0x523   : > { %14340 = vst [vmem:[#allocation30_spill] sm:$0xff] %v10413_v26  ;;  %v10433_v14 = vadd.f32 %v14354_v51, %v14353_v11  ;;  %v14357_v26 = vld [vmem:[#allocation90_spill] sm:$0xff]  ;;  %v14364_v6 = vld [vmem:[#allocation121_spill] sm:$0xff] }
 0x524   : > { %14343 = vst [vmem:[#allocation93_spill] sm:$0xff] %v10417_v18  ;;  %v10437_v44 = vadd.f32 %v14357_v26, %v14356_v56  ;;  %v14360_v18 = vld [vmem:[#allocation104_spill] sm:$0xff]  ;;  %v14370_v11 = vld [vmem:[#allocation13_spill] sm:$0xff]  ;;  %v14373_v56 = vld [vmem:[#allocation67_spill] sm:$0xff] }
 0x525   : > { %14346 = vst [vmem:[#allocation165_spill] sm:$0xff] %v10421_v49  ;;  %v10441_v1 = vadd.f32 %v14360_v18, %v14359_v45  ;;  %v10461_v18 = vadd.f32 %v9972_v22, %v14373_v56  ;;  %v14375_v45 = vld [vmem:[#allocation194_spill] sm:$0xff]  ;;  %v14389_v56 = vld [vmem:[#allocation133_spill] sm:$0xff]  ;;  %v2792_v49 = vld [vmem:[%s3971_s14 + $0x12f] sm:$0x1] }
 0x526   : > { %14349 = vst [vmem:[#allocation40_spill] sm:$0xff] %v10425_v57  ;;  %v14365_v57 = vld [vmem:[#allocation117_spill] sm:$0xff] }
 0x527   : > { %14352 = vst [vmem:[#allocation128_spill] sm:$0xff] %v10429_v31  ;;  %v10449_v25 = vadd.f32 %v14365_v57, %v14364_v6  ;;  %v14368_v31 = vld [vmem:[#allocation144_spill] sm:$0xff]  ;;  %v14381_v6 = vld [vmem:[#allocation101_spill] sm:$0xff] }
 0x528   : > { %14355 = vst [vmem:[#allocation19_spill] sm:$0xff] %v10433_v14  ;;  %v10453_v51 = vadd.f32 %v14368_v31, %v14367_v8  ;;  %v14371_v14 = vld [vmem:[#allocation192_spill] sm:$0xff]  ;;  %v14384_v8 = vld [vmem:[#allocation201_spill] sm:$0xff] }
 0x529   : > { %14358 = vst [vmem:[#allocation23_spill] sm:$0xff] %v10437_v44  ;;  %v10457_v26 = vadd.f32 %v14371_v14, %v14370_v11  ;;  %v10477_v14 = vadd.f32 %v9987_v46, %v14384_v8  ;;  %v14386_v11 = vld [vmem:[#allocation140_spill] sm:$0xff]  ;;  %v14400_v8 = vld [vmem:[#allocation50_spill] sm:$0xff] }
 0x52a   : > { %14361 = vst [vmem:[#allocation26_spill] sm:$0xff] %v10441_v1  ;;  %v14376_v1 = vld [vmem:[#allocation185_spill] sm:$0xff]  ;;  %v2791_v44 = vld [vmem:[%s3971_s14 + $0x127] sm:$0x1] }
 0x52b   : > { %14363 = vst [vmem:[#allocation60_spill] sm:$0xff] %v10445_v9  ;;  %v10465_v54 = vadd.f32 %v14376_v1, %v14375_v45  ;;  %v14379_v9 = vld [vmem:[#allocation167_spill] sm:$0xff]  ;;  %v14392_v45 = vld [vmem:[#allocation182_spill] sm:$0xff] }
 0x52c   : > { %14366 = vst [vmem:[#allocation66_spill] sm:$0xff] %v10449_v25  ;;  %v10469_v57 = vadd.f32 %v14379_v9, %v14378_v61  ;;  %v14382_v25 = vld [vmem:[#allocation62_spill] sm:$0xff]  ;;  %v14395_v61 = vld [vmem:[#allocation148_spill] sm:$0xff] }
 0x52d   : > { %14369 = vst [vmem:[#allocation103_spill] sm:$0xff] %v10453_v51  ;;  %v10473_v31 = vadd.f32 %v14382_v25, %v14381_v6  ;;  %v10493_v25 = vadd.f32 %v10002_v53, %v14395_v61  ;;  %v14397_v6 = vld [vmem:[#allocation57_spill] sm:$0xff]  ;;  %v14411_v61 = vld [vmem:[#allocation95_spill] sm:$0xff] }
 0x52e   : > { %14372 = vst [vmem:[#allocation12_spill] sm:$0xff] %v10457_v26  ;;  %v14387_v26 = vld [vmem:[#allocation158_spill] sm:$0xff]  ;;  %v2790_v51 = vld [vmem:[%s3971_s14 + $0x11f] sm:$0x1] }
 0x52f   : > { %14374 = vst [vmem:[#allocation39_spill] sm:$0xff] %v10461_v18  ;;  %v10481_v22 = vadd.f32 %v14387_v26, %v14386_v11  ;;  %v14390_v18 = vld [vmem:[#allocation198_spill] sm:$0xff] }
 0x530   : > { %14377 = vst [vmem:[#allocation210_spill] sm:$0xff] %v10465_v54  ;;  %v10485_v1 = vadd.f32 %v14390_v18, %v14389_v56  ;;  %v14393_v54 = vld [vmem:[#allocation17_spill] sm:$0xff]  ;;  %v14403_v11 = vld [vmem:[#allocation154_spill] sm:$0xff] }
 0x531   : > { %14380 = vst [vmem:[#allocation89_spill] sm:$0xff] %v10469_v57  ;;  %v10489_v9 = vadd.f32 %v14393_v54, %v14392_v45  ;;  %v14406_v56 = vld [vmem:[#allocation78_spill] sm:$0xff]  ;;  %v2789_v57 = vld [vmem:[%s3971_s14 + $0x117] sm:$0x1] }
 0x532   : > { %14383 = vst [vmem:[#allocation56_spill] sm:$0xff] %v10473_v31  ;;  %v14398_v31 = vld [vmem:[#allocation25_spill] sm:$0xff]  ;;  %v10509_v54 = vadd.f32 %v10017_v47, %v14406_v56  ;;  %v14408_v45 = vld [vmem:[#allocation86_spill] sm:$0xff]  ;;  %v14422_v56 = vld [vmem:[#allocation36_spill] sm:$0xff] }
 0x533   : > { %14385 = vst [vmem:[#allocation114_spill] sm:$0xff] %v10477_v14  ;;  %v10497_v46 = vadd.f32 %v14398_v31, %v14397_v6  ;;  %v14401_v14 = vld [vmem:[#allocation175_spill] sm:$0xff]  ;;  %v14414_v6 = vld [vmem:[#allocation126_spill] sm:$0xff] }
 0x534   : > { %14388 = vst [vmem:[#allocation76_spill] sm:$0xff] %v10481_v22  ;;  %v10501_v26 = vadd.f32 %v14401_v14, %v14400_v8  ;;  %v14404_v22 = vld [vmem:[#allocation46_spill] sm:$0xff] }
 0x535   : > { %14391 = vst [vmem:[#allocation72_spill] sm:$0xff] %v10485_v1  ;;  %v10505_v18 = vadd.f32 %v14404_v22, %v14403_v11  ;;  %v14417_v8 = vld [vmem:[#allocation110_spill] sm:$0xff]  ;;  %v2788_v1 = vld [vmem:[%s3971_s14 + $0x10f] sm:$0x1] }
 0x536   : > { %14394 = vst [vmem:[#allocation206_spill] sm:$0xff] %v10489_v9  ;;  %v14409_v9 = vld [vmem:[#allocation32_spill] sm:$0xff]  ;;  %v10525_v22 = vadd.f32 %v10032_v4, %v14417_v8  ;;  %v14419_v11 = vld [vmem:[#allocation122_spill] sm:$0xff] }
 0x537   : > { %14396 = vst [vmem:[#allocation81_spill] sm:$0xff] %v10493_v25  ;;  %v10513_v53 = vadd.f32 %v14409_v9, %v14408_v45  ;;  %v14412_v25 = vld [vmem:[#allocation74_spill] sm:$0xff]  ;;  %v14423_v9 = vld [vmem:[#allocation91_spill] sm:$0xff]  ;;  %v14431_v8 = vld [vmem:[#allocation28_spill] sm:$0xff] }
 0x538   : > { %14399 = vst [vmem:[#allocation34_spill] sm:$0xff] %v10497_v46  ;;  %v10517_v31 = vadd.f32 %v14412_v25, %v14411_v61  ;;  %v14415_v46 = vld [vmem:[#allocation63_spill] sm:$0xff]  ;;  %v10533_v45 = vadd.f32 %v14423_v9, %v14422_v56  ;;  %v14425_v25 = vld [vmem:[#allocation42_spill] sm:$0xff] }
 0x539   : > { %14402 = vst [vmem:[#allocation143_spill] sm:$0xff] %v10501_v26  ;;  %v10521_v14 = vadd.f32 %v14415_v46, %v14414_v6  ;;  %v14426_v61 = vld [vmem:[#allocation130_spill] sm:$0xff]  ;;  %v14428_v46 = vld [vmem:[#allocation21_spill] sm:$0xff]  ;;  %v14429_v6 = vld [vmem:[#allocation176_spill] sm:$0xff] }
 0x53a   : > { %14405 = vst [vmem:[#allocation84_spill] sm:$0xff] %v10505_v18  ;;  %v14420_v18 = vld [vmem:[#allocation105_spill] sm:$0xff]  ;;  %v10541_v4 = vadd.f32 %v14429_v6, %v14428_v46  ;;  %v14437_v56 = vld [vmem:[#allocation70_spill] sm:$0xff] }
 0x53b   : > { %14407 = vst [vmem:[#allocation157_spill] sm:$0xff] %v10509_v54  ;;  %v10529_v47 = vadd.f32 %v14420_v18, %v14419_v11  ;;  %v14434_v18 = vld [vmem:[#allocation202_spill] sm:$0xff]  ;;  %v14435_v11 = vld [vmem:[#allocation145_spill] sm:$0xff] }
 0x53c   : > { %14410 = vst [vmem:[#allocation161_spill] sm:$0xff] %v10513_v53  ;;  %v14438_v9 = vld [vmem:[#allocation186_spill] sm:$0xff]  ;;  %v14440_v53 = vld [vmem:[#allocation163_spill] sm:$0xff]  ;;  %v14445_v6 = vld [vmem:[#allocation189_spill] sm:$0xff] }
 0x53d   : > { %14413 = vst [vmem:[#allocation53_spill] sm:$0xff] %v10517_v31  ;;  %v10537_v31 = vadd.f32 %v14426_v61, %v14425_v25  ;;  %v10557_v25 = vadd.f32 %v10062_v24, %v14440_v53  ;;  %v14442_v61 = vld [vmem:[#allocation170_spill] sm:$0xff]  ;;  %v14453_v24 = vld [vmem:[#allocation195_spill] sm:$0xff]  ;;  %v2786_v54 = vld [vmem:[%s3971_s14 + $0xff] sm:$0x1] }
 0x53e   : > { %14416 = vst [vmem:[#allocation181_spill] sm:$0xff] %v10521_v14  ;;  %v10577_v53 = vadd.f32 %v10080_v36, %v14453_v24  ;;  %v14462_v24 = vld [vmem:[#allocation141_spill] sm:$0xff]  ;;  %v2787_v26 = vld [vmem:[%s3971_s14 + $0x107] sm:$0x1] }
 0x53f   : > { %14418 = vst [vmem:[#allocation173_spill] sm:$0xff] %v10525_v22  ;;  %v14432_v22 = vld [vmem:[#allocation159_spill] sm:$0xff] }
 0x540   : > { %14421 = vst [vmem:[#allocation179_spill] sm:$0xff] %v10529_v47  ;;  %v10545_v14 = vadd.f32 %v14432_v22, %v14431_v8  ;;  %v10549_v47 = vadd.f32 %v14435_v11, %v14434_v18  ;;  %v14446_v22 = vld [vmem:[#allocation106_spill] sm:$0xff]  ;;  %v14448_v18 = vld [vmem:[#allocation207_spill] sm:$0xff] }
 0x541   : > { %14424 = vst [vmem:[#allocation136_spill] sm:$0xff] %v10533_v45  ;;  %v10553_v45 = vadd.f32 %v14438_v9, %v14437_v56  ;;  %v10565_v8 = vadd.f32 %v14446_v22, %v14445_v6  ;;  %v14449_v11 = vld [vmem:[#allocation199_spill] sm:$0xff]  ;;  %v14451_v56 = vld [vmem:[#allocation149_spill] sm:$0xff]  ;;  %v14458_v6 = vld [vmem:[#allocation18_spill] sm:$0xff] }
 0x542   : > { %14427 = vst [vmem:[#allocation139_spill] sm:$0xff] %v10537_v31  ;;  %v14443_v31 = vld [vmem:[#allocation64_spill] sm:$0xff]  ;;  %v10573_v9 = vadd.f32 %v10077_v35, %v14451_v56  ;;  %v2758_v35 = vld [vmem:[%s3971_s14 + $0x1f] sm:$0x1] }
 0x543   : > { %14430 = vst [vmem:[#allocation16_spill] sm:$0xff] %v10541_v4  ;;  %v10561_v46 = vadd.f32 %v14443_v31, %v14442_v61  ;;  %v14455_v31 = vld [vmem:[#allocation111_spill] sm:$0xff]  ;;  %v14460_v56 = vld [vmem:[#allocation96_spill] sm:$0xff] }
 0x544   : > { %14433 = vst [vmem:[#allocation132_spill] sm:$0xff] %v10545_v14  ;;  %v10581_v61 = vadd.f32 %v10083_v43, %v14455_v31  ;;  %v10593_v36 = vadd.f32 %v10092_v48, %v14460_v56  ;;  %v10597_v43 = vadd.f32 %v10095_v58, %v14462_v24  ;;  %v14464_v31 = vld [vmem:[#allocation134_spill] sm:$0xff]  ;;  %v2784_v14 = vld [vmem:[%s3971_s14 + $0xef] sm:$0x1]  ;;  %v2785_v4 = vld [vmem:[%s3971_s14 + $0xf7] sm:$0x1] }
 0x545   : > { %14436 = vst [vmem:[#allocation115_spill] sm:$0xff] %v10549_v47  ;;  %v10569_v47 = vadd.f32 %v14449_v11, %v14448_v18  ;;  %v2756_v18 = vld [vmem:[%s3971_s14 + $0xf] sm:$0x1]  ;;  %v2757_v11 = vld [vmem:[%s3971_s14 + $0x17] sm:$0x1]  ;;  %v14470_v58 = vld [vmem:[#allocation58_spill] sm:$0xff] }
 0x546   : > { %14439 = vst [vmem:[#allocation153_spill] sm:$0xff] %v10553_v45  ;;  %v10616_v56 = vadd.f32 %v10107_v39, %v14470_v58  ;;  %v14478_v58 = vld [vmem:[#allocation87_spill] sm:$0xff]  ;;  %v2783_v45 = vld [vmem:[%s3971_s14 + $0xe7] sm:$0x1] }
 0x547   : > { %14441 = vst [vmem:[#allocation197_spill] sm:$0xff] %v10557_v25  ;;  %v2782_v25 = vld [vmem:[%s3971_s14 + $0xdf] sm:$0x1] }
 0x548   : > { %14444 = vst [vmem:[#allocation200_spill] sm:$0xff] %v10561_v46  ;;  %v14457_v46 = vld [vmem:[#allocation14_spill] sm:$0xff] }
 0x549   : > { %14447 = vst [vmem:[#allocation209_spill] sm:$0xff] %v10565_v8  ;;  %v10585_v22 = vadd.f32 %v14458_v6, %v14457_v46  ;;  %v2755_v8 = vld [vmem:[%s3971_s14 + $0x7] sm:$0x1]  ;;  %v10601_v46 = vadd.f32 %v10098_v30, %v14464_v31  ;;  %v14466_v6 = vld [vmem:[#allocation155_spill] sm:$0xff] }
 0x54a   : > { %14450 = vst [vmem:[#allocation120_spill] sm:$0xff] %v10569_v47  ;;  %v14468_v47 = vld [vmem:[#allocation37_spill] sm:$0xff]  ;;  %v14472_v30 = vld [vmem:[#allocation51_spill] sm:$0xff] }
 0x54b   : > { %14452 = vst [vmem:[#allocation191_spill] sm:$0xff] %v10573_v9  ;;  %v2761_v9 = vld [vmem:[%s3971_s14 + $0x37] sm:$0x1]  ;;  %v10612_v48 = vadd.f32 %v10104_v29, %v14468_v47  ;;  %v10620_v24 = vadd.f32 %v10110_v3, %v14472_v30  ;;  %v2766_v29 = vld [vmem:[%s3971_s14 + $0x5f] sm:$0x1]  ;;  %v14476_v47 = vld [vmem:[#allocation203_spill] sm:$0xff]  ;;  %v10637_v3 = vadd.f32 %v10119_v38, %v14478_v58 }
 0x54c   : > { %14454 = vst [vmem:[#allocation108_spill] sm:$0xff] %v10577_v53  ;;  %v2760_v53 = vld [vmem:[%s3971_s14 + $0x2f] sm:$0x1]  ;;  %v10633_v39 = vadd.f32 %v10116_v34, %v14476_v47  ;;  %v2769_v47 = vld [vmem:[%s3971_s14 + $0x77] sm:$0x1] }
 0x54d   : > { %14456 = vst [vmem:[#allocation61_spill] sm:$0xff] %v10581_v61  ;;  %v2759_v61 = vld [vmem:[%s3971_s14 + $0x27] sm:$0x1]  ;;  %v2768_v34 = vld [vmem:[%s3971_s14 + $0x6f] sm:$0x1] }
 0x54e   : > { %14459 = vst [vmem:[#allocation125_spill] sm:$0xff] %v10585_v22  ;;  %v10605_v22 = vadd.f32 %v10101_v32, %v14466_v6  ;;  %v14474_v32 = vld [vmem:[#allocation183_spill] sm:$0xff]  ;;  %v2762_v6 = vld [vmem:[%s3971_s14 + $0x3f] sm:$0x1] }
 0x54f   : > { %14461 = vst [vmem:[#allocation166_spill] sm:$0xff] %v10593_v36  ;;  %v10624_v31 = vadd.f32 %v10113_v42, %v14474_v32  ;;  %v14480_v42 = vld [vmem:[#allocation79_spill] sm:$0xff]  ;;  %v14482_v32 = vld [vmem:[#allocation102_spill] sm:$0xff]  ;;  %v2781_v36 = vld [vmem:[%s3971_s14 + $0xd7] sm:$0x1] }
 0x550   : > { %14463 = vst [vmem:[#allocation77_spill] sm:$0xff] %v10597_v43  ;;  %v2765_v43 = vld [vmem:[%s3971_s14 + $0x57] sm:$0x1]  ;;  %v10641_v30 = vadd.f32 %v10122_v27, %v14480_v42  ;;  %v14486_v58 = vld [vmem:[#allocation171_spill] sm:$0xff] }
 0x551   : > { %14465 = vst [vmem:[#allocation73_spill] sm:$0xff] %v10601_v46  ;;  %v2764_v46 = vld [vmem:[%s3971_s14 + $0x4f] sm:$0x1]  ;;  %v10658_v27 = vadd.f32 %v10131_v10, %v14486_v58  ;;  %v14488_v42 = vld [vmem:[#allocation112_spill] sm:$0xff] }
 0x552   : > { %14467 = vst [vmem:[#allocation85_spill] sm:$0xff] %v10605_v22  ;;  %v2763_v22 = vld [vmem:[%s3971_s14 + $0x47] sm:$0x1]  ;;  %v2776_v10 = vld [vmem:[%s3971_s14 + $0xaf] sm:$0x1] }
 0x553   : > { %14469 = vst [vmem:[#allocation24_spill] sm:$0xff] %v10612_v48  ;;  %v2775_v48 = vld [vmem:[%s3971_s14 + $0xa7] sm:$0x1]  ;;  %v2777_v58 = vld [vmem:[%s3971_s14 + $0xb7] sm:$0x1] }
 0x554   : > { %14471 = vst [vmem:[#allocation147_spill] sm:$0xff] %v10616_v56  ;;  %v14484_v56 = vld [vmem:[#allocation150_spill] sm:$0xff] }
 0x555   : > { %14473 = vst [vmem:[#allocation31_spill] sm:$0xff] %v10620_v24  ;;  %v2767_v24 = vld [vmem:[%s3971_s14 + $0x67] sm:$0x1]  ;;  %v10654_v38 = vadd.f32 %v10128_v33, %v14484_v56  ;;  %v2772_v33 = vld [vmem:[%s3971_s14 + $0x8f] sm:$0x1] }
 0x556   : > { %14475 = vst [vmem:[#allocation100_spill] sm:$0xff] %v10624_v31  ;;  %v10645_v31 = vadd.f32 %v10125_v19, %v14482_v32  ;;  %v10662_v19 = vadd.f32 %v10134_v60, %v14488_v42  ;;  %v14490_v32 = vld [vmem:[#allocation127_spill] sm:$0xff]  ;;  %v2773_v56 = vld [vmem:[%s3971_s14 + $0x97] sm:$0x1]  ;;  %v2778_v60 = vld [vmem:[%s3971_s14 + $0xbf] sm:$0x1] }
 0x557   : > { %14477 = vst [vmem:[#allocation116_spill] sm:$0xff] %v10633_v39  ;;  %v10650_v39 = vld [vmem:[#allocation5 + $0x7] ss:$0 sm:$0xff] }
 0x558   : > { %14479 = vst [vmem:[#allocation49_spill] sm:$0xff] %v10637_v3  ;;  %v2771_v3 = vld [vmem:[%s3971_s14 + $0x87] sm:$0x1]  ;;  %v10678_v42 = vmul.f32 %v10650_v39, %v2755_v8  ;;  %v10694_v8 = vmul.f32 %v10650_v39, %v2759_v61  ;;  %v10710_v61 = vmul.f32 %v10650_v39, %v2763_v22  ;;  %v10726_v22 = vmul.f32 %v10650_v39, %v2767_v24 }
 0x559   : > { %14481 = vst [vmem:[#allocation45_spill] sm:$0xff] %v10641_v30  ;;  %v2770_v30 = vld [vmem:[%s3971_s14 + $0x7f] sm:$0x1]  ;;  %v10742_v24 = vmul.f32 %v10650_v39, %v2771_v3  ;;  %v10758_v3 = vmul.f32 %v10650_v39, %v2775_v48 }
 0x55a   : > { %14483 = vst [vmem:[#allocation169_spill] sm:$0xff] %v10645_v31  ;;  %v10666_v31 = vadd.f32 %v10137_v37, %v14490_v32  ;;  %v10681_v37 = vmul.f32 %v10650_v39, %v2756_v18  ;;  %v10684_v32 = vmul.f32 %v10650_v39, %v2757_v11  ;;  %v10697_v18 = vmul.f32 %v10650_v39, %v2760_v53 }
 0x55b   : > { %14485 = vst [vmem:[#allocation82_spill] sm:$0xff] %v10654_v38  ;;  %v2774_v38 = vld [vmem:[%s3971_s14 + $0x9f] sm:$0x1]  ;;  %v10700_v11 = vmul.f32 %v10650_v39, %v2761_v9  ;;  %v10713_v53 = vmul.f32 %v10650_v39, %v2764_v46  ;;  %v10716_v9 = vmul.f32 %v10650_v39, %v2765_v43  ;;  %v10729_v46 = vmul.f32 %v10650_v39, %v2768_v34 }
 0x55c   : > { %14487 = vst [vmem:[#allocation94_spill] sm:$0xff] %v10658_v27  ;;  %v2780_v27 = vld [vmem:[%s3971_s14 + $0xcf] sm:$0x1]  ;;  %v10732_v43 = vmul.f32 %v10650_v39, %v2769_v47  ;;  %v10745_v34 = vmul.f32 %v10650_v39, %v2772_v33  ;;  %v10748_v47 = vmul.f32 %v10650_v39, %v2773_v56  ;;  %v10761_v33 = vmul.f32 %v10650_v39, %v2776_v10 }
 0x55d   : > { %14489 = vst [vmem:[#allocation174_spill] sm:$0xff] %v10662_v19  ;;  %v2779_v19 = vld [vmem:[%s3971_s14 + $0xc7] sm:$0x1]  ;;  %v10764_v56 = vmul.f32 %v10650_v39, %v2777_v58  ;;  %v10777_v10 = vmul.f32 %v10650_v39, %v2780_v27  ;;  %v10780_v58 = vmul.f32 %v10650_v39, %v2781_v36  ;;  %v10793_v27 = vmul.f32 %v10650_v39, %v2784_v14 }
 0x55e   : > { %14491 = vst [vmem:[#allocation69_spill] sm:$0xff] %v10666_v31  ;;  %v10687_v31 = vmul.f32 %v10650_v39, %v2758_v35  ;;  %v10703_v35 = vmul.f32 %v10650_v39, %v2762_v6  ;;  %v10719_v6 = vmul.f32 %v10650_v39, %v2766_v29  ;;  %v10735_v29 = vmul.f32 %v10650_v39, %v2770_v30 }
 0x55f   : > { %14493 = vst [vmem:[#allocation20_spill] sm:$0xff] %v10742_v24  ;;  %v10751_v30 = vmul.f32 %v10650_v39, %v2774_v38  ;;  %v10767_v38 = vmul.f32 %v10650_v39, %v2778_v60  ;;  %v2802_v24 = vld [vmem:[%s3971_s14 + $0x17f] sm:$0x1]  ;;  %v10774_v48 = vmul.f32 %v10650_v39, %v2779_v19  ;;  %v10783_v60 = vmul.f32 %v10650_v39, %v2782_v25 }
 0x560   : > { %14492 = vst [vmem:[#allocation54_spill] sm:$0xff] %v10735_v29  ;;  %v2798_v29 = vld [vmem:[%s3971_s14 + $0x15f] sm:$0x1]  ;;  %v10790_v19 = vmul.f32 %v10650_v39, %v2783_v45  ;;  %v10796_v36 = vmul.f32 %v10650_v39, %v2785_v4  ;;  %v10799_v25 = vmul.f32 %v10650_v39, %v2786_v54  ;;  %v10806_v45 = vmul.f32 %v10650_v39, %v2787_v26 }
 0x561   : > { %14494 = vst [vmem:[#allocation129_spill] sm:$0xff] %v10745_v34  ;;  %v2801_v34 = vld [vmem:[%s3971_s14 + $0x177] sm:$0x1]  ;;  %v10809_v14 = vmul.f32 %v10650_v39, %v2788_v1  ;;  %v10812_v4 = vmul.f32 %v10650_v39, %v2789_v57  ;;  %v10815_v54 = vmul.f32 %v10650_v39, %v2790_v51  ;;  %v10822_v26 = vmul.f32 %v10650_v39, %v2791_v44 }
 0x562   : > { %14495 = vst [vmem:[#allocation27_spill] sm:$0xff] %v10748_v47  ;;  %v2800_v47 = vld [vmem:[%s3971_s14 + $0x16f] sm:$0x1]  ;;  %v10825_v1 = vmul.f32 %v10650_v39, %v2792_v49  ;;  %v10828_v57 = vmul.f32 %v10650_v39, %v2793_v52  ;;  %v10831_v51 = vmul.f32 %v10650_v39, %v2794_v23  ;;  %v10838_v44 = vmul.f32 %v10650_v39, %v2795_v15 }
 0x563   : > { %14496 = vst [vmem:[#allocation137_spill] sm:$0xff] %v10751_v30  ;;  %v2799_v30 = vld [vmem:[%s3971_s14 + $0x167] sm:$0x1]  ;;  %v10841_v49 = vmul.f32 %v10650_v39, %v2796_v0  ;;  %v10844_v52 = vmul.f32 %v10650_v39, %v2797_v59  ;;  %v10847_v23 = vmul.f32 %v10650_v39, %v2798_v29  ;;  %v10857_v0 = vmul.f32 %v10650_v39, %v2800_v47 }
 0x564   : > { %14497 = vst [vmem:[#allocation35_spill] sm:$0xff] %v10758_v3  ;;  %v2806_v3 = vld [vmem:[%s3971_s14 + $0x19f] sm:$0x1]  ;;  %v10854_v15 = vmul.f32 %v10650_v39, %v2799_v30  ;;  %v10860_v59 = vmul.f32 %v10650_v39, %v2801_v34  ;;  %v10863_v29 = vmul.f32 %v10650_v39, %v2802_v24 }
 0x565   : > { %14498 = vst [vmem:[#allocation90_spill] sm:$0xff] %v10761_v33  ;;  %v2805_v33 = vld [vmem:[%s3971_s14 + $0x197] sm:$0x1]  ;;  %v10879_v24 = vmul.f32 %v10650_v39, %v2806_v3 }
 0x566   : > { %14499 = vst [vmem:[#allocation41_spill] sm:$0xff] %v10764_v56  ;;  %v2804_v56 = vld [vmem:[%s3971_s14 + $0x18f] sm:$0x1]  ;;  %v10876_v34 = vmul.f32 %v10650_v39, %v2805_v33 }
 0x567   : > { %14500 = vst [vmem:[#allocation104_spill] sm:$0xff] %v10767_v38  ;;  %v2803_v38 = vld [vmem:[%s3971_s14 + $0x187] sm:$0x1]  ;;  %v10873_v47 = vmul.f32 %v10650_v39, %v2804_v56 }
 0x568   : > { %14501 = vst [vmem:[#allocation109_spill] sm:$0xff] %v10774_v48  ;;  %v2810_v48 = vld [vmem:[%s3971_s14 + $0x1bf] sm:$0x1]  ;;  %v10870_v30 = vmul.f32 %v10650_v39, %v2803_v38 }
 0x569   : > { %14502 = vst [vmem:[#allocation121_spill] sm:$0xff] %v10777_v10  ;;  %v2809_v10 = vld [vmem:[%s3971_s14 + $0x1b7] sm:$0x1]  ;;  %v10895_v3 = vmul.f32 %v10650_v39, %v2810_v48 }
 0x56a   : > { %14503 = vst [vmem:[#allocation117_spill] sm:$0xff] %v10780_v58  ;;  %v2808_v58 = vld [vmem:[%s3971_s14 + $0x1af] sm:$0x1]  ;;  %v10892_v33 = vmul.f32 %v10650_v39, %v2809_v10 }
 0x56b   : > { %14504 = vst [vmem:[#allocation188_spill] sm:$0xff] %v10783_v60  ;;  %v2807_v60 = vld [vmem:[%s3971_s14 + $0x1a7] sm:$0x1]  ;;  %v10889_v56 = vmul.f32 %v10650_v39, %v2808_v58 }
 0x56c   : > { %14505 = vst [vmem:[#allocation144_spill] sm:$0xff] %v10790_v19  ;;  %v2814_v19 = vld [vmem:[%s3971_s14 + $0x1df] sm:$0x1]  ;;  %v10886_v38 = vmul.f32 %v10650_v39, %v2807_v60 }
 0x56d   : > { %14506 = vst [vmem:[#allocation13_spill] sm:$0xff] %v10793_v27  ;;  %v2813_v27 = vld [vmem:[%s3971_s14 + $0x1d7] sm:$0x1]  ;;  %v10911_v48 = vmul.f32 %v10650_v39, %v2814_v19 }
 0x56e   : > { %14507 = vst [vmem:[#allocation192_spill] sm:$0xff] %v10796_v36  ;;  %v2812_v36 = vld [vmem:[%s3971_s14 + $0x1cf] sm:$0x1]  ;;  %v10908_v10 = vmul.f32 %v10650_v39, %v2813_v27 }
 0x56f   : > { %14508 = vst [vmem:[#allocation67_spill] sm:$0xff] %v10799_v25  ;;  %v2811_v25 = vld [vmem:[%s3971_s14 + $0x1c7] sm:$0x1]  ;;  %v10905_v58 = vmul.f32 %v10650_v39, %v2812_v36 }
 0x570   : > { %14509 = vst [vmem:[#allocation194_spill] sm:$0xff] %v10806_v45  ;;  %v2818_v45 = vld [vmem:[%s3971_s14 + $0x1ff] sm:$0x1]  ;;  %v10902_v60 = vmul.f32 %v10650_v39, %v2811_v25 }
 0x571   : > { %14510 = vst [vmem:[#allocation185_spill] sm:$0xff] %v10809_v14  ;;  %v2817_v14 = vld [vmem:[%s3971_s14 + $0x1f7] sm:$0x1]  ;;  %v10927_v19 = vmul.f32 %v10650_v39, %v2818_v45 }
 0x572   : > { %14511 = vst [vmem:[#allocation162_spill] sm:$0xff] %v10812_v4  ;;  %v2816_v4 = vld [vmem:[%s3971_s14 + $0x1ef] sm:$0x1]  ;;  %v10924_v27 = vmul.f32 %v10650_v39, %v2817_v14 }
 0x573   : > { %14512 = vst [vmem:[#allocation167_spill] sm:$0xff] %v10815_v54  ;;  %v2815_v54 = vld [vmem:[%s3971_s14 + $0x1e7] sm:$0x1]  ;;  %v10921_v36 = vmul.f32 %v10650_v39, %v2816_v4 }
 0x574   : > { %14513 = vst [vmem:[#allocation101_spill] sm:$0xff] %v10822_v26  ;;  %v2822_v26 = vld [vmem:[%s3971_s14 + $0x21f] sm:$0x1]  ;;  %v10918_v25 = vmul.f32 %v10650_v39, %v2815_v54 }
 0x575   : > { %14514 = vst [vmem:[#allocation62_spill] sm:$0xff] %v10825_v1  ;;  %v2821_v1 = vld [vmem:[%s3971_s14 + $0x217] sm:$0x1]  ;;  %v10943_v45 = vmul.f32 %v10650_v39, %v2822_v26 }
 0x576   : > { %14515 = vst [vmem:[#allocation201_spill] sm:$0xff] %v10828_v57  ;;  %v2820_v57 = vld [vmem:[%s3971_s14 + $0x20f] sm:$0x1]  ;;  %v10940_v14 = vmul.f32 %v10650_v39, %v2821_v1 }
 0x577   : > { %14516 = vst [vmem:[#allocation140_spill] sm:$0xff] %v10831_v51  ;;  %v2819_v51 = vld [vmem:[%s3971_s14 + $0x207] sm:$0x1]  ;;  %v10937_v4 = vmul.f32 %v10650_v39, %v2820_v57 }
 0x578   : > { %14517 = vst [vmem:[#allocation158_spill] sm:$0xff] %v10838_v44  ;;  %v2826_v44 = vld [vmem:[%s3971_s14 + $0x23f] sm:$0x1]  ;;  %v10934_v54 = vmul.f32 %v10650_v39, %v2819_v51 }
 0x579   : > { %14518 = vst [vmem:[#allocation133_spill] sm:$0xff] %v10841_v49  ;;  %v2825_v49 = vld [vmem:[%s3971_s14 + $0x237] sm:$0x1]  ;;  %v10959_v26 = vmul.f32 %v10650_v39, %v2826_v44 }
 0x57a   : > { %14519 = vst [vmem:[#allocation198_spill] sm:$0xff] %v10844_v52  ;;  %v2824_v52 = vld [vmem:[%s3971_s14 + $0x22f] sm:$0x1]  ;;  %v10956_v1 = vmul.f32 %v10650_v39, %v2825_v49 }
 0x57b   : > { %14520 = vst [vmem:[#allocation182_spill] sm:$0xff] %v10847_v23  ;;  %v2823_v23 = vld [vmem:[%s3971_s14 + $0x227] sm:$0x1]  ;;  %v10953_v57 = vmul.f32 %v10650_v39, %v2824_v52 }
 0x57c   : > { %14521 = vst [vmem:[#allocation17_spill] sm:$0xff] %v10854_v15  ;;  %v2830_v15 = vld [vmem:[%s3971_s14 + $0x25f] sm:$0x1]  ;;  %v10950_v51 = vmul.f32 %v10650_v39, %v2823_v23 }
 0x57d   : > { %14522 = vst [vmem:[#allocation148_spill] sm:$0xff] %v10857_v0  ;;  %v2829_v0 = vld [vmem:[%s3971_s14 + $0x257] sm:$0x1]  ;;  %v10975_v44 = vmul.f32 %v10650_v39, %v2830_v15  ;;  %v2855_v15 = vld [vmem:[%s3971_s14 + $0x327] sm:$0x1] }
 0x57e   : > { %14523 = vst [vmem:[#allocation57_spill] sm:$0xff] %v10860_v59  ;;  %v2828_v59 = vld [vmem:[%s3971_s14 + $0x24f] sm:$0x1]  ;;  %v10972_v49 = vmul.f32 %v10650_v39, %v2829_v0 }
 0x57f   : > { %14524 = vst [vmem:[#allocation25_spill] sm:$0xff] %v10863_v29  ;;  %v2827_v29 = vld [vmem:[%s3971_s14 + $0x247] sm:$0x1]  ;;  %v10969_v52 = vmul.f32 %v10650_v39, %v2828_v59 }
 0x580   : > { %14525 = vst [vmem:[#allocation50_spill] sm:$0xff] %v10870_v30  ;;  %v2834_v30 = vld [vmem:[%s3971_s14 + $0x27f] sm:$0x1]  ;;  %v10966_v23 = vmul.f32 %v10650_v39, %v2827_v29 }
 0x581   : > { %14526 = vst [vmem:[#allocation175_spill] sm:$0xff] %v10873_v47  ;;  %v2833_v47 = vld [vmem:[%s3971_s14 + $0x277] sm:$0x1]  ;;  %v10991_v0 = vmul.f32 %v10650_v39, %v2834_v30 }
 0x582   : > { %14527 = vst [vmem:[#allocation154_spill] sm:$0xff] %v10876_v34  ;;  %v2832_v34 = vld [vmem:[%s3971_s14 + $0x26f] sm:$0x1]  ;;  %v10988_v59 = vmul.f32 %v10650_v39, %v2833_v47  ;;  %v2859_v47 = vld [vmem:[%s3971_s14 + $0x347] sm:$0x1] }
 0x583   : > { %14528 = vst [vmem:[#allocation46_spill] sm:$0xff] %v10879_v24  ;;  %v2831_v24 = vld [vmem:[%s3971_s14 + $0x267] sm:$0x1]  ;;  %v10985_v29 = vmul.f32 %v10650_v39, %v2832_v34 }
 0x584   : > { %14529 = vst [vmem:[#allocation78_spill] sm:$0xff] %v10886_v38  ;;  %v2838_v38 = vld [vmem:[%s3971_s14 + $0x29f] sm:$0x1]  ;;  %v10982_v63 = vmul.f32 %v10650_v39, %v2831_v24 }
 0x585   : > { %14530 = vst [vmem:[#allocation86_spill] sm:$0xff] %v10889_v56  ;;  %v2837_v56 = vld [vmem:[%s3971_s14 + $0x297] sm:$0x1]  ;;  %v11007_v30 = vmul.f32 %v10650_v39, %v2838_v38  ;;  %v2862_v38 = vld [vmem:[%s3971_s14 + $0x35f] sm:$0x1] }
 0x586   : > { %14531 = vst [vmem:[#allocation32_spill] sm:$0xff] %v10892_v33  ;;  %v2836_v33 = vld [vmem:[%s3971_s14 + $0x28f] sm:$0x1]  ;;  %v11004_v34 = vmul.f32 %v10650_v39, %v2837_v56 }
 0x587   : > { %14532 = vst [vmem:[#allocation95_spill] sm:$0xff] %v10895_v3  ;;  %v2835_v3 = vld [vmem:[%s3971_s14 + $0x287] sm:$0x1]  ;;  %v11001_v24 = vmul.f32 %v10650_v39, %v2836_v33 }
 0x588   : > { %14533 = vst [vmem:[#allocation74_spill] sm:$0xff] %v10902_v60  ;;  %v2842_v60 = vld [vmem:[%s3971_s14 + $0x2bf] sm:$0x1] }
 0x589   : > { %14534 = vst [vmem:[#allocation126_spill] sm:$0xff] %v10905_v58  ;;  %v2841_v58 = vld [vmem:[%s3971_s14 + $0x2b7] sm:$0x1]  ;;  %v11022_v56 = vmul.f32 %v10650_v39, %v2842_v60 }
 0x58a   : > { %14535 = vst [vmem:[#allocation63_spill] sm:$0xff] %v10908_v10  ;;  %v2840_v10 = vld [vmem:[%s3971_s14 + $0x2af] sm:$0x1]  ;;  %v11019_v33 = vmul.f32 %v10650_v39, %v2841_v58  ;;  %v2865_v60 = vld [vmem:[%s3971_s14 + $0x377] sm:$0x1] }
 0x58b   : > { %14536 = vst [vmem:[#allocation110_spill] sm:$0xff] %v10911_v48  ;;  %v2839_v48 = vld [vmem:[%s3971_s14 + $0x2a7] sm:$0x1] }
 0x58c   : > { %14537 = vst [vmem:[#allocation122_spill] sm:$0xff] %v10918_v25  ;;  %v2846_v25 = vld [vmem:[%s3971_s14 + $0x2df] sm:$0x1] }
 0x58d   : > { %14538 = vst [vmem:[#allocation105_spill] sm:$0xff] %v10921_v36  ;;  %v2845_v36 = vld [vmem:[%s3971_s14 + $0x2d7] sm:$0x1]  ;;  %v11037_v58 = vmul.f32 %v10650_v39, %v2846_v25  ;;  %v2868_v25 = vld [vmem:[%s3971_s14 + $0x38f] sm:$0x1] }
 0x58e   : > { %14539 = vst [vmem:[#allocation36_spill] sm:$0xff] %v10924_v27  ;;  %v2844_v27 = vld [vmem:[%s3971_s14 + $0x2cf] sm:$0x1] }
 0x58f   : > { %14540 = vst [vmem:[#allocation91_spill] sm:$0xff] %v10927_v19  ;;  %v2843_v19 = vld [vmem:[%s3971_s14 + $0x2c7] sm:$0x1] }
 0x590   : > { %14541 = vst [vmem:[#allocation42_spill] sm:$0xff] %v10934_v54  ;;  %v2850_v54 = vld [vmem:[%s3971_s14 + $0x2ff] sm:$0x1] }
 0x591   : > { %14542 = vst [vmem:[#allocation130_spill] sm:$0xff] %v10937_v4  ;;  %v2849_v4 = vld [vmem:[%s3971_s14 + $0x2f7] sm:$0x1] }
 0x592   : > { %14543 = vst [vmem:[#allocation21_spill] sm:$0xff] %v10940_v14  ;;  %v2848_v14 = vld [vmem:[%s3971_s14 + $0x2ef] sm:$0x1] }
 0x593   : > { %14544 = vst [vmem:[#allocation176_spill] sm:$0xff] %v10943_v45  ;;  %v2847_v45 = vld [vmem:[%s3971_s14 + $0x2e7] sm:$0x1] }
 0x594   : > { %14545 = vst [vmem:[#allocation28_spill] sm:$0xff] %v10950_v51  ;;  %v2854_v51 = vld [vmem:[%s3971_s14 + $0x31f] sm:$0x1] }
 0x595   : > { %14546 = vst [vmem:[#allocation159_spill] sm:$0xff] %v10953_v57  ;;  %v2853_v57 = vld [vmem:[%s3971_s14 + $0x317] sm:$0x1] }
 0x596   : > { %14547 = vst [vmem:[#allocation202_spill] sm:$0xff] %v10956_v1  ;;  %v2852_v1 = vld [vmem:[%s3971_s14 + $0x30f] sm:$0x1] }
 0x597   : > { %14548 = vst [vmem:[#allocation145_spill] sm:$0xff] %v10959_v26  ;;  %v2851_v26 = vld [vmem:[%s3971_s14 + $0x307] sm:$0x1] }
 0x598   : > { %14549 = vst [vmem:[#allocation70_spill] sm:$0xff] %v10966_v23  ;;  %v10998_v23 = vmul.f32 %v10650_v39, %v2835_v3  ;;  %v11016_v3 = vmul.f32 %v10650_v39, %v2840_v10  ;;  %v11034_v10 = vmul.f32 %v10650_v39, %v2845_v36  ;;  %v11052_v36 = vmul.f32 %v10650_v39, %v2850_v54  ;;  %v2871_v54 = vld [vmem:[%s3971_s14 + $0x3a7] sm:$0x1] }
 0x599   : > { %14550 = vst [vmem:[#allocation186_spill] sm:$0xff] %v10969_v52  ;;  %v2858_v52 = vld [vmem:[%s3971_s14 + $0x33f] sm:$0x1] }
 0x59a   : > { %14551 = vst [vmem:[#allocation163_spill] sm:$0xff] %v10972_v49  ;;  %v2857_v49 = vld [vmem:[%s3971_s14 + $0x337] sm:$0x1] }
 0x59b   : > { %14552 = vst [vmem:[#allocation170_spill] sm:$0xff] %v10975_v44  ;;  %v2856_v44 = vld [vmem:[%s3971_s14 + $0x32f] sm:$0x1] }
 0x59c   : > { %14553 = vst [vmem:[#allocation64_spill] sm:$0xff] %v10985_v29  ;;  %v11013_v29 = vmul.f32 %v10650_v39, %v2839_v48  ;;  %v11031_v48 = vmul.f32 %v10650_v39, %v2844_v27  ;;  %v11049_v27 = vmul.f32 %v10650_v39, %v2849_v4  ;;  %v11067_v4 = vmul.f32 %v10650_v39, %v2854_v51  ;;  %v2874_v51 = vld [vmem:[%s3971_s14 + $0x3bf] sm:$0x1] }
 0x59d   : > { %14554 = vst [vmem:[#allocation189_spill] sm:$0xff] %v10988_v59  ;;  %v2861_v59 = vld [vmem:[%s3971_s14 + $0x357] sm:$0x1] }
 0x59e   : > { %14555 = vst [vmem:[#allocation106_spill] sm:$0xff] %v10991_v0  ;;  %v2860_v0 = vld [vmem:[%s3971_s14 + $0x34f] sm:$0x1] }
 0x59f   : > { %14556 = vst [vmem:[#allocation207_spill] sm:$0xff] %v11001_v24  ;;  %v11028_v24 = vmul.f32 %v10650_v39, %v2843_v19  ;;  %v11046_v19 = vmul.f32 %v10650_v39, %v2848_v14  ;;  %v11064_v14 = vmul.f32 %v10650_v39, %v2853_v57  ;;  %v11082_v57 = vmul.f32 %v10650_v39, %v2858_v52  ;;  %v2878_v52 = vld [vmem:[%s3971_s14 + $0x3df] sm:$0x1] }
 0x5a0   : > { %14557 = vst [vmem:[#allocation199_spill] sm:$0xff] %v11004_v34  ;;  %v2864_v34 = vld [vmem:[%s3971_s14 + $0x36f] sm:$0x1] }
 0x5a1   : > { %14558 = vst [vmem:[#allocation149_spill] sm:$0xff] %v11007_v30  ;;  %v2863_v30 = vld [vmem:[%s3971_s14 + $0x367] sm:$0x1] }
 0x5a2   : > { %14559 = vst [vmem:[#allocation195_spill] sm:$0xff] %v11016_v3  ;;  %v11043_v3 = vmul.f32 %v10650_v39, %v2847_v45  ;;  %v11061_v45 = vmul.f32 %v10650_v39, %v2852_v1  ;;  %v11079_v1 = vmul.f32 %v10650_v39, %v2857_v49  ;;  %v11097_v49 = vmul.f32 %v10650_v39, %v2862_v38 }
 0x5a3   : > { %14560 = vst [vmem:[#allocation111_spill] sm:$0xff] %v11019_v33  ;;  %v2867_v33 = vld [vmem:[%s3971_s14 + $0x387] sm:$0x1] }
 0x5a4   : > { %14561 = vst [vmem:[#allocation14_spill] sm:$0xff] %v11022_v56  ;;  %v2866_v56 = vld [vmem:[%s3971_s14 + $0x37f] sm:$0x1]  ;;  %v11118_v38 = vmul.f32 %v10650_v39, %v2867_v33  ;;  %v11139_v33 = vmul.f32 %v10650_v39, %v2874_v51 }
 0x5a5   : > { %14562 = vst [vmem:[#allocation18_spill] sm:$0xff] %v11031_v48  ;;  %v11058_v48 = vmul.f32 %v10650_v39, %v2851_v26  ;;  %v11076_v26 = vmul.f32 %v10650_v39, %v2856_v44  ;;  %v11094_v44 = vmul.f32 %v10650_v39, %v2861_v59  ;;  %v2880_v59 = vld [vmem:[%s3971_s14 + $0x3ef] sm:$0x1] }
 0x5a6   : > { %14563 = vst [vmem:[#allocation96_spill] sm:$0xff] %v11034_v10  ;;  %v2870_v10 = vld [vmem:[%s3971_s14 + $0x39f] sm:$0x1] }
 0x5a7   : > { %14564 = vst [vmem:[#allocation141_spill] sm:$0xff] %v11037_v58  ;;  %v2869_v58 = vld [vmem:[%s3971_s14 + $0x397] sm:$0x1] }
 0x5a8   : > { %14565 = vst [vmem:[#allocation134_spill] sm:$0xff] %v11046_v19  ;;  %v11073_v19 = vmul.f32 %v10650_v39, %v2855_v15  ;;  %v11091_v15 = vmul.f32 %v10650_v39, %v2860_v0  ;;  %v11112_v0 = vmul.f32 %v10650_v39, %v2866_v56 }
 0x5a9   : > { %14566 = vst [vmem:[#allocation155_spill] sm:$0xff] %v11049_v27  ;;  %v2873_v27 = vld [vmem:[%s3971_s14 + $0x3b7] sm:$0x1] }
 0x5aa   : > { %14567 = vst [vmem:[#allocation37_spill] sm:$0xff] %v11052_v36  ;;  %v2872_v36 = vld [vmem:[%s3971_s14 + $0x3af] sm:$0x1] }
 0x5ab   : > { %14568 = vst [vmem:[#allocation58_spill] sm:$0xff] %v11061_v45  ;;  %v11088_v45 = vmul.f32 %v10650_v39, %v2859_v47  ;;  %v11109_v47 = vmul.f32 %v10650_v39, %v2865_v60  ;;  %v11130_v60 = vmul.f32 %v10650_v39, %v2871_v54  ;;  %v11133_v56 = vmul.f32 %v10650_v39, %v2872_v36 }
 0x5ac   : > { %14569 = vst [vmem:[#allocation51_spill] sm:$0xff] %v11064_v14  ;;  %v2876_v14 = vld [vmem:[%s3971_s14 + $0x3cf] sm:$0x1]  ;;  %v11151_v54 = vmul.f32 %v10650_v39, %v2878_v52  ;;  %v11179_v52 = vadd.f32 %v10687_v31, %v10153_v13  ;;  %v11199_v13 = vadd.f32 %v10710_v61, %v10173_v40  ;;  %v11219_v40 = vadd.f32 %v10729_v46, %v10193_v20  ;;  %v14587_v61 = vld [vmem:[#allocation118_spill] sm:$0xff] }
 0x5ad   : > { %14570 = vst [vmem:[#allocation183_spill] sm:$0xff] %v11067_v4  ;;  %v2875_v4 = vld [vmem:[%s3971_s14 + $0x3c7] sm:$0x1]  ;;  %v14579_v31 = vld [vmem:[#allocation11_spill] sm:$0xff] }
 0x5ae   : > { %14571 = vst [vmem:[#allocation203_spill] sm:$0xff] %v11073_v19  ;;  %v11106_v19 = vmul.f32 %v10650_v39, %v2864_v34  ;;  %v11127_v34 = vmul.f32 %v10650_v39, %v2870_v10  ;;  %v14591_v46 = vld [vmem:[#allocation47_spill] sm:$0xff] }
 0x5af   : > { %14572 = vst [vmem:[#allocation87_spill] sm:$0xff] %v11076_v26  ;;  %v11103_v26 = vmul.f32 %v10650_v39, %v2863_v30  ;;  %v11124_v30 = vmul.f32 %v10650_v39, %v2869_v58  ;;  %v11145_v58 = vmul.f32 %v10650_v39, %v2876_v14  ;;  %v11167_v14 = vadd.f32 %v10678_v42, %v10141_v16  ;;  %v14580_v42 = vld [vmem:[#allocation54_spill] sm:$0xff] }
 0x5b0   : > { %14573 = vst [vmem:[#allocation79_spill] sm:$0xff] %v11079_v1  ;;  %v2877_v1 = vld [vmem:[%s3971_s14 + $0x3d7] sm:$0x1]  ;;  %v11187_v16 = vadd.f32 %v10697_v18, %v10161_v17  ;;  %v11207_v17 = vadd.f32 %v10716_v9, %v10181_v62  ;;  %v11227_v62 = vadd.f32 %v14580_v42, %v14579_v31  ;;  %v14584_v18 = vld [vmem:[#allocation129_spill] sm:$0xff]  ;;  %v14589_v9 = vld [vmem:[#allocation22_spill] sm:$0xff] }
 0x5b1   : > { %14574 = vst [vmem:[#allocation102_spill] sm:$0xff] %v11082_v57  ;;  %v2879_v57 = vld [vmem:[%s3971_s14 + $0x3e7] sm:$0x1]  ;;  %v11148_v10 = vmul.f32 %v10650_v39, %v2877_v1  ;;  %v11171_v1 = vadd.f32 %v10681_v37, %v10145_v28  ;;  %v11191_v28 = vadd.f32 %v10700_v11, %v10165_v41  ;;  %v11211_v41 = vadd.f32 %v10719_v6, %v10185_v50  ;;  %v14581_v37 = vld [vmem:[#allocation97_spill] sm:$0xff]  ;;  %v14590_v6 = vld [vmem:[#allocation35_spill] sm:$0xff] }
 0x5b2   : > { %14575 = vst [vmem:[#allocation150_spill] sm:$0xff] %v11091_v15  ;;  %v2882_v15 = vld [vmem:[%s3971_s14 + $0x3ff] sm:$0x1]  ;;  %v11154_v36 = vmul.f32 %v10650_v39, %v2879_v57  ;;  %v11175_v57 = vadd.f32 %v10684_v32, %v10149_v5  ;;  %v11195_v5 = vadd.f32 %v10703_v35, %v10169_v55  ;;  %v11215_v55 = vadd.f32 %v10726_v22, %v10189_v12  ;;  %v14582_v32 = vld [vmem:[#allocation20_spill] sm:$0xff]  ;;  %v14586_v35 = vld [vmem:[#allocation27_spill] sm:$0xff] }
 0x5b3   : > { %14576 = vst [vmem:[#allocation171_spill] sm:$0xff] %v11094_v44  ;;  %v2881_v44 = vld [vmem:[%s3971_s14 + $0x3f7] sm:$0x1]  ;;  %v11231_v50 = vadd.f32 %v14582_v32, %v14581_v37  ;;  %v14585_v11 = vld [vmem:[#allocation29_spill] sm:$0xff]  ;;  %v11247_v22 = vadd.f32 %v14590_v6, %v14589_v9  ;;  %v14606_v9 = vld [vmem:[#allocation59_spill] sm:$0xff] }
 0x5b4   : > { %14577 = vst [vmem:[#allocation112_spill] sm:$0xff] %v11097_v49  ;;  %v11121_v49 = vmul.f32 %v10650_v39, %v2868_v25  ;;  %v11142_v25 = vmul.f32 %v10650_v39, %v2875_v4  ;;  %v11160_v51 = vmul.f32 %v10650_v39, %v2881_v44  ;;  %v11163_v4 = vmul.f32 %v10650_v39, %v2882_v15  ;;  %v14594_v44 = vld [vmem:[#allocation43_spill] sm:$0xff]  ;;  %v14597_v42 = vld [vmem:[#allocation205_spill] sm:$0xff]  ;;  %v14598_v37 = vld [vmem:[#allocation104_spill] sm:$0xff] }
 0x5b5   : > { %14578 = vst [vmem:[#allocation127_spill] sm:$0xff] %v11112_v0  ;;  %v11136_v0 = vmul.f32 %v10650_v39, %v2873_v27  ;;  %v11157_v27 = vmul.f32 %v10650_v39, %v2880_v59  ;;  %v11183_v39 = vadd.f32 %v10694_v8, %v10157_v21  ;;  %v11203_v21 = vadd.f32 %v10713_v53, %v10177_v7  ;;  %v14583_v8 = vld [vmem:[#allocation177_spill] sm:$0xff] }
 0x5b6   : > { %v11223_v7 = vadd.f32 %v10732_v43, %v10197_v2  ;;  %v11235_v12 = vadd.f32 %v14584_v18, %v14583_v8  ;;  %v11239_v20 = vadd.f32 %v14586_v35, %v14585_v11  ;;  %v14588_v53 = vld [vmem:[#allocation137_spill] sm:$0xff]  ;;  %v14592_v43 = vld [vmem:[#allocation90_spill] sm:$0xff]  ;;  %v11259_v32 = vadd.f32 %v14598_v37, %v14597_v42  ;;  %v14615_v37 = vld [vmem:[#allocation75_spill] sm:$0xff] }
 0x5b7   : > { %v11243_v2 = vadd.f32 %v14588_v53, %v14587_v61  ;;  %v11251_v15 = vadd.f32 %v14592_v43, %v14591_v46  ;;  %v14595_v59 = vld [vmem:[#allocation41_spill] sm:$0xff]  ;;  %v14600_v8 = vld [vmem:[#allocation38_spill] sm:$0xff]  ;;  %v14609_v43 = vld [vmem:[#allocation83_spill] sm:$0xff] }
 0x5b8   : > { %v11255_v31 = vadd.f32 %v14595_v59, %v14594_v44  ;;  %14599 = vst [vmem:[#allocation97_spill] sm:$0xff] %v11259_v32  ;;  %v14601_v18 = vld [vmem:[#allocation109_spill] sm:$0xff]  ;;  %v14612_v59 = vld [vmem:[#allocation164_spill] sm:$0xff] }
 0x5b9   : > { %14593 = vst [vmem:[#allocation11_spill] sm:$0xff] %v11251_v15  ;;  %v11263_v11 = vadd.f32 %v14601_v18, %v14600_v8  ;;  %v14603_v35 = vld [vmem:[#allocation33_spill] sm:$0xff]  ;;  %v14610_v15 = vld [vmem:[#allocation188_spill] sm:$0xff]  ;;  %v14618_v18 = vld [vmem:[#allocation71_spill] sm:$0xff] }
 0x5ba   : > { %14596 = vst [vmem:[#allocation54_spill] sm:$0xff] %v11255_v31  ;;  %v14604_v61 = vld [vmem:[#allocation121_spill] sm:$0xff]  ;;  %v11275_v44 = vadd.f32 %v14610_v15, %v14609_v43  ;;  %v14613_v31 = vld [vmem:[#allocation144_spill] sm:$0xff] }
 0x5bb   : > { %14602 = vst [vmem:[#allocation20_spill] sm:$0xff] %v11263_v11  ;;  %v11267_v53 = vadd.f32 %v14604_v61, %v14603_v35  ;;  %v14607_v6 = vld [vmem:[#allocation117_spill] sm:$0xff]  ;;  %v11279_v42 = vadd.f32 %v14613_v31, %v14612_v59  ;;  %v14619_v11 = vld [vmem:[#allocation192_spill] sm:$0xff] }
 0x5bc   : > { %v11271_v46 = vadd.f32 %v14607_v6, %v14606_v9  ;;  %14611 = vst [vmem:[#allocation29_spill] sm:$0xff] %v11275_v44  ;;  %v14616_v32 = vld [vmem:[#allocation13_spill] sm:$0xff]  ;;  %v11287_v35 = vadd.f32 %v14619_v11, %v14618_v18  ;;  %v14621_v61 = vld [vmem:[#allocation180_spill] sm:$0xff]  ;;  %v14624_v6 = vld [vmem:[#allocation190_spill] sm:$0xff] }
 0x5bd   : > { %14605 = vst [vmem:[#allocation177_spill] sm:$0xff] %v11267_v53  ;;  %v11283_v8 = vadd.f32 %v14616_v32, %v14615_v37  ;;  %v14622_v53 = vld [vmem:[#allocation67_spill] sm:$0xff]  ;;  %v14627_v43 = vld [vmem:[#allocation65_spill] sm:$0xff]  ;;  %v14630_v59 = vld [vmem:[#allocation196_spill] sm:$0xff] }
 0x5be   : > { %14608 = vst [vmem:[#allocation129_spill] sm:$0xff] %v11271_v46  ;;  %v11291_v9 = vadd.f32 %v14622_v53, %v14621_v61  ;;  %v14625_v46 = vld [vmem:[#allocation194_spill] sm:$0xff]  ;;  %v14628_v44 = vld [vmem:[#allocation185_spill] sm:$0xff]  ;;  %v14633_v37 = vld [vmem:[#allocation55_spill] sm:$0xff] }
 0x5bf   : > { %14614 = vst [vmem:[#allocation27_spill] sm:$0xff] %v11279_v42  ;;  %v11295_v15 = vadd.f32 %v14625_v46, %v14624_v6  ;;  %v11299_v31 = vadd.f32 %v14628_v44, %v14627_v43  ;;  %v14631_v42 = vld [vmem:[#allocation162_spill] sm:$0xff]  ;;  %v14636_v18 = vld [vmem:[#allocation208_spill] sm:$0xff]  ;;  %v14639_v61 = vld [vmem:[#allocation107_spill] sm:$0xff] }
 0x5c0   : > { %14617 = vst [vmem:[#allocation118_spill] sm:$0xff] %v11283_v8  ;;  %v11303_v32 = vadd.f32 %v14631_v42, %v14630_v59  ;;  %v14634_v8 = vld [vmem:[#allocation167_spill] sm:$0xff]  ;;  %v14642_v6 = vld [vmem:[#allocation204_spill] sm:$0xff]  ;;  %v14648_v59 = vld [vmem:[#allocation142_spill] sm:$0xff] }
 0x5c1   : > { %14620 = vst [vmem:[#allocation137_spill] sm:$0xff] %v11287_v35  ;;  %v11307_v11 = vadd.f32 %v14634_v8, %v14633_v37  ;;  %v14637_v35 = vld [vmem:[#allocation101_spill] sm:$0xff]  ;;  %v14645_v43 = vld [vmem:[#allocation152_spill] sm:$0xff] }
 0x5c2   : > { %14623 = vst [vmem:[#allocation22_spill] sm:$0xff] %v11291_v9  ;;  %v11311_v53 = vadd.f32 %v14637_v35, %v14636_v18  ;;  %v14640_v9 = vld [vmem:[#allocation62_spill] sm:$0xff]  ;;  %v14651_v37 = vld [vmem:[#allocation92_spill] sm:$0xff] }
 0x5c3   : > { %14626 = vst [vmem:[#allocation35_spill] sm:$0xff] %v11295_v15  ;;  %v11315_v46 = vadd.f32 %v14640_v9, %v14639_v61  ;;  %v14643_v15 = vld [vmem:[#allocation201_spill] sm:$0xff]  ;;  %v14654_v18 = vld [vmem:[#allocation52_spill] sm:$0xff]  ;;  %v14657_v61 = vld [vmem:[#allocation138_spill] sm:$0xff] }
 0x5c4   : > { %14629 = vst [vmem:[#allocation47_spill] sm:$0xff] %v11299_v31  ;;  %v11319_v44 = vadd.f32 %v14643_v15, %v14642_v6  ;;  %v14646_v31 = vld [vmem:[#allocation140_spill] sm:$0xff]  ;;  %v14660_v6 = vld [vmem:[#allocation15_spill] sm:$0xff] }
 0x5c5   : > { %14632 = vst [vmem:[#allocation90_spill] sm:$0xff] %v11303_v32  ;;  %v11323_v42 = vadd.f32 %v14646_v31, %v14645_v43  ;;  %v14649_v32 = vld [vmem:[#allocation158_spill] sm:$0xff]  ;;  %v14663_v43 = vld [vmem:[#allocation131_spill] sm:$0xff] }
 0x5c6   : > { %14635 = vst [vmem:[#allocation43_spill] sm:$0xff] %v11307_v11  ;;  %v11327_v8 = vadd.f32 %v14649_v32, %v14648_v59  ;;  %v14652_v11 = vld [vmem:[#allocation133_spill] sm:$0xff]  ;;  %v14666_v59 = vld [vmem:[#allocation151_spill] sm:$0xff] }
 0x5c7   : > { %14638 = vst [vmem:[#allocation41_spill] sm:$0xff] %v11311_v53  ;;  %v11331_v35 = vadd.f32 %v14652_v11, %v14651_v37  ;;  %v14655_v53 = vld [vmem:[#allocation198_spill] sm:$0xff]  ;;  %v14669_v37 = vld [vmem:[#allocation124_spill] sm:$0xff] }
 0x5c8   : > { %14641 = vst [vmem:[#allocation205_spill] sm:$0xff] %v11315_v46  ;;  %v11335_v9 = vadd.f32 %v14655_v53, %v14654_v18  ;;  %v14658_v46 = vld [vmem:[#allocation182_spill] sm:$0xff]  ;;  %v14672_v18 = vld [vmem:[#allocation123_spill] sm:$0xff] }
 0x5c9   : > { %14644 = vst [vmem:[#allocation104_spill] sm:$0xff] %v11319_v44  ;;  %v11339_v15 = vadd.f32 %v14658_v46, %v14657_v61  ;;  %v14661_v44 = vld [vmem:[#allocation17_spill] sm:$0xff]  ;;  %v14675_v61 = vld [vmem:[#allocation146_spill] sm:$0xff] }
 0x5ca   : > { %14647 = vst [vmem:[#allocation38_spill] sm:$0xff] %v11323_v42  ;;  %v11343_v31 = vadd.f32 %v14661_v44, %v14660_v6  ;;  %v14664_v42 = vld [vmem:[#allocation148_spill] sm:$0xff] }
 0x5cb   : > { %14650 = vst [vmem:[#allocation109_spill] sm:$0xff] %v11327_v8  ;;  %v11347_v32 = vadd.f32 %v14664_v42, %v14663_v43  ;;  %v14667_v8 = vld [vmem:[#allocation57_spill] sm:$0xff]  ;;  %v14678_v6 = vld [vmem:[#allocation156_spill] sm:$0xff]  ;;  %v14681_v43 = vld [vmem:[#allocation119_spill] sm:$0xff] }
 0x5cc   : > { %14653 = vst [vmem:[#allocation33_spill] sm:$0xff] %v11331_v35  ;;  %v11351_v11 = vadd.f32 %v14667_v8, %v14666_v59  ;;  %v14670_v35 = vld [vmem:[#allocation25_spill] sm:$0xff]  ;;  %v14684_v59 = vld [vmem:[#allocation135_spill] sm:$0xff] }
 0x5cd   : > { %14656 = vst [vmem:[#allocation121_spill] sm:$0xff] %v11335_v9  ;;  %v11355_v53 = vadd.f32 %v14670_v35, %v14669_v37  ;;  %v14673_v9 = vld [vmem:[#allocation50_spill] sm:$0xff]  ;;  %v14687_v37 = vld [vmem:[#allocation160_spill] sm:$0xff] }
 0x5ce   : > { %14659 = vst [vmem:[#allocation59_spill] sm:$0xff] %v11339_v15  ;;  %v11359_v46 = vadd.f32 %v14673_v9, %v14672_v18  ;;  %v14676_v15 = vld [vmem:[#allocation175_spill] sm:$0xff]  ;;  %v14690_v18 = vld [vmem:[#allocation88_spill] sm:$0xff] }
 0x5cf   : > { %14662 = vst [vmem:[#allocation117_spill] sm:$0xff] %v11343_v31  ;;  %v11363_v44 = vadd.f32 %v14676_v15, %v14675_v61  ;;  %v14679_v31 = vld [vmem:[#allocation154_spill] sm:$0xff]  ;;  %v14693_v61 = vld [vmem:[#allocation99_spill] sm:$0xff] }
 0x5d0   : > { %14665 = vst [vmem:[#allocation83_spill] sm:$0xff] %v11347_v32  ;;  %v11367_v42 = vadd.f32 %v14679_v31, %v14678_v6  ;;  %v14682_v32 = vld [vmem:[#allocation46_spill] sm:$0xff] }
 0x5d1   : > { %14668 = vst [vmem:[#allocation188_spill] sm:$0xff] %v11351_v11  ;;  %v11371_v8 = vadd.f32 %v14682_v32, %v14681_v43  ;;  %v14685_v11 = vld [vmem:[#allocation78_spill] sm:$0xff]  ;;  %v14699_v43 = vld [vmem:[#allocation187_spill] sm:$0xff] }
 0x5d2   : > { %14671 = vst [vmem:[#allocation164_spill] sm:$0xff] %v11355_v53  ;;  %v11375_v35 = vadd.f32 %v14685_v11, %v14684_v59  ;;  %v14688_v53 = vld [vmem:[#allocation86_spill] sm:$0xff]  ;;  %v14702_v59 = vld [vmem:[#allocation184_spill] sm:$0xff] }
 0x5d3   : > { %14674 = vst [vmem:[#allocation144_spill] sm:$0xff] %v11359_v46  ;;  %v11379_v9 = vadd.f32 %v14688_v53, %v14687_v37  ;;  %v14691_v46 = vld [vmem:[#allocation32_spill] sm:$0xff]  ;;  %v14696_v6 = vld [vmem:[#allocation98_spill] sm:$0xff]  ;;  %v14705_v37 = vld [vmem:[#allocation193_spill] sm:$0xff] }
 0x5d4   : > { %14677 = vst [vmem:[#allocation75_spill] sm:$0xff] %v11363_v44  ;;  %v11383_v15 = vadd.f32 %v14691_v46, %v14690_v18  ;;  %v14694_v44 = vld [vmem:[#allocation95_spill] sm:$0xff]  ;;  %v14708_v18 = vld [vmem:[#allocation113_spill] sm:$0xff] }
 0x5d5   : > { %14680 = vst [vmem:[#allocation13_spill] sm:$0xff] %v11367_v42  ;;  %v11387_v31 = vadd.f32 %v14694_v44, %v14693_v61  ;;  %v14697_v42 = vld [vmem:[#allocation74_spill] sm:$0xff] }
 0x5d6   : > { %14683 = vst [vmem:[#allocation71_spill] sm:$0xff] %v11371_v8  ;;  %v11391_v32 = vadd.f32 %v14697_v42, %v14696_v6  ;;  %v14700_v8 = vld [vmem:[#allocation126_spill] sm:$0xff]  ;;  %v14714_v6 = vld [vmem:[#allocation172_spill] sm:$0xff] }
 0x5d7   : > { %14686 = vst [vmem:[#allocation192_spill] sm:$0xff] %v11375_v35  ;;  %v11395_v11 = vadd.f32 %v14700_v8, %v14699_v43  ;;  %v14703_v35 = vld [vmem:[#allocation63_spill] sm:$0xff]  ;;  %v14711_v61 = vld [vmem:[#allocation178_spill] sm:$0xff]  ;;  %v14717_v43 = vld [vmem:[#allocation68_spill] sm:$0xff] }
 0x5d8   : > { %14689 = vst [vmem:[#allocation180_spill] sm:$0xff] %v11379_v9  ;;  %v11399_v53 = vadd.f32 %v14703_v35, %v14702_v59  ;;  %v14706_v9 = vld [vmem:[#allocation110_spill] sm:$0xff]  ;;  %v14720_v59 = vld [vmem:[#allocation44_spill] sm:$0xff] }
 0x5d9   : > { %14692 = vst [vmem:[#allocation67_spill] sm:$0xff] %v11383_v15  ;;  %v11403_v46 = vadd.f32 %v14706_v9, %v14705_v37  ;;  %v14709_v15 = vld [vmem:[#allocation122_spill] sm:$0xff]  ;;  %v14723_v37 = vld [vmem:[#allocation48_spill] sm:$0xff] }
 0x5da   : > { %14695 = vst [vmem:[#allocation190_spill] sm:$0xff] %v11387_v31  ;;  %v11407_v44 = vadd.f32 %v14709_v15, %v14708_v18  ;;  %v14712_v31 = vld [vmem:[#allocation105_spill] sm:$0xff]  ;;  %v14726_v18 = vld [vmem:[#allocation80_spill] sm:$0xff] }
 0x5db   : > { %14698 = vst [vmem:[#allocation194_spill] sm:$0xff] %v11391_v32  ;;  %v11411_v42 = vadd.f32 %v14712_v31, %v14711_v61  ;;  %v14715_v32 = vld [vmem:[#allocation36_spill] sm:$0xff] }
 0x5dc   : > { %14701 = vst [vmem:[#allocation65_spill] sm:$0xff] %v11395_v11  ;;  %v11415_v8 = vadd.f32 %v14715_v32, %v14714_v6  ;;  %v14718_v11 = vld [vmem:[#allocation91_spill] sm:$0xff]  ;;  %v14729_v61 = vld [vmem:[#allocation168_spill] sm:$0xff]  ;;  %v14732_v6 = vld [vmem:[#allocation30_spill] sm:$0xff] }
 0x5dd   : > { %14704 = vst [vmem:[#allocation185_spill] sm:$0xff] %v11399_v53  ;;  %v11419_v35 = vadd.f32 %v14718_v11, %v14717_v43  ;;  %v14721_v53 = vld [vmem:[#allocation42_spill] sm:$0xff]  ;;  %v14735_v43 = vld [vmem:[#allocation93_spill] sm:$0xff] }
 0x5de   : > { %14707 = vst [vmem:[#allocation196_spill] sm:$0xff] %v11403_v46  ;;  %v11423_v9 = vadd.f32 %v14721_v53, %v14720_v59  ;;  %v14724_v46 = vld [vmem:[#allocation130_spill] sm:$0xff]  ;;  %v14738_v59 = vld [vmem:[#allocation165_spill] sm:$0xff] }
 0x5df   : > { %14710 = vst [vmem:[#allocation162_spill] sm:$0xff] %v11407_v44  ;;  %v11427_v15 = vadd.f32 %v14724_v46, %v14723_v37  ;;  %v14727_v44 = vld [vmem:[#allocation21_spill] sm:$0xff]  ;;  %v14740_v37 = vld [vmem:[#allocation40_spill] sm:$0xff] }
 0x5e0   : > { %14713 = vst [vmem:[#allocation55_spill] sm:$0xff] %v11411_v42  ;;  %v11431_v31 = vadd.f32 %v14727_v44, %v14726_v18  ;;  %v14730_v42 = vld [vmem:[#allocation176_spill] sm:$0xff] }
 0x5e1   : > { %14716 = vst [vmem:[#allocation167_spill] sm:$0xff] %v11415_v8  ;;  %v11435_v32 = vadd.f32 %v14730_v42, %v14729_v61  ;;  %v14733_v8 = vld [vmem:[#allocation28_spill] sm:$0xff]  ;;  %v14746_v61 = vld [vmem:[#allocation19_spill] sm:$0xff] }
 0x5e2   : > { %14719 = vst [vmem:[#allocation208_spill] sm:$0xff] %v11419_v35  ;;  %v11439_v11 = vadd.f32 %v14733_v8, %v14732_v6  ;;  %v14736_v35 = vld [vmem:[#allocation159_spill] sm:$0xff]  ;;  %v14743_v18 = vld [vmem:[#allocation128_spill] sm:$0xff] }
 0x5e3   : > { %14722 = vst [vmem:[#allocation101_spill] sm:$0xff] %v11423_v9  ;;  %v11443_v53 = vadd.f32 %v14736_v35, %v14735_v43  ;;  %v14739_v9 = vld [vmem:[#allocation202_spill] sm:$0xff]  ;;  %v14749_v6 = vld [vmem:[#allocation23_spill] sm:$0xff] }
 0x5e4   : > { %14725 = vst [vmem:[#allocation107_spill] sm:$0xff] %v11427_v15  ;;  %v11447_v46 = vadd.f32 %v14739_v9, %v14738_v59  ;;  %v14741_v15 = vld [vmem:[#allocation145_spill] sm:$0xff]  ;;  %v14751_v43 = vld [vmem:[#allocation26_spill] sm:$0xff]  ;;  %v14754_v59 = vld [vmem:[#allocation60_spill] sm:$0xff] }
 0x5e5   : > { %14728 = vst [vmem:[#allocation62_spill] sm:$0xff] %v11431_v31  ;;  %v11451_v44 = vadd.f32 %v14741_v15, %v14740_v37  ;;  %v14744_v31 = vld [vmem:[#allocation70_spill] sm:$0xff]  ;;  %v11471_v15 = vadd.f32 %v10982_v63, %v14754_v59  ;;  %v14769_v59 = vld [vmem:[#allocation89_spill] sm:$0xff] }
 0x5e6   : > { %14731 = vst [vmem:[#allocation204_spill] sm:$0xff] %v11435_v32  ;;  %v11455_v42 = vadd.f32 %v14744_v31, %v14743_v18  ;;  %v14747_v32 = vld [vmem:[#allocation186_spill] sm:$0xff]  ;;  %v14759_v18 = vld [vmem:[#allocation103_spill] sm:$0xff] }
 0x5e7   : > { %14734 = vst [vmem:[#allocation201_spill] sm:$0xff] %v11439_v11  ;;  %v11459_v8 = vadd.f32 %v14747_v32, %v14746_v61  ;;  %v14750_v11 = vld [vmem:[#allocation163_spill] sm:$0xff]  ;;  %v14756_v37 = vld [vmem:[#allocation66_spill] sm:$0xff]  ;;  %v14761_v61 = vld [vmem:[#allocation12_spill] sm:$0xff] }
 0x5e8   : > { %14737 = vst [vmem:[#allocation152_spill] sm:$0xff] %v11443_v53  ;;  %v11463_v35 = vadd.f32 %v14750_v11, %v14749_v6  ;;  %v14752_v53 = vld [vmem:[#allocation170_spill] sm:$0xff]  ;;  %v14764_v6 = vld [vmem:[#allocation39_spill] sm:$0xff] }
 0x5e9   : > { %14742 = vst [vmem:[#allocation140_spill] sm:$0xff] %v11451_v44  ;;  %v11467_v9 = vadd.f32 %v14752_v53, %v14751_v43  ;;  %v14757_v44 = vld [vmem:[#allocation64_spill] sm:$0xff]  ;;  %v11487_v53 = vadd.f32 %v10998_v23, %v14764_v6  ;;  %v14766_v43 = vld [vmem:[#allocation210_spill] sm:$0xff] }
 0x5ea   : > { %14745 = vst [vmem:[#allocation142_spill] sm:$0xff] %v11455_v42  ;;  %v11475_v31 = vadd.f32 %v14757_v44, %v14756_v37  ;;  %v14760_v42 = vld [vmem:[#allocation189_spill] sm:$0xff]  ;;  %v14771_v37 = vld [vmem:[#allocation56_spill] sm:$0xff] }
 0x5eb   : > { %14748 = vst [vmem:[#allocation158_spill] sm:$0xff] %v11459_v8  ;;  %v11479_v32 = vadd.f32 %v14760_v42, %v14759_v18  ;;  %v14762_v8 = vld [vmem:[#allocation106_spill] sm:$0xff]  ;;  %v14779_v6 = vld [vmem:[#allocation72_spill] sm:$0xff] }
 0x5ec   : > { %14753 = vst [vmem:[#allocation92_spill] sm:$0xff] %v11467_v9  ;;  %v11483_v11 = vadd.f32 %v14762_v8, %v14761_v61  ;;  %v14767_v9 = vld [vmem:[#allocation207_spill] sm:$0xff]  ;;  %v14774_v18 = vld [vmem:[#allocation114_spill] sm:$0xff]  ;;  %v14776_v61 = vld [vmem:[#allocation76_spill] sm:$0xff] }
 0x5ed   : > { %14755 = vst [vmem:[#allocation133_spill] sm:$0xff] %v11471_v15  ;;  %v11491_v63 = vadd.f32 %v14767_v9, %v14766_v43  ;;  %v14770_v15 = vld [vmem:[#allocation199_spill] sm:$0xff]  ;;  %v11503_v8 = vadd.f32 %v11013_v29, %v14774_v18  ;;  %v14781_v43 = vld [vmem:[#allocation206_spill] sm:$0xff] }
 0x5ee   : > { %14758 = vst [vmem:[#allocation52_spill] sm:$0xff] %v11475_v31  ;;  %v11495_v44 = vadd.f32 %v14770_v15, %v14769_v59  ;;  %v14772_v31 = vld [vmem:[#allocation149_spill] sm:$0xff]  ;;  %v14789_v18 = vld [vmem:[#allocation143_spill] sm:$0xff] }
 0x5ef   : > { %14763 = vst [vmem:[#allocation198_spill] sm:$0xff] %v11483_v11  ;;  %v11499_v42 = vadd.f32 %v14772_v31, %v14771_v37  ;;  %v14777_v11 = vld [vmem:[#allocation195_spill] sm:$0xff]  ;;  %v14784_v59 = vld [vmem:[#allocation81_spill] sm:$0xff]  ;;  %v14786_v37 = vld [vmem:[#allocation34_spill] sm:$0xff] }
 0x5f0   : > { %14765 = vst [vmem:[#allocation138_spill] sm:$0xff] %v11487_v53  ;;  %v11507_v23 = vadd.f32 %v14777_v11, %v14776_v61  ;;  %v14780_v53 = vld [vmem:[#allocation111_spill] sm:$0xff]  ;;  %v11519_v31 = vadd.f32 %v11028_v24, %v14784_v59  ;;  %v14791_v61 = vld [vmem:[#allocation84_spill] sm:$0xff]  ;;  %v14799_v59 = vld [vmem:[#allocation53_spill] sm:$0xff] }
 0x5f1   : > { %14768 = vst [vmem:[#allocation182_spill] sm:$0xff] %v11491_v63  ;;  %v11511_v9 = vadd.f32 %v14780_v53, %v14779_v6  ;;  %v14782_v63 = vld [vmem:[#allocation14_spill] sm:$0xff]  ;;  %v14794_v6 = vld [vmem:[#allocation157_spill] sm:$0xff] }
 0x5f2   : > { %14773 = vst [vmem:[#allocation15_spill] sm:$0xff] %v11499_v42  ;;  %v11515_v15 = vadd.f32 %v14782_v63, %v14781_v43  ;;  %v14787_v42 = vld [vmem:[#allocation18_spill] sm:$0xff]  ;;  %v11535_v63 = vadd.f32 %v11043_v3, %v14794_v6  ;;  %v14796_v43 = vld [vmem:[#allocation161_spill] sm:$0xff]  ;;  %v14810_v6 = vld [vmem:[#allocation136_spill] sm:$0xff] }
 0x5f3   : > { %14775 = vst [vmem:[#allocation17_spill] sm:$0xff] %v11503_v8  ;;  %v11523_v29 = vadd.f32 %v14787_v42, %v14786_v37  ;;  %v14790_v8 = vld [vmem:[#allocation96_spill] sm:$0xff]  ;;  %v14802_v37 = vld [vmem:[#allocation181_spill] sm:$0xff] }
 0x5f4   : > { %14778 = vst [vmem:[#allocation131_spill] sm:$0xff] %v11507_v23  ;;  %v11527_v11 = vadd.f32 %v14790_v8, %v14789_v18  ;;  %v14792_v23 = vld [vmem:[#allocation141_spill] sm:$0xff] }
 0x5f5   : > { %14783 = vst [vmem:[#allocation148_spill] sm:$0xff] %v11515_v15  ;;  %v11531_v53 = vadd.f32 %v14792_v23, %v14791_v61  ;;  %v14797_v15 = vld [vmem:[#allocation134_spill] sm:$0xff]  ;;  %v14805_v18 = vld [vmem:[#allocation173_spill] sm:$0xff]  ;;  %v14807_v61 = vld [vmem:[#allocation179_spill] sm:$0xff] }
 0x5f6   : > { %14785 = vst [vmem:[#allocation151_spill] sm:$0xff] %v11519_v31  ;;  %v11539_v24 = vadd.f32 %v14797_v15, %v14796_v43  ;;  %v14800_v31 = vld [vmem:[#allocation155_spill] sm:$0xff]  ;;  %v11551_v23 = vadd.f32 %v11058_v48, %v14805_v18 }
 0x5f7   : > { %14788 = vst [vmem:[#allocation57_spill] sm:$0xff] %v11523_v29  ;;  %v11543_v42 = vadd.f32 %v14800_v31, %v14799_v59  ;;  %v14803_v29 = vld [vmem:[#allocation37_spill] sm:$0xff]  ;;  %v14812_v43 = vld [vmem:[#allocation139_spill] sm:$0xff]  ;;  %v14815_v59 = vld [vmem:[#allocation16_spill] sm:$0xff] }
 0x5f8   : > { %14793 = vst [vmem:[#allocation124_spill] sm:$0xff] %v11531_v53  ;;  %v11547_v8 = vadd.f32 %v14803_v29, %v14802_v37  ;;  %v14808_v53 = vld [vmem:[#allocation58_spill] sm:$0xff]  ;;  %v14818_v37 = vld [vmem:[#allocation132_spill] sm:$0xff]  ;;  %v14821_v18 = vld [vmem:[#allocation115_spill] sm:$0xff] }
 0x5f9   : > { %14795 = vst [vmem:[#allocation25_spill] sm:$0xff] %v11535_v63  ;;  %v11555_v3 = vadd.f32 %v14808_v53, %v14807_v61  ;;  %v14811_v63 = vld [vmem:[#allocation51_spill] sm:$0xff]  ;;  %v14823_v61 = vld [vmem:[#allocation153_spill] sm:$0xff] }
 0x5fa   : > { %14798 = vst [vmem:[#allocation123_spill] sm:$0xff] %v11539_v24  ;;  %v11559_v15 = vadd.f32 %v14811_v63, %v14810_v6  ;;  %v14813_v24 = vld [vmem:[#allocation183_spill] sm:$0xff]  ;;  %v14825_v6 = vld [vmem:[#allocation197_spill] sm:$0xff] }
 0x5fb   : > { %14801 = vst [vmem:[#allocation50_spill] sm:$0xff] %v11543_v42  ;;  %v11563_v31 = vadd.f32 %v14813_v24, %v14812_v43  ;;  %v14816_v42 = vld [vmem:[#allocation203_spill] sm:$0xff]  ;;  %v11583_v24 = vadd.f32 %v11088_v45, %v14825_v6  ;;  %v14827_v43 = vld [vmem:[#allocation200_spill] sm:$0xff]  ;;  %v14835_v6 = vld [vmem:[#allocation61_spill] sm:$0xff] }
 0x5fc   : > { %14804 = vst [vmem:[#allocation146_spill] sm:$0xff] %v11547_v8  ;;  %v11567_v29 = vadd.f32 %v14816_v42, %v14815_v59  ;;  %v14819_v8 = vld [vmem:[#allocation87_spill] sm:$0xff]  ;;  %v14829_v59 = vld [vmem:[#allocation209_spill] sm:$0xff] }
 0x5fd   : > { %14806 = vst [vmem:[#allocation175_spill] sm:$0xff] %v11551_v23  ;;  %v11571_v48 = vadd.f32 %v14819_v8, %v14818_v37  ;;  %v14822_v23 = vld [vmem:[#allocation79_spill] sm:$0xff]  ;;  %v14831_v37 = vld [vmem:[#allocation120_spill] sm:$0xff] }
 0x5fe   : > { %14809 = vst [vmem:[#allocation156_spill] sm:$0xff] %v11555_v3  ;;  %v11575_v53 = vadd.f32 %v14822_v23, %v14821_v18  ;;  %v14824_v3 = vld [vmem:[#allocation102_spill] sm:$0xff]  ;;  %v14833_v18 = vld [vmem:[#allocation191_spill] sm:$0xff] }
 0x5ff   : > { %14814 = vst [vmem:[#allocation154_spill] sm:$0xff] %v11563_v31  ;;  %v11579_v63 = vadd.f32 %v14824_v3, %v14823_v61  ;;  %v14828_v31 = vld [vmem:[#allocation150_spill] sm:$0xff]  ;;  %v11599_v3 = vadd.f32 %v11103_v26, %v14833_v18  ;;  %v14834_v61 = vld [vmem:[#allocation108_spill] sm:$0xff]  ;;  %v14840_v18 = vld [vmem:[#allocation73_spill] sm:$0xff] }
 0x600   : > { %14817 = vst [vmem:[#allocation119_spill] sm:$0xff] %v11567_v29  ;;  %v11587_v42 = vadd.f32 %v14828_v31, %v14827_v43  ;;  %v14830_v29 = vld [vmem:[#allocation171_spill] sm:$0xff]  ;;  %v11603_v45 = vadd.f32 %v11106_v19, %v14834_v61  ;;  %v11607_v31 = vadd.f32 %v11109_v47, %v14835_v6  ;;  %v14836_v43 = vld [vmem:[#allocation125_spill] sm:$0xff]  ;;  %v11623_v19 = vadd.f32 %v11124_v30, %v14840_v18  ;;  %v14842_v6 = vld [vmem:[#allocation24_spill] sm:$0xff] }
 0x601   : > { %14820 = vst [vmem:[#allocation46_spill] sm:$0xff] %v11571_v48  ;;  %v11591_v8 = vadd.f32 %v14830_v29, %v14829_v59  ;;  %v14832_v48 = vld [vmem:[#allocation112_spill] sm:$0xff]  ;;  %v14838_v59 = vld [vmem:[#allocation166_spill] sm:$0xff]  ;;  %v14841_v61 = vld [vmem:[#allocation85_spill] sm:$0xff] }
 0x602   : > { %14826 = vst [vmem:[#allocation135_spill] sm:$0xff] %v11583_v24  ;;  %v11595_v23 = vadd.f32 %v14832_v48, %v14831_v37  ;;  %v14837_v24 = vld [vmem:[#allocation127_spill] sm:$0xff]  ;;  %v11615_v48 = vadd.f32 %v11118_v38, %v14838_v59  ;;  %v14839_v37 = vld [vmem:[#allocation77_spill] sm:$0xff]  ;;  %v11627_v47 = vadd.f32 %v11127_v34, %v14841_v61  ;;  %v14846_v18 = vld [vmem:[#allocation116_spill] sm:$0xff] }
 0x603   : > { %v11611_v29 = vadd.f32 %v14837_v24, %v14836_v43  ;;  %v11619_v26 = vadd.f32 %v11121_v49, %v14839_v37  ;;  %v11631_v24 = vadd.f32 %v11130_v60, %v14842_v6  ;;  %v14843_v43 = vld [vmem:[#allocation147_spill] sm:$0xff]  ;;  %v14845_v37 = vld [vmem:[#allocation100_spill] sm:$0xff]  ;;  %v11647_v34 = vadd.f32 %v11142_v25, %v14846_v18  ;;  %v14847_v61 = vld [vmem:[#allocation49_spill] sm:$0xff] }
 0x604   : > { %v11635_v38 = vadd.f32 %v11133_v56, %v14843_v43  ;;  %v14844_v59 = vld [vmem:[#allocation31_spill] sm:$0xff]  ;;  %v11643_v30 = vadd.f32 %v11139_v33, %v14845_v37  ;;  %v11651_v60 = vadd.f32 %v11145_v58, %v14847_v61  ;;  %v14848_v6 = vld [vmem:[#allocation45_spill] sm:$0xff]  ;;  %v14851_v37 = vld [vmem:[#allocation94_spill] sm:$0xff] }
 0x605   : > { %v11639_v49 = vadd.f32 %v11136_v0, %v14844_v59  ;;  %v11655_v56 = vadd.f32 %v11148_v10, %v14848_v6  ;;  %v14849_v43 = vld [vmem:[#allocation169_spill] sm:$0xff]  ;;  %v14850_v59 = vld [vmem:[#allocation82_spill] sm:$0xff]  ;;  %v11667_v25 = vadd.f32 %v11157_v27, %v14851_v37  ;;  %v3272_v6 = vrot.slane %v11175_v57, 6 }
 0x606   : > { %v11659_v0 = vadd.f32 %v11151_v54, %v14849_v43  ;;  %v11663_v33 = vadd.f32 %v11154_v36, %v14850_v59  ;;  %v14852_v18 = vld [vmem:[#allocation174_spill] sm:$0xff]  ;;  %v14853_v61 = vld [vmem:[#allocation69_spill] sm:$0xff]  ;;  %v3269_v54 = vrot.slane %v11171_v1, 7  ;;  %v3275_v36 = vrot.slane %v11179_v52, 5 }
 0x607   : > { %v11671_v58 = vadd.f32 %v11160_v51, %v14852_v18  ;;  %v11675_v10 = vadd.f32 %v11163_v4, %v14853_v61  ;;  %v3278_v27 = vrot.slane %v11183_v39, 4  ;;  %v3281_v43 = vrot.slane %v11187_v16, 3 }
 0x608   : > { %v3271_v51 = vsel %vm3270_vm0, %v3269_v54, %v11167_v14  ;;  %v3284_v4 = vrot.slane %v11191_v28, 2  ;;  %v3287_v57 = vrot.slane %v11195_v5, 1  ;;  %v3290_v39 = vrot.slane %v11203_v21, 7 }
 0x609   : > { %v3274_v1 = vsel %vm3273_vm1, %v3272_v6, %v3271_v51  ;;  %v3292_v59 = vrot.slane %v11207_v17, 6  ;;  %v3294_v14 = vrot.slane %v11211_v41, 5  ;;  %v3296_v37 = vrot.slane %v11215_v55, 4 }
 0x60a   : > { %v3277_v52 = vsel %vm3276_vm2, %v3275_v36, %v3274_v1  ;;  %v3298_v28 = vrot.slane %v11219_v40, 3  ;;  %v3300_v18 = vrot.slane %v11223_v7, 2  ;;  %v3291_v5 = vsel %vm3270_vm0, %v3290_v39, %v11199_v13 }
 0x60b   : > { %v3280_v16 = vsel %vm3279_vm3, %v3278_v27, %v3277_v52  ;;  %v3302_v54 = vrot.slane %v11227_v62, 1  ;;  %v3304_v21 = vrot.slane %v11235_v12, 7  ;;  %v3293_v41 = vsel %vm3273_vm1, %v3292_v59, %v3291_v5  ;;  %v14854_v27 = vld [vmem:[#allocation11_spill] sm:$0xff]  ;;  %v14858_v59 = vld [vmem:[#allocation129_spill] sm:$0xff] }
 0x60c   : > { %v3283_v61 = vsel %vm3282_vm4, %v3281_v43, %v3280_v16  ;;  %v3306_v6 = vrot.slane %v11239_v20, 6  ;;  %v3308_v55 = vrot.slane %v11243_v2, 5  ;;  %v3295_v7 = vsel %vm3276_vm2, %v3294_v14, %v3293_v41  ;;  %v14855_v43 = vld [vmem:[#allocation54_spill] sm:$0xff]  ;;  %v14859_v16 = vld [vmem:[#allocation29_spill] sm:$0xff] }
 0x60d   : > { %v3286_v17 = vsel %vm3285_vm5, %v3284_v4, %v3283_v61  ;;  %v3305_v36 = vsel %vm3270_vm0, %v3304_v21, %v11231_v50  ;;  %v3310_v13 = vrot.slane %v11247_v22, 4  ;;  %v3297_v62 = vsel %vm3279_vm3, %v3296_v37, %v3295_v7  ;;  %v14856_v50 = vld [vmem:[#allocation97_spill] sm:$0xff] }
 0x60e   : > { %v3289_v40 = vsel %vm3288_vm6, %v3287_v57, %v3286_v17  ;;  %v3307_v12 = vsel %vm3273_vm1, %v3306_v6, %v3305_v36  ;;  %v3312_v51 = vrot.slane %v14854_v27, 3  ;;  %v3314_v4 = vrot.slane %v14855_v43, 2  ;;  %v14857_v22 = vld [vmem:[#allocation177_spill] sm:$0xff]  ;;  %v14861_v17 = vld [vmem:[#allocation27_spill] sm:$0xff] }
 0x60f   : > { %3516 = vst [vmem:[%s11714_s23] sm:$0xff] %v3289_v40  ;;  %v3299_v20 = vsel %vm3282_vm4, %v3298_v28, %v3297_v62  ;;  %v3309_v2 = vsel %vm3276_vm2, %v3308_v55, %v3307_v12  ;;  %v3316_v1 = vrot.slane %v14856_v50, 1  ;;  %v3318_v57 = vrot.slane %v14857_v22, 7  ;;  %v14860_v28 = vld [vmem:[#allocation20_spill] sm:$0xff]  ;;  %v14862_v55 = vld [vmem:[#allocation118_spill] sm:$0xff]  ;;  %v14863_v7 = vld [vmem:[#allocation137_spill] sm:$0xff] }
 0x610   : > { %v3301_v52 = vsel %vm3285_vm5, %v3300_v18, %v3299_v20  ;;  %v3311_v39 = vsel %vm3279_vm3, %v3310_v13, %v3309_v2  ;;  %v3320_v14 = vrot.slane %v14858_v59, 6  ;;  %v3322_v37 = vrot.slane %v14859_v16, 5  ;;  %v14864_v62 = vld [vmem:[#allocation22_spill] sm:$0xff]  ;;  %v14865_v27 = vld [vmem:[#allocation47_spill] sm:$0xff]  ;;  %v14868_v22 = vld [vmem:[#allocation41_spill] sm:$0xff] }
 0x611   : > { %v3303_v61 = vsel %vm3288_vm6, %v3302_v54, %v3301_v52  ;;  %v3313_v5 = vsel %vm3282_vm4, %v3312_v51, %v3311_v39  ;;  %v3319_v21 = vsel %vm3270_vm0, %v3318_v57, %v14860_v28  ;;  %v3324_v41 = vrot.slane %v14861_v17, 4  ;;  %v14866_v20 = vld [vmem:[#allocation90_spill] sm:$0xff]  ;;  %v14869_v39 = vld [vmem:[#allocation35_spill] sm:$0xff]  ;;  %v14870_v59 = vld [vmem:[#allocation205_spill] sm:$0xff] }
 0x612   : > { %v3315_v6 = vsel %vm3285_vm5, %v3314_v4, %v3313_v5  ;;  %v3321_v18 = vsel %vm3273_vm1, %v3320_v14, %v3319_v21  ;;  %v3326_v40 = vrot.slane %v14862_v55, 3  ;;  %v3328_v36 = vrot.slane %v14863_v7, 2  ;;  %3517 = vst [vmem:[%s11714_s23 + $0x8] sm:$0xff] %v3303_v61  ;;  %v14867_v4 = vld [vmem:[#allocation43_spill] sm:$0xff]  ;;  %v14871_v16 = vld [vmem:[#allocation104_spill] sm:$0xff]  ;;  %v14872_v28 = vld [vmem:[#allocation38_spill] sm:$0xff] }
 0x613   : > { %v3317_v13 = vsel %vm3288_vm6, %v3316_v1, %v3315_v6  ;;  %v3323_v54 = vsel %vm3276_vm2, %v3322_v37, %v3321_v18  ;;  %v3330_v12 = vrot.slane %v14864_v62, 1  ;;  %v3332_v51 = vrot.slane %v14865_v27, 7  ;;  %v14873_v17 = vld [vmem:[#allocation33_spill] sm:$0xff]  ;;  %v14875_v7 = vld [vmem:[#allocation59_spill] sm:$0xff] }
 0x614   : > { %v3325_v43 = vsel %vm3279_vm3, %v3324_v41, %v3323_v54  ;;  %v3334_v2 = vrot.slane %v14866_v20, 6  ;;  %v3336_v50 = vrot.slane %v14867_v4, 5  ;;  %v3338_v57 = vrot.slane %v14868_v22, 4  ;;  %3518 = vst [vmem:[%s11714_s23 + $0x10] sm:$0xff] %v3317_v13  ;;  %v14874_v55 = vld [vmem:[#allocation121_spill] sm:$0xff]  ;;  %v14879_v4 = vld [vmem:[#allocation188_spill] sm:$0xff] }
 0x615   : > { %v3327_v52 = vsel %vm3282_vm4, %v3326_v40, %v3325_v43  ;;  %v3333_v1 = vsel %vm3270_vm0, %v3332_v51, %v14869_v39  ;;  %v3340_v14 = vrot.slane %v14870_v59, 3  ;;  %v3342_v37 = vrot.slane %v14871_v16, 2  ;;  %v14876_v62 = vld [vmem:[#allocation109_spill] sm:$0xff]  ;;  %v14878_v43 = vld [vmem:[#allocation83_spill] sm:$0xff]  ;;  %v14880_v22 = vld [vmem:[#allocation164_spill] sm:$0xff] }
 0x616   : > { %v3329_v61 = vsel %vm3285_vm5, %v3328_v36, %v3327_v52  ;;  %v3335_v5 = vsel %vm3273_vm1, %v3334_v2, %v3333_v1  ;;  %v3344_v21 = vrot.slane %v14872_v28, 1  ;;  %v3346_v41 = vrot.slane %v14873_v17, 7  ;;  %v14877_v36 = vld [vmem:[#allocation117_spill] sm:$0xff]  ;;  %v14881_v1 = vld [vmem:[#allocation75_spill] sm:$0xff] }
 0x617   : > { %v3331_v6 = vsel %vm3288_vm6, %v3330_v12, %v3329_v61  ;;  %v3337_v18 = vsel %vm3276_vm2, %v3336_v50, %v3335_v5  ;;  %v3348_v40 = vrot.slane %v14874_v55, 6  ;;  %v3350_v13 = vrot.slane %v14875_v7, 5  ;;  %v14882_v16 = vld [vmem:[#allocation13_spill] sm:$0xff]  ;;  %v14885_v55 = vld [vmem:[#allocation144_spill] sm:$0xff] }
 0x618   : > { %v3339_v54 = vsel %vm3279_vm3, %v3338_v57, %v3337_v18  ;;  %v3347_v27 = vsel %vm3270_vm0, %v3346_v41, %v14876_v62  ;;  %v3352_v51 = vrot.slane %v14877_v36, 4  ;;  %v3354_v20 = vrot.slane %v14878_v43, 3  ;;  %3519 = vst [vmem:[%s11714_s23 + $0x18] sm:$0xff] %v3331_v6  ;;  %v14884_v41 = vld [vmem:[#allocation192_spill] sm:$0xff] }
 0x619   : > { %v3341_v2 = vsel %vm3282_vm4, %v3340_v14, %v3339_v54  ;;  %v3349_v12 = vsel %vm3273_vm1, %v3348_v40, %v3347_v27  ;;  %v3356_v50 = vrot.slane %v14879_v4, 2  ;;  %v3358_v52 = vrot.slane %v14880_v22, 1  ;;  %v14883_v14 = vld [vmem:[#allocation71_spill] sm:$0xff]  ;;  %v14888_v27 = vld [vmem:[#allocation190_spill] sm:$0xff]  ;;  %v14891_v22 = vld [vmem:[#allocation196_spill] sm:$0xff] }
 0x61a   : > { %v3343_v39 = vsel %vm3285_vm5, %v3342_v37, %v3341_v2  ;;  %v3351_v57 = vsel %vm3276_vm2, %v3350_v13, %v3349_v12  ;;  %v3360_v59 = vrot.slane %v14881_v1, 7  ;;  %v3362_v61 = vrot.slane %v14882_v16, 6  ;;  %v14886_v37 = vld [vmem:[#allocation180_spill] sm:$0xff]  ;;  %v14887_v13 = vld [vmem:[#allocation67_spill] sm:$0xff]  ;;  %v14890_v12 = vld [vmem:[#allocation185_spill] sm:$0xff] }
 0x61b   : > { %v3345_v5 = vsel %vm3288_vm6, %v3344_v21, %v3343_v39  ;;  %v3353_v28 = vsel %vm3279_vm3, %v3352_v51, %v3351_v57  ;;  %v3364_v17 = vrot.slane %v14883_v14, 5  ;;  %v3366_v6 = vrot.slane %v14884_v41, 4  ;;  %v14889_v51 = vld [vmem:[#allocation65_spill] sm:$0xff]  ;;  %v14892_v1 = vld [vmem:[#allocation194_spill] sm:$0xff]  ;;  %v14895_v14 = vld [vmem:[#allocation167_spill] sm:$0xff] }
 0x61c   : > { %v3355_v18 = vsel %vm3282_vm4, %v3354_v20, %v3353_v28  ;;  %v3361_v40 = vsel %vm3270_vm0, %v3360_v59, %v14885_v55  ;;  %v3368_v7 = vrot.slane %v14886_v37, 3  ;;  %v3370_v54 = vrot.slane %v14887_v13, 2  ;;  %3520 = vst [vmem:[%s11714_s23 + $0x20] sm:$0xff] %v3345_v5  ;;  %v14896_v41 = vld [vmem:[#allocation208_spill] sm:$0xff]  ;;  %v14898_v13 = vld [vmem:[#allocation62_spill] sm:$0xff] }
 0x61d   : > { %v3357_v62 = vsel %vm3285_vm5, %v3356_v50, %v3355_v18  ;;  %v3363_v21 = vsel %vm3273_vm1, %v3362_v61, %v3361_v40  ;;  %v3372_v36 = vrot.slane %v14888_v27, 1  ;;  %v3374_v43 = vrot.slane %v14889_v51, 7  ;;  %v14893_v50 = vld [vmem:[#allocation162_spill] sm:$0xff]  ;;  %v14894_v61 = vld [vmem:[#allocation55_spill] sm:$0xff] }
 0x61e   : > { %v3359_v2 = vsel %vm3288_vm6, %v3358_v52, %v3357_v62  ;;  %v3365_v20 = vsel %vm3276_vm2, %v3364_v17, %v3363_v21  ;;  %v3376_v4 = vrot.slane %v14890_v12, 6  ;;  %v3378_v39 = vrot.slane %v14891_v22, 5  ;;  %v14897_v40 = vld [vmem:[#allocation107_spill] sm:$0xff]  ;;  %v14901_v12 = vld [vmem:[#allocation101_spill] sm:$0xff] }
 0x61f   : > { %v3367_v57 = vsel %vm3279_vm3, %v3366_v6, %v3365_v20  ;;  %v3375_v59 = vsel %vm3270_vm0, %v3374_v43, %v14892_v1  ;;  %v3380_v16 = vrot.slane %v14893_v50, 4  ;;  %v3382_v5 = vrot.slane %v14894_v61, 3  ;;  %3521 = vst [vmem:[%s11714_s23 + $0x28] sm:$0xff] %v3359_v2  ;;  %v14900_v43 = vld [vmem:[#allocation201_spill] sm:$0xff]  ;;  %v14903_v1 = vld [vmem:[#allocation140_spill] sm:$0xff]  ;;  %v14904_v50 = vld [vmem:[#allocation158_spill] sm:$0xff] }
 0x620   : > { %v3369_v28 = vsel %vm3282_vm4, %v3368_v7, %v3367_v57  ;;  %v3377_v52 = vsel %vm3273_vm1, %v3376_v4, %v3375_v59  ;;  %v3384_v17 = vrot.slane %v14895_v14, 2  ;;  %v3386_v18 = vrot.slane %v14896_v41, 1  ;;  %v14899_v7 = vld [vmem:[#allocation204_spill] sm:$0xff] }
 0x621   : > { %v3371_v55 = vsel %vm3285_vm5, %v3370_v54, %v3369_v28  ;;  %v3379_v6 = vsel %vm3276_vm2, %v3378_v39, %v3377_v52  ;;  %v3388_v37 = vrot.slane %v14897_v40, 7  ;;  %v3390_v62 = vrot.slane %v14898_v13, 6  ;;  %v14902_v54 = vld [vmem:[#allocation152_spill] sm:$0xff] }
 0x622   : > { %v3373_v21 = vsel %vm3288_vm6, %v3372_v36, %v3371_v55  ;;  %v3381_v27 = vsel %vm3279_vm3, %v3380_v16, %v3379_v6  ;;  %v3392_v51 = vrot.slane %v14899_v7, 5  ;;  %v3394_v2 = vrot.slane %v14900_v43, 4  ;;  %v14905_v52 = vld [vmem:[#allocation92_spill] sm:$0xff] }
 0x623   : > { %v3383_v20 = vsel %vm3282_vm4, %v3382_v5, %v3381_v27  ;;  %v3389_v4 = vsel %vm3270_vm0, %v3388_v37, %v14901_v12  ;;  %v3396_v22 = vrot.slane %v14902_v54, 3  ;;  %v3398_v39 = vrot.slane %v11447_v46, 2  ;;  %3522 = vst [vmem:[%s11714_s23 + $0x30] sm:$0xff] %v3373_v21  ;;  %v14906_v46 = vld [vmem:[#allocation142_spill] sm:$0xff]  ;;  %v14908_v40 = vld [vmem:[#allocation52_spill] sm:$0xff] }
 0x624   : > { %v3385_v57 = vsel %vm3285_vm5, %v3384_v17, %v3383_v20  ;;  %v3391_v36 = vsel %vm3273_vm1, %v3390_v62, %v3389_v4  ;;  %v3400_v59 = vrot.slane %v14903_v1, 1  ;;  %v3402_v16 = vrot.slane %v14904_v50, 7  ;;  %v14907_v17 = vld [vmem:[#allocation133_spill] sm:$0xff]  ;;  %v14911_v4 = vld [vmem:[#allocation15_spill] sm:$0xff] }
 0x625   : > { %v3387_v61 = vsel %vm3288_vm6, %v3386_v18, %v3385_v57  ;;  %v3393_v5 = vsel %vm3276_vm2, %v3392_v51, %v3391_v36  ;;  %v3404_v28 = vrot.slane %v11463_v35, 6  ;;  %v3406_v14 = vrot.slane %v14905_v52, 5  ;;  %v14909_v35 = vld [vmem:[#allocation198_spill] sm:$0xff] }
 0x626   : > { %v3395_v41 = vsel %vm3279_vm3, %v3394_v2, %v3393_v5  ;;  %v3403_v55 = vsel %vm3270_vm0, %v3402_v16, %v14906_v46  ;;  %v3408_v6 = vrot.slane %v14907_v17, 4  ;;  %v3410_v37 = vrot.slane %v14908_v40, 3  ;;  %3523 = vst [vmem:[%s11714_s23 + $0x38] sm:$0xff] %v3387_v61  ;;  %v14910_v51 = vld [vmem:[#allocation182_spill] sm:$0xff]  ;;  %v14915_v61 = vld [vmem:[#allocation148_spill] sm:$0xff] }
 0x627   : > { %v3397_v13 = vsel %vm3282_vm4, %v3396_v22, %v3395_v41  ;;  %v3405_v18 = vsel %vm3273_vm1, %v3404_v28, %v3403_v55  ;;  %v3412_v62 = vrot.slane %v11479_v32, 2  ;;  %v3414_v21 = vrot.slane %v14909_v35, 1  ;;  %v14912_v22 = vld [vmem:[#allocation17_spill] sm:$0xff]  ;;  %v14913_v36 = vld [vmem:[#allocation138_spill] sm:$0xff]  ;;  %v14917_v55 = vld [vmem:[#allocation124_spill] sm:$0xff] }
 0x628   : > { %v3399_v27 = vsel %vm3285_vm5, %v3398_v39, %v3397_v13  ;;  %v3407_v7 = vsel %vm3276_vm2, %v3406_v14, %v3405_v18  ;;  %v3416_v43 = vrot.slane %v14910_v51, 7  ;;  %v3418_v2 = vrot.slane %v11495_v44, 6  ;;  %v14914_v39 = vld [vmem:[#allocation131_spill] sm:$0xff]  ;;  %v14916_v28 = vld [vmem:[#allocation57_spill] sm:$0xff] }
 0x629   : > { %v3401_v20 = vsel %vm3288_vm6, %v3400_v59, %v3399_v27  ;;  %v3409_v12 = vsel %vm3279_vm3, %v3408_v6, %v3407_v7  ;;  %v3420_v54 = vrot.slane %v14911_v4, 5  ;;  %v3422_v57 = vrot.slane %v14912_v22, 4  ;;  %v14920_v18 = vld [vmem:[#allocation123_spill] sm:$0xff]  ;;  %v14921_v27 = vld [vmem:[#allocation50_spill] sm:$0xff] }
 0x62a   : > { %v3411_v32 = vsel %vm3282_vm4, %v3410_v37, %v3409_v12  ;;  %v3417_v1 = vsel %vm3270_vm0, %v3416_v43, %v14913_v36  ;;  %v3424_v50 = vrot.slane %v14914_v39, 3  ;;  %v3426_v16 = vrot.slane %v11511_v9, 2  ;;  %3524 = vst [vmem:[%s11714_s23 + $0x40] sm:$0xff] %v3401_v20  ;;  %v14918_v9 = vld [vmem:[#allocation151_spill] sm:$0xff]  ;;  %v14919_v37 = vld [vmem:[#allocation25_spill] sm:$0xff]  ;;  %v14923_v20 = vld [vmem:[#allocation156_spill] sm:$0xff] }
 0x62b   : > { %v3413_v44 = vsel %vm3285_vm5, %v3412_v62, %v3411_v32  ;;  %v3419_v59 = vsel %vm3273_vm1, %v3418_v2, %v3417_v1  ;;  %v3428_v5 = vrot.slane %v14915_v61, 1  ;;  %v3430_v52 = vrot.slane %v14916_v28, 7  ;;  %v14925_v36 = vld [vmem:[#allocation119_spill] sm:$0xff] }
 0x62c   : > { %v3415_v14 = vsel %vm3288_vm6, %v3414_v21, %v3413_v44  ;;  %v3421_v41 = vsel %vm3276_vm2, %v3420_v54, %v3419_v59  ;;  %v3432_v46 = vrot.slane %v11527_v11, 6  ;;  %v3434_v17 = vrot.slane %v14917_v55, 5  ;;  %v14922_v11 = vld [vmem:[#allocation146_spill] sm:$0xff] }
 0x62d   : > { %v3423_v6 = vsel %vm3279_vm3, %v3422_v57, %v3421_v41  ;;  %v3431_v40 = vsel %vm3270_vm0, %v3430_v52, %v14918_v9  ;;  %v3436_v13 = vrot.slane %v14919_v37, 4  ;;  %v3438_v62 = vrot.slane %v14920_v18, 3  ;;  %3525 = vst [vmem:[%s11714_s23 + $0x48] sm:$0xff] %v3415_v14  ;;  %v14924_v57 = vld [vmem:[#allocation154_spill] sm:$0xff] }
 0x62e   : > { %v3425_v35 = vsel %vm3282_vm4, %v3424_v50, %v3423_v6  ;;  %v3433_v21 = vsel %vm3273_vm1, %v3432_v46, %v3431_v40  ;;  %v3440_v7 = vrot.slane %v14921_v27, 2  ;;  %v3442_v51 = vrot.slane %v14922_v11, 1  ;;  %v14926_v50 = vld [vmem:[#allocation175_spill] sm:$0xff] }
 0x62f   : > { %v3427_v43 = vsel %vm3285_vm5, %v3426_v16, %v3425_v35  ;;  %v3435_v2 = vsel %vm3276_vm2, %v3434_v17, %v3433_v21  ;;  %v3444_v12 = vrot.slane %v14923_v20, 7  ;;  %v3446_v4 = vrot.slane %v11559_v15, 6  ;;  %v14927_v16 = vld [vmem:[#allocation46_spill] sm:$0xff]  ;;  %v14928_v17 = vld [vmem:[#allocation135_spill] sm:$0xff] }
 0x630   : > { %v3429_v54 = vsel %vm3288_vm6, %v3428_v5, %v3427_v43  ;;  %v3437_v22 = vsel %vm3279_vm3, %v3436_v13, %v3435_v2  ;;  %v3448_v32 = vrot.slane %v14924_v57, 5  ;;  %v3450_v1 = vrot.slane %v14925_v36, 4 }
 0x631   : > { %v3439_v39 = vsel %vm3282_vm4, %v3438_v62, %v3437_v22  ;;  %v3445_v44 = vsel %vm3270_vm0, %v3444_v12, %v14926_v50  ;;  %v3452_v59 = vrot.slane %v14927_v16, 3  ;;  %v3454_v61 = vrot.slane %v11575_v53, 2  ;;  %3526 = vst [vmem:[%s11714_s23 + $0x50] sm:$0xff] %v3429_v54 }
 0x632   : > { %v3441_v15 = vsel %vm3285_vm5, %v3440_v7, %v3439_v39  ;;  %v3447_v5 = vsel %vm3273_vm1, %v3446_v4, %v3445_v44  ;;  %v3456_v28 = vrot.slane %v11579_v63, 1  ;;  %v3458_v52 = vrot.slane %v11587_v42, 7 }
 0x633   : > { %v3443_v14 = vsel %vm3288_vm6, %v3442_v51, %v3441_v15  ;;  %v3449_v41 = vsel %vm3276_vm2, %v3448_v32, %v3447_v5  ;;  %v3460_v46 = vrot.slane %v11591_v8, 6  ;;  %v3462_v55 = vrot.slane %v11595_v23, 5 }
 0x634   : > { %v3451_v53 = vsel %vm3279_vm3, %v3450_v1, %v3449_v41  ;;  %v3459_v6 = vsel %vm3270_vm0, %v3458_v52, %v14928_v17  ;;  %v3464_v9 = vrot.slane %v11599_v3, 4  ;;  %v3466_v63 = vrot.slane %v11603_v45, 3  ;;  %3527 = vst [vmem:[%s11714_s23 + $0x58] sm:$0xff] %v3443_v14 }
 0x635   : > { %v3453_v42 = vsel %vm3282_vm4, %v3452_v59, %v3451_v53  ;;  %v3461_v40 = vsel %vm3273_vm1, %v3460_v46, %v3459_v6  ;;  %v3468_v37 = vrot.slane %v11607_v31, 2  ;;  %v3470_v8 = vrot.slane %v11611_v29, 1 }
 0x636   : > { %v3455_v23 = vsel %vm3285_vm5, %v3454_v61, %v3453_v42  ;;  %v3463_v13 = vsel %vm3276_vm2, %v3462_v55, %v3461_v40  ;;  %v3472_v18 = vrot.slane %v11619_v26, 7  ;;  %v3474_v3 = vrot.slane %v11623_v19, 6 }
 0x637   : > { %v3457_v45 = vsel %vm3288_vm6, %v3456_v28, %v3455_v23  ;;  %v3465_v62 = vsel %vm3279_vm3, %v3464_v9, %v3463_v13  ;;  %v3476_v35 = vrot.slane %v11627_v47, 5  ;;  %v3478_v21 = vrot.slane %v11631_v24, 4 }
 0x638   : > { %v3467_v31 = vsel %vm3282_vm4, %v3466_v63, %v3465_v62  ;;  %v3473_v29 = vsel %vm3270_vm0, %v3472_v18, %v11615_v48  ;;  %v3480_v27 = vrot.slane %v11635_v38, 3  ;;  %v3482_v26 = vrot.slane %v11639_v49, 2  ;;  %3528 = vst [vmem:[%s11714_s23 + $0x60] sm:$0xff] %v3457_v45 }
 0x639   : > { %v3469_v19 = vsel %vm3285_vm5, %v3468_v37, %v3467_v31  ;;  %v3475_v7 = vsel %vm3273_vm1, %v3474_v3, %v3473_v29  ;;  %v3484_v47 = vrot.slane %v11643_v30, 1  ;;  %v3486_v24 = vrot.slane %v11651_v60, 7 }
 0x63a   : > { %v3471_v48 = vsel %vm3288_vm6, %v3470_v8, %v3469_v19  ;;  %v3477_v38 = vsel %vm3276_vm2, %v3476_v35, %v3475_v7  ;;  %v3488_v49 = vrot.slane %v11655_v56, 6  ;;  %v3490_v11 = vrot.slane %v11659_v0, 5 }
 0x63b   : > { %v3479_v51 = vsel %vm3279_vm3, %v3478_v21, %v3477_v38  ;;  %v3487_v30 = vsel %vm3270_vm0, %v3486_v24, %v11647_v34  ;;  %v3492_v60 = vrot.slane %v11663_v33, 4  ;;  %v3494_v43 = vrot.slane %v11667_v25, 3  ;;  %3529 = vst [vmem:[%s11714_s23 + $0x68] sm:$0xff] %v3471_v48 }
 0x63c   : > { %v3481_v2 = vsel %vm3282_vm4, %v3480_v27, %v3479_v51  ;;  %v3489_v20 = vsel %vm3273_vm1, %v3488_v49, %v3487_v30  ;;  %v3496_v56 = vrot.slane %v11671_v58, 2  ;;  %v3498_v34 = vrot.slane %v11675_v10, 1 }
 0x63d   : > { %v3483_v0 = vsel %vm3285_vm5, %v3482_v26, %v3481_v2  ;;  %v3491_v12 = vsel %vm3276_vm2, %v3490_v11, %v3489_v20 }
 0x63e   : > { %v3485_v33 = vsel %vm3288_vm6, %v3484_v47, %v3483_v0  ;;  %v3493_v25 = vsel %vm3279_vm3, %v3492_v60, %v3491_v12 }
 0x63f   : > { %v3495_v4 = vsel %vm3282_vm4, %v3494_v43, %v3493_v25  ;;  %3530 = vst [vmem:[%s11714_s23 + $0x70] sm:$0xff] %v3485_v33 }
 0x640   : > { %v3497_v58 = vsel %vm3285_vm5, %v3496_v56, %v3495_v4 }
 0x641   : > { %v3499_v54 = vsel %vm3288_vm6, %v3498_v34, %v3497_v58 }
 0x642   : > { %3531 = vst [vmem:[%s11714_s23 + $0x78] sm:$0xff] %v3499_v54 }
 0x643   : > { %3805 = shalt.err (!%p3802_p8)
}
 0x644   : > { %s3853_s5 = smov 128   ;;  %s3854_s6 = smov 8  }
 0x645   : > { %3655 = dma.vmem_to_hbm [thread:$0]  (%p3922_p11), %s3546_s17, 2048, %s3548_s24, %s3533_s19, %s3853_s5, %s3853_s5, %s3854_s6  }
 0x646 PF: > { %s3562_s7 = sand.u32 1, %s3836_s9   ;;  %p14929_p9 = scmp.ge.s32.totalorder %s3848_s12, 2 }
 0x647   : > { %s3563_s14 = scalar_lea.sflag [#allocation4], %s3562_s7 }
 0x648   : > { %p3666_p10 = pnand %p14929_p9, %p3926_p12 }
 0x64a   : > { %p3667_p1 = pneg %p3666_p10 }
 0x64c   : > { %3831 = dma.done.wait (%p3667_p1), %s3563_s14, 2048  }
 0x64d   : > { %3833 = vsyncadd (%p3667_p1), %s3563_s14, 4294965248  ;;  %p16_p2 = scmp.ge.s32.totalorder %s3895_s15, 4   ;;  %s14930_s9 = smov %s3840_s10 }
 0x64e   : > { %s14931_s10 = smov %s3844_s11  ;;  %s14932_s11 = smov %s3907_s18 }
 0x64f   : > { %s14933_s12 = smov %s3895_s15  ;;  %18 = sbr.rel (!%p16_p2) target bundleno = 6 (0x6), region = 77 }
 0x654   :  { %3569 = vsyncpa [#allocation3], 1 }
 0x655   :  { %3571 = vsyncpa [#allocation3 + $0x1], 1 }
 0x656   :  { %3572 = vsyncpa [#allocation6], 1 }
 0x657   :  { %3573 = vsyncpa [#allocation4], 1 }
 0x658   :  { %3575 = vsyncpa [#allocation4 + $0x1], 1 }

</bundles_post_ra>
